<compile_context>
chip_gen: v7x
topology: tpu7x:2x2x1
jax: 0.10.0
libtpu: 0.0.40
codegen_flags: <defaults>
</compile_context>

<pallas_src>
import math

import jax
import jax.numpy as jnp
from jax import lax
from jax.experimental import pallas as pl
from jax.experimental.pallas import tpu as pltpu

# ----------------- module hyper-params (small, synthetic) -----------------
IN_CHANNELS = 8
SKIP_CHANNELS = 8
OUT_CHANNELS = 16
STRIDE = 2
GROUPS = 8            # nn.GroupNorm(8, out_channels)  -> 2 channels per group
EPS = 1e-3

N = 2
D = H = W = 4                                     # low-res spatial of `x`
DS, HS, WS = D * STRIDE, H * STRIDE, W * STRIDE   # spatial of skip / output (8)

LANES_UP = WS * OUT_CHANNELS          # 128 lanes: (W', co) upconv part
LANES_SKIP = WS * SKIP_CHANNELS       # 64  lanes: (W', cs) skip part
K1 = 256                              # lane-aligned conv1 input width (128+64+64 zero)
K2 = WS * OUT_CHANNELS                # 128 = conv output lane width
ROWS = DS * HS                        # 64 output rows = (D', H')

PITCH = HS + 2                        # 10: padded-H pitch in the row direction
GRID_ROWS = (DS + 2) * PITCH          # 100: flattened padded (d,h) grid
MARGIN = PITCH + 1                    # 11: margin so every (kd,kh) tap is a
                                      #     contiguous row-shifted slab
EXT_ROWS = 128                        # scratch rows (>= 2*MARGIN + GRID_ROWS = 122)
MM = 104                              # matmul M (GRID_ROWS rounded up to mult of 8)

_INV_SQRT2 = 1.0 / math.sqrt(2.0)

assert OUT_CHANNELS // GROUPS == 2    # group-fold matrix assumes 2-channel groups


# ----------------------------- in-kernel math ------------------------------
def _gelu(x):
    # exact (erf-based) GELU via Abramowitz & Stegun 7.1.26 (|err| < 2e-7),
    # rewritten as  gelu(x) = relu(x) - 0.5*|x|*erfc(|x|/sqrt(2)).
    # TODO(synk): switch to lax.erf once it has a Mosaic lowering everywhere.
    a1, a2, a3, a4, a5 = (0.254829592, -0.284496736, 1.421413741,
                          -1.453152027, 1.061405429)
    p = 0.3275911
    ax = jnp.abs(x)
    u = ax * _INV_SQRT2
    t = 1.0 / (1.0 + p * u)
    poly = ((((a5 * t + a4) * t + a3) * t + a2) * t + a1) * t
    q = poly * jnp.exp(-0.5 * x * x)          # erfc(|x|/sqrt(2))
    return jnp.maximum(x, 0.0) - (0.5 * ax) * q


def _zero_pad_rows(ref, width):
    # Zero ONLY the padding rows that interior outputs read: 11 leading rows,
    # 11 trailing rows and 7 two-row H-padding gaps between D-slices.  Interior
    # rows are fully overwritten every step; the far margins only feed garbage
    # output rows that are never consumed.
    zb = jnp.zeros((MARGIN, width), jnp.float32)
    zg = jnp.zeros((2, width), jnp.float32)
    ref[MARGIN:2 * MARGIN, :] = zb                                  # rows 11:22
    tail = 2 * MARGIN + PITCH * (DS - 1) + HS                       # row 100
    ref[tail:tail + MARGIN, :] = zb                                 # rows 100:111
    for dd in range(DS - 1):
        r = 2 * MARGIN + PITCH * dd + HS                            # 30 + 10*dd
        ref[r:r + 2, :] = zg


# ------------------------------ fused kernel -------------------------------
def _synthesis_kernel(x_ref, skip_ref, wup_ref, bup_ref, w1_ref, b1_ref,
                      w2_ref, b2_ref, gamma_ref, beta_ref, fold_ref,
                      out_ref, z1_ref, z2_ref):
    f32 = jnp.float32

    # ---- 0) zero only the padding strips of the two staging buffers --------
    _zero_pad_rows(z1_ref, K1)
    _zero_pad_rows(z2_ref, K2)

    # ---- 1) ConvTranspose3d(k=2, s=2) + bias + GELU as ONE (64,128)x(128,128)
    #         matmul whose row order (d_low, kd, h_low, kh) already interleaves
    #         H for the pixel shuffle (lanes = (w', co)).
    yup = jnp.dot(x_ref[0], wup_ref[...], preferred_element_type=f32)
    yup = _gelu(yup + bup_ref[...])                       # (64, 128)

    # ---- 2) pixel-shuffle placement: 8 contiguous full-lane (8,128) stores --
    for dl in range(D):
        for kd in range(STRIDE):
            src = (STRIDE * dl + kd) * HS
            dst = 2 * MARGIN + PITCH * (STRIDE * dl + kd)
            z1_ref[dst:dst + HS, 0:LANES_UP] = yup[src:src + HS, :]

    # ---- 3) concat: skip channels (pre-padded to 128 lanes host-side) -------
    for dp in range(DS):
        dst = 2 * MARGIN + PITCH * dp
        z1_ref[dst:dst + HS, LANES_UP:K1] = skip_ref[0, dp]

    # ---- 4) Conv3d #1 (3x3x3 'same'): 9 banded matmuls on contiguous
    #         row-shifted slabs (kw + W-padding folded into the weights,
    #         no window reshapes).
    acc = jnp.zeros((MM, K2), f32)
    for j in range(9):
        kd, kh = j // 3, j % 3
        start = PITCH * kd + kh
        acc = acc + jnp.dot(z1_ref[start:start + MM, :], w1_ref[j],
                            preferred_element_type=f32)

    # ---- 5) bias + GELU on the 64 interior rows only, stage into conv2 buf --
    for dp in range(DS):
        src = MARGIN + PITCH * dp
        dst = 2 * MARGIN + PITCH * dp
        z2_ref[dst:dst + HS, :] = _gelu(acc[src:src + HS, :] + b1_ref[...])

    # ---- 6) Conv3d #2: 9 banded matmuls, K=128 ------------------------------
    acc2 = jnp.zeros((MM, K2), f32)
    for j in range(9):
        kd, kh = j // 3, j % 3
        start = PITCH * kd + kh
        acc2 = acc2 + jnp.dot(z2_ref[start:start + MM, :], w2_ref[j],
                              preferred_element_type=f32)

    # ---- 7) bias + GELU, gather interior rows through the aligned out block -
    for dp in range(DS):
        src = MARGIN + PITCH * dp
        out_ref[0, HS * dp:HS * dp + HS, :] = _gelu(acc2[src:src + HS, :]
                                                    + b2_ref[...])
    h2 = out_ref[0]                                       # (64, 128), lane-dense

    # ---- 8) GroupNorm(8, 16, eps=1e-3): two-pass; the per-group lane fold
    #         (+ broadcast back) is a tiny 0/1 matmul on the idle MXU.
    inv_count = 1.0 / float(DS * HS * WS * (OUT_CHANNELS // GROUPS))   # 1/1024
    s1 = jnp.sum(h2, axis=0, keepdims=True)               # (1, 128)
    mean = jnp.dot(s1, fold_ref[...], preferred_element_type=f32) * inv_count
    diff = h2 - mean
    s2 = jnp.sum(diff * diff, axis=0, keepdims=True)
    var = jnp.dot(s2, fold_ref[...], preferred_element_type=f32) * inv_count
    scale = lax.rsqrt(var + EPS) * gamma_ref[...]         # (1, 128)
    out_ref[0] = (diff * scale + beta_ref[...]).astype(out_ref.dtype)


def _fused_call(xr64, sk, wup, bup, w1b, b1t, w2b, b2t, gamma, beta, fold):
    n = xr64.shape[0]
    return pl.pallas_call(
        _synthesis_kernel,
        out_shape=jax.ShapeDtypeStruct((n, ROWS, K2), jnp.float32),
        grid=(n,),
        in_specs=[
            pl.BlockSpec((1, ROWS, LANES_UP), lambda i: (i, 0, 0)),       # xr64
            pl.BlockSpec((1, DS, HS, LANES_UP), lambda i: (i, 0, 0, 0)),  # skip
            pl.BlockSpec((LANES_UP, LANES_UP), lambda i: (0, 0)),         # wup
            pl.BlockSpec((1, LANES_UP), lambda i: (0, 0)),                # bup
            pl.BlockSpec((9, K1, K2), lambda i: (0, 0, 0)),               # w1b
            pl.BlockSpec((1, K2), lambda i: (0, 0)),                      # b1t
            pl.BlockSpec((9, K2, K2), lambda i: (0, 0, 0)),               # w2b
            pl.BlockSpec((1, K2), lambda i: (0, 0)),                      # b2t
            pl.BlockSpec((1, K2), lambda i: (0, 0)),                      # gamma
            pl.BlockSpec((1, K2), lambda i: (0, 0)),                      # beta
            pl.BlockSpec((K2, K2), lambda i: (0, 0)),                     # fold
        ],
        out_specs=pl.BlockSpec((1, ROWS, K2), lambda i: (i, 0, 0)),
        scratch_shapes=[
            pltpu.VMEM((EXT_ROWS, K1), jnp.float32),   # padded-row concat buffer
            pltpu.VMEM((EXT_ROWS, K2), jnp.float32),   # padded-row conv1 output
        ],
        compiler_params=pltpu.CompilerParams(
            dimension_semantics=("parallel",)),
    )(xr64, sk, wup, bup, w1b, b1t, w2b, b2t, gamma, beta, fold)


# ------------------------------ parameters ---------------------------------
def init_params(key):
    ks = jax.random.split(key, 6)
    cin, cskip, cout, s = IN_CHANNELS, SKIP_CHANNELS, OUT_CHANNELS, STRIDE
    c1_in = cout + cskip
    p = {}
    # ConvTranspose3d weight layout: (in, out, kD, kH, kW)
    p["up_w"] = 0.1 * jax.random.normal(ks[0], (cin, cout, s, s, s), jnp.float32)
    p["up_b"] = 0.1 * jax.random.normal(ks[1], (cout,), jnp.float32)
    # Conv3d weight layout: (out, in, kD, kH, kW)
    p["c1_w"] = 0.1 * jax.random.normal(ks[2], (cout, c1_in, 3, 3, 3), jnp.float32)
    p["c1_b"] = 0.1 * jax.random.normal(ks[3], (cout,), jnp.float32)
    p["c2_w"] = 0.1 * jax.random.normal(ks[4], (cout, cout, 3, 3, 3), jnp.float32)
    p["c2_b"] = 0.1 * jax.random.normal(ks[5], (cout,), jnp.float32)
    # GroupNorm affine defaults (weight=1, bias=0)
    p["gn_w"] = jnp.ones((cout,), jnp.float32)
    p["gn_b"] = jnp.zeros((cout,), jnp.float32)
    return p


def prepare_params(p):
    """One-time host-side repacking of PyTorch-layout weights into the matmul
    layouts the fused kernel consumes (pure indexing, no rounding matmuls)."""
    f32 = jnp.float32
    cout = OUT_CHANNELS

    # -- upconv: (128,128); rows = (kd, kh, w_low, ci) matching the 4-way
    #    block-expanded LHS built in the wrapper, cols = (w', co).
    wt = jnp.transpose(p["up_w"], (2, 3, 0, 1, 4))          # (kd,kh,ci,co,kw)
    wprime = jnp.arange(WS)
    g = wt[..., wprime % STRIDE]                            # (kd,kh,ci,co,w')
    sel = (wprime[None, :] // STRIDE ==
           jnp.arange(W)[:, None]).astype(f32)              # (w_low, w')
    A = g[:, :, None, :, :, :] * sel[None, None, :, None, None, :]
    wup = jnp.transpose(A, (0, 1, 2, 3, 5, 4)).reshape(
        STRIDE * STRIDE * W * IN_CHANNELS, WS * cout)       # (128, 128)
    bup = jnp.tile(p["up_b"], WS)[None, :]                  # (1, 128)

    # -- conv 'band' weights: fold the 3 kw taps + W zero-padding into a
    #    (W_in*C_in, W_out*C_out) matrix per (kd, kh) tap.
    def band(wconv):
        wi = jnp.arange(WS)[:, None]
        wo = jnp.arange(WS)[None, :]
        kw = wi - wo + 1
        valid = ((kw >= 0) & (kw <= 2)).astype(f32)
        kw_c = jnp.clip(kw, 0, 2)
        wperm = jnp.transpose(wconv, (2, 3, 4, 1, 0))       # (kd,kh,kw,ci,co)
        b = wperm[:, :, kw_c] * valid[None, None, :, :, None, None]
        return jnp.transpose(b, (0, 1, 2, 4, 3, 5))         # (kd,kh,Wi,ci,Wo,co)

    b1 = band(p["c1_w"])                                    # (3,3,8,24,8,16)
    b1_up = b1[:, :, :, :cout].reshape(3, 3, LANES_UP, K2)  # rows Wi*16+ci
    b1_sk = b1[:, :, :, cout:].reshape(3, 3, LANES_SKIP, K2)  # rows Wi*8+cs
    pad0 = jnp.zeros((3, 3, K1 - LANES_UP - LANES_SKIP, K2), f32)
    w1b = jnp.concatenate([b1_up, b1_sk, pad0], axis=2).reshape(9, K1, K2)
    b1t = jnp.tile(p["c1_b"], WS)[None, :]                  # (1, 128)

    w2b = band(p["c2_w"]).reshape(3, 3, K2, K2).reshape(9, K2, K2)
    b2t = jnp.tile(p["c2_b"], WS)[None, :]

    gamma = jnp.tile(p["gn_w"], WS)[None, :]                # (1, 128)
    beta = jnp.tile(p["gn_b"], WS)[None, :]

    # -- GroupNorm 0/1 fold matrix: fold[l, m] = 1 iff lanes l and m belong to
    #    the same channel group (sums over W' replicas + 2-channel pair, and
    #    broadcasts the group total back to every lane, in a single MXU dot).
    lane = jnp.arange(K2)
    grp = (lane % OUT_CHANNELS) // (OUT_CHANNELS // GROUPS)
    fold = (grp[:, None] == grp[None, :]).astype(f32)       # (128, 128)

    return dict(wup=wup, bup=bup, w1b=w1b, b1t=b1t, w2b=w2b, b2t=b2t,
                gamma=gamma, beta=beta, fold=fold)


# ------------------------------- forward -----------------------------------
@jax.jit
def synthesis_block_forward(x, skip_x, prep):
    """x: (N, Cin, D, H, W), skip_x: (N, Cskip, 2D, 2H, 2W)  [NCDHW]."""
    n = x.shape[0]
    # thin layout plumbing only (tiny tensors, exact 0/1 placement - no matmuls)
    # upconv LHS: rows = (d_low, kd, h_low, kh); lanes = 32*(2kd+kh) + (8*w_low+ci)
    xt = jnp.transpose(x, (0, 2, 3, 4, 1)).reshape(n, D, H, W * IN_CHANNELS)
    xr64 = jnp.zeros((n, D, STRIDE, H, STRIDE, STRIDE * STRIDE,
                      W * IN_CHANNELS), x.dtype)
    for kd in range(STRIDE):
        for kh in range(STRIDE):
            xr64 = xr64.at[:, :, kd, :, kh, STRIDE * kd + kh, :].set(xt)
    xr64 = xr64.reshape(n, ROWS, LANES_UP)

    # skip: rows = (d', h'); lanes = 8*w' + cs, zero-padded to 128 lanes
    sk = jnp.transpose(skip_x, (0, 2, 3, 4, 1)).reshape(n, DS, HS, LANES_SKIP)
    sk = jnp.pad(sk, ((0, 0), (0, 0), (0, 0), (0, LANES_UP - LANES_SKIP)))

    out = _fused_call(xr64, sk, prep["wup"], prep["bup"], prep["w1b"],
                      prep["b1t"], prep["w2b"], prep["b2t"],
                      prep["gamma"], prep["beta"], prep["fold"])  # (N, 64, 128)

    out = out.reshape(n, DS, HS, WS, OUT_CHANNELS)
    return jnp.transpose(out, (0, 4, 1, 2, 3))              # back to NCDHW


# --------------------------------- main -------------------------------------
if __name__ == "__main__":
    key = jax.random.PRNGKey(0)
    kx, ks, kp = jax.random.split(key, 3)
    x = jax.random.normal(kx, (N, IN_CHANNELS, D, H, W), jnp.float32)
    skip = jax.random.normal(ks, (N, SKIP_CHANNELS, DS, HS, WS), jnp.float32)
    params = init_params(kp)
    prep = prepare_params(params)

    out = synthesis_block_forward(x, skip, prep)
    out = jax.block_until_ready(out)
    assert out.shape == (N, OUT_CHANNELS, DS, HS, WS), out.shape
    assert bool(jnp.all(jnp.isfinite(out)))
    print("KERNEL_OK")
</pallas_src>

<mosaic_0001>
module attributes {stable_mosaic.version = 11 : i64} {
  func.func @_synthesis_kernel(%arg0: i32, %arg1: memref<1x64x128xf32, #tpu.memory_space<vmem>>, %arg2: memref<1x8x8x128xf32, #tpu.memory_space<vmem>>, %arg3: memref<128x128xf32, #tpu.memory_space<vmem>>, %arg4: memref<1x128xf32, #tpu.memory_space<vmem>>, %arg5: memref<9x256x128xf32, #tpu.memory_space<vmem>>, %arg6: memref<1x128xf32, #tpu.memory_space<vmem>>, %arg7: memref<9x128x128xf32, #tpu.memory_space<vmem>>, %arg8: memref<1x128xf32, #tpu.memory_space<vmem>>, %arg9: memref<1x128xf32, #tpu.memory_space<vmem>>, %arg10: memref<1x128xf32, #tpu.memory_space<vmem>>, %arg11: memref<128x128xf32, #tpu.memory_space<vmem>>, %arg12: memref<1x64x128xf32, #tpu.memory_space<vmem>>, %arg13: memref<128x256xf32, #tpu.memory_space<vmem>>, %arg14: memref<128x128xf32, #tpu.memory_space<vmem>>) attributes {dimension_semantics = [#tpu.dimension_semantics<parallel>], iteration_bounds = array<i64: 2>, scalar_prefetch = 0 : i64, scratch_operands = 2 : i64, tpu.core_type = #tpu.core_type<tc>, window_params = [{transform_indices = @transform_0, window_bounds = array<i64: 1, 64, 128>}, {transform_indices = @transform_1, window_bounds = array<i64: 1, 8, 8, 128>}, {pipeline_mode = #tpu.pipeline_mode<synchronous>, transform_indices = @transform_2, window_bounds = array<i64: 128, 128>}, {pipeline_mode = #tpu.pipeline_mode<synchronous>, transform_indices = @transform_3, window_bounds = array<i64: 1, 128>}, {pipeline_mode = #tpu.pipeline_mode<synchronous>, transform_indices = @transform_4, window_bounds = array<i64: 9, 256, 128>}, {pipeline_mode = #tpu.pipeline_mode<synchronous>, transform_indices = @transform_5, window_bounds = array<i64: 1, 128>}, {pipeline_mode = #tpu.pipeline_mode<synchronous>, transform_indices = @transform_6, window_bounds = array<i64: 9, 128, 128>}, {pipeline_mode = #tpu.pipeline_mode<synchronous>, transform_indices = @transform_7, window_bounds = array<i64: 1, 128>}, {pipeline_mode = #tpu.pipeline_mode<synchronous>, transform_indices = @transform_8, window_bounds = array<i64: 1, 128>}, {pipeline_mode = #tpu.pipeline_mode<synchronous>, transform_indices = @transform_9, window_bounds = array<i64: 1, 128>}, {pipeline_mode = #tpu.pipeline_mode<synchronous>, transform_indices = @transform_10, window_bounds = array<i64: 128, 128>}, {transform_indices = @transform_11, window_bounds = array<i64: 1, 64, 128>}]} {
    %cst = arith.constant 0.000000e+00 : f32
    %0 = vector.broadcast %cst : f32 to vector<11x256xf32>
    %cst_0 = arith.constant 0.000000e+00 : f32
    %1 = vector.broadcast %cst_0 : f32 to vector<2x256xf32>
    %c11 = arith.constant 11 : index
    %c0 = arith.constant 0 : index
    %2 = vector.load %arg13[%c11, %c0] : memref<128x256xf32, #tpu.memory_space<vmem>>, vector<11x256xf32>
    tpu.vector_store %arg13[%c11, %c0], %0 {strides = array<i32>} : memref<128x256xf32, #tpu.memory_space<vmem>>, vector<11x256xf32>,
    %c100 = arith.constant 100 : index
    %c0_1 = arith.constant 0 : index
    %3 = vector.load %arg13[%c100, %c0_1] : memref<128x256xf32, #tpu.memory_space<vmem>>, vector<11x256xf32>
    tpu.vector_store %arg13[%c100, %c0_1], %0 {strides = array<i32>} : memref<128x256xf32, #tpu.memory_space<vmem>>, vector<11x256xf32>,
    %c30 = arith.constant 30 : index
    %c0_2 = arith.constant 0 : index
    %4 = vector.load %arg13[%c30, %c0_2] : memref<128x256xf32, #tpu.memory_space<vmem>>, vector<2x256xf32>
    tpu.vector_store %arg13[%c30, %c0_2], %1 {strides = array<i32>} : memref<128x256xf32, #tpu.memory_space<vmem>>, vector<2x256xf32>,
    %c40 = arith.constant 40 : index
    %c0_3 = arith.constant 0 : index
    %5 = vector.load %arg13[%c40, %c0_3] : memref<128x256xf32, #tpu.memory_space<vmem>>, vector<2x256xf32>
    tpu.vector_store %arg13[%c40, %c0_3], %1 {strides = array<i32>} : memref<128x256xf32, #tpu.memory_space<vmem>>, vector<2x256xf32>,
    %c50 = arith.constant 50 : index
    %c0_4 = arith.constant 0 : index
    %6 = vector.load %arg13[%c50, %c0_4] : memref<128x256xf32, #tpu.memory_space<vmem>>, vector<2x256xf32>
    tpu.vector_store %arg13[%c50, %c0_4], %1 {strides = array<i32>} : memref<128x256xf32, #tpu.memory_space<vmem>>, vector<2x256xf32>,
    %c60 = arith.constant 60 : index
    %c0_5 = arith.constant 0 : index
    %7 = vector.load %arg13[%c60, %c0_5] : memref<128x256xf32, #tpu.memory_space<vmem>>, vector<2x256xf32>
    tpu.vector_store %arg13[%c60, %c0_5], %1 {strides = array<i32>} : memref<128x256xf32, #tpu.memory_space<vmem>>, vector<2x256xf32>,
    %c70 = arith.constant 70 : index
    %c0_6 = arith.constant 0 : index
    %8 = vector.load %arg13[%c70, %c0_6] : memref<128x256xf32, #tpu.memory_space<vmem>>, vector<2x256xf32>
    tpu.vector_store %arg13[%c70, %c0_6], %1 {strides = array<i32>} : memref<128x256xf32, #tpu.memory_space<vmem>>, vector<2x256xf32>,
    %c80 = arith.constant 80 : index
    %c0_7 = arith.constant 0 : index
    %9 = vector.load %arg13[%c80, %c0_7] : memref<128x256xf32, #tpu.memory_space<vmem>>, vector<2x256xf32>
    tpu.vector_store %arg13[%c80, %c0_7], %1 {strides = array<i32>} : memref<128x256xf32, #tpu.memory_space<vmem>>, vector<2x256xf32>,
    %c90 = arith.constant 90 : index
    %c0_8 = arith.constant 0 : index
    %10 = vector.load %arg13[%c90, %c0_8] : memref<128x256xf32, #tpu.memory_space<vmem>>, vector<2x256xf32>
    tpu.vector_store %arg13[%c90, %c0_8], %1 {strides = array<i32>} : memref<128x256xf32, #tpu.memory_space<vmem>>, vector<2x256xf32>,
    %cst_9 = arith.constant 0.000000e+00 : f32
    %11 = vector.broadcast %cst_9 : f32 to vector<11x128xf32>
    %cst_10 = arith.constant 0.000000e+00 : f32
    %12 = vector.broadcast %cst_10 : f32 to vector<2x128xf32>
    %c11_11 = arith.constant 11 : index
    %c0_12 = arith.constant 0 : index
    %13 = vector.load %arg14[%c11_11, %c0_12] : memref<128x128xf32, #tpu.memory_space<vmem>>, vector<11x128xf32>
    tpu.vector_store %arg14[%c11_11, %c0_12], %11 {strides = array<i32>} : memref<128x128xf32, #tpu.memory_space<vmem>>, vector<11x128xf32>,
    %c100_13 = arith.constant 100 : index
    %c0_14 = arith.constant 0 : index
    %14 = vector.load %arg14[%c100_13, %c0_14] : memref<128x128xf32, #tpu.memory_space<vmem>>, vector<11x128xf32>
    tpu.vector_store %arg14[%c100_13, %c0_14], %11 {strides = array<i32>} : memref<128x128xf32, #tpu.memory_space<vmem>>, vector<11x128xf32>,
    %c30_15 = arith.constant 30 : index
    %c0_16 = arith.constant 0 : index
    %15 = vector.load %arg14[%c30_15, %c0_16] : memref<128x128xf32, #tpu.memory_space<vmem>>, vector<2x128xf32>
    tpu.vector_store %arg14[%c30_15, %c0_16], %12 {strides = array<i32>} : memref<128x128xf32, #tpu.memory_space<vmem>>, vector<2x128xf32>,
    %c40_17 = arith.constant 40 : index
    %c0_18 = arith.constant 0 : index
    %16 = vector.load %arg14[%c40_17, %c0_18] : memref<128x128xf32, #tpu.memory_space<vmem>>, vector<2x128xf32>
    tpu.vector_store %arg14[%c40_17, %c0_18], %12 {strides = array<i32>} : memref<128x128xf32, #tpu.memory_space<vmem>>, vector<2x128xf32>,
    %c50_19 = arith.constant 50 : index
    %c0_20 = arith.constant 0 : index
    %17 = vector.load %arg14[%c50_19, %c0_20] : memref<128x128xf32, #tpu.memory_space<vmem>>, vector<2x128xf32>
    tpu.vector_store %arg14[%c50_19, %c0_20], %12 {strides = array<i32>} : memref<128x128xf32, #tpu.memory_space<vmem>>, vector<2x128xf32>,
    %c60_21 = arith.constant 60 : index
    %c0_22 = arith.constant 0 : index
    %18 = vector.load %arg14[%c60_21, %c0_22] : memref<128x128xf32, #tpu.memory_space<vmem>>, vector<2x128xf32>
    tpu.vector_store %arg14[%c60_21, %c0_22], %12 {strides = array<i32>} : memref<128x128xf32, #tpu.memory_space<vmem>>, vector<2x128xf32>,
    %c70_23 = arith.constant 70 : index
    %c0_24 = arith.constant 0 : index
    %19 = vector.load %arg14[%c70_23, %c0_24] : memref<128x128xf32, #tpu.memory_space<vmem>>, vector<2x128xf32>
    tpu.vector_store %arg14[%c70_23, %c0_24], %12 {strides = array<i32>} : memref<128x128xf32, #tpu.memory_space<vmem>>, vector<2x128xf32>,
    %c80_25 = arith.constant 80 : index
    %c0_26 = arith.constant 0 : index
    %20 = vector.load %arg14[%c80_25, %c0_26] : memref<128x128xf32, #tpu.memory_space<vmem>>, vector<2x128xf32>
    tpu.vector_store %arg14[%c80_25, %c0_26], %12 {strides = array<i32>} : memref<128x128xf32, #tpu.memory_space<vmem>>, vector<2x128xf32>,
    %c90_27 = arith.constant 90 : index
    %c0_28 = arith.constant 0 : index
    %21 = vector.load %arg14[%c90_27, %c0_28] : memref<128x128xf32, #tpu.memory_space<vmem>>, vector<2x128xf32>
    tpu.vector_store %arg14[%c90_27, %c0_28], %12 {strides = array<i32>} : memref<128x128xf32, #tpu.memory_space<vmem>>, vector<2x128xf32>,
    %c0_29 = arith.constant 0 : index
    %c0_30 = arith.constant 0 : index
    %c0_31 = arith.constant 0 : index
    %22 = vector.load %arg1[%c0_29, %c0_30, %c0_31] : memref<1x64x128xf32, #tpu.memory_space<vmem>>, vector<1x64x128xf32>
    %23 = vector.shape_cast %22 : vector<1x64x128xf32> to vector<64x128xf32>
    %c0_32 = arith.constant 0 : index
    %c0_33 = arith.constant 0 : index
    %24 = vector.load %arg3[%c0_32, %c0_33] : memref<128x128xf32, #tpu.memory_space<vmem>>, vector<128x128xf32>
    %cst_34 = arith.constant dense<0.000000e+00> : vector<64x128xf32>
    %25 = tpu.matmul %23, %24, %cst_34 {dimension_numbers = #tpu.dot_dimension_numbers<[1], [0], [0], [1], [0, 0, 1, 1], [], []>} : vector<64x128xf32>, vector<128x128xf32>, vector<64x128xf32> -> vector<64x128xf32>
    %c0_35 = arith.constant 0 : index
    %c0_36 = arith.constant 0 : index
    %26 = vector.load %arg4[%c0_35, %c0_36] : memref<1x128xf32, #tpu.memory_space<vmem>>, vector<1x128xf32>
    %27 = vector.broadcast %26 : vector<1x128xf32> to vector<64x128xf32>
    %28 = arith.addf %25, %27 : vector<64x128xf32>
    %29 = math.absf %28 : vector<64x128xf32>
    %cst_37 = arith.constant 0.707106769 : f32
    %30 = vector.broadcast %cst_37 : f32 to vector<64x128xf32>
    %31 = arith.mulf %29, %30 : vector<64x128xf32>
    %cst_38 = arith.constant 0.327591091 : f32
    %32 = vector.broadcast %cst_38 : f32 to vector<64x128xf32>
    %33 = arith.mulf %32, %31 : vector<64x128xf32>
    %cst_39 = arith.constant 1.000000e+00 : f32
    %34 = vector.broadcast %cst_39 : f32 to vector<64x128xf32>
    %35 = arith.addf %34, %33 : vector<64x128xf32>
    %cst_40 = arith.constant 1.000000e+00 : f32
    %36 = vector.broadcast %cst_40 : f32 to vector<64x128xf32>
    %37 = arith.divf %36, %35 : vector<64x128xf32>
    %cst_41 = arith.constant 1.06140542 : f32
    %38 = vector.broadcast %cst_41 : f32 to vector<64x128xf32>
    %39 = arith.mulf %38, %37 : vector<64x128xf32>
    %cst_42 = arith.constant -1.45315206 : f32
    %40 = vector.broadcast %cst_42 : f32 to vector<64x128xf32>
    %41 = arith.addf %39, %40 : vector<64x128xf32>
    %42 = arith.mulf %41, %37 : vector<64x128xf32>
    %cst_43 = arith.constant 1.42141378 : f32
    %43 = vector.broadcast %cst_43 : f32 to vector<64x128xf32>
    %44 = arith.addf %42, %43 : vector<64x128xf32>
    %45 = arith.mulf %44, %37 : vector<64x128xf32>
    %cst_44 = arith.constant -0.284496725 : f32
    %46 = vector.broadcast %cst_44 : f32 to vector<64x128xf32>
    %47 = arith.addf %45, %46 : vector<64x128xf32>
    %48 = arith.mulf %47, %37 : vector<64x128xf32>
    %cst_45 = arith.constant 0.254829586 : f32
    %49 = vector.broadcast %cst_45 : f32 to vector<64x128xf32>
    %50 = arith.addf %48, %49 : vector<64x128xf32>
    %51 = arith.mulf %50, %37 : vector<64x128xf32>
    %cst_46 = arith.constant -5.000000e-01 : f32
    %52 = vector.broadcast %cst_46 : f32 to vector<64x128xf32>
    %53 = arith.mulf %52, %28 : vector<64x128xf32>
    %54 = arith.mulf %53, %28 : vector<64x128xf32>
    %55 = math.exp %54 : vector<64x128xf32>
    %56 = arith.mulf %51, %55 : vector<64x128xf32>
    %cst_47 = arith.constant 0.000000e+00 : f32
    %57 = vector.broadcast %cst_47 : f32 to vector<64x128xf32>
    %58 = arith.maximumf %28, %57 : vector<64x128xf32>
    %cst_48 = arith.constant 5.000000e-01 : f32
    %59 = vector.broadcast %cst_48 : f32 to vector<64x128xf32>
    %60 = arith.mulf %59, %29 : vector<64x128xf32>
    %61 = arith.mulf %60, %56 : vector<64x128xf32>
    %62 = arith.subf %58, %61 : vector<64x128xf32>
    %63 = vector.extract_strided_slice %62 {offsets = [0, 0], sizes = [8, 128], strides = [1, 1]} : vector<64x128xf32> to vector<8x128xf32>
    %c22 = arith.constant 22 : index
    %c0_49 = arith.constant 0 : index
    %64 = vector.load %arg13[%c22, %c0_49] : memref<128x256xf32, #tpu.memory_space<vmem>>, vector<8x128xf32>
    tpu.vector_store %arg13[%c22, %c0_49], %63 {strides = array<i32>} : memref<128x256xf32, #tpu.memory_space<vmem>>, vector<8x128xf32>,
    %65 = vector.extract_strided_slice %62 {offsets = [8, 0], sizes = [8, 128], strides = [1, 1]} : vector<64x128xf32> to vector<8x128xf32>
    %c32 = arith.constant 32 : index
    %c0_50 = arith.constant 0 : index
    %66 = vector.load %arg13[%c32, %c0_50] : memref<128x256xf32, #tpu.memory_space<vmem>>, vector<8x128xf32>
    tpu.vector_store %arg13[%c32, %c0_50], %65 {strides = array<i32>} : memref<128x256xf32, #tpu.memory_space<vmem>>, vector<8x128xf32>,
    %67 = vector.extract_strided_slice %62 {offsets = [16, 0], sizes = [8, 128], strides = [1, 1]} : vector<64x128xf32> to vector<8x128xf32>
    %c42 = arith.constant 42 : index
    %c0_51 = arith.constant 0 : index
    %68 = vector.load %arg13[%c42, %c0_51] : memref<128x256xf32, #tpu.memory_space<vmem>>, vector<8x128xf32>
    tpu.vector_store %arg13[%c42, %c0_51], %67 {strides = array<i32>} : memref<128x256xf32, #tpu.memory_space<vmem>>, vector<8x128xf32>,
    %69 = vector.extract_strided_slice %62 {offsets = [24, 0], sizes = [8, 128], strides = [1, 1]} : vector<64x128xf32> to vector<8x128xf32>
    %c52 = arith.constant 52 : index
    %c0_52 = arith.constant 0 : index
    %70 = vector.load %arg13[%c52, %c0_52] : memref<128x256xf32, #tpu.memory_space<vmem>>, vector<8x128xf32>
    tpu.vector_store %arg13[%c52, %c0_52], %69 {strides = array<i32>} : memref<128x256xf32, #tpu.memory_space<vmem>>, vector<8x128xf32>,
    %71 = vector.extract_strided_slice %62 {offsets = [32, 0], sizes = [8, 128], strides = [1, 1]} : vector<64x128xf32> to vector<8x128xf32>
    %c62 = arith.constant 62 : index
    %c0_53 = arith.constant 0 : index
    %72 = vector.load %arg13[%c62, %c0_53] : memref<128x256xf32, #tpu.memory_space<vmem>>, vector<8x128xf32>
    tpu.vector_store %arg13[%c62, %c0_53], %71 {strides = array<i32>} : memref<128x256xf32, #tpu.memory_space<vmem>>, vector<8x128xf32>,
    %73 = vector.extract_strided_slice %62 {offsets = [40, 0], sizes = [8, 128], strides = [1, 1]} : vector<64x128xf32> to vector<8x128xf32>
    %c72 = arith.constant 72 : index
    %c0_54 = arith.constant 0 : index
    %74 = vector.load %arg13[%c72, %c0_54] : memref<128x256xf32, #tpu.memory_space<vmem>>, vector<8x128xf32>
    tpu.vector_store %arg13[%c72, %c0_54], %73 {strides = array<i32>} : memref<128x256xf32, #tpu.memory_space<vmem>>, vector<8x128xf32>,
    %75 = vector.extract_strided_slice %62 {offsets = [48, 0], sizes = [8, 128], strides = [1, 1]} : vector<64x128xf32> to vector<8x128xf32>
    %c82 = arith.constant 82 : index
    %c0_55 = arith.constant 0 : index
    %76 = vector.load %arg13[%c82, %c0_55] : memref<128x256xf32, #tpu.memory_space<vmem>>, vector<8x128xf32>
    tpu.vector_store %arg13[%c82, %c0_55], %75 {strides = array<i32>} : memref<128x256xf32, #tpu.memory_space<vmem>>, vector<8x128xf32>,
    %77 = vector.extract_strided_slice %62 {offsets = [56, 0], sizes = [8, 128], strides = [1, 1]} : vector<64x128xf32> to vector<8x128xf32>
    %c92 = arith.constant 92 : index
    %c0_56 = arith.constant 0 : index
    %78 = vector.load %arg13[%c92, %c0_56] : memref<128x256xf32, #tpu.memory_space<vmem>>, vector<8x128xf32>
    tpu.vector_store %arg13[%c92, %c0_56], %77 {strides = array<i32>} : memref<128x256xf32, #tpu.memory_space<vmem>>, vector<8x128xf32>,
    %c0_57 = arith.constant 0 : index
    %c0_58 = arith.constant 0 : index
    %c0_59 = arith.constant 0 : index
    %c0_60 = arith.constant 0 : index
    %79 = vector.load %arg2[%c0_57, %c0_58, %c0_59, %c0_60] : memref<1x8x8x128xf32, #tpu.memory_space<vmem>>, vector<1x1x8x128xf32>
    %80 = vector.shape_cast %79 : vector<1x1x8x128xf32> to vector<8x128xf32>
    %c22_61 = arith.constant 22 : index
    %c128 = arith.constant 128 : index
    %81 = vector.load %arg13[%c22_61, %c128] : memref<128x256xf32, #tpu.memory_space<vmem>>, vector<8x128xf32>
    tpu.vector_store %arg13[%c22_61, %c128], %80 {strides = array<i32>} : memref<128x256xf32, #tpu.memory_space<vmem>>, vector<8x128xf32>,
    %c0_62 = arith.constant 0 : index
    %c1 = arith.constant 1 : index
    %c0_63 = arith.constant 0 : index
    %c0_64 = arith.constant 0 : index
    %82 = vector.load %arg2[%c0_62, %c1, %c0_63, %c0_64] : memref<1x8x8x128xf32, #tpu.memory_space<vmem>>, vector<1x1x8x128xf32>
    %83 = vector.shape_cast %82 : vector<1x1x8x128xf32> to vector<8x128xf32>
    %c32_65 = arith.constant 32 : index
    %c128_66 = arith.constant 128 : index
    %84 = vector.load %arg13[%c32_65, %c128_66] : memref<128x256xf32, #tpu.memory_space<vmem>>, vector<8x128xf32>
    tpu.vector_store %arg13[%c32_65, %c128_66], %83 {strides = array<i32>} : memref<128x256xf32, #tpu.memory_space<vmem>>, vector<8x128xf32>,
    %c0_67 = arith.constant 0 : index
    %c2 = arith.constant 2 : index
    %c0_68 = arith.constant 0 : index
    %c0_69 = arith.constant 0 : index
    %85 = vector.load %arg2[%c0_67, %c2, %c0_68, %c0_69] : memref<1x8x8x128xf32, #tpu.memory_space<vmem>>, vector<1x1x8x128xf32>
    %86 = vector.shape_cast %85 : vector<1x1x8x128xf32> to vector<8x128xf32>
    %c42_70 = arith.constant 42 : index
    %c128_71 = arith.constant 128 : index
    %87 = vector.load %arg13[%c42_70, %c128_71] : memref<128x256xf32, #tpu.memory_space<vmem>>, vector<8x128xf32>
    tpu.vector_store %arg13[%c42_70, %c128_71], %86 {strides = array<i32>} : memref<128x256xf32, #tpu.memory_space<vmem>>, vector<8x128xf32>,
    %c0_72 = arith.constant 0 : index
    %c3 = arith.constant 3 : index
    %c0_73 = arith.constant 0 : index
    %c0_74 = arith.constant 0 : index
    %88 = vector.load %arg2[%c0_72, %c3, %c0_73, %c0_74] : memref<1x8x8x128xf32, #tpu.memory_space<vmem>>, vector<1x1x8x128xf32>
    %89 = vector.shape_cast %88 : vector<1x1x8x128xf32> to vector<8x128xf32>
    %c52_75 = arith.constant 52 : index
    %c128_76 = arith.constant 128 : index
    %90 = vector.load %arg13[%c52_75, %c128_76] : memref<128x256xf32, #tpu.memory_space<vmem>>, vector<8x128xf32>
    tpu.vector_store %arg13[%c52_75, %c128_76], %89 {strides = array<i32>} : memref<128x256xf32, #tpu.memory_space<vmem>>, vector<8x128xf32>,
    %c0_77 = arith.constant 0 : index
    %c4 = arith.constant 4 : index
    %c0_78 = arith.constant 0 : index
    %c0_79 = arith.constant 0 : index
    %91 = vector.load %arg2[%c0_77, %c4, %c0_78, %c0_79] : memref<1x8x8x128xf32, #tpu.memory_space<vmem>>, vector<1x1x8x128xf32>
    %92 = vector.shape_cast %91 : vector<1x1x8x128xf32> to vector<8x128xf32>
    %c62_80 = arith.constant 62 : index
    %c128_81 = arith.constant 128 : index
    %93 = vector.load %arg13[%c62_80, %c128_81] : memref<128x256xf32, #tpu.memory_space<vmem>>, vector<8x128xf32>
    tpu.vector_store %arg13[%c62_80, %c128_81], %92 {strides = array<i32>} : memref<128x256xf32, #tpu.memory_space<vmem>>, vector<8x128xf32>,
    %c0_82 = arith.constant 0 : index
    %c5 = arith.constant 5 : index
    %c0_83 = arith.constant 0 : index
    %c0_84 = arith.constant 0 : index
    %94 = vector.load %arg2[%c0_82, %c5, %c0_83, %c0_84] : memref<1x8x8x128xf32, #tpu.memory_space<vmem>>, vector<1x1x8x128xf32>
    %95 = vector.shape_cast %94 : vector<1x1x8x128xf32> to vector<8x128xf32>
    %c72_85 = arith.constant 72 : index
    %c128_86 = arith.constant 128 : index
    %96 = vector.load %arg13[%c72_85, %c128_86] : memref<128x256xf32, #tpu.memory_space<vmem>>, vector<8x128xf32>
    tpu.vector_store %arg13[%c72_85, %c128_86], %95 {strides = array<i32>} : memref<128x256xf32, #tpu.memory_space<vmem>>, vector<8x128xf32>,
    %c0_87 = arith.constant 0 : index
    %c6 = arith.constant 6 : index
    %c0_88 = arith.constant 0 : index
    %c0_89 = arith.constant 0 : index
    %97 = vector.load %arg2[%c0_87, %c6, %c0_88, %c0_89] : memref<1x8x8x128xf32, #tpu.memory_space<vmem>>, vector<1x1x8x128xf32>
    %98 = vector.shape_cast %97 : vector<1x1x8x128xf32> to vector<8x128xf32>
    %c82_90 = arith.constant 82 : index
    %c128_91 = arith.constant 128 : index
    %99 = vector.load %arg13[%c82_90, %c128_91] : memref<128x256xf32, #tpu.memory_space<vmem>>, vector<8x128xf32>
    tpu.vector_store %arg13[%c82_90, %c128_91], %98 {strides = array<i32>} : memref<128x256xf32, #tpu.memory_space<vmem>>, vector<8x128xf32>,
    %c0_92 = arith.constant 0 : index
    %c7 = arith.constant 7 : index
    %c0_93 = arith.constant 0 : index
    %c0_94 = arith.constant 0 : index
    %100 = vector.load %arg2[%c0_92, %c7, %c0_93, %c0_94] : memref<1x8x8x128xf32, #tpu.memory_space<vmem>>, vector<1x1x8x128xf32>
    %101 = vector.shape_cast %100 : vector<1x1x8x128xf32> to vector<8x128xf32>
    %c92_95 = arith.constant 92 : index
    %c128_96 = arith.constant 128 : index
    %102 = vector.load %arg13[%c92_95, %c128_96] : memref<128x256xf32, #tpu.memory_space<vmem>>, vector<8x128xf32>
    tpu.vector_store %arg13[%c92_95, %c128_96], %101 {strides = array<i32>} : memref<128x256xf32, #tpu.memory_space<vmem>>, vector<8x128xf32>,
    %cst_97 = arith.constant 0.000000e+00 : f32
    %103 = vector.broadcast %cst_97 : f32 to vector<104x128xf32>
    %c0_98 = arith.constant 0 : index
    %c0_99 = arith.constant 0 : index
    %104 = vector.load %arg13[%c0_98, %c0_99] : memref<128x256xf32, #tpu.memory_space<vmem>>, vector<104x256xf32>
    %c0_100 = arith.constant 0 : index
    %c0_101 = arith.constant 0 : index
    %c0_102 = arith.constant 0 : index
    %105 = vector.load %arg5[%c0_100, %c0_101, %c0_102] : memref<9x256x128xf32, #tpu.memory_space<vmem>>, vector<1x256x128xf32>
    %106 = vector.shape_cast %105 : vector<1x256x128xf32> to vector<256x128xf32>
    %cst_103 = arith.constant dense<0.000000e+00> : vector<104x128xf32>
    %107 = tpu.matmul %104, %106, %cst_103 {dimension_numbers = #tpu.dot_dimension_numbers<[1], [0], [0], [1], [0, 0, 1, 1], [], []>} : vector<104x256xf32>, vector<256x128xf32>, vector<104x128xf32> -> vector<104x128xf32>
    %108 = arith.addf %103, %107 : vector<104x128xf32>
    %c1_104 = arith.constant 1 : index
    %c0_105 = arith.constant 0 : index
    %109 = vector.load %arg13[%c1_104, %c0_105] : memref<128x256xf32, #tpu.memory_space<vmem>>, vector<104x256xf32>
    %c1_106 = arith.constant 1 : index
    %c0_107 = arith.constant 0 : index
    %c0_108 = arith.constant 0 : index
    %110 = vector.load %arg5[%c1_106, %c0_107, %c0_108] : memref<9x256x128xf32, #tpu.memory_space<vmem>>, vector<1x256x128xf32>
    %111 = vector.shape_cast %110 : vector<1x256x128xf32> to vector<256x128xf32>
    %cst_109 = arith.constant dense<0.000000e+00> : vector<104x128xf32>
    %112 = tpu.matmul %109, %111, %cst_109 {dimension_numbers = #tpu.dot_dimension_numbers<[1], [0], [0], [1], [0, 0, 1, 1], [], []>} : vector<104x256xf32>, vector<256x128xf32>, vector<104x128xf32> -> vector<104x128xf32>
    %113 = arith.addf %108, %112 : vector<104x128xf32>
    %c2_110 = arith.constant 2 : index
    %c0_111 = arith.constant 0 : index
    %114 = vector.load %arg13[%c2_110, %c0_111] : memref<128x256xf32, #tpu.memory_space<vmem>>, vector<104x256xf32>
    %c2_112 = arith.constant 2 : index
    %c0_113 = arith.constant 0 : index
    %c0_114 = arith.constant 0 : index
    %115 = vector.load %arg5[%c2_112, %c0_113, %c0_114] : memref<9x256x128xf32, #tpu.memory_space<vmem>>, vector<1x256x128xf32>
    %116 = vector.shape_cast %115 : vector<1x256x128xf32> to vector<256x128xf32>
    %cst_115 = arith.constant dense<0.000000e+00> : vector<104x128xf32>
    %117 = tpu.matmul %114, %116, %cst_115 {dimension_numbers = #tpu.dot_dimension_numbers<[1], [0], [0], [1], [0, 0, 1, 1], [], []>} : vector<104x256xf32>, vector<256x128xf32>, vector<104x128xf32> -> vector<104x128xf32>
    %118 = arith.addf %113, %117 : vector<104x128xf32>
    %c10 = arith.constant 10 : index
    %c0_116 = arith.constant 0 : index
    %119 = vector.load %arg13[%c10, %c0_116] : memref<128x256xf32, #tpu.memory_space<vmem>>, vector<104x256xf32>
    %c3_117 = arith.constant 3 : index
    %c0_118 = arith.constant 0 : index
    %c0_119 = arith.constant 0 : index
    %120 = vector.load %arg5[%c3_117, %c0_118, %c0_119] : memref<9x256x128xf32, #tpu.memory_space<vmem>>, vector<1x256x128xf32>
    %121 = vector.shape_cast %120 : vector<1x256x128xf32> to vector<256x128xf32>
    %cst_120 = arith.constant dense<0.000000e+00> : vector<104x128xf32>
    %122 = tpu.matmul %119, %121, %cst_120 {dimension_numbers = #tpu.dot_dimension_numbers<[1], [0], [0], [1], [0, 0, 1, 1], [], []>} : vector<104x256xf32>, vector<256x128xf32>, vector<104x128xf32> -> vector<104x128xf32>
    %123 = arith.addf %118, %122 : vector<104x128xf32>
    %c11_121 = arith.constant 11 : index
    %c0_122 = arith.constant 0 : index
    %124 = vector.load %arg13[%c11_121, %c0_122] : memref<128x256xf32, #tpu.memory_space<vmem>>, vector<104x256xf32>
    %c4_123 = arith.constant 4 : index
    %c0_124 = arith.constant 0 : index
    %c0_125 = arith.constant 0 : index
    %125 = vector.load %arg5[%c4_123, %c0_124, %c0_125] : memref<9x256x128xf32, #tpu.memory_space<vmem>>, vector<1x256x128xf32>
    %126 = vector.shape_cast %125 : vector<1x256x128xf32> to vector<256x128xf32>
    %cst_126 = arith.constant dense<0.000000e+00> : vector<104x128xf32>
    %127 = tpu.matmul %124, %126, %cst_126 {dimension_numbers = #tpu.dot_dimension_numbers<[1], [0], [0], [1], [0, 0, 1, 1], [], []>} : vector<104x256xf32>, vector<256x128xf32>, vector<104x128xf32> -> vector<104x128xf32>
    %128 = arith.addf %123, %127 : vector<104x128xf32>
    %c12 = arith.constant 12 : index
    %c0_127 = arith.constant 0 : index
    %129 = vector.load %arg13[%c12, %c0_127] : memref<128x256xf32, #tpu.memory_space<vmem>>, vector<104x256xf32>
    %c5_128 = arith.constant 5 : index
    %c0_129 = arith.constant 0 : index
    %c0_130 = arith.constant 0 : index
    %130 = vector.load %arg5[%c5_128, %c0_129, %c0_130] : memref<9x256x128xf32, #tpu.memory_space<vmem>>, vector<1x256x128xf32>
    %131 = vector.shape_cast %130 : vector<1x256x128xf32> to vector<256x128xf32>
    %cst_131 = arith.constant dense<0.000000e+00> : vector<104x128xf32>
    %132 = tpu.matmul %129, %131, %cst_131 {dimension_numbers = #tpu.dot_dimension_numbers<[1], [0], [0], [1], [0, 0, 1, 1], [], []>} : vector<104x256xf32>, vector<256x128xf32>, vector<104x128xf32> -> vector<104x128xf32>
    %133 = arith.addf %128, %132 : vector<104x128xf32>
    %c20 = arith.constant 20 : index
    %c0_132 = arith.constant 0 : index
    %134 = vector.load %arg13[%c20, %c0_132] : memref<128x256xf32, #tpu.memory_space<vmem>>, vector<104x256xf32>
    %c6_133 = arith.constant 6 : index
    %c0_134 = arith.constant 0 : index
    %c0_135 = arith.constant 0 : index
    %135 = vector.load %arg5[%c6_133, %c0_134, %c0_135] : memref<9x256x128xf32, #tpu.memory_space<vmem>>, vector<1x256x128xf32>
    %136 = vector.shape_cast %135 : vector<1x256x128xf32> to vector<256x128xf32>
    %cst_136 = arith.constant dense<0.000000e+00> : vector<104x128xf32>
    %137 = tpu.matmul %134, %136, %cst_136 {dimension_numbers = #tpu.dot_dimension_numbers<[1], [0], [0], [1], [0, 0, 1, 1], [], []>} : vector<104x256xf32>, vector<256x128xf32>, vector<104x128xf32> -> vector<104x128xf32>
    %138 = arith.addf %133, %137 : vector<104x128xf32>
    %c21 = arith.constant 21 : index
    %c0_137 = arith.constant 0 : index
    %139 = vector.load %arg13[%c21, %c0_137] : memref<128x256xf32, #tpu.memory_space<vmem>>, vector<104x256xf32>
    %c7_138 = arith.constant 7 : index
    %c0_139 = arith.constant 0 : index
    %c0_140 = arith.constant 0 : index
    %140 = vector.load %arg5[%c7_138, %c0_139, %c0_140] : memref<9x256x128xf32, #tpu.memory_space<vmem>>, vector<1x256x128xf32>
    %141 = vector.shape_cast %140 : vector<1x256x128xf32> to vector<256x128xf32>
    %cst_141 = arith.constant dense<0.000000e+00> : vector<104x128xf32>
    %142 = tpu.matmul %139, %141, %cst_141 {dimension_numbers = #tpu.dot_dimension_numbers<[1], [0], [0], [1], [0, 0, 1, 1], [], []>} : vector<104x256xf32>, vector<256x128xf32>, vector<104x128xf32> -> vector<104x128xf32>
    %143 = arith.addf %138, %142 : vector<104x128xf32>
    %c22_142 = arith.constant 22 : index
    %c0_143 = arith.constant 0 : index
    %144 = vector.load %arg13[%c22_142, %c0_143] : memref<128x256xf32, #tpu.memory_space<vmem>>, vector<104x256xf32>
    %c8 = arith.constant 8 : index
    %c0_144 = arith.constant 0 : index
    %c0_145 = arith.constant 0 : index
    %145 = vector.load %arg5[%c8, %c0_144, %c0_145] : memref<9x256x128xf32, #tpu.memory_space<vmem>>, vector<1x256x128xf32>
    %146 = vector.shape_cast %145 : vector<1x256x128xf32> to vector<256x128xf32>
    %cst_146 = arith.constant dense<0.000000e+00> : vector<104x128xf32>
    %147 = tpu.matmul %144, %146, %cst_146 {dimension_numbers = #tpu.dot_dimension_numbers<[1], [0], [0], [1], [0, 0, 1, 1], [], []>} : vector<104x256xf32>, vector<256x128xf32>, vector<104x128xf32> -> vector<104x128xf32>
    %148 = arith.addf %143, %147 : vector<104x128xf32>
    %149 = vector.extract_strided_slice %148 {offsets = [11, 0], sizes = [8, 128], strides = [1, 1]} : vector<104x128xf32> to vector<8x128xf32>
    %c0_147 = arith.constant 0 : index
    %c0_148 = arith.constant 0 : index
    %150 = vector.load %arg6[%c0_147, %c0_148] : memref<1x128xf32, #tpu.memory_space<vmem>>, vector<1x128xf32>
    %151 = vector.broadcast %150 : vector<1x128xf32> to vector<8x128xf32>
    %152 = arith.addf %149, %151 : vector<8x128xf32>
    %153 = math.absf %152 : vector<8x128xf32>
    %cst_149 = arith.constant 0.707106769 : f32
    %154 = vector.broadcast %cst_149 : f32 to vector<8x128xf32>
    %155 = arith.mulf %153, %154 : vector<8x128xf32>
    %cst_150 = arith.constant 0.327591091 : f32
    %156 = vector.broadcast %cst_150 : f32 to vector<8x128xf32>
    %157 = arith.mulf %156, %155 : vector<8x128xf32>
    %cst_151 = arith.constant 1.000000e+00 : f32
    %158 = vector.broadcast %cst_151 : f32 to vector<8x128xf32>
    %159 = arith.addf %158, %157 : vector<8x128xf32>
    %cst_152 = arith.constant 1.000000e+00 : f32
    %160 = vector.broadcast %cst_152 : f32 to vector<8x128xf32>
    %161 = arith.divf %160, %159 : vector<8x128xf32>
    %cst_153 = arith.constant 1.06140542 : f32
    %162 = vector.broadcast %cst_153 : f32 to vector<8x128xf32>
    %163 = arith.mulf %162, %161 : vector<8x128xf32>
    %cst_154 = arith.constant -1.45315206 : f32
    %164 = vector.broadcast %cst_154 : f32 to vector<8x128xf32>
    %165 = arith.addf %163, %164 : vector<8x128xf32>
    %166 = arith.mulf %165, %161 : vector<8x128xf32>
    %cst_155 = arith.constant 1.42141378 : f32
    %167 = vector.broadcast %cst_155 : f32 to vector<8x128xf32>
    %168 = arith.addf %166, %167 : vector<8x128xf32>
    %169 = arith.mulf %168, %161 : vector<8x128xf32>
    %cst_156 = arith.constant -0.284496725 : f32
    %170 = vector.broadcast %cst_156 : f32 to vector<8x128xf32>
    %171 = arith.addf %169, %170 : vector<8x128xf32>
    %172 = arith.mulf %171, %161 : vector<8x128xf32>
    %cst_157 = arith.constant 0.254829586 : f32
    %173 = vector.broadcast %cst_157 : f32 to vector<8x128xf32>
    %174 = arith.addf %172, %173 : vector<8x128xf32>
    %175 = arith.mulf %174, %161 : vector<8x128xf32>
    %cst_158 = arith.constant -5.000000e-01 : f32
    %176 = vector.broadcast %cst_158 : f32 to vector<8x128xf32>
    %177 = arith.mulf %176, %152 : vector<8x128xf32>
    %178 = arith.mulf %177, %152 : vector<8x128xf32>
    %179 = math.exp %178 : vector<8x128xf32>
    %180 = arith.mulf %175, %179 : vector<8x128xf32>
    %cst_159 = arith.constant 0.000000e+00 : f32
    %181 = vector.broadcast %cst_159 : f32 to vector<8x128xf32>
    %182 = arith.maximumf %152, %181 : vector<8x128xf32>
    %cst_160 = arith.constant 5.000000e-01 : f32
    %183 = vector.broadcast %cst_160 : f32 to vector<8x128xf32>
    %184 = arith.mulf %183, %153 : vector<8x128xf32>
    %185 = arith.mulf %184, %180 : vector<8x128xf32>
    %186 = arith.subf %182, %185 : vector<8x128xf32>
    %c22_161 = arith.constant 22 : index
    %c0_162 = arith.constant 0 : index
    %187 = vector.load %arg14[%c22_161, %c0_162] : memref<128x128xf32, #tpu.memory_space<vmem>>, vector<8x128xf32>
    tpu.vector_store %arg14[%c22_161, %c0_162], %186 {strides = array<i32>} : memref<128x128xf32, #tpu.memory_space<vmem>>, vector<8x128xf32>,
    %188 = vector.extract_strided_slice %148 {offsets = [21, 0], sizes = [8, 128], strides = [1, 1]} : vector<104x128xf32> to vector<8x128xf32>
    %c0_163 = arith.constant 0 : index
    %c0_164 = arith.constant 0 : index
    %189 = vector.load %arg6[%c0_163, %c0_164] : memref<1x128xf32, #tpu.memory_space<vmem>>, vector<1x128xf32>
    %190 = vector.broadcast %189 : vector<1x128xf32> to vector<8x128xf32>
    %191 = arith.addf %188, %190 : vector<8x128xf32>
    %192 = math.absf %191 : vector<8x128xf32>
    %cst_165 = arith.constant 0.707106769 : f32
    %193 = vector.broadcast %cst_165 : f32 to vector<8x128xf32>
    %194 = arith.mulf %192, %193 : vector<8x128xf32>
    %cst_166 = arith.constant 0.327591091 : f32
    %195 = vector.broadcast %cst_166 : f32 to vector<8x128xf32>
    %196 = arith.mulf %195, %194 : vector<8x128xf32>
    %cst_167 = arith.constant 1.000000e+00 : f32
    %197 = vector.broadcast %cst_167 : f32 to vector<8x128xf32>
    %198 = arith.addf %197, %196 : vector<8x128xf32>
    %cst_168 = arith.constant 1.000000e+00 : f32
    %199 = vector.broadcast %cst_168 : f32 to vector<8x128xf32>
    %200 = arith.divf %199, %198 : vector<8x128xf32>
    %cst_169 = arith.constant 1.06140542 : f32
    %201 = vector.broadcast %cst_169 : f32 to vector<8x128xf32>
    %202 = arith.mulf %201, %200 : vector<8x128xf32>
    %cst_170 = arith.constant -1.45315206 : f32
    %203 = vector.broadcast %cst_170 : f32 to vector<8x128xf32>
    %204 = arith.addf %202, %203 : vector<8x128xf32>
    %205 = arith.mulf %204, %200 : vector<8x128xf32>
    %cst_171 = arith.constant 1.42141378 : f32
    %206 = vector.broadcast %cst_171 : f32 to vector<8x128xf32>
    %207 = arith.addf %205, %206 : vector<8x128xf32>
    %208 = arith.mulf %207, %200 : vector<8x128xf32>
    %cst_172 = arith.constant -0.284496725 : f32
    %209 = vector.broadcast %cst_172 : f32 to vector<8x128xf32>
    %210 = arith.addf %208, %209 : vector<8x128xf32>
    %211 = arith.mulf %210, %200 : vector<8x128xf32>
    %cst_173 = arith.constant 0.254829586 : f32
    %212 = vector.broadcast %cst_173 : f32 to vector<8x128xf32>
    %213 = arith.addf %211, %212 : vector<8x128xf32>
    %214 = arith.mulf %213, %200 : vector<8x128xf32>
    %cst_174 = arith.constant -5.000000e-01 : f32
    %215 = vector.broadcast %cst_174 : f32 to vector<8x128xf32>
    %216 = arith.mulf %215, %191 : vector<8x128xf32>
    %217 = arith.mulf %216, %191 : vector<8x128xf32>
    %218 = math.exp %217 : vector<8x128xf32>
    %219 = arith.mulf %214, %218 : vector<8x128xf32>
    %cst_175 = arith.constant 0.000000e+00 : f32
    %220 = vector.broadcast %cst_175 : f32 to vector<8x128xf32>
    %221 = arith.maximumf %191, %220 : vector<8x128xf32>
    %cst_176 = arith.constant 5.000000e-01 : f32
    %222 = vector.broadcast %cst_176 : f32 to vector<8x128xf32>
    %223 = arith.mulf %222, %192 : vector<8x128xf32>
    %224 = arith.mulf %223, %219 : vector<8x128xf32>
    %225 = arith.subf %221, %224 : vector<8x128xf32>
    %c32_177 = arith.constant 32 : index
    %c0_178 = arith.constant 0 : index
    %226 = vector.load %arg14[%c32_177, %c0_178] : memref<128x128xf32, #tpu.memory_space<vmem>>, vector<8x128xf32>
    tpu.vector_store %arg14[%c32_177, %c0_178], %225 {strides = array<i32>} : memref<128x128xf32, #tpu.memory_space<vmem>>, vector<8x128xf32>,
    %227 = vector.extract_strided_slice %148 {offsets = [31, 0], sizes = [8, 128], strides = [1, 1]} : vector<104x128xf32> to vector<8x128xf32>
    %c0_179 = arith.constant 0 : index
    %c0_180 = arith.constant 0 : index
    %228 = vector.load %arg6[%c0_179, %c0_180] : memref<1x128xf32, #tpu.memory_space<vmem>>, vector<1x128xf32>
    %229 = vector.broadcast %228 : vector<1x128xf32> to vector<8x128xf32>
    %230 = arith.addf %227, %229 : vector<8x128xf32>
    %231 = math.absf %230 : vector<8x128xf32>
    %cst_181 = arith.constant 0.707106769 : f32
    %232 = vector.broadcast %cst_181 : f32 to vector<8x128xf32>
    %233 = arith.mulf %231, %232 : vector<8x128xf32>
    %cst_182 = arith.constant 0.327591091 : f32
    %234 = vector.broadcast %cst_182 : f32 to vector<8x128xf32>
    %235 = arith.mulf %234, %233 : vector<8x128xf32>
    %cst_183 = arith.constant 1.000000e+00 : f32
    %236 = vector.broadcast %cst_183 : f32 to vector<8x128xf32>
    %237 = arith.addf %236, %235 : vector<8x128xf32>
    %cst_184 = arith.constant 1.000000e+00 : f32
    %238 = vector.broadcast %cst_184 : f32 to vector<8x128xf32>
    %239 = arith.divf %238, %237 : vector<8x128xf32>
    %cst_185 = arith.constant 1.06140542 : f32
    %240 = vector.broadcast %cst_185 : f32 to vector<8x128xf32>
    %241 = arith.mulf %240, %239 : vector<8x128xf32>
    %cst_186 = arith.constant -1.45315206 : f32
    %242 = vector.broadcast %cst_186 : f32 to vector<8x128xf32>
    %243 = arith.addf %241, %242 : vector<8x128xf32>
    %244 = arith.mulf %243, %239 : vector<8x128xf32>
    %cst_187 = arith.constant 1.42141378 : f32
    %245 = vector.broadcast %cst_187 : f32 to vector<8x128xf32>
    %246 = arith.addf %244, %245 : vector<8x128xf32>
    %247 = arith.mulf %246, %239 : vector<8x128xf32>
    %cst_188 = arith.constant -0.284496725 : f32
    %248 = vector.broadcast %cst_188 : f32 to vector<8x128xf32>
    %249 = arith.addf %247, %248 : vector<8x128xf32>
    %250 = arith.mulf %249, %239 : vector<8x128xf32>
    %cst_189 = arith.constant 0.254829586 : f32
    %251 = vector.broadcast %cst_189 : f32 to vector<8x128xf32>
    %252 = arith.addf %250, %251 : vector<8x128xf32>
    %253 = arith.mulf %252, %239 : vector<8x128xf32>
    %cst_190 = arith.constant -5.000000e-01 : f32
    %254 = vector.broadcast %cst_190 : f32 to vector<8x128xf32>
    %255 = arith.mulf %254, %230 : vector<8x128xf32>
    %256 = arith.mulf %255, %230 : vector<8x128xf32>
    %257 = math.exp %256 : vector<8x128xf32>
    %258 = arith.mulf %253, %257 : vector<8x128xf32>
    %cst_191 = arith.constant 0.000000e+00 : f32
    %259 = vector.broadcast %cst_191 : f32 to vector<8x128xf32>
    %260 = arith.maximumf %230, %259 : vector<8x128xf32>
    %cst_192 = arith.constant 5.000000e-01 : f32
    %261 = vector.broadcast %cst_192 : f32 to vector<8x128xf32>
    %262 = arith.mulf %261, %231 : vector<8x128xf32>
    %263 = arith.mulf %262, %258 : vector<8x128xf32>
    %264 = arith.subf %260, %263 : vector<8x128xf32>
    %c42_193 = arith.constant 42 : index
    %c0_194 = arith.constant 0 : index
    %265 = vector.load %arg14[%c42_193, %c0_194] : memref<128x128xf32, #tpu.memory_space<vmem>>, vector<8x128xf32>
    tpu.vector_store %arg14[%c42_193, %c0_194], %264 {strides = array<i32>} : memref<128x128xf32, #tpu.memory_space<vmem>>, vector<8x128xf32>,
    %266 = vector.extract_strided_slice %148 {offsets = [41, 0], sizes = [8, 128], strides = [1, 1]} : vector<104x128xf32> to vector<8x128xf32>
    %c0_195 = arith.constant 0 : index
    %c0_196 = arith.constant 0 : index
    %267 = vector.load %arg6[%c0_195, %c0_196] : memref<1x128xf32, #tpu.memory_space<vmem>>, vector<1x128xf32>
    %268 = vector.broadcast %267 : vector<1x128xf32> to vector<8x128xf32>
    %269 = arith.addf %266, %268 : vector<8x128xf32>
    %270 = math.absf %269 : vector<8x128xf32>
    %cst_197 = arith.constant 0.707106769 : f32
    %271 = vector.broadcast %cst_197 : f32 to vector<8x128xf32>
    %272 = arith.mulf %270, %271 : vector<8x128xf32>
    %cst_198 = arith.constant 0.327591091 : f32
    %273 = vector.broadcast %cst_198 : f32 to vector<8x128xf32>
    %274 = arith.mulf %273, %272 : vector<8x128xf32>
    %cst_199 = arith.constant 1.000000e+00 : f32
    %275 = vector.broadcast %cst_199 : f32 to vector<8x128xf32>
    %276 = arith.addf %275, %274 : vector<8x128xf32>
    %cst_200 = arith.constant 1.000000e+00 : f32
    %277 = vector.broadcast %cst_200 : f32 to vector<8x128xf32>
    %278 = arith.divf %277, %276 : vector<8x128xf32>
    %cst_201 = arith.constant 1.06140542 : f32
    %279 = vector.broadcast %cst_201 : f32 to vector<8x128xf32>
    %280 = arith.mulf %279, %278 : vector<8x128xf32>
    %cst_202 = arith.constant -1.45315206 : f32
    %281 = vector.broadcast %cst_202 : f32 to vector<8x128xf32>
    %282 = arith.addf %280, %281 : vector<8x128xf32>
    %283 = arith.mulf %282, %278 : vector<8x128xf32>
    %cst_203 = arith.constant 1.42141378 : f32
    %284 = vector.broadcast %cst_203 : f32 to vector<8x128xf32>
    %285 = arith.addf %283, %284 : vector<8x128xf32>
    %286 = arith.mulf %285, %278 : vector<8x128xf32>
    %cst_204 = arith.constant -0.284496725 : f32
    %287 = vector.broadcast %cst_204 : f32 to vector<8x128xf32>
    %288 = arith.addf %286, %287 : vector<8x128xf32>
    %289 = arith.mulf %288, %278 : vector<8x128xf32>
    %cst_205 = arith.constant 0.254829586 : f32
    %290 = vector.broadcast %cst_205 : f32 to vector<8x128xf32>
    %291 = arith.addf %289, %290 : vector<8x128xf32>
    %292 = arith.mulf %291, %278 : vector<8x128xf32>
    %cst_206 = arith.constant -5.000000e-01 : f32
    %293 = vector.broadcast %cst_206 : f32 to vector<8x128xf32>
    %294 = arith.mulf %293, %269 : vector<8x128xf32>
    %295 = arith.mulf %294, %269 : vector<8x128xf32>
    %296 = math.exp %295 : vector<8x128xf32>
    %297 = arith.mulf %292, %296 : vector<8x128xf32>
    %cst_207 = arith.constant 0.000000e+00 : f32
    %298 = vector.broadcast %cst_207 : f32 to vector<8x128xf32>
    %299 = arith.maximumf %269, %298 : vector<8x128xf32>
    %cst_208 = arith.constant 5.000000e-01 : f32
    %300 = vector.broadcast %cst_208 : f32 to vector<8x128xf32>
    %301 = arith.mulf %300, %270 : vector<8x128xf32>
    %302 = arith.mulf %301, %297 : vector<8x128xf32>
    %303 = arith.subf %299, %302 : vector<8x128xf32>
    %c52_209 = arith.constant 52 : index
    %c0_210 = arith.constant 0 : index
    %304 = vector.load %arg14[%c52_209, %c0_210] : memref<128x128xf32, #tpu.memory_space<vmem>>, vector<8x128xf32>
    tpu.vector_store %arg14[%c52_209, %c0_210], %303 {strides = array<i32>} : memref<128x128xf32, #tpu.memory_space<vmem>>, vector<8x128xf32>,
    %305 = vector.extract_strided_slice %148 {offsets = [51, 0], sizes = [8, 128], strides = [1, 1]} : vector<104x128xf32> to vector<8x128xf32>
    %c0_211 = arith.constant 0 : index
    %c0_212 = arith.constant 0 : index
    %306 = vector.load %arg6[%c0_211, %c0_212] : memref<1x128xf32, #tpu.memory_space<vmem>>, vector<1x128xf32>
    %307 = vector.broadcast %306 : vector<1x128xf32> to vector<8x128xf32>
    %308 = arith.addf %305, %307 : vector<8x128xf32>
    %309 = math.absf %308 : vector<8x128xf32>
    %cst_213 = arith.constant 0.707106769 : f32
    %310 = vector.broadcast %cst_213 : f32 to vector<8x128xf32>
    %311 = arith.mulf %309, %310 : vector<8x128xf32>
    %cst_214 = arith.constant 0.327591091 : f32
    %312 = vector.broadcast %cst_214 : f32 to vector<8x128xf32>
    %313 = arith.mulf %312, %311 : vector<8x128xf32>
    %cst_215 = arith.constant 1.000000e+00 : f32
    %314 = vector.broadcast %cst_215 : f32 to vector<8x128xf32>
    %315 = arith.addf %314, %313 : vector<8x128xf32>
    %cst_216 = arith.constant 1.000000e+00 : f32
    %316 = vector.broadcast %cst_216 : f32 to vector<8x128xf32>
    %317 = arith.divf %316, %315 : vector<8x128xf32>
    %cst_217 = arith.constant 1.06140542 : f32
    %318 = vector.broadcast %cst_217 : f32 to vector<8x128xf32>
    %319 = arith.mulf %318, %317 : vector<8x128xf32>
    %cst_218 = arith.constant -1.45315206 : f32
    %320 = vector.broadcast %cst_218 : f32 to vector<8x128xf32>
    %321 = arith.addf %319, %320 : vector<8x128xf32>
    %322 = arith.mulf %321, %317 : vector<8x128xf32>
    %cst_219 = arith.constant 1.42141378 : f32
    %323 = vector.broadcast %cst_219 : f32 to vector<8x128xf32>
    %324 = arith.addf %322, %323 : vector<8x128xf32>
    %325 = arith.mulf %324, %317 : vector<8x128xf32>
    %cst_220 = arith.constant -0.284496725 : f32
    %326 = vector.broadcast %cst_220 : f32 to vector<8x128xf32>
    %327 = arith.addf %325, %326 : vector<8x128xf32>
    %328 = arith.mulf %327, %317 : vector<8x128xf32>
    %cst_221 = arith.constant 0.254829586 : f32
    %329 = vector.broadcast %cst_221 : f32 to vector<8x128xf32>
    %330 = arith.addf %328, %329 : vector<8x128xf32>
    %331 = arith.mulf %330, %317 : vector<8x128xf32>
    %cst_222 = arith.constant -5.000000e-01 : f32
    %332 = vector.broadcast %cst_222 : f32 to vector<8x128xf32>
    %333 = arith.mulf %332, %308 : vector<8x128xf32>
    %334 = arith.mulf %333, %308 : vector<8x128xf32>
    %335 = math.exp %334 : vector<8x128xf32>
    %336 = arith.mulf %331, %335 : vector<8x128xf32>
    %cst_223 = arith.constant 0.000000e+00 : f32
    %337 = vector.broadcast %cst_223 : f32 to vector<8x128xf32>
    %338 = arith.maximumf %308, %337 : vector<8x128xf32>
    %cst_224 = arith.constant 5.000000e-01 : f32
    %339 = vector.broadcast %cst_224 : f32 to vector<8x128xf32>
    %340 = arith.mulf %339, %309 : vector<8x128xf32>
    %341 = arith.mulf %340, %336 : vector<8x128xf32>
    %342 = arith.subf %338, %341 : vector<8x128xf32>
    %c62_225 = arith.constant 62 : index
    %c0_226 = arith.constant 0 : index
    %343 = vector.load %arg14[%c62_225, %c0_226] : memref<128x128xf32, #tpu.memory_space<vmem>>, vector<8x128xf32>
    tpu.vector_store %arg14[%c62_225, %c0_226], %342 {strides = array<i32>} : memref<128x128xf32, #tpu.memory_space<vmem>>, vector<8x128xf32>,
    %344 = vector.extract_strided_slice %148 {offsets = [61, 0], sizes = [8, 128], strides = [1, 1]} : vector<104x128xf32> to vector<8x128xf32>
    %c0_227 = arith.constant 0 : index
    %c0_228 = arith.constant 0 : index
    %345 = vector.load %arg6[%c0_227, %c0_228] : memref<1x128xf32, #tpu.memory_space<vmem>>, vector<1x128xf32>
    %346 = vector.broadcast %345 : vector<1x128xf32> to vector<8x128xf32>
    %347 = arith.addf %344, %346 : vector<8x128xf32>
    %348 = math.absf %347 : vector<8x128xf32>
    %cst_229 = arith.constant 0.707106769 : f32
    %349 = vector.broadcast %cst_229 : f32 to vector<8x128xf32>
    %350 = arith.mulf %348, %349 : vector<8x128xf32>
    %cst_230 = arith.constant 0.327591091 : f32
    %351 = vector.broadcast %cst_230 : f32 to vector<8x128xf32>
    %352 = arith.mulf %351, %350 : vector<8x128xf32>
    %cst_231 = arith.constant 1.000000e+00 : f32
    %353 = vector.broadcast %cst_231 : f32 to vector<8x128xf32>
    %354 = arith.addf %353, %352 : vector<8x128xf32>
    %cst_232 = arith.constant 1.000000e+00 : f32
    %355 = vector.broadcast %cst_232 : f32 to vector<8x128xf32>
    %356 = arith.divf %355, %354 : vector<8x128xf32>
    %cst_233 = arith.constant 1.06140542 : f32
    %357 = vector.broadcast %cst_233 : f32 to vector<8x128xf32>
    %358 = arith.mulf %357, %356 : vector<8x128xf32>
    %cst_234 = arith.constant -1.45315206 : f32
    %359 = vector.broadcast %cst_234 : f32 to vector<8x128xf32>
    %360 = arith.addf %358, %359 : vector<8x128xf32>
    %361 = arith.mulf %360, %356 : vector<8x128xf32>
    %cst_235 = arith.constant 1.42141378 : f32
    %362 = vector.broadcast %cst_235 : f32 to vector<8x128xf32>
    %363 = arith.addf %361, %362 : vector<8x128xf32>
    %364 = arith.mulf %363, %356 : vector<8x128xf32>
    %cst_236 = arith.constant -0.284496725 : f32
    %365 = vector.broadcast %cst_236 : f32 to vector<8x128xf32>
    %366 = arith.addf %364, %365 : vector<8x128xf32>
    %367 = arith.mulf %366, %356 : vector<8x128xf32>
    %cst_237 = arith.constant 0.254829586 : f32
    %368 = vector.broadcast %cst_237 : f32 to vector<8x128xf32>
    %369 = arith.addf %367, %368 : vector<8x128xf32>
    %370 = arith.mulf %369, %356 : vector<8x128xf32>
    %cst_238 = arith.constant -5.000000e-01 : f32
    %371 = vector.broadcast %cst_238 : f32 to vector<8x128xf32>
    %372 = arith.mulf %371, %347 : vector<8x128xf32>
    %373 = arith.mulf %372, %347 : vector<8x128xf32>
    %374 = math.exp %373 : vector<8x128xf32>
    %375 = arith.mulf %370, %374 : vector<8x128xf32>
    %cst_239 = arith.constant 0.000000e+00 : f32
    %376 = vector.broadcast %cst_239 : f32 to vector<8x128xf32>
    %377 = arith.maximumf %347, %376 : vector<8x128xf32>
    %cst_240 = arith.constant 5.000000e-01 : f32
    %378 = vector.broadcast %cst_240 : f32 to vector<8x128xf32>
    %379 = arith.mulf %378, %348 : vector<8x128xf32>
    %380 = arith.mulf %379, %375 : vector<8x128xf32>
    %381 = arith.subf %377, %380 : vector<8x128xf32>
    %c72_241 = arith.constant 72 : index
    %c0_242 = arith.constant 0 : index
    %382 = vector.load %arg14[%c72_241, %c0_242] : memref<128x128xf32, #tpu.memory_space<vmem>>, vector<8x128xf32>
    tpu.vector_store %arg14[%c72_241, %c0_242], %381 {strides = array<i32>} : memref<128x128xf32, #tpu.memory_space<vmem>>, vector<8x128xf32>,
    %383 = vector.extract_strided_slice %148 {offsets = [71, 0], sizes = [8, 128], strides = [1, 1]} : vector<104x128xf32> to vector<8x128xf32>
    %c0_243 = arith.constant 0 : index
    %c0_244 = arith.constant 0 : index
    %384 = vector.load %arg6[%c0_243, %c0_244] : memref<1x128xf32, #tpu.memory_space<vmem>>, vector<1x128xf32>
    %385 = vector.broadcast %384 : vector<1x128xf32> to vector<8x128xf32>
    %386 = arith.addf %383, %385 : vector<8x128xf32>
    %387 = math.absf %386 : vector<8x128xf32>
    %cst_245 = arith.constant 0.707106769 : f32
    %388 = vector.broadcast %cst_245 : f32 to vector<8x128xf32>
    %389 = arith.mulf %387, %388 : vector<8x128xf32>
    %cst_246 = arith.constant 0.327591091 : f32
    %390 = vector.broadcast %cst_246 : f32 to vector<8x128xf32>
    %391 = arith.mulf %390, %389 : vector<8x128xf32>
    %cst_247 = arith.constant 1.000000e+00 : f32
    %392 = vector.broadcast %cst_247 : f32 to vector<8x128xf32>
    %393 = arith.addf %392, %391 : vector<8x128xf32>
    %cst_248 = arith.constant 1.000000e+00 : f32
    %394 = vector.broadcast %cst_248 : f32 to vector<8x128xf32>
    %395 = arith.divf %394, %393 : vector<8x128xf32>
    %cst_249 = arith.constant 1.06140542 : f32
    %396 = vector.broadcast %cst_249 : f32 to vector<8x128xf32>
    %397 = arith.mulf %396, %395 : vector<8x128xf32>
    %cst_250 = arith.constant -1.45315206 : f32
    %398 = vector.broadcast %cst_250 : f32 to vector<8x128xf32>
    %399 = arith.addf %397, %398 : vector<8x128xf32>
    %400 = arith.mulf %399, %395 : vector<8x128xf32>
    %cst_251 = arith.constant 1.42141378 : f32
    %401 = vector.broadcast %cst_251 : f32 to vector<8x128xf32>
    %402 = arith.addf %400, %401 : vector<8x128xf32>
    %403 = arith.mulf %402, %395 : vector<8x128xf32>
    %cst_252 = arith.constant -0.284496725 : f32
    %404 = vector.broadcast %cst_252 : f32 to vector<8x128xf32>
    %405 = arith.addf %403, %404 : vector<8x128xf32>
    %406 = arith.mulf %405, %395 : vector<8x128xf32>
    %cst_253 = arith.constant 0.254829586 : f32
    %407 = vector.broadcast %cst_253 : f32 to vector<8x128xf32>
    %408 = arith.addf %406, %407 : vector<8x128xf32>
    %409 = arith.mulf %408, %395 : vector<8x128xf32>
    %cst_254 = arith.constant -5.000000e-01 : f32
    %410 = vector.broadcast %cst_254 : f32 to vector<8x128xf32>
    %411 = arith.mulf %410, %386 : vector<8x128xf32>
    %412 = arith.mulf %411, %386 : vector<8x128xf32>
    %413 = math.exp %412 : vector<8x128xf32>
    %414 = arith.mulf %409, %413 : vector<8x128xf32>
    %cst_255 = arith.constant 0.000000e+00 : f32
    %415 = vector.broadcast %cst_255 : f32 to vector<8x128xf32>
    %416 = arith.maximumf %386, %415 : vector<8x128xf32>
    %cst_256 = arith.constant 5.000000e-01 : f32
    %417 = vector.broadcast %cst_256 : f32 to vector<8x128xf32>
    %418 = arith.mulf %417, %387 : vector<8x128xf32>
    %419 = arith.mulf %418, %414 : vector<8x128xf32>
    %420 = arith.subf %416, %419 : vector<8x128xf32>
    %c82_257 = arith.constant 82 : index
    %c0_258 = arith.constant 0 : index
    %421 = vector.load %arg14[%c82_257, %c0_258] : memref<128x128xf32, #tpu.memory_space<vmem>>, vector<8x128xf32>
    tpu.vector_store %arg14[%c82_257, %c0_258], %420 {strides = array<i32>} : memref<128x128xf32, #tpu.memory_space<vmem>>, vector<8x128xf32>,
    %422 = vector.extract_strided_slice %148 {offsets = [81, 0], sizes = [8, 128], strides = [1, 1]} : vector<104x128xf32> to vector<8x128xf32>
    %c0_259 = arith.constant 0 : index
    %c0_260 = arith.constant 0 : index
    %423 = vector.load %arg6[%c0_259, %c0_260] : memref<1x128xf32, #tpu.memory_space<vmem>>, vector<1x128xf32>
    %424 = vector.broadcast %423 : vector<1x128xf32> to vector<8x128xf32>
    %425 = arith.addf %422, %424 : vector<8x128xf32>
    %426 = math.absf %425 : vector<8x128xf32>
    %cst_261 = arith.constant 0.707106769 : f32
    %427 = vector.broadcast %cst_261 : f32 to vector<8x128xf32>
    %428 = arith.mulf %426, %427 : vector<8x128xf32>
    %cst_262 = arith.constant 0.327591091 : f32
    %429 = vector.broadcast %cst_262 : f32 to vector<8x128xf32>
    %430 = arith.mulf %429, %428 : vector<8x128xf32>
    %cst_263 = arith.constant 1.000000e+00 : f32
    %431 = vector.broadcast %cst_263 : f32 to vector<8x128xf32>
    %432 = arith.addf %431, %430 : vector<8x128xf32>
    %cst_264 = arith.constant 1.000000e+00 : f32
    %433 = vector.broadcast %cst_264 : f32 to vector<8x128xf32>
    %434 = arith.divf %433, %432 : vector<8x128xf32>
    %cst_265 = arith.constant 1.06140542 : f32
    %435 = vector.broadcast %cst_265 : f32 to vector<8x128xf32>
    %436 = arith.mulf %435, %434 : vector<8x128xf32>
    %cst_266 = arith.constant -1.45315206 : f32
    %437 = vector.broadcast %cst_266 : f32 to vector<8x128xf32>
    %438 = arith.addf %436, %437 : vector<8x128xf32>
    %439 = arith.mulf %438, %434 : vector<8x128xf32>
    %cst_267 = arith.constant 1.42141378 : f32
    %440 = vector.broadcast %cst_267 : f32 to vector<8x128xf32>
    %441 = arith.addf %439, %440 : vector<8x128xf32>
    %442 = arith.mulf %441, %434 : vector<8x128xf32>
    %cst_268 = arith.constant -0.284496725 : f32
    %443 = vector.broadcast %cst_268 : f32 to vector<8x128xf32>
    %444 = arith.addf %442, %443 : vector<8x128xf32>
    %445 = arith.mulf %444, %434 : vector<8x128xf32>
    %cst_269 = arith.constant 0.254829586 : f32
    %446 = vector.broadcast %cst_269 : f32 to vector<8x128xf32>
    %447 = arith.addf %445, %446 : vector<8x128xf32>
    %448 = arith.mulf %447, %434 : vector<8x128xf32>
    %cst_270 = arith.constant -5.000000e-01 : f32
    %449 = vector.broadcast %cst_270 : f32 to vector<8x128xf32>
    %450 = arith.mulf %449, %425 : vector<8x128xf32>
    %451 = arith.mulf %450, %425 : vector<8x128xf32>
    %452 = math.exp %451 : vector<8x128xf32>
    %453 = arith.mulf %448, %452 : vector<8x128xf32>
    %cst_271 = arith.constant 0.000000e+00 : f32
    %454 = vector.broadcast %cst_271 : f32 to vector<8x128xf32>
    %455 = arith.maximumf %425, %454 : vector<8x128xf32>
    %cst_272 = arith.constant 5.000000e-01 : f32
    %456 = vector.broadcast %cst_272 : f32 to vector<8x128xf32>
    %457 = arith.mulf %456, %426 : vector<8x128xf32>
    %458 = arith.mulf %457, %453 : vector<8x128xf32>
    %459 = arith.subf %455, %458 : vector<8x128xf32>
    %c92_273 = arith.constant 92 : index
    %c0_274 = arith.constant 0 : index
    %460 = vector.load %arg14[%c92_273, %c0_274] : memref<128x128xf32, #tpu.memory_space<vmem>>, vector<8x128xf32>
    tpu.vector_store %arg14[%c92_273, %c0_274], %459 {strides = array<i32>} : memref<128x128xf32, #tpu.memory_space<vmem>>, vector<8x128xf32>,
    %cst_275 = arith.constant 0.000000e+00 : f32
    %461 = vector.broadcast %cst_275 : f32 to vector<104x128xf32>
    %c0_276 = arith.constant 0 : index
    %c0_277 = arith.constant 0 : index
    %462 = vector.load %arg14[%c0_276, %c0_277] : memref<128x128xf32, #tpu.memory_space<vmem>>, vector<104x128xf32>
    %c0_278 = arith.constant 0 : index
    %c0_279 = arith.constant 0 : index
    %c0_280 = arith.constant 0 : index
    %463 = vector.load %arg7[%c0_278, %c0_279, %c0_280] : memref<9x128x128xf32, #tpu.memory_space<vmem>>, vector<1x128x128xf32>
    %464 = vector.shape_cast %463 : vector<1x128x128xf32> to vector<128x128xf32>
    %cst_281 = arith.constant dense<0.000000e+00> : vector<104x128xf32>
    %465 = tpu.matmul %462, %464, %cst_281 {dimension_numbers = #tpu.dot_dimension_numbers<[1], [0], [0], [1], [0, 0, 1, 1], [], []>} : vector<104x128xf32>, vector<128x128xf32>, vector<104x128xf32> -> vector<104x128xf32>
    %466 = arith.addf %461, %465 : vector<104x128xf32>
    %c1_282 = arith.constant 1 : index
    %c0_283 = arith.constant 0 : index
    %467 = vector.load %arg14[%c1_282, %c0_283] : memref<128x128xf32, #tpu.memory_space<vmem>>, vector<104x128xf32>
    %c1_284 = arith.constant 1 : index
    %c0_285 = arith.constant 0 : index
    %c0_286 = arith.constant 0 : index
    %468 = vector.load %arg7[%c1_284, %c0_285, %c0_286] : memref<9x128x128xf32, #tpu.memory_space<vmem>>, vector<1x128x128xf32>
    %469 = vector.shape_cast %468 : vector<1x128x128xf32> to vector<128x128xf32>
    %cst_287 = arith.constant dense<0.000000e+00> : vector<104x128xf32>
    %470 = tpu.matmul %467, %469, %cst_287 {dimension_numbers = #tpu.dot_dimension_numbers<[1], [0], [0], [1], [0, 0, 1, 1], [], []>} : vector<104x128xf32>, vector<128x128xf32>, vector<104x128xf32> -> vector<104x128xf32>
    %471 = arith.addf %466, %470 : vector<104x128xf32>
    %c2_288 = arith.constant 2 : index
    %c0_289 = arith.constant 0 : index
    %472 = vector.load %arg14[%c2_288, %c0_289] : memref<128x128xf32, #tpu.memory_space<vmem>>, vector<104x128xf32>
    %c2_290 = arith.constant 2 : index
    %c0_291 = arith.constant 0 : index
    %c0_292 = arith.constant 0 : index
    %473 = vector.load %arg7[%c2_290, %c0_291, %c0_292] : memref<9x128x128xf32, #tpu.memory_space<vmem>>, vector<1x128x128xf32>
    %474 = vector.shape_cast %473 : vector<1x128x128xf32> to vector<128x128xf32>
    %cst_293 = arith.constant dense<0.000000e+00> : vector<104x128xf32>
    %475 = tpu.matmul %472, %474, %cst_293 {dimension_numbers = #tpu.dot_dimension_numbers<[1], [0], [0], [1], [0, 0, 1, 1], [], []>} : vector<104x128xf32>, vector<128x128xf32>, vector<104x128xf32> -> vector<104x128xf32>
    %476 = arith.addf %471, %475 : vector<104x128xf32>
    %c10_294 = arith.constant 10 : index
    %c0_295 = arith.constant 0 : index
    %477 = vector.load %arg14[%c10_294, %c0_295] : memref<128x128xf32, #tpu.memory_space<vmem>>, vector<104x128xf32>
    %c3_296 = arith.constant 3 : index
    %c0_297 = arith.constant 0 : index
    %c0_298 = arith.constant 0 : index
    %478 = vector.load %arg7[%c3_296, %c0_297, %c0_298] : memref<9x128x128xf32, #tpu.memory_space<vmem>>, vector<1x128x128xf32>
    %479 = vector.shape_cast %478 : vector<1x128x128xf32> to vector<128x128xf32>
    %cst_299 = arith.constant dense<0.000000e+00> : vector<104x128xf32>
    %480 = tpu.matmul %477, %479, %cst_299 {dimension_numbers = #tpu.dot_dimension_numbers<[1], [0], [0], [1], [0, 0, 1, 1], [], []>} : vector<104x128xf32>, vector<128x128xf32>, vector<104x128xf32> -> vector<104x128xf32>
    %481 = arith.addf %476, %480 : vector<104x128xf32>
    %c11_300 = arith.constant 11 : index
    %c0_301 = arith.constant 0 : index
    %482 = vector.load %arg14[%c11_300, %c0_301] : memref<128x128xf32, #tpu.memory_space<vmem>>, vector<104x128xf32>
    %c4_302 = arith.constant 4 : index
    %c0_303 = arith.constant 0 : index
    %c0_304 = arith.constant 0 : index
    %483 = vector.load %arg7[%c4_302, %c0_303, %c0_304] : memref<9x128x128xf32, #tpu.memory_space<vmem>>, vector<1x128x128xf32>
    %484 = vector.shape_cast %483 : vector<1x128x128xf32> to vector<128x128xf32>
    %cst_305 = arith.constant dense<0.000000e+00> : vector<104x128xf32>
    %485 = tpu.matmul %482, %484, %cst_305 {dimension_numbers = #tpu.dot_dimension_numbers<[1], [0], [0], [1], [0, 0, 1, 1], [], []>} : vector<104x128xf32>, vector<128x128xf32>, vector<104x128xf32> -> vector<104x128xf32>
    %486 = arith.addf %481, %485 : vector<104x128xf32>
    %c12_306 = arith.constant 12 : index
    %c0_307 = arith.constant 0 : index
    %487 = vector.load %arg14[%c12_306, %c0_307] : memref<128x128xf32, #tpu.memory_space<vmem>>, vector<104x128xf32>
    %c5_308 = arith.constant 5 : index
    %c0_309 = arith.constant 0 : index
    %c0_310 = arith.constant 0 : index
    %488 = vector.load %arg7[%c5_308, %c0_309, %c0_310] : memref<9x128x128xf32, #tpu.memory_space<vmem>>, vector<1x128x128xf32>
    %489 = vector.shape_cast %488 : vector<1x128x128xf32> to vector<128x128xf32>
    %cst_311 = arith.constant dense<0.000000e+00> : vector<104x128xf32>
    %490 = tpu.matmul %487, %489, %cst_311 {dimension_numbers = #tpu.dot_dimension_numbers<[1], [0], [0], [1], [0, 0, 1, 1], [], []>} : vector<104x128xf32>, vector<128x128xf32>, vector<104x128xf32> -> vector<104x128xf32>
    %491 = arith.addf %486, %490 : vector<104x128xf32>
    %c20_312 = arith.constant 20 : index
    %c0_313 = arith.constant 0 : index
    %492 = vector.load %arg14[%c20_312, %c0_313] : memref<128x128xf32, #tpu.memory_space<vmem>>, vector<104x128xf32>
    %c6_314 = arith.constant 6 : index
    %c0_315 = arith.constant 0 : index
    %c0_316 = arith.constant 0 : index
    %493 = vector.load %arg7[%c6_314, %c0_315, %c0_316] : memref<9x128x128xf32, #tpu.memory_space<vmem>>, vector<1x128x128xf32>
    %494 = vector.shape_cast %493 : vector<1x128x128xf32> to vector<128x128xf32>
    %cst_317 = arith.constant dense<0.000000e+00> : vector<104x128xf32>
    %495 = tpu.matmul %492, %494, %cst_317 {dimension_numbers = #tpu.dot_dimension_numbers<[1], [0], [0], [1], [0, 0, 1, 1], [], []>} : vector<104x128xf32>, vector<128x128xf32>, vector<104x128xf32> -> vector<104x128xf32>
    %496 = arith.addf %491, %495 : vector<104x128xf32>
    %c21_318 = arith.constant 21 : index
    %c0_319 = arith.constant 0 : index
    %497 = vector.load %arg14[%c21_318, %c0_319] : memref<128x128xf32, #tpu.memory_space<vmem>>, vector<104x128xf32>
    %c7_320 = arith.constant 7 : index
    %c0_321 = arith.constant 0 : index
    %c0_322 = arith.constant 0 : index
    %498 = vector.load %arg7[%c7_320, %c0_321, %c0_322] : memref<9x128x128xf32, #tpu.memory_space<vmem>>, vector<1x128x128xf32>
    %499 = vector.shape_cast %498 : vector<1x128x128xf32> to vector<128x128xf32>
    %cst_323 = arith.constant dense<0.000000e+00> : vector<104x128xf32>
    %500 = tpu.matmul %497, %499, %cst_323 {dimension_numbers = #tpu.dot_dimension_numbers<[1], [0], [0], [1], [0, 0, 1, 1], [], []>} : vector<104x128xf32>, vector<128x128xf32>, vector<104x128xf32> -> vector<104x128xf32>
    %501 = arith.addf %496, %500 : vector<104x128xf32>
    %c22_324 = arith.constant 22 : index
    %c0_325 = arith.constant 0 : index
    %502 = vector.load %arg14[%c22_324, %c0_325] : memref<128x128xf32, #tpu.memory_space<vmem>>, vector<104x128xf32>
    %c8_326 = arith.constant 8 : index
    %c0_327 = arith.constant 0 : index
    %c0_328 = arith.constant 0 : index
    %503 = vector.load %arg7[%c8_326, %c0_327, %c0_328] : memref<9x128x128xf32, #tpu.memory_space<vmem>>, vector<1x128x128xf32>
    %504 = vector.shape_cast %503 : vector<1x128x128xf32> to vector<128x128xf32>
    %cst_329 = arith.constant dense<0.000000e+00> : vector<104x128xf32>
    %505 = tpu.matmul %502, %504, %cst_329 {dimension_numbers = #tpu.dot_dimension_numbers<[1], [0], [0], [1], [0, 0, 1, 1], [], []>} : vector<104x128xf32>, vector<128x128xf32>, vector<104x128xf32> -> vector<104x128xf32>
    %506 = arith.addf %501, %505 : vector<104x128xf32>
    %507 = vector.extract_strided_slice %506 {offsets = [11, 0], sizes = [8, 128], strides = [1, 1]} : vector<104x128xf32> to vector<8x128xf32>
    %c0_330 = arith.constant 0 : index
    %c0_331 = arith.constant 0 : index
    %508 = vector.load %arg8[%c0_330, %c0_331] : memref<1x128xf32, #tpu.memory_space<vmem>>, vector<1x128xf32>
    %509 = vector.broadcast %508 : vector<1x128xf32> to vector<8x128xf32>
    %510 = arith.addf %507, %509 : vector<8x128xf32>
    %511 = math.absf %510 : vector<8x128xf32>
    %cst_332 = arith.constant 0.707106769 : f32
    %512 = vector.broadcast %cst_332 : f32 to vector<8x128xf32>
    %513 = arith.mulf %511, %512 : vector<8x128xf32>
    %cst_333 = arith.constant 0.327591091 : f32
    %514 = vector.broadcast %cst_333 : f32 to vector<8x128xf32>
    %515 = arith.mulf %514, %513 : vector<8x128xf32>
    %cst_334 = arith.constant 1.000000e+00 : f32
    %516 = vector.broadcast %cst_334 : f32 to vector<8x128xf32>
    %517 = arith.addf %516, %515 : vector<8x128xf32>
    %cst_335 = arith.constant 1.000000e+00 : f32
    %518 = vector.broadcast %cst_335 : f32 to vector<8x128xf32>
    %519 = arith.divf %518, %517 : vector<8x128xf32>
    %cst_336 = arith.constant 1.06140542 : f32
    %520 = vector.broadcast %cst_336 : f32 to vector<8x128xf32>
    %521 = arith.mulf %520, %519 : vector<8x128xf32>
    %cst_337 = arith.constant -1.45315206 : f32
    %522 = vector.broadcast %cst_337 : f32 to vector<8x128xf32>
    %523 = arith.addf %521, %522 : vector<8x128xf32>
    %524 = arith.mulf %523, %519 : vector<8x128xf32>
    %cst_338 = arith.constant 1.42141378 : f32
    %525 = vector.broadcast %cst_338 : f32 to vector<8x128xf32>
    %526 = arith.addf %524, %525 : vector<8x128xf32>
    %527 = arith.mulf %526, %519 : vector<8x128xf32>
    %cst_339 = arith.constant -0.284496725 : f32
    %528 = vector.broadcast %cst_339 : f32 to vector<8x128xf32>
    %529 = arith.addf %527, %528 : vector<8x128xf32>
    %530 = arith.mulf %529, %519 : vector<8x128xf32>
    %cst_340 = arith.constant 0.254829586 : f32
    %531 = vector.broadcast %cst_340 : f32 to vector<8x128xf32>
    %532 = arith.addf %530, %531 : vector<8x128xf32>
    %533 = arith.mulf %532, %519 : vector<8x128xf32>
    %cst_341 = arith.constant -5.000000e-01 : f32
    %534 = vector.broadcast %cst_341 : f32 to vector<8x128xf32>
    %535 = arith.mulf %534, %510 : vector<8x128xf32>
    %536 = arith.mulf %535, %510 : vector<8x128xf32>
    %537 = math.exp %536 : vector<8x128xf32>
    %538 = arith.mulf %533, %537 : vector<8x128xf32>
    %cst_342 = arith.constant 0.000000e+00 : f32
    %539 = vector.broadcast %cst_342 : f32 to vector<8x128xf32>
    %540 = arith.maximumf %510, %539 : vector<8x128xf32>
    %cst_343 = arith.constant 5.000000e-01 : f32
    %541 = vector.broadcast %cst_343 : f32 to vector<8x128xf32>
    %542 = arith.mulf %541, %511 : vector<8x128xf32>
    %543 = arith.mulf %542, %538 : vector<8x128xf32>
    %544 = arith.subf %540, %543 : vector<8x128xf32>
    %c0_344 = arith.constant 0 : index
    %c0_345 = arith.constant 0 : index
    %c0_346 = arith.constant 0 : index
    %545 = vector.load %arg12[%c0_344, %c0_345, %c0_346] : memref<1x64x128xf32, #tpu.memory_space<vmem>>, vector<1x8x128xf32>
    %546 = vector.shape_cast %545 : vector<1x8x128xf32> to vector<8x128xf32>
    %547 = vector.shape_cast %544 : vector<8x128xf32> to vector<1x8x128xf32>
    tpu.vector_store %arg12[%c0_344, %c0_345, %c0_346], %547 {strides = array<i32>} : memref<1x64x128xf32, #tpu.memory_space<vmem>>, vector<1x8x128xf32>,
    %548 = vector.extract_strided_slice %506 {offsets = [21, 0], sizes = [8, 128], strides = [1, 1]} : vector<104x128xf32> to vector<8x128xf32>
    %c0_347 = arith.constant 0 : index
    %c0_348 = arith.constant 0 : index
    %549 = vector.load %arg8[%c0_347, %c0_348] : memref<1x128xf32, #tpu.memory_space<vmem>>, vector<1x128xf32>
    %550 = vector.broadcast %549 : vector<1x128xf32> to vector<8x128xf32>
    %551 = arith.addf %548, %550 : vector<8x128xf32>
    %552 = math.absf %551 : vector<8x128xf32>
    %cst_349 = arith.constant 0.707106769 : f32
    %553 = vector.broadcast %cst_349 : f32 to vector<8x128xf32>
    %554 = arith.mulf %552, %553 : vector<8x128xf32>
    %cst_350 = arith.constant 0.327591091 : f32
    %555 = vector.broadcast %cst_350 : f32 to vector<8x128xf32>
    %556 = arith.mulf %555, %554 : vector<8x128xf32>
    %cst_351 = arith.constant 1.000000e+00 : f32
    %557 = vector.broadcast %cst_351 : f32 to vector<8x128xf32>
    %558 = arith.addf %557, %556 : vector<8x128xf32>
    %cst_352 = arith.constant 1.000000e+00 : f32
    %559 = vector.broadcast %cst_352 : f32 to vector<8x128xf32>
    %560 = arith.divf %559, %558 : vector<8x128xf32>
    %cst_353 = arith.constant 1.06140542 : f32
    %561 = vector.broadcast %cst_353 : f32 to vector<8x128xf32>
    %562 = arith.mulf %561, %560 : vector<8x128xf32>
    %cst_354 = arith.constant -1.45315206 : f32
    %563 = vector.broadcast %cst_354 : f32 to vector<8x128xf32>
    %564 = arith.addf %562, %563 : vector<8x128xf32>
    %565 = arith.mulf %564, %560 : vector<8x128xf32>
    %cst_355 = arith.constant 1.42141378 : f32
    %566 = vector.broadcast %cst_355 : f32 to vector<8x128xf32>
    %567 = arith.addf %565, %566 : vector<8x128xf32>
    %568 = arith.mulf %567, %560 : vector<8x128xf32>
    %cst_356 = arith.constant -0.284496725 : f32
    %569 = vector.broadcast %cst_356 : f32 to vector<8x128xf32>
    %570 = arith.addf %568, %569 : vector<8x128xf32>
    %571 = arith.mulf %570, %560 : vector<8x128xf32>
    %cst_357 = arith.constant 0.254829586 : f32
    %572 = vector.broadcast %cst_357 : f32 to vector<8x128xf32>
    %573 = arith.addf %571, %572 : vector<8x128xf32>
    %574 = arith.mulf %573, %560 : vector<8x128xf32>
    %cst_358 = arith.constant -5.000000e-01 : f32
    %575 = vector.broadcast %cst_358 : f32 to vector<8x128xf32>
    %576 = arith.mulf %575, %551 : vector<8x128xf32>
    %577 = arith.mulf %576, %551 : vector<8x128xf32>
    %578 = math.exp %577 : vector<8x128xf32>
    %579 = arith.mulf %574, %578 : vector<8x128xf32>
    %cst_359 = arith.constant 0.000000e+00 : f32
    %580 = vector.broadcast %cst_359 : f32 to vector<8x128xf32>
    %581 = arith.maximumf %551, %580 : vector<8x128xf32>
    %cst_360 = arith.constant 5.000000e-01 : f32
    %582 = vector.broadcast %cst_360 : f32 to vector<8x128xf32>
    %583 = arith.mulf %582, %552 : vector<8x128xf32>
    %584 = arith.mulf %583, %579 : vector<8x128xf32>
    %585 = arith.subf %581, %584 : vector<8x128xf32>
    %c0_361 = arith.constant 0 : index
    %c8_362 = arith.constant 8 : index
    %c0_363 = arith.constant 0 : index
    %586 = vector.load %arg12[%c0_361, %c8_362, %c0_363] : memref<1x64x128xf32, #tpu.memory_space<vmem>>, vector<1x8x128xf32>
    %587 = vector.shape_cast %586 : vector<1x8x128xf32> to vector<8x128xf32>
    %588 = vector.shape_cast %585 : vector<8x128xf32> to vector<1x8x128xf32>
    tpu.vector_store %arg12[%c0_361, %c8_362, %c0_363], %588 {strides = array<i32>} : memref<1x64x128xf32, #tpu.memory_space<vmem>>, vector<1x8x128xf32>,
    %589 = vector.extract_strided_slice %506 {offsets = [31, 0], sizes = [8, 128], strides = [1, 1]} : vector<104x128xf32> to vector<8x128xf32>
    %c0_364 = arith.constant 0 : index
    %c0_365 = arith.constant 0 : index
    %590 = vector.load %arg8[%c0_364, %c0_365] : memref<1x128xf32, #tpu.memory_space<vmem>>, vector<1x128xf32>
    %591 = vector.broadcast %590 : vector<1x128xf32> to vector<8x128xf32>
    %592 = arith.addf %589, %591 : vector<8x128xf32>
    %593 = math.absf %592 : vector<8x128xf32>
    %cst_366 = arith.constant 0.707106769 : f32
    %594 = vector.broadcast %cst_366 : f32 to vector<8x128xf32>
    %595 = arith.mulf %593, %594 : vector<8x128xf32>
    %cst_367 = arith.constant 0.327591091 : f32
    %596 = vector.broadcast %cst_367 : f32 to vector<8x128xf32>
    %597 = arith.mulf %596, %595 : vector<8x128xf32>
    %cst_368 = arith.constant 1.000000e+00 : f32
    %598 = vector.broadcast %cst_368 : f32 to vector<8x128xf32>
    %599 = arith.addf %598, %597 : vector<8x128xf32>
    %cst_369 = arith.constant 1.000000e+00 : f32
    %600 = vector.broadcast %cst_369 : f32 to vector<8x128xf32>
    %601 = arith.divf %600, %599 : vector<8x128xf32>
    %cst_370 = arith.constant 1.06140542 : f32
    %602 = vector.broadcast %cst_370 : f32 to vector<8x128xf32>
    %603 = arith.mulf %602, %601 : vector<8x128xf32>
    %cst_371 = arith.constant -1.45315206 : f32
    %604 = vector.broadcast %cst_371 : f32 to vector<8x128xf32>
    %605 = arith.addf %603, %604 : vector<8x128xf32>
    %606 = arith.mulf %605, %601 : vector<8x128xf32>
    %cst_372 = arith.constant 1.42141378 : f32
    %607 = vector.broadcast %cst_372 : f32 to vector<8x128xf32>
    %608 = arith.addf %606, %607 : vector<8x128xf32>
    %609 = arith.mulf %608, %601 : vector<8x128xf32>
    %cst_373 = arith.constant -0.284496725 : f32
    %610 = vector.broadcast %cst_373 : f32 to vector<8x128xf32>
    %611 = arith.addf %609, %610 : vector<8x128xf32>
    %612 = arith.mulf %611, %601 : vector<8x128xf32>
    %cst_374 = arith.constant 0.254829586 : f32
    %613 = vector.broadcast %cst_374 : f32 to vector<8x128xf32>
    %614 = arith.addf %612, %613 : vector<8x128xf32>
    %615 = arith.mulf %614, %601 : vector<8x128xf32>
    %cst_375 = arith.constant -5.000000e-01 : f32
    %616 = vector.broadcast %cst_375 : f32 to vector<8x128xf32>
    %617 = arith.mulf %616, %592 : vector<8x128xf32>
    %618 = arith.mulf %617, %592 : vector<8x128xf32>
    %619 = math.exp %618 : vector<8x128xf32>
    %620 = arith.mulf %615, %619 : vector<8x128xf32>
    %cst_376 = arith.constant 0.000000e+00 : f32
    %621 = vector.broadcast %cst_376 : f32 to vector<8x128xf32>
    %622 = arith.maximumf %592, %621 : vector<8x128xf32>
    %cst_377 = arith.constant 5.000000e-01 : f32
    %623 = vector.broadcast %cst_377 : f32 to vector<8x128xf32>
    %624 = arith.mulf %623, %593 : vector<8x128xf32>
    %625 = arith.mulf %624, %620 : vector<8x128xf32>
    %626 = arith.subf %622, %625 : vector<8x128xf32>
    %c0_378 = arith.constant 0 : index
    %c16 = arith.constant 16 : index
    %c0_379 = arith.constant 0 : index
    %627 = vector.load %arg12[%c0_378, %c16, %c0_379] : memref<1x64x128xf32, #tpu.memory_space<vmem>>, vector<1x8x128xf32>
    %628 = vector.shape_cast %627 : vector<1x8x128xf32> to vector<8x128xf32>
    %629 = vector.shape_cast %626 : vector<8x128xf32> to vector<1x8x128xf32>
    tpu.vector_store %arg12[%c0_378, %c16, %c0_379], %629 {strides = array<i32>} : memref<1x64x128xf32, #tpu.memory_space<vmem>>, vector<1x8x128xf32>,
    %630 = vector.extract_strided_slice %506 {offsets = [41, 0], sizes = [8, 128], strides = [1, 1]} : vector<104x128xf32> to vector<8x128xf32>
    %c0_380 = arith.constant 0 : index
    %c0_381 = arith.constant 0 : index
    %631 = vector.load %arg8[%c0_380, %c0_381] : memref<1x128xf32, #tpu.memory_space<vmem>>, vector<1x128xf32>
    %632 = vector.broadcast %631 : vector<1x128xf32> to vector<8x128xf32>
    %633 = arith.addf %630, %632 : vector<8x128xf32>
    %634 = math.absf %633 : vector<8x128xf32>
    %cst_382 = arith.constant 0.707106769 : f32
    %635 = vector.broadcast %cst_382 : f32 to vector<8x128xf32>
    %636 = arith.mulf %634, %635 : vector<8x128xf32>
    %cst_383 = arith.constant 0.327591091 : f32
    %637 = vector.broadcast %cst_383 : f32 to vector<8x128xf32>
    %638 = arith.mulf %637, %636 : vector<8x128xf32>
    %cst_384 = arith.constant 1.000000e+00 : f32
    %639 = vector.broadcast %cst_384 : f32 to vector<8x128xf32>
    %640 = arith.addf %639, %638 : vector<8x128xf32>
    %cst_385 = arith.constant 1.000000e+00 : f32
    %641 = vector.broadcast %cst_385 : f32 to vector<8x128xf32>
    %642 = arith.divf %641, %640 : vector<8x128xf32>
    %cst_386 = arith.constant 1.06140542 : f32
    %643 = vector.broadcast %cst_386 : f32 to vector<8x128xf32>
    %644 = arith.mulf %643, %642 : vector<8x128xf32>
    %cst_387 = arith.constant -1.45315206 : f32
    %645 = vector.broadcast %cst_387 : f32 to vector<8x128xf32>
    %646 = arith.addf %644, %645 : vector<8x128xf32>
    %647 = arith.mulf %646, %642 : vector<8x128xf32>
    %cst_388 = arith.constant 1.42141378 : f32
    %648 = vector.broadcast %cst_388 : f32 to vector<8x128xf32>
    %649 = arith.addf %647, %648 : vector<8x128xf32>
    %650 = arith.mulf %649, %642 : vector<8x128xf32>
    %cst_389 = arith.constant -0.284496725 : f32
    %651 = vector.broadcast %cst_389 : f32 to vector<8x128xf32>
    %652 = arith.addf %650, %651 : vector<8x128xf32>
    %653 = arith.mulf %652, %642 : vector<8x128xf32>
    %cst_390 = arith.constant 0.254829586 : f32
    %654 = vector.broadcast %cst_390 : f32 to vector<8x128xf32>
    %655 = arith.addf %653, %654 : vector<8x128xf32>
    %656 = arith.mulf %655, %642 : vector<8x128xf32>
    %cst_391 = arith.constant -5.000000e-01 : f32
    %657 = vector.broadcast %cst_391 : f32 to vector<8x128xf32>
    %658 = arith.mulf %657, %633 : vector<8x128xf32>
    %659 = arith.mulf %658, %633 : vector<8x128xf32>
    %660 = math.exp %659 : vector<8x128xf32>
    %661 = arith.mulf %656, %660 : vector<8x128xf32>
    %cst_392 = arith.constant 0.000000e+00 : f32
    %662 = vector.broadcast %cst_392 : f32 to vector<8x128xf32>
    %663 = arith.maximumf %633, %662 : vector<8x128xf32>
    %cst_393 = arith.constant 5.000000e-01 : f32
    %664 = vector.broadcast %cst_393 : f32 to vector<8x128xf32>
    %665 = arith.mulf %664, %634 : vector<8x128xf32>
    %666 = arith.mulf %665, %661 : vector<8x128xf32>
    %667 = arith.subf %663, %666 : vector<8x128xf32>
    %c0_394 = arith.constant 0 : index
    %c24 = arith.constant 24 : index
    %c0_395 = arith.constant 0 : index
    %668 = vector.load %arg12[%c0_394, %c24, %c0_395] : memref<1x64x128xf32, #tpu.memory_space<vmem>>, vector<1x8x128xf32>
    %669 = vector.shape_cast %668 : vector<1x8x128xf32> to vector<8x128xf32>
    %670 = vector.shape_cast %667 : vector<8x128xf32> to vector<1x8x128xf32>
    tpu.vector_store %arg12[%c0_394, %c24, %c0_395], %670 {strides = array<i32>} : memref<1x64x128xf32, #tpu.memory_space<vmem>>, vector<1x8x128xf32>,
    %671 = vector.extract_strided_slice %506 {offsets = [51, 0], sizes = [8, 128], strides = [1, 1]} : vector<104x128xf32> to vector<8x128xf32>
    %c0_396 = arith.constant 0 : index
    %c0_397 = arith.constant 0 : index
    %672 = vector.load %arg8[%c0_396, %c0_397] : memref<1x128xf32, #tpu.memory_space<vmem>>, vector<1x128xf32>
    %673 = vector.broadcast %672 : vector<1x128xf32> to vector<8x128xf32>
    %674 = arith.addf %671, %673 : vector<8x128xf32>
    %675 = math.absf %674 : vector<8x128xf32>
    %cst_398 = arith.constant 0.707106769 : f32
    %676 = vector.broadcast %cst_398 : f32 to vector<8x128xf32>
    %677 = arith.mulf %675, %676 : vector<8x128xf32>
    %cst_399 = arith.constant 0.327591091 : f32
    %678 = vector.broadcast %cst_399 : f32 to vector<8x128xf32>
    %679 = arith.mulf %678, %677 : vector<8x128xf32>
    %cst_400 = arith.constant 1.000000e+00 : f32
    %680 = vector.broadcast %cst_400 : f32 to vector<8x128xf32>
    %681 = arith.addf %680, %679 : vector<8x128xf32>
    %cst_401 = arith.constant 1.000000e+00 : f32
    %682 = vector.broadcast %cst_401 : f32 to vector<8x128xf32>
    %683 = arith.divf %682, %681 : vector<8x128xf32>
    %cst_402 = arith.constant 1.06140542 : f32
    %684 = vector.broadcast %cst_402 : f32 to vector<8x128xf32>
    %685 = arith.mulf %684, %683 : vector<8x128xf32>
    %cst_403 = arith.constant -1.45315206 : f32
    %686 = vector.broadcast %cst_403 : f32 to vector<8x128xf32>
    %687 = arith.addf %685, %686 : vector<8x128xf32>
    %688 = arith.mulf %687, %683 : vector<8x128xf32>
    %cst_404 = arith.constant 1.42141378 : f32
    %689 = vector.broadcast %cst_404 : f32 to vector<8x128xf32>
    %690 = arith.addf %688, %689 : vector<8x128xf32>
    %691 = arith.mulf %690, %683 : vector<8x128xf32>
    %cst_405 = arith.constant -0.284496725 : f32
    %692 = vector.broadcast %cst_405 : f32 to vector<8x128xf32>
    %693 = arith.addf %691, %692 : vector<8x128xf32>
    %694 = arith.mulf %693, %683 : vector<8x128xf32>
    %cst_406 = arith.constant 0.254829586 : f32
    %695 = vector.broadcast %cst_406 : f32 to vector<8x128xf32>
    %696 = arith.addf %694, %695 : vector<8x128xf32>
    %697 = arith.mulf %696, %683 : vector<8x128xf32>
    %cst_407 = arith.constant -5.000000e-01 : f32
    %698 = vector.broadcast %cst_407 : f32 to vector<8x128xf32>
    %699 = arith.mulf %698, %674 : vector<8x128xf32>
    %700 = arith.mulf %699, %674 : vector<8x128xf32>
    %701 = math.exp %700 : vector<8x128xf32>
    %702 = arith.mulf %697, %701 : vector<8x128xf32>
    %cst_408 = arith.constant 0.000000e+00 : f32
    %703 = vector.broadcast %cst_408 : f32 to vector<8x128xf32>
    %704 = arith.maximumf %674, %703 : vector<8x128xf32>
    %cst_409 = arith.constant 5.000000e-01 : f32
    %705 = vector.broadcast %cst_409 : f32 to vector<8x128xf32>
    %706 = arith.mulf %705, %675 : vector<8x128xf32>
    %707 = arith.mulf %706, %702 : vector<8x128xf32>
    %708 = arith.subf %704, %707 : vector<8x128xf32>
    %c0_410 = arith.constant 0 : index
    %c32_411 = arith.constant 32 : index
    %c0_412 = arith.constant 0 : index
    %709 = vector.load %arg12[%c0_410, %c32_411, %c0_412] : memref<1x64x128xf32, #tpu.memory_space<vmem>>, vector<1x8x128xf32>
    %710 = vector.shape_cast %709 : vector<1x8x128xf32> to vector<8x128xf32>
    %711 = vector.shape_cast %708 : vector<8x128xf32> to vector<1x8x128xf32>
    tpu.vector_store %arg12[%c0_410, %c32_411, %c0_412], %711 {strides = array<i32>} : memref<1x64x128xf32, #tpu.memory_space<vmem>>, vector<1x8x128xf32>,
    %712 = vector.extract_strided_slice %506 {offsets = [61, 0], sizes = [8, 128], strides = [1, 1]} : vector<104x128xf32> to vector<8x128xf32>
    %c0_413 = arith.constant 0 : index
    %c0_414 = arith.constant 0 : index
    %713 = vector.load %arg8[%c0_413, %c0_414] : memref<1x128xf32, #tpu.memory_space<vmem>>, vector<1x128xf32>
    %714 = vector.broadcast %713 : vector<1x128xf32> to vector<8x128xf32>
    %715 = arith.addf %712, %714 : vector<8x128xf32>
    %716 = math.absf %715 : vector<8x128xf32>
    %cst_415 = arith.constant 0.707106769 : f32
    %717 = vector.broadcast %cst_415 : f32 to vector<8x128xf32>
    %718 = arith.mulf %716, %717 : vector<8x128xf32>
    %cst_416 = arith.constant 0.327591091 : f32
    %719 = vector.broadcast %cst_416 : f32 to vector<8x128xf32>
    %720 = arith.mulf %719, %718 : vector<8x128xf32>
    %cst_417 = arith.constant 1.000000e+00 : f32
    %721 = vector.broadcast %cst_417 : f32 to vector<8x128xf32>
    %722 = arith.addf %721, %720 : vector<8x128xf32>
    %cst_418 = arith.constant 1.000000e+00 : f32
    %723 = vector.broadcast %cst_418 : f32 to vector<8x128xf32>
    %724 = arith.divf %723, %722 : vector<8x128xf32>
    %cst_419 = arith.constant 1.06140542 : f32
    %725 = vector.broadcast %cst_419 : f32 to vector<8x128xf32>
    %726 = arith.mulf %725, %724 : vector<8x128xf32>
    %cst_420 = arith.constant -1.45315206 : f32
    %727 = vector.broadcast %cst_420 : f32 to vector<8x128xf32>
    %728 = arith.addf %726, %727 : vector<8x128xf32>
    %729 = arith.mulf %728, %724 : vector<8x128xf32>
    %cst_421 = arith.constant 1.42141378 : f32
    %730 = vector.broadcast %cst_421 : f32 to vector<8x128xf32>
    %731 = arith.addf %729, %730 : vector<8x128xf32>
    %732 = arith.mulf %731, %724 : vector<8x128xf32>
    %cst_422 = arith.constant -0.284496725 : f32
    %733 = vector.broadcast %cst_422 : f32 to vector<8x128xf32>
    %734 = arith.addf %732, %733 : vector<8x128xf32>
    %735 = arith.mulf %734, %724 : vector<8x128xf32>
    %cst_423 = arith.constant 0.254829586 : f32
    %736 = vector.broadcast %cst_423 : f32 to vector<8x128xf32>
    %737 = arith.addf %735, %736 : vector<8x128xf32>
    %738 = arith.mulf %737, %724 : vector<8x128xf32>
    %cst_424 = arith.constant -5.000000e-01 : f32
    %739 = vector.broadcast %cst_424 : f32 to vector<8x128xf32>
    %740 = arith.mulf %739, %715 : vector<8x128xf32>
    %741 = arith.mulf %740, %715 : vector<8x128xf32>
    %742 = math.exp %741 : vector<8x128xf32>
    %743 = arith.mulf %738, %742 : vector<8x128xf32>
    %cst_425 = arith.constant 0.000000e+00 : f32
    %744 = vector.broadcast %cst_425 : f32 to vector<8x128xf32>
    %745 = arith.maximumf %715, %744 : vector<8x128xf32>
    %cst_426 = arith.constant 5.000000e-01 : f32
    %746 = vector.broadcast %cst_426 : f32 to vector<8x128xf32>
    %747 = arith.mulf %746, %716 : vector<8x128xf32>
    %748 = arith.mulf %747, %743 : vector<8x128xf32>
    %749 = arith.subf %745, %748 : vector<8x128xf32>
    %c0_427 = arith.constant 0 : index
    %c40_428 = arith.constant 40 : index
    %c0_429 = arith.constant 0 : index
    %750 = vector.load %arg12[%c0_427, %c40_428, %c0_429] : memref<1x64x128xf32, #tpu.memory_space<vmem>>, vector<1x8x128xf32>
    %751 = vector.shape_cast %750 : vector<1x8x128xf32> to vector<8x128xf32>
    %752 = vector.shape_cast %749 : vector<8x128xf32> to vector<1x8x128xf32>
    tpu.vector_store %arg12[%c0_427, %c40_428, %c0_429], %752 {strides = array<i32>} : memref<1x64x128xf32, #tpu.memory_space<vmem>>, vector<1x8x128xf32>,
    %753 = vector.extract_strided_slice %506 {offsets = [71, 0], sizes = [8, 128], strides = [1, 1]} : vector<104x128xf32> to vector<8x128xf32>
    %c0_430 = arith.constant 0 : index
    %c0_431 = arith.constant 0 : index
    %754 = vector.load %arg8[%c0_430, %c0_431] : memref<1x128xf32, #tpu.memory_space<vmem>>, vector<1x128xf32>
    %755 = vector.broadcast %754 : vector<1x128xf32> to vector<8x128xf32>
    %756 = arith.addf %753, %755 : vector<8x128xf32>
    %757 = math.absf %756 : vector<8x128xf32>
    %cst_432 = arith.constant 0.707106769 : f32
    %758 = vector.broadcast %cst_432 : f32 to vector<8x128xf32>
    %759 = arith.mulf %757, %758 : vector<8x128xf32>
    %cst_433 = arith.constant 0.327591091 : f32
    %760 = vector.broadcast %cst_433 : f32 to vector<8x128xf32>
    %761 = arith.mulf %760, %759 : vector<8x128xf32>
    %cst_434 = arith.constant 1.000000e+00 : f32
    %762 = vector.broadcast %cst_434 : f32 to vector<8x128xf32>
    %763 = arith.addf %762, %761 : vector<8x128xf32>
    %cst_435 = arith.constant 1.000000e+00 : f32
    %764 = vector.broadcast %cst_435 : f32 to vector<8x128xf32>
    %765 = arith.divf %764, %763 : vector<8x128xf32>
    %cst_436 = arith.constant 1.06140542 : f32
    %766 = vector.broadcast %cst_436 : f32 to vector<8x128xf32>
    %767 = arith.mulf %766, %765 : vector<8x128xf32>
    %cst_437 = arith.constant -1.45315206 : f32
    %768 = vector.broadcast %cst_437 : f32 to vector<8x128xf32>
    %769 = arith.addf %767, %768 : vector<8x128xf32>
    %770 = arith.mulf %769, %765 : vector<8x128xf32>
    %cst_438 = arith.constant 1.42141378 : f32
    %771 = vector.broadcast %cst_438 : f32 to vector<8x128xf32>
    %772 = arith.addf %770, %771 : vector<8x128xf32>
    %773 = arith.mulf %772, %765 : vector<8x128xf32>
    %cst_439 = arith.constant -0.284496725 : f32
    %774 = vector.broadcast %cst_439 : f32 to vector<8x128xf32>
    %775 = arith.addf %773, %774 : vector<8x128xf32>
    %776 = arith.mulf %775, %765 : vector<8x128xf32>
    %cst_440 = arith.constant 0.254829586 : f32
    %777 = vector.broadcast %cst_440 : f32 to vector<8x128xf32>
    %778 = arith.addf %776, %777 : vector<8x128xf32>
    %779 = arith.mulf %778, %765 : vector<8x128xf32>
    %cst_441 = arith.constant -5.000000e-01 : f32
    %780 = vector.broadcast %cst_441 : f32 to vector<8x128xf32>
    %781 = arith.mulf %780, %756 : vector<8x128xf32>
    %782 = arith.mulf %781, %756 : vector<8x128xf32>
    %783 = math.exp %782 : vector<8x128xf32>
    %784 = arith.mulf %779, %783 : vector<8x128xf32>
    %cst_442 = arith.constant 0.000000e+00 : f32
    %785 = vector.broadcast %cst_442 : f32 to vector<8x128xf32>
    %786 = arith.maximumf %756, %785 : vector<8x128xf32>
    %cst_443 = arith.constant 5.000000e-01 : f32
    %787 = vector.broadcast %cst_443 : f32 to vector<8x128xf32>
    %788 = arith.mulf %787, %757 : vector<8x128xf32>
    %789 = arith.mulf %788, %784 : vector<8x128xf32>
    %790 = arith.subf %786, %789 : vector<8x128xf32>
    %c0_444 = arith.constant 0 : index
    %c48 = arith.constant 48 : index
    %c0_445 = arith.constant 0 : index
    %791 = vector.load %arg12[%c0_444, %c48, %c0_445] : memref<1x64x128xf32, #tpu.memory_space<vmem>>, vector<1x8x128xf32>
    %792 = vector.shape_cast %791 : vector<1x8x128xf32> to vector<8x128xf32>
    %793 = vector.shape_cast %790 : vector<8x128xf32> to vector<1x8x128xf32>
    tpu.vector_store %arg12[%c0_444, %c48, %c0_445], %793 {strides = array<i32>} : memref<1x64x128xf32, #tpu.memory_space<vmem>>, vector<1x8x128xf32>,
    %794 = vector.extract_strided_slice %506 {offsets = [81, 0], sizes = [8, 128], strides = [1, 1]} : vector<104x128xf32> to vector<8x128xf32>
    %c0_446 = arith.constant 0 : index
    %c0_447 = arith.constant 0 : index
    %795 = vector.load %arg8[%c0_446, %c0_447] : memref<1x128xf32, #tpu.memory_space<vmem>>, vector<1x128xf32>
    %796 = vector.broadcast %795 : vector<1x128xf32> to vector<8x128xf32>
    %797 = arith.addf %794, %796 : vector<8x128xf32>
    %798 = math.absf %797 : vector<8x128xf32>
    %cst_448 = arith.constant 0.707106769 : f32
    %799 = vector.broadcast %cst_448 : f32 to vector<8x128xf32>
    %800 = arith.mulf %798, %799 : vector<8x128xf32>
    %cst_449 = arith.constant 0.327591091 : f32
    %801 = vector.broadcast %cst_449 : f32 to vector<8x128xf32>
    %802 = arith.mulf %801, %800 : vector<8x128xf32>
    %cst_450 = arith.constant 1.000000e+00 : f32
    %803 = vector.broadcast %cst_450 : f32 to vector<8x128xf32>
    %804 = arith.addf %803, %802 : vector<8x128xf32>
    %cst_451 = arith.constant 1.000000e+00 : f32
    %805 = vector.broadcast %cst_451 : f32 to vector<8x128xf32>
    %806 = arith.divf %805, %804 : vector<8x128xf32>
    %cst_452 = arith.constant 1.06140542 : f32
    %807 = vector.broadcast %cst_452 : f32 to vector<8x128xf32>
    %808 = arith.mulf %807, %806 : vector<8x128xf32>
    %cst_453 = arith.constant -1.45315206 : f32
    %809 = vector.broadcast %cst_453 : f32 to vector<8x128xf32>
    %810 = arith.addf %808, %809 : vector<8x128xf32>
    %811 = arith.mulf %810, %806 : vector<8x128xf32>
    %cst_454 = arith.constant 1.42141378 : f32
    %812 = vector.broadcast %cst_454 : f32 to vector<8x128xf32>
    %813 = arith.addf %811, %812 : vector<8x128xf32>
    %814 = arith.mulf %813, %806 : vector<8x128xf32>
    %cst_455 = arith.constant -0.284496725 : f32
    %815 = vector.broadcast %cst_455 : f32 to vector<8x128xf32>
    %816 = arith.addf %814, %815 : vector<8x128xf32>
    %817 = arith.mulf %816, %806 : vector<8x128xf32>
    %cst_456 = arith.constant 0.254829586 : f32
    %818 = vector.broadcast %cst_456 : f32 to vector<8x128xf32>
    %819 = arith.addf %817, %818 : vector<8x128xf32>
    %820 = arith.mulf %819, %806 : vector<8x128xf32>
    %cst_457 = arith.constant -5.000000e-01 : f32
    %821 = vector.broadcast %cst_457 : f32 to vector<8x128xf32>
    %822 = arith.mulf %821, %797 : vector<8x128xf32>
    %823 = arith.mulf %822, %797 : vector<8x128xf32>
    %824 = math.exp %823 : vector<8x128xf32>
    %825 = arith.mulf %820, %824 : vector<8x128xf32>
    %cst_458 = arith.constant 0.000000e+00 : f32
    %826 = vector.broadcast %cst_458 : f32 to vector<8x128xf32>
    %827 = arith.maximumf %797, %826 : vector<8x128xf32>
    %cst_459 = arith.constant 5.000000e-01 : f32
    %828 = vector.broadcast %cst_459 : f32 to vector<8x128xf32>
    %829 = arith.mulf %828, %798 : vector<8x128xf32>
    %830 = arith.mulf %829, %825 : vector<8x128xf32>
    %831 = arith.subf %827, %830 : vector<8x128xf32>
    %c0_460 = arith.constant 0 : index
    %c56 = arith.constant 56 : index
    %c0_461 = arith.constant 0 : index
    %832 = vector.load %arg12[%c0_460, %c56, %c0_461] : memref<1x64x128xf32, #tpu.memory_space<vmem>>, vector<1x8x128xf32>
    %833 = vector.shape_cast %832 : vector<1x8x128xf32> to vector<8x128xf32>
    %834 = vector.shape_cast %831 : vector<8x128xf32> to vector<1x8x128xf32>
    tpu.vector_store %arg12[%c0_460, %c56, %c0_461], %834 {strides = array<i32>} : memref<1x64x128xf32, #tpu.memory_space<vmem>>, vector<1x8x128xf32>,
    %c0_462 = arith.constant 0 : index
    %c0_463 = arith.constant 0 : index
    %c0_464 = arith.constant 0 : index
    %835 = vector.load %arg12[%c0_462, %c0_463, %c0_464] : memref<1x64x128xf32, #tpu.memory_space<vmem>>, vector<1x64x128xf32>
    %836 = vector.shape_cast %835 : vector<1x64x128xf32> to vector<64x128xf32>
    %cst_465 = arith.constant dense<0.000000e+00> : vector<128xf32>
    %837 = vector.multi_reduction <add>, %836, %cst_465 [0] : vector<64x128xf32> to vector<128xf32>
    %838 = vector.shape_cast %837 : vector<128xf32> to vector<1x128xf32>
    %c0_466 = arith.constant 0 : index
    %c0_467 = arith.constant 0 : index
    %839 = vector.load %arg11[%c0_466, %c0_467] : memref<128x128xf32, #tpu.memory_space<vmem>>, vector<128x128xf32>
    %cst_468 = arith.constant dense<0.000000e+00> : vector<1x128xf32>
    %840 = tpu.matmul %838, %839, %cst_468 {dimension_numbers = #tpu.dot_dimension_numbers<[1], [0], [0], [1], [0, 0, 1, 1], [], []>} : vector<1x128xf32>, vector<128x128xf32>, vector<1x128xf32> -> vector<1x128xf32>
    %cst_469 = arith.constant 9.765625E-4 : f32
    %841 = vector.broadcast %cst_469 : f32 to vector<1x128xf32>
    %842 = arith.mulf %840, %841 : vector<1x128xf32>
    %843 = vector.broadcast %842 : vector<1x128xf32> to vector<64x128xf32>
    %844 = arith.subf %836, %843 : vector<64x128xf32>
    %845 = arith.mulf %844, %844 : vector<64x128xf32>
    %cst_470 = arith.constant dense<0.000000e+00> : vector<128xf32>
    %846 = vector.multi_reduction <add>, %845, %cst_470 [0] : vector<64x128xf32> to vector<128xf32>
    %847 = vector.shape_cast %846 : vector<128xf32> to vector<1x128xf32>
    %c0_471 = arith.constant 0 : index
    %c0_472 = arith.constant 0 : index
    %848 = vector.load %arg11[%c0_471, %c0_472] : memref<128x128xf32, #tpu.memory_space<vmem>>, vector<128x128xf32>
    %cst_473 = arith.constant dense<0.000000e+00> : vector<1x128xf32>
    %849 = tpu.matmul %847, %848, %cst_473 {dimension_numbers = #tpu.dot_dimension_numbers<[1], [0], [0], [1], [0, 0, 1, 1], [], []>} : vector<1x128xf32>, vector<128x128xf32>, vector<1x128xf32> -> vector<1x128xf32>
    %cst_474 = arith.constant 9.765625E-4 : f32
    %850 = vector.broadcast %cst_474 : f32 to vector<1x128xf32>
    %851 = arith.mulf %849, %850 : vector<1x128xf32>
    %cst_475 = arith.constant 1.000000e-03 : f32
    %852 = vector.broadcast %cst_475 : f32 to vector<1x128xf32>
    %853 = arith.addf %851, %852 : vector<1x128xf32>
    %854 = math.rsqrt %853 : vector<1x128xf32>
    %c0_476 = arith.constant 0 : index
    %c0_477 = arith.constant 0 : index
    %855 = vector.load %arg9[%c0_476, %c0_477] : memref<1x128xf32, #tpu.memory_space<vmem>>, vector<1x128xf32>
    %856 = arith.mulf %854, %855 : vector<1x128xf32>
    %857 = vector.broadcast %856 : vector<1x128xf32> to vector<64x128xf32>
    %858 = arith.mulf %844, %857 : vector<64x128xf32>
    %c0_478 = arith.constant 0 : index
    %c0_479 = arith.constant 0 : index
    %859 = vector.load %arg10[%c0_478, %c0_479] : memref<1x128xf32, #tpu.memory_space<vmem>>, vector<1x128xf32>
    %860 = vector.broadcast %859 : vector<1x128xf32> to vector<64x128xf32>
    %861 = arith.addf %858, %860 : vector<64x128xf32>
    %c0_480 = arith.constant 0 : index
    %c0_481 = arith.constant 0 : index
    %c0_482 = arith.constant 0 : index
    %862 = vector.load %arg12[%c0_480, %c0_481, %c0_482] : memref<1x64x128xf32, #tpu.memory_space<vmem>>, vector<1x64x128xf32>
    %863 = vector.shape_cast %862 : vector<1x64x128xf32> to vector<64x128xf32>
    %864 = vector.shape_cast %861 : vector<64x128xf32> to vector<1x64x128xf32>
    tpu.vector_store %arg12[%c0_480, %c0_481, %c0_482], %864 {strides = array<i32>} : memref<1x64x128xf32, #tpu.memory_space<vmem>>, vector<1x64x128xf32>,
    return
  }
  func.func @transform_0(%arg0: i32) -> (i32, i32, i32) {
    %c0_i32 = arith.constant 0 : i32
    %c0_i32_0 = arith.constant 0 : i32
    %c0_i32_1 = arith.constant 0 : i32
    return %arg0, %c0_i32, %c0_i32_0 : i32, i32, i32
  }
  func.func @transform_1(%arg0: i32) -> (i32, i32, i32, i32) {
    %c0_i32 = arith.constant 0 : i32
    %c0_i32_0 = arith.constant 0 : i32
    %c0_i32_1 = arith.constant 0 : i32
    %c0_i32_2 = arith.constant 0 : i32
    return %arg0, %c0_i32, %c0_i32_0, %c0_i32_1 : i32, i32, i32, i32
  }
  func.func @transform_2(%arg0: i32) -> (i32, i32) {
    %c0_i32 = arith.constant 0 : i32
    %c0_i32_0 = arith.constant 0 : i32
    %c0_i32_1 = arith.constant 0 : i32
    return %c0_i32, %c0_i32_0 : i32, i32
  }
  func.func @transform_3(%arg0: i32) -> (i32, i32) {
    %c0_i32 = arith.constant 0 : i32
    %c0_i32_0 = arith.constant 0 : i32
    %c0_i32_1 = arith.constant 0 : i32
    return %c0_i32, %c0_i32_0 : i32, i32
  }
  func.func @transform_4(%arg0: i32) -> (i32, i32, i32) {
    %c0_i32 = arith.constant 0 : i32
    %c0_i32_0 = arith.constant 0 : i32
    %c0_i32_1 = arith.constant 0 : i32
    %c0_i32_2 = arith.constant 0 : i32
    return %c0_i32, %c0_i32_0, %c0_i32_1 : i32, i32, i32
  }
  func.func @transform_5(%arg0: i32) -> (i32, i32) {
    %c0_i32 = arith.constant 0 : i32
    %c0_i32_0 = arith.constant 0 : i32
    %c0_i32_1 = arith.constant 0 : i32
    return %c0_i32, %c0_i32_0 : i32, i32
  }
  func.func @transform_6(%arg0: i32) -> (i32, i32, i32) {
    %c0_i32 = arith.constant 0 : i32
    %c0_i32_0 = arith.constant 0 : i32
    %c0_i32_1 = arith.constant 0 : i32
    %c0_i32_2 = arith.constant 0 : i32
    return %c0_i32, %c0_i32_0, %c0_i32_1 : i32, i32, i32
  }
  func.func @transform_7(%arg0: i32) -> (i32, i32) {
    %c0_i32 = arith.constant 0 : i32
    %c0_i32_0 = arith.constant 0 : i32
    %c0_i32_1 = arith.constant 0 : i32
    return %c0_i32, %c0_i32_0 : i32, i32
  }
  func.func @transform_8(%arg0: i32) -> (i32, i32) {
    %c0_i32 = arith.constant 0 : i32
    %c0_i32_0 = arith.constant 0 : i32
    %c0_i32_1 = arith.constant 0 : i32
    return %c0_i32, %c0_i32_0 : i32, i32
  }
  func.func @transform_9(%arg0: i32) -> (i32, i32) {
    %c0_i32 = arith.constant 0 : i32
    %c0_i32_0 = arith.constant 0 : i32
    %c0_i32_1 = arith.constant 0 : i32
    return %c0_i32, %c0_i32_0 : i32, i32
  }
  func.func @transform_10(%arg0: i32) -> (i32, i32) {
    %c0_i32 = arith.constant 0 : i32
    %c0_i32_0 = arith.constant 0 : i32
    %c0_i32_1 = arith.constant 0 : i32
    return %c0_i32, %c0_i32_0 : i32, i32
  }
  func.func @transform_11(%arg0: i32) -> (i32, i32, i32) {
    %c0_i32 = arith.constant 0 : i32
    %c0_i32_0 = arith.constant 0 : i32
    %c0_i32_1 = arith.constant 0 : i32
    return %arg0, %c0_i32, %c0_i32_0 : i32, i32, i32
  }
}

</mosaic_0001>

<bundles_post_ra>
// kernel: synthesis_block_forward.1
= control target key start
LH: loop header
LB: loop body
LE: loop exit
PB: predicated region body
PF: predicated region fallthrough
CT: control target
= control target key end

     0   :  { %s9027_s17 = smov 0   ;;  %s12507_s0 = inlined_call_operand.vmem [shape: f32[2,64,128], index: 0, kind: input, shape index: {}]   ;;  %s12508_s1 = inlined_call_operand.vmem [shape: f32[2,8,8,128], index: 1, kind: input, shape index: {}]   ;;  %s12509_s2 = inlined_call_operand.vmem [shape: f32[128,128], index: 2, kind: input, shape index: {}]   ;;  %s12510_s3 = inlined_call_operand.vmem [shape: f32[1,128], index: 3, kind: input, shape index: {}]   ;;  %s12511_s4 = inlined_call_operand.vmem [shape: f32[9,256,128], index: 4, kind: input, shape index: {}]   ;;  %s12512_s5 = inlined_call_operand.vmem [shape: f32[1,128], index: 5, kind: input, shape index: {}]   ;;  %s12513_s6 = inlined_call_operand.vmem [shape: f32[9,128,128], index: 6, kind: input, shape index: {}]   ;;  %s12514_s7 = inlined_call_operand.vmem [shape: f32[1,128], index: 7, kind: input, shape index: {}]   ;;  %s12515_s8 = inlined_call_operand.vmem [shape: f32[1,128], index: 8, kind: input, shape index: {}]   ;;  %s12516_s9 = inlined_call_operand.vmem [shape: f32[1,128], index: 9, kind: input, shape index: {}]   ;;  %s12517_s10 = inlined_call_operand.vmem [shape: f32[128,128], index: 10, kind: input, shape index: {}]   ;;  %s12518_s11 = inlined_call_operand.vmem [shape: f32[2,64,128], index: 11, kind: output, shape index: {}]  }
   0x1 LB: > { %s5988_s18 = sadd.s32 4294967295, %s8962_s17   ;;  %p5992_p0 = scmp.ge.s32.totalorder %s8962_s17, 1  ;;  %s8962_s17 = sphi %s9027_s17, %s21_s17  }
   0x2   : > { %p347_p1 = scmp.lt.s32.totalorder %s8962_s17, 3 }
   0x4   : > { %p348_p2 = pnand %p5992_p0, %p347_p1 }
   0x6   : > { %351 = sbr.rel (%p348_p2) target bundleno = 2260 (0x8d4), region = 64 }
   0xd   : > { %v448_v0 = vld [vmem:[%s12509_s2] sm:$0xff]  ;;  %v449_v1 = vld [vmem:[%s12509_s2 + $0x8] sm:$0xff]  ;;  %v450_v2 = vld [vmem:[%s12509_s2 + $0x10] sm:$0xff]  ;;  %p392_p3 = scmp.lt.s32.totalorder %s5988_s18, 1  ;;  %vm970_vm0 = vcmask 1046528   ;;  %vm1348_vm1 = vcmask 1045504  }
   0xe   : > { %v8124_v3 = vpack.c.bf16 %v449_v1, %v448_v0  ;;  %v451_v4 = vld [vmem:[%s12509_s2 + $0x18] sm:$0xff]  ;;  %v452_v6 = vld [vmem:[%s12509_s2 + $0x20] sm:$0xff]  ;;  %v453_v7 = vld [vmem:[%s12509_s2 + $0x28] sm:$0xff]  ;;  %vm1917_vm2 = vcmask 1044480   ;;  %vm2178_vm3 = vcmask 1043456   ;;  %vm3008_vm4 = vcmask 1041408  }
   0xf   : > { %v8128_v5 = vpack.c.bf16 %v451_v4, %v450_v2  ;;  %s12540_s18 = smov (!%p392_p3, %s5988_s18), 1  ;;  %v8132_v8 = vpack.c.bf16 %v453_v7, %v452_v6  ;;  %v454_v9 = vld [vmem:[%s12509_s2 + $0x30] sm:$0xff]  ;;  %v455_v10 = vld [vmem:[%s12509_s2 + $0x38] sm:$0xff]  ;;  %v456_v27 = vld [vmem:[%s12509_s2 + $0x40] sm:$0xff]  ;;  %vm2747_vm5 = vcmask 1042432   ;;  %vm8966_vm6 = vmmov 0  }
  0x10   : > { %8125 = vmatprep.subr.bf16.mxu0 %v8124_v3  ;;  %s9053_s12 = sshll.u32 %s12540_s18, 6  ;;  %v8136_v24 = vpack.c.bf16 %v455_v10, %v454_v9  ;;  %v457_v28 = vld [vmem:[%s12509_s2 + $0x48] sm:$0xff]  ;;  %v458_v30 = vld [vmem:[%s12509_s2 + $0x50] sm:$0xff]  ;;  %v459_v31 = vld [vmem:[%s12509_s2 + $0x58] sm:$0xff] }
  0x11   : > { %8127 = vmatpush3.bf16.msra.mxu0 %v8124_v3  ;;  %s9065_s21 = scalar_lea.vmem %s12507_s0, %s9053_s12  ;;  %s401_s23 = scalar_lea.vmem %s12508_s1, %s9053_s12  ;;  %v8140_v29 = vpack.c.bf16 %v457_v28, %v456_v27  ;;  %v8144_v32 = vpack.c.bf16 %v459_v31, %v458_v30  ;;  %v460_v33 = vld [vmem:[%s12509_s2 + $0x60] sm:$0xff]  ;;  %v461_v34 = vld [vmem:[%s12509_s2 + $0x68] sm:$0xff]  ;;  %v462_v36 = vld [vmem:[%s12509_s2 + $0x70] sm:$0xff] }
  0x12   : > { %8129 = vmatprep.subr.bf16.mxu0 %v8128_v5  ;;  %v440_v11 = vld [vmem:[%s9065_s21] sm:$0xff]  ;;  %v9072_v13 = vld [vmem:[%s401_s23 + $0x8] sm:$0xff]  ;;  %v6001_v15 = vld [vmem:[%s401_s23 + $0x10] sm:$0xff]  ;;  %v8148_v35 = vpack.c.bf16 %v461_v34, %v460_v33  ;;  %s12367_s27 = scalar_lea.vmem %s12518_s11, %s9053_s12 }
  0x13   : > { %v800_v12 = vld [vmem:[%s401_s23] sm:$0xff]  ;;  %7403 = vmatprep.mubr.f32.mxu0 %v440_v11  ;;  %808 = vst [vmem:[#allocation2 + $0x48] sm:$0xff] %v9072_v13  ;;  %v6002_v16 = vld [vmem:[%s401_s23 + $0x18] sm:$0xff]  ;;  %v812_v18 = vrot.slane %v6001_v15, 6  ;;  %v6004_v21 = vld [vmem:[%s401_s23 + $0x28] sm:$0xff] }
  0x14   : > { %v802_v14 = vrot.slane %v800_v12, 2  ;;  %v6003_v17 = vld [vmem:[%s401_s23 + $0x20] sm:$0xff]  ;;  %v819_v19 = vrot.slane %v6002_v16, 4  ;;  %v6005_v22 = vld [vmem:[%s401_s23 + $0x30] sm:$0xff]  ;;  %v6006_v23 = vld [vmem:[%s401_s23 + $0x38] sm:$0xff]  ;;  %832 = vst [vmem:[#allocation2 + $0x98] sm:$0xff] %v6004_v21 }
  0x15   : > { %8131 = vmatpush3.bf16.msra.mxu0 %v8128_v5  ;;  %v826_v20 = vrot.slane %v6003_v17, 2  ;;  %v836_v25 = vrot.slane %v6005_v22, 6  ;;  %v843_v26 = vrot.slane %v6006_v23, 4  ;;  %814 = vst [vmem:[#allocation2 + $0x58] sm:$0xfc] %v812_v18  ;;  %v463_v37 = vld [vmem:[%s12509_s2 + $0x78] sm:$0xff] }
  0x16   : > { %8133 = vmatprep.subr.bf16.mxu0 %v8132_v8  ;;  %804 = vst [vmem:[#allocation2 + $0x28] sm:$0xc0] %v802_v14  ;;  %805 = vst [vmem:[#allocation2 + $0x38] sm:$0x3f] %v802_v14  ;;  %v8152_v38 = vpack.c.bf16 %v463_v37, %v462_v36  ;;  %v441_v39 = vld [vmem:[%s9065_s21 + $0x8] sm:$0xff]  ;;  %v442_v40 = vld [vmem:[%s9065_s21 + $0x10] sm:$0xff] }
  0x17   : > { %815 = vst [vmem:[#allocation2 + $0x68] sm:$0x3] %v812_v18  ;;  %821 = vst [vmem:[#allocation2 + $0x78] ss:$-12 sps:$4 sm:$0xff] %v819_v19   ;;  %v443_v41 = vld [vmem:[%s9065_s21 + $0x18] sm:$0xff]  ;;  %v444_v42 = vld [vmem:[%s9065_s21 + $0x20] sm:$0xff] }
  0x18   : > { %828 = vst [vmem:[#allocation2 + $0x78] sm:$0xc0] %v826_v20  ;;  %829 = vst [vmem:[#allocation2 + $0x88] sm:$0x3f] %v826_v20  ;;  %v445_v43 = vld [vmem:[%s9065_s21 + $0x28] sm:$0xff]  ;;  %v446_v44 = vld [vmem:[%s9065_s21 + $0x30] sm:$0xff] }
  0x19   : > { %838 = vst [vmem:[#allocation2 + $0xa8] sm:$0xfc] %v836_v25  ;;  %839 = vst [vmem:[#allocation2 + $0xb8] sm:$0x3] %v836_v25  ;;  %8135 = vmatpush3.bf16.msra.mxu0 %v8132_v8  ;;  %v447_v45 = vld [vmem:[%s9065_s21 + $0x38] sm:$0xff]  ;;  %v6023_v46 = vld [vmem:[%s12511_s4 + $0x180] sm:$0xff] }
  0x1a   : > { %845 = vst [vmem:[#allocation2 + $0xc8] ss:$-12 sps:$4 sm:$0xff] %v843_v26   ;;  %8137 = vmatprep.subr.bf16.mxu0 %v8136_v24  ;;  %v6024_v47 = vld [vmem:[%s12511_s4 + $0x188] sm:$0xff]  ;;  %v6007_v49 = vld [vmem:[%s12511_s4 + $0x100] sm:$0xff]  ;;  %v6025_v52 = vld [vmem:[%s12511_s4 + $0x190] sm:$0xff]  ;;  %v8964_v19 = vmov 0.0  }
  0x1b   : > { %v8156_v48 = vpack.c.bf16 %v6024_v47, %v6023_v46  ;;  %v6008_v50 = vld [vmem:[%s12511_s4 + $0x108] sm:$0xff]  ;;  %v6026_v53 = vld [vmem:[%s12511_s4 + $0x198] sm:$0xff]  ;;  %v6009_v55 = vld [vmem:[%s12511_s4 + $0x110] sm:$0xff]  ;;  %408 = vst [vmem:[#allocation2 + $0x18] sm:$0xf8] %v8964_v19 }
  0x1c   : > { %v8158_v51 = vpack.c.bf16 %v6008_v50, %v6007_v49  ;;  %v8160_v54 = vpack.c.bf16 %v6026_v53, %v6025_v52  ;;  %v6010_v56 = vld [vmem:[%s12511_s4 + $0x118] sm:$0xff]  ;;  %v6027_v58 = vld [vmem:[%s12511_s4 + $0x1a0] sm:$0xff]  ;;  %v6028_v59 = vld [vmem:[%s12511_s4 + $0x1a8] sm:$0xff]  ;;  %407 = vst [vmem:[#allocation2 + $0x10] sm:$0xf8] %v8964_v19 }
  0x1d   : > { %8139 = vmatpush3.bf16.msra.mxu0 %v8136_v24  ;;  %8157 = vmatprep.subr.bf16.mxu1 %v8156_v48  ;;  %v8162_v57 = vpack.c.bf16 %v6010_v56, %v6009_v55  ;;  %v8164_v60 = vpack.c.bf16 %v6028_v59, %v6027_v58  ;;  %v6011_v61 = vld [vmem:[%s12511_s4 + $0x120] sm:$0xff]  ;;  %v6012_v62 = vld [vmem:[%s12511_s4 + $0x128] sm:$0xff]  ;;  %v6029_v0 = vld [vmem:[%s12511_s4 + $0x1b0] sm:$0xff]  ;;  %409 = vst [vmem:[#allocation2 + $0x20] sm:$0x3f] %v8964_v19 }
  0x1e   : > { %8141 = vmatprep.subr.bf16.mxu0 %v8140_v29  ;;  %8159 = vmatpush3.bf16.msra.mxu1 %v8158_v51  ;;  %v8166_v63 = vpack.c.bf16 %v6012_v62, %v6011_v61  ;;  %v6030_v1 = vld [vmem:[%s12511_s4 + $0x1b8] sm:$0xff]  ;;  %v6013_v3 = vld [vmem:[%s12511_s4 + $0x130] sm:$0xff]  ;;  %v6031_v6 = vld [vmem:[%s12511_s4 + $0x1c0] sm:$0xff]  ;;  %410 = vst [vmem:[#allocation2 + $0x28] sm:$0x3f] %v8964_v19 }
  0x1f   : > { %8161 = vmatprep.subr.bf16.mxu1 %v8160_v54  ;;  %v8168_v2 = vpack.c.bf16 %v6030_v1, %v6029_v0  ;;  %v6014_v4 = vld [vmem:[%s12511_s4 + $0x138] sm:$0xff]  ;;  %v6032_v7 = vld [vmem:[%s12511_s4 + $0x1c8] sm:$0xff]  ;;  %v6015_v9 = vld [vmem:[%s12511_s4 + $0x140] sm:$0xff]  ;;  %411 = vst [vmem:[#allocation2 + $0xc0] sm:$0xf0] %v8964_v19 }
  0x20   : > { %v8170_v5 = vpack.c.bf16 %v6014_v4, %v6013_v3  ;;  %v8172_v8 = vpack.c.bf16 %v6032_v7, %v6031_v6  ;;  %v6016_v10 = vld [vmem:[%s12511_s4 + $0x148] sm:$0xff]  ;;  %v6033_v12 = vld [vmem:[%s12511_s4 + $0x1d0] sm:$0xff]  ;;  %v6034_v14 = vld [vmem:[%s12511_s4 + $0x1d8] sm:$0xff]  ;;  %412 = vst [vmem:[#allocation2 + $0xc8] sm:$0xf0] %v8964_v19 }
  0x21   : > { %8143 = vmatpush3.bf16.msra.mxu0 %v8140_v29  ;;  %v8174_v11 = vpack.c.bf16 %v6016_v10, %v6015_v9  ;;  %v8176_v15 = vpack.c.bf16 %v6034_v14, %v6033_v12  ;;  %v6017_v16 = vld [vmem:[%s12511_s4 + $0x150] sm:$0xff]  ;;  %v6018_v17 = vld [vmem:[%s12511_s4 + $0x158] sm:$0xff]  ;;  %413 = vst [vmem:[#allocation2 + $0xd0] sm:$0x7f] %v8964_v19  ;;  %414 = vst [vmem:[#allocation2 + $0xd8] sm:$0x7f] %v8964_v19 }
  0x22   : > { %8145 = vmatprep.subr.bf16.mxu0 %v8144_v32  ;;  %8163 = vmatpush3.bf16.msra.mxu1 %v8162_v57  ;;  %v8178_v18 = vpack.c.bf16 %v6018_v17, %v6017_v16  ;;  %415 = vst [vmem:[#allocation2 + $0x30] sm:$0xc0] %v8964_v19  ;;  %416 = vst [vmem:[#allocation2 + $0x38] sm:$0xc0] %v8964_v19  ;;  %v6035_v20 = vld [vmem:[%s12511_s4 + $0x1e0] sm:$0xff]  ;;  %v6036_v21 = vld [vmem:[%s12511_s4 + $0x1e8] sm:$0xff] }
  0x23   : > { %8165 = vmatprep.subr.bf16.mxu1 %v8164_v60  ;;  %417 = vst [vmem:[#allocation2 + $0x50] sm:$0x3] %v8964_v19  ;;  %418 = vst [vmem:[#allocation2 + $0x58] sm:$0x3] %v8964_v19  ;;  %v8180_v22 = vpack.c.bf16 %v6036_v21, %v6035_v20  ;;  %v6019_v23 = vld [vmem:[%s12511_s4 + $0x160] sm:$0xff]  ;;  %v6020_v24 = vld [vmem:[%s12511_s4 + $0x168] sm:$0xff] }
  0x24   : > { %419 = vst [vmem:[#allocation2 + $0x60] sm:$0xc] %v8964_v19  ;;  %420 = vst [vmem:[#allocation2 + $0x68] sm:$0xc] %v8964_v19  ;;  %v8182_v25 = vpack.c.bf16 %v6020_v24, %v6019_v23  ;;  %v6037_v26 = vld [vmem:[%s12511_s4 + $0x1f0] sm:$0xff]  ;;  %v6038_v27 = vld [vmem:[%s12511_s4 + $0x1f8] sm:$0xff] }
  0x25   : > { %8147 = vmatpush3.bf16.msra.mxu0 %v8144_v32  ;;  %421 = vst [vmem:[#allocation2 + $0x70] sm:$0x30] %v8964_v19  ;;  %422 = vst [vmem:[#allocation2 + $0x78] sm:$0x30] %v8964_v19  ;;  %v8184_v28 = vpack.c.bf16 %v6038_v27, %v6037_v26  ;;  %v6021_v29 = vld [vmem:[%s12511_s4 + $0x170] sm:$0xff]  ;;  %v6022_v30 = vld [vmem:[%s12511_s4 + $0x178] sm:$0xff] }
  0x26   : > { %8149 = vmatprep.subr.bf16.mxu0 %v8148_v35  ;;  %8167 = vmatpush3.bf16.msra.mxu1 %v8166_v63  ;;  %423 = vst [vmem:[#allocation2 + $0x80] sm:$0xc0] %v8964_v19  ;;  %424 = vst [vmem:[#allocation2 + $0x88] sm:$0xc0] %v8964_v19  ;;  %v8186_v31 = vpack.c.bf16 %v6022_v30, %v6021_v29  ;;  %v9202_v32 = vld [vmem:[#allocation2 + $0x18] sm:$0xff]  ;;  %v9205_v36 = vld [vmem:[#allocation2 + $0x10] sm:$0xff] }
  0x27   : > { %8169 = vmatprep.subr.bf16.mxu1 %v8168_v2  ;;  %425 = vst [vmem:[#allocation2 + $0xa0] sm:$0x3] %v8964_v19  ;;  %426 = vst [vmem:[#allocation2 + $0xa8] sm:$0x3] %v8964_v19  ;;  %v906_v33 = vld [vmem:[#allocation2 + $0x8] sm:$0xfe] }
  0x28   : > { %427 = vst [vmem:[#allocation2 + $0xb0] sm:$0xc] %v8964_v19  ;;  %428 = vst [vmem:[#allocation2 + $0xb8] sm:$0xc] %v8964_v19  ;;  %v974_v34 = vrot.slane %v906_v33, 1  ;;  %v890_v46 = vld [vmem:[%s12511_s4 + $0x88] sm:$0xff] }
  0x29   : > { %8151 = vmatpush3.bf16.msra.mxu0 %v8148_v35  ;;  %429 = vst [vmem:[#allocation3 + $0xb] sm:$0xff] %v8964_v19  ;;  %430 = vst [vmem:[#allocation3 + $0x13] sm:$0x7] %v8964_v19  ;;  %v975_v35 = vrot.slane %v9202_v32, 1  ;;  %v905_v37 = vld [vmem:[#allocation2] sm:$0xfe] }
  0x2a   : > { %8153 = vmatprep.subr.bf16.mxu0 %v8152_v38  ;;  %8171 = vmatpush3.bf16.msra.mxu1 %v8170_v5  ;;  %431 = vst [vmem:[#allocation3 + $0x64] sm:$0xff] %v8964_v19  ;;  %432 = vst [vmem:[#allocation3 + $0x6c] sm:$0x7] %v8964_v19  ;;  %v873_v47 = vld [vmem:[%s12511_s4] sm:$0xff]  ;;  %v874_v49 = vld [vmem:[%s12511_s4 + $0x8] sm:$0xff] }
  0x2b   : > { %8173 = vmatprep.subr.bf16.mxu1 %v8172_v8  ;;  %433 = vst [vmem:[#allocation3 + $0x1e] sm:$0x3] %v8964_v19  ;;  %434 = vst [vmem:[#allocation3 + $0x28] sm:$0x3] %v8964_v19  ;;  %v891_v50 = vld [vmem:[%s12511_s4 + $0x90] sm:$0xff]  ;;  %v892_v51 = vld [vmem:[%s12511_s4 + $0x98] sm:$0xff]  ;;  %v8190_v52 = vpack.c.bf16 %v874_v49, %v873_v47 }
  0x2c   : > { %435 = vst [vmem:[#allocation3 + $0x32] sm:$0x3] %v8964_v19  ;;  %436 = vst [vmem:[#allocation3 + $0x3c] sm:$0x3] %v8964_v19  ;;  %v8192_v53 = vpack.c.bf16 %v892_v51, %v891_v50  ;;  %v875_v54 = vld [vmem:[%s12511_s4 + $0x10] sm:$0xff]  ;;  %v876_v55 = vld [vmem:[%s12511_s4 + $0x18] sm:$0xff] }
  0x2d   : > { %8155 = vmatpush3.bf16.msra.mxu0 %v8152_v38  ;;  %437 = vst [vmem:[#allocation3 + $0x46] sm:$0x3] %v8964_v19  ;;  %438 = vst [vmem:[#allocation3 + $0x50] sm:$0x3] %v8964_v19  ;;  %v971_v38 = vrot.slane %v905_v37, 1  ;;  %v893_v56 = vld [vmem:[%s12511_s4 + $0xa0] sm:$0xff]  ;;  %v8194_v58 = vpack.c.bf16 %v876_v55, %v875_v54 }
  0x2e   : > { %8175 = vmatpush3.bf16.msra.mxu1 %v8174_v11  ;;  %439 = vst [vmem:[#allocation3 + $0x5a] sm:$0x3] %v8964_v19  ;;  %v894_v57 = vld [vmem:[%s12511_s4 + $0xa8] sm:$0xff]  ;;  %v877_v60 = vld [vmem:[%s12511_s4 + $0x20] sm:$0xff]  ;;  %v895_v62 = vld [vmem:[%s12511_s4 + $0xb0] sm:$0xff] }
  0x2f   : > { %8177 = vmatprep.subr.bf16.mxu1 %v8176_v15  ;;  %v8196_v59 = vpack.c.bf16 %v894_v57, %v893_v56  ;;  %v878_v61 = vld [vmem:[%s12511_s4 + $0x28] sm:$0xff]  ;;  %v896_v63 = vld [vmem:[%s12511_s4 + $0xb8] sm:$0xff]  ;;  %v879_v2 = vld [vmem:[%s12511_s4 + $0x30] sm:$0xff] }
  0x30   : > { %7404 = vmatmul.mubr.f32.vlgmr.msra.gmra.mrb[0].mxu0 %v441_v39  ;;  %v972_v39 = vrot.slane %v9205_v36, 1  ;;  %v8198_v0 = vpack.c.bf16 %v878_v61, %v877_v60  ;;  %v8200_v1 = vpack.c.bf16 %v896_v63, %v895_v62  ;;  %v880_v3 = vld [vmem:[%s12511_s4 + $0x38] sm:$0xff]  ;;  %v897_v4 = vld [vmem:[%s12511_s4 + $0xc0] sm:$0xff]  ;;  %v898_v5 = vld [vmem:[%s12511_s4 + $0xc8] sm:$0xff] }
  0x31   : > { %7406 = vmatprep.mubr.f32.mxu0 %v442_v40  ;;  %v976_v40 = vsel %vm970_vm0, %v974_v34, %v975_v35  ;;  %v8202_v6 = vpack.c.bf16 %v880_v3, %v879_v2  ;;  %v8204_v7 = vpack.c.bf16 %v898_v5, %v897_v4  ;;  %v881_v8 = vld [vmem:[%s12511_s4 + $0x40] sm:$0xff]  ;;  %v882_v9 = vld [vmem:[%s12511_s4 + $0x48] sm:$0xff]  ;;  %v899_v11 = vld [vmem:[%s12511_s4 + $0xd0] sm:$0xff] }
  0x32   : > { %8179 = vmatpush3.bf16.msra.mxu1 %v8178_v18  ;;  %1115 = vmatprep.mubr.f32.mxu1 %v976_v40  ;;  %v8206_v10 = vpack.c.bf16 %v882_v9, %v881_v8  ;;  %v900_v12 = vld [vmem:[%s12511_s4 + $0xd8] sm:$0xff]  ;;  %v883_v14 = vld [vmem:[%s12511_s4 + $0x50] sm:$0xff]  ;;  %v901_v18 = vld [vmem:[%s12511_s4 + $0xe0] sm:$0xff] }
  0x33   : > { %8181 = vmatprep.subr.bf16.mxu1 %v8180_v22  ;;  %v8208_v15 = vpack.c.bf16 %v900_v12, %v899_v11  ;;  %v884_v16 = vld [vmem:[%s12511_s4 + $0x58] sm:$0xff]  ;;  %v902_v19 = vld [vmem:[%s12511_s4 + $0xe8] sm:$0xff]  ;;  %v885_v21 = vld [vmem:[%s12511_s4 + $0x60] sm:$0xff] }
  0x34   : > { %7407 = vmatmul.mubr.f32.gmra.mrb[2].mxu0 %v443_v41  ;;  %v973_v41 = vsel %vm970_vm0, %v971_v38, %v972_v39  ;;  %v8210_v17 = vpack.c.bf16 %v884_v16, %v883_v14  ;;  %v8212_v20 = vpack.c.bf16 %v902_v19, %v901_v18  ;;  %v886_v22 = vld [vmem:[%s12511_s4 + $0x68] sm:$0xff]  ;;  %v903_v24 = vld [vmem:[%s12511_s4 + $0xf0] sm:$0xff]  ;;  %v6055_v30 = vld [vmem:[%s12511_s4 + $0x280] sm:$0xff] }
  0x35   : > { %7409 = vmatprep.mubr.f32.mxu0 %v444_v42  ;;  %v9212_v42 = vld [vmem:[#allocation2 + $0x28] sm:$0xff]  ;;  %v8214_v23 = vpack.c.bf16 %v886_v22, %v885_v21  ;;  %v887_v26 = vld [vmem:[%s12511_s4 + $0x70] sm:$0xff]  ;;  %v5999_v34 = vld [vmem:[%s12510_s3] ss:$0 sm:$0xff] }
  0x36   : > { %8183 = vmatpush3.bf16.msra.mxu1 %v8182_v25  ;;  %v904_v25 = vld [vmem:[%s12511_s4 + $0xf8] sm:$0xff] }
  0x37   : > { %8185 = vmatprep.subr.bf16.mxu1 %v8184_v28  ;;  %v8216_v27 = vpack.c.bf16 %v904_v25, %v903_v24  ;;  %v888_v28 = vld [vmem:[%s12511_s4 + $0x78] sm:$0xff] }
  0x38   : > { %7410 = vmatmul.mubr.f32.gmra.mrb[4].mxu0 %v445_v43  ;;  %v979_v43 = vrot.slane %v9212_v42, 1  ;;  %v8218_v29 = vpack.c.bf16 %v888_v28, %v887_v26 }
  0x39   : > { %7412 = vmatprep.mubr.f32.mxu0 %v446_v44 }
  0x3a   : > { %8187 = vmatpush3.bf16.msra.mxu1 %v8186_v31  ;;  %v980_v44 = vsel %vm970_vm0, %v975_v35, %v979_v43  ;;  %v6056_v31 = vld [vmem:[%s12511_s4 + $0x288] sm:$0xff] }
  0x3b   : > { %v8220_v33 = vpack.c.bf16 %v6056_v31, %v6055_v30 }
  0x3c   : > { %7413 = vmatmul.mubr.f32.gmra.mrb[6].mxu0 %v447_v45  ;;  %v889_v45 = vld [vmem:[%s12511_s4 + $0x80] sm:$0xff] }
  0x3d   : > { %1116 = vmatmul.mubr.f32.vlgmr.msra.gmra.mrb[0].mxu1 %v973_v41  ;;  %v8188_v48 = vpack.c.bf16 %v890_v46, %v889_v45 }
  0x3e   : > { %1119 = vmatprep.mubr.f32.mxu1 %v980_v44 }
  0x3f   : > { %8189 = vmatprep.subr.bf16.mxu1 %v8188_v48 }
  0x40   : > { %8191 = vmatpush3.bf16.msra.mxu1 %v8190_v52 }
  0x41   : > { %8193 = vmatprep.subr.bf16.mxu1 %v8192_v53 }
  0x44   : > { %8195 = vmatpush3.bf16.msra.mxu1 %v8194_v58 }
  0x45   : > { %8197 = vmatprep.subr.bf16.mxu1 %v8196_v59 }
  0x48   : > { %8199 = vmatpush3.bf16.msra.mxu1 %v8198_v0 }
  0x49   : > { %8201 = vmatprep.subr.bf16.mxu1 %v8200_v1 }
  0x4c   : > { %8203 = vmatpush3.bf16.msra.mxu1 %v8202_v6 }
  0x4d   : > { %8205 = vmatprep.subr.bf16.mxu1 %v8204_v7 }
  0x50   : > { %8207 = vmatpush3.bf16.msra.mxu1 %v8206_v10 }
  0x51   : > { %8209 = vmatprep.subr.bf16.mxu1 %v8208_v15 }
  0x54   : > { %8211 = vmatpush3.bf16.msra.mxu1 %v8210_v17 }
  0x55   : > { %8213 = vmatprep.subr.bf16.mxu1 %v8212_v20 }
  0x58   : > { %8215 = vmatpush3.bf16.msra.mxu1 %v8214_v23 }
  0x59   : > { %8217 = vmatprep.subr.bf16.mxu1 %v8216_v27 }
  0x5c   : > { %8219 = vmatpush3.bf16.msra.mxu1 %v8218_v29 }
  0x5d   : > { %8221 = vmatprep.subr.bf16.mxu1 %v8220_v33 }
 0x103   : > { %v7405_v35 = vpop.f32.mrb[0].mxu0 }
 0x104   : > { %v9323_v37 = vadd.f32 %v7405_v35, %v5999_v34  ;;  %v537_v38 = vpop.f32.mrb[1].mxu0 }
 0x105   : > { %v9325_v40 = vadd.f32 %v5999_v34, %v537_v38 }
 0x106   : > { %v577_v41 = vand.u32 2147483647, %v9323_v37  ;;  %v697_v57 = vmul.f32 -0.5, %v9323_v37  ;;  %v737_v15 = vmax.f32 %v9323_v37, 0.0 }
 0x107   : > { %v576_v44 = vand.u32 2147483647, %v9325_v40  ;;  %v7408_v45 = vpop.f32.mrb[2].mxu0  ;;  %v696_v62 = vmul.f32 -0.5, %v9325_v40  ;;  %v736_v18 = vmax.f32 %v9325_v40, 0.0 }
 0x108   : > { %v585_v46 = vmul.f32 0.70710677, %v577_v41  ;;  %v9329_v47 = vadd.f32 %v7408_v45, %v5999_v34  ;;  %v547_v48 = vpop.f32.mrb[3].mxu0  ;;  %v705_v5 = vmul.f32 %v697_v57, %v9323_v37  ;;  %v9354_v17 = vmul.f32 0.5, %v577_v41 }
 0x109   : > { %v584_v49 = vmul.f32 0.70710677, %v576_v44  ;;  %v9331_v50 = vadd.f32 %v5999_v34, %v547_v48  ;;  %v704_v8 = vmul.f32 %v696_v62, %v9325_v40  ;;  %v9357_v19 = vmul.f32 0.5, %v576_v44 }
 0x10a   : > { %v593_v51 = vmul.f32 0.3275911, %v585_v46  ;;  %v579_v52 = vand.u32 2147483647, %v9329_v47  ;;  %v714_v14 = vmul.f32 1.442695, %v705_v5 }
 0x10b   : > { %v592_v53 = vmul.f32 0.3275911, %v584_v49  ;;  %v7411_v56 = vpop.f32.mrb[4].mxu0  ;;  %v578_v59 = vand.u32 2147483647, %v9331_v50  ;;  %v699_v26 = vmul.f32 -0.5, %v9329_v47 }
 0x10c   : > { %v601_v54 = vadd.f32 1.0, %v593_v51  ;;  %v587_v55 = vmul.f32 0.70710677, %v579_v52  ;;  %v557_v60 = vpop.f32.mrb[5].mxu0  ;;  %v9339_v2 = vadd.f32 %v7411_v56, %v5999_v34  ;;  %v712_v21 = vmul.f32 1.442695, %v704_v8 }
 0x10d   : > { %v600_v58 = vadd.f32 1.0, %v592_v53  ;;  %v586_v63 = vmul.f32 0.70710677, %v578_v59  ;;  %v9341_v3 = vadd.f32 %v5999_v34, %v557_v60  ;;  %v739_v27 = vmax.f32 %v9329_v47, 0.0 }
 0x10e   : > { %8799 = vrcp.f32 %v601_v54  ;;  %v595_v61 = vmul.f32 0.3275911, %v587_v55  ;;  %v581_v7 = vand.u32 2147483647, %v9339_v2  ;;  %v698_v28 = vmul.f32 -0.5, %v9331_v50 }
 0x10f   : > { %8801 = vrcp.f32 %v600_v58  ;;  %v7414_v0 = vpop.f32.mrb[6].mxu0  ;;  %v594_v6 = vmul.f32 0.3275911, %v586_v63  ;;  %v580_v10 = vand.u32 2147483647, %v9341_v3  ;;  %v9373_v38 = vmul.f32 0.5, %v579_v52 }
 0x110   : > { %v603_v1 = vadd.f32 1.0, %v595_v61  ;;  %v567_v4 = vpop.f32.mrb[7].mxu0  ;;  %v9347_v11 = vadd.f32 %v7414_v0, %v5999_v34  ;;  %v589_v12 = vmul.f32 0.70710677, %v581_v7  ;;  %v701_v41 = vmul.f32 -0.5, %v9339_v2 }
 0x111   : > { %v602_v9 = vadd.f32 1.0, %v594_v6  ;;  %v588_v16 = vmul.f32 0.70710677, %v580_v10  ;;  %v9360_v24 = vadd.f32 %v5999_v34, %v567_v4  ;;  %v707_v51 = vmul.f32 %v699_v26, %v9329_v47 }
 0x112   : > { %8803 = vrcp.f32 %v603_v1  ;;  %v597_v20 = vmul.f32 0.3275911, %v589_v12  ;;  %v583_v23 = vand.u32 2147483647, %v9347_v11  ;;  %v706_v53 = vmul.f32 %v698_v28, %v9331_v50 }
 0x113   : > { %8805 = vrcp.f32 %v602_v9  ;;  %v596_v22 = vmul.f32 0.3275911, %v588_v16  ;;  %v582_v46 = vand.u32 2147483647, %v9360_v24  ;;  %v700_v54 = vmul.f32 -0.5, %v9341_v3 }
 0x114   : > { %v605_v29 = vadd.f32 1.0, %v597_v20  ;;  %8807 = vpow2.f32 %v714_v14  ;;  %v591_v35 = vmul.f32 0.70710677, %v583_v23  ;;  %v709_v60 = vmul.f32 %v701_v41, %v9339_v2 }
 0x115   : > { %v604_v33 = vadd.f32 1.0, %v596_v22  ;;  %v590_v57 = vmul.f32 0.70710677, %v582_v46  ;;  %v703_v61 = vmul.f32 -0.5, %v9347_v11  ;;  %v718_v5 = vmul.f32 1.442695, %v707_v51 }
 0x116   : > { %8809 = vrcp.f32 %v605_v29  ;;  %v599_v45 = vmul.f32 0.3275911, %v591_v35  ;;  %v708_v8 = vmul.f32 %v700_v54, %v9341_v3  ;;  %v716_v14 = vmul.f32 1.442695, %v706_v53 }
 0x117   : > { %8811 = vrcp.f32 %v604_v33  ;;  %v598_v1 = vmul.f32 0.3275911, %v590_v57  ;;  %v9398_v22 = vmul.f32 0.5, %v578_v59  ;;  %v711_v26 = vmul.f32 %v703_v61, %v9347_v11 }
 0x118   : > { %v9362_v25 = vpop.eup %8799  ;;  %v607_v56 = vadd.f32 1.0, %v599_v45  ;;  %8813 = vpow2.f32 %v712_v21  ;;  %v722_v33 = vmul.f32 1.442695, %v709_v60 }
 0x119   : > { %v9367_v30 = vpop.eup %8801  ;;  %v625_v31 = vmul.f32 1.0614054, %v9362_v25  ;;  %v606_v16 = vadd.f32 1.0, %v598_v1 }
 0x11a   : > { %v624_v34 = vmul.f32 1.0614054, %v9367_v30  ;;  %8815 = vrcp.f32 %v607_v56 }
 0x11b   : > { %v633_v44 = vadd.f32 -1.4531521, %v625_v31  ;;  %8817 = vrcp.f32 %v606_v16 }
 0x11c   : > { %v9377_v48 = vpop.eup %8803  ;;  %v632_v49 = vadd.f32 -1.4531521, %v624_v34  ;;  %8819 = vpow2.f32 %v718_v5 }
 0x11d   : > { %v641_v52 = vmul.f32 %v9362_v25, %v633_v44  ;;  %v627_v55 = vmul.f32 1.0614054, %v9377_v48  ;;  %v9389_v62 = vpop.eup %8805  ;;  %v720_v44 = vmul.f32 1.442695, %v708_v8  ;;  %8821 = vpow2.f32 %v716_v14 }
 0x11e   : > { %v640_v58 = vmul.f32 %v9367_v30, %v632_v49  ;;  %v626_v6 = vmul.f32 1.0614054, %v9389_v62  ;;  %v8808_v28 = vpop.eup %8807  ;;  %8823 = vpow2.f32 %v722_v33  ;;  %v702_v8 = vmul.f32 -0.5, %v9360_v24 }
 0x11f   : > { %v649_v63 = vadd.f32 1.4214138, %v641_v52  ;;  %v635_v0 = vadd.f32 -1.4531521, %v627_v55  ;;  %v726_v55 = vmul.f32 1.442695, %v711_v26  ;;  %8825 = vpow2.f32 %v720_v44 }
 0x120   : > { %v648_v4 = vadd.f32 1.4214138, %v640_v58  ;;  %v634_v21 = vadd.f32 -1.4531521, %v626_v6  ;;  %v9401_v35 = vpop.eup %8809 }
 0x121   : > { %v657_v9 = vmul.f32 %v9362_v25, %v649_v63  ;;  %v643_v12 = vmul.f32 %v9377_v48, %v635_v0  ;;  %v9404_v45 = vpop.eup %8811  ;;  %v629_v51 = vmul.f32 1.0614054, %v9401_v35  ;;  %8827 = vpow2.f32 %v726_v55 }
 0x122   : > { %v656_v20 = vmul.f32 %v9367_v30, %v648_v4  ;;  %v642_v41 = vmul.f32 %v9389_v62, %v634_v21  ;;  %v628_v52 = vmul.f32 1.0614054, %v9404_v45  ;;  %v8814_v60 = vpop.eup %8813 }
 0x123   : > { %v665_v29 = vadd.f32 -0.28449672, %v657_v9  ;;  %v651_v31 = vadd.f32 1.4214138, %v643_v12  ;;  %v637_v58 = vadd.f32 -1.4531521, %v629_v51 }
 0x124   : > { %v664_v34 = vadd.f32 -0.28449672, %v656_v20  ;;  %v650_v54 = vadd.f32 1.4214138, %v642_v41  ;;  %v636_v0 = vadd.f32 -1.4531521, %v628_v52  ;;  %v9412_v1 = vpop.eup %8815 }
 0x125   : > { %v673_v49 = vmul.f32 %v9362_v25, %v665_v29  ;;  %v659_v59 = vmul.f32 %v9377_v48, %v651_v31  ;;  %v645_v6 = vmul.f32 %v9401_v35, %v637_v58  ;;  %v631_v16 = vmul.f32 1.0614054, %v9412_v1 }
 0x126   : > { %v672_v53 = vmul.f32 %v9367_v30, %v664_v34  ;;  %v658_v63 = vmul.f32 %v9389_v62, %v650_v54  ;;  %v644_v14 = vmul.f32 %v9404_v45, %v636_v0  ;;  %v9422_v34 = vpop.eup %8817 }
 0x127   : > { %v681_v56 = vadd.f32 0.2548296, %v673_v49  ;;  %v667_v57 = vadd.f32 -0.28449672, %v659_v59  ;;  %v653_v26 = vadd.f32 1.4214138, %v645_v6  ;;  %v710_v49 = vmul.f32 %v702_v8, %v9360_v24  ;;  %v8820_v59 = vpop.eup %8819 }
 0x128   : > { %v680_v61 = vadd.f32 0.2548296, %v672_v53  ;;  %v666_v12 = vadd.f32 -0.28449672, %v658_v63  ;;  %v652_v31 = vadd.f32 1.4214138, %v644_v14  ;;  %v8822_v52 = vpop.eup %8821 }
 0x129   : > { %v689_v4 = vmul.f32 %v9362_v25, %v681_v56  ;;  %v675_v5 = vmul.f32 %v9377_v48, %v667_v57  ;;  %v639_v33 = vadd.f32 -1.4531521, %v631_v16  ;;  %v661_v44 = vmul.f32 %v9401_v35, %v653_v26 }
 0x12a   : > { %v688_v9 = vmul.f32 %v9367_v30, %v680_v61  ;;  %v674_v25 = vmul.f32 %v9389_v62, %v666_v12  ;;  %v660_v53 = vmul.f32 %v9404_v45, %v652_v31  ;;  %v8824_v61 = vpop.eup %8823  ;;  %v724_v0 = vmul.f32 1.442695, %v710_v49 }
 0x12b   : > { %v729_v20 = vmul.f32 %v8808_v28, %v689_v4  ;;  %v683_v21 = vadd.f32 0.2548296, %v675_v5  ;;  %v647_v54 = vmul.f32 %v9412_v1, %v639_v33  ;;  %v669_v56 = vadd.f32 -0.28449672, %v661_v44  ;;  %v8826_v4 = vpop.eup %8825 }
 0x12c   : > { %v728_v29 = vmul.f32 %v8814_v60, %v688_v9  ;;  %v682_v51 = vadd.f32 0.2548296, %v674_v25  ;;  %8829 = vpow2.f32 %v724_v0 }
 0x12d   : > { %v753_v41 = vmul.f32 %v9354_v17, %v729_v20  ;;  %v691_v30 = vmul.f32 %v9377_v48, %v683_v21  ;;  %v630_v48 = vmul.f32 1.0614054, %v9422_v34  ;;  %v655_v60 = vadd.f32 1.4214138, %v647_v54  ;;  %v9449_v20 = vld [vmem:[#allocation2 + $0x38] sm:$0xff]  ;;  %v8828_v21 = vpop.eup %8827 }
 0x12e   : > { %v752_v28 = vmul.f32 %v9357_v19, %v728_v29  ;;  %v690_v58 = vmul.f32 %v9389_v62, %v682_v51  ;;  %v668_v19 = vadd.f32 -0.28449672, %v660_v53  ;;  %v677_v37 = vmul.f32 %v9401_v35, %v669_v56 }
 0x12f   : > { %v9433_v55 = vsub.f32 %v737_v15, %v753_v41  ;;  %v731_v17 = vmul.f32 %v8820_v59, %v691_v30  ;;  %v638_v15 = vadd.f32 -1.4531521, %v630_v48  ;;  %v663_v40 = vmul.f32 %v9412_v1, %v655_v60 }
 0x130   : > { %v760_v57 = vsub.f32 %v736_v18, %v752_v28  ;;  %v730_v6 = vmul.f32 %v8822_v52, %v690_v58  ;;  %v676_v8 = vmul.f32 %v9404_v45, %v668_v19  ;;  %v685_v62 = vadd.f32 0.2548296, %v677_v37  ;;  %v9489_v37 = vld [vmem:[#allocation2 + $0x58] sm:$0xff] }
 0x131   : > { %773 = vst [vmem:[#allocation2 + $0x40] sm:$0xff] %v9433_v55  ;;  %v755_v63 = vmul.f32 %v9373_v38, %v731_v17  ;;  %v646_v9 = vmul.f32 %v9422_v34, %v638_v15  ;;  %v738_v38 = vmax.f32 %v9331_v50, 0.0  ;;  %v671_v16 = vadd.f32 -0.28449672, %v663_v40 }
 0x132   : > { %v769_v5 = vrot.slane %v760_v57, 2  ;;  %v754_v12 = vmul.f32 %v9398_v22, %v730_v6  ;;  %v684_v14 = vadd.f32 0.2548296, %v676_v8  ;;  %v693_v29 = vmul.f32 %v9401_v35, %v685_v62 }
 0x133   : > { %v763_v18 = vsub.f32 %v739_v27, %v755_v63  ;;  %v654_v25 = vadd.f32 1.4214138, %v646_v9  ;;  %v679_v31 = vmul.f32 %v9412_v1, %v671_v16  ;;  %v749_v50 = vmul.f32 0.5, %v581_v7 }
 0x134   : > { %771 = vst [vmem:[#allocation2 + $0x20] sm:$0xc0] %v769_v5  ;;  %772 = vst [vmem:[#allocation2 + $0x30] sm:$0x3f] %v769_v5  ;;  %v762_v47 = vsub.f32 %v738_v38, %v754_v12  ;;  %v692_v27 = vmul.f32 %v9404_v45, %v684_v14  ;;  %v733_v33 = vmul.f32 %v8824_v61, %v693_v29  ;;  %v983_v41 = vrot.slane %v9449_v20, 1  ;;  %v9512_v29 = vld [vmem:[#allocation2 + $0x78] sm:$0xff] }
 0x135   : > { %v780_v26 = vrot.slane %v763_v18, 4  ;;  %v662_v22 = vmul.f32 %v9422_v34, %v654_v25  ;;  %v748_v35 = vmul.f32 0.5, %v580_v10  ;;  %v687_v49 = vadd.f32 0.2548296, %v679_v31  ;;  %v9502_v18 = vld [vmem:[#allocation2 + $0x68] sm:$0xff] }
 0x136   : > { %v775_v30 = vrot.slane %v762_v47, 6  ;;  %v732_v44 = vmul.f32 %v8826_v4, %v692_v27  ;;  %v741_v45 = vmax.f32 %v9339_v2, 0.0  ;;  %v757_v59 = vmul.f32 %v749_v50, %v733_v33  ;;  %v8830_v0 = vpop.eup %8829  ;;  %v9520_v50 = vld [vmem:[#allocation2 + $0x88] sm:$0xff] }
 0x137   : > { %782 = vst [vmem:[#allocation2 + $0x70] ss:$-12 sps:$4 sm:$0xff] %v780_v26   ;;  %v670_v28 = vadd.f32 -0.28449672, %v662_v22  ;;  %v740_v51 = vmax.f32 %v9341_v3, 0.0  ;;  %v695_v7 = vmul.f32 %v9412_v1, %v687_v49  ;;  %v984_v2 = vsel %vm970_vm0, %v979_v43, %v983_v41 }
 0x138   : > { %777 = vst [vmem:[#allocation2 + $0x50] sm:$0xfc] %v775_v30  ;;  %778 = vst [vmem:[#allocation2 + $0x60] sm:$0x3] %v775_v30  ;;  %v756_v53 = vmul.f32 %v748_v35, %v732_v44  ;;  %v9463_v54 = vsub.f32 %v741_v45, %v757_v59  ;;  %v987_v56 = vrot.slane %v9072_v13, 1  ;;  %v751_v1 = vmul.f32 0.5, %v583_v23 }
 0x139   : > { %v678_v52 = vmul.f32 %v9422_v34, %v670_v28  ;;  %v735_v3 = vmul.f32 %v8828_v21, %v695_v7  ;;  %v743_v58 = vmax.f32 %v9347_v11, 0.0  ;;  %v991_v8 = vrot.slane %v9489_v37, 1 }
 0x13a   : > { %v764_v48 = vsub.f32 %v740_v51, %v756_v53  ;;  %789 = vst [vmem:[#allocation2 + $0x90] sm:$0xff] %v9463_v54  ;;  %v988_v6 = vsel %vm970_vm0, %v983_v41, %v987_v56  ;;  %v742_v62 = vmax.f32 %v9360_v24, 0.0  ;;  %v985_v12 = vrot.slane %v9433_v55, 1  ;;  %v9540_v53 = vld [vmem:[#allocation2 + $0x98] sm:$0xff] }
 0x13b   : > { %v9466_v17 = vld [vmem:[#allocation2 + $0x20] sm:$0xff]  ;;  %v9471_v10 = vld [vmem:[#allocation2 + $0x30] sm:$0xff]  ;;  %v686_v19 = vadd.f32 0.2548296, %v678_v52  ;;  %v759_v13 = vmul.f32 %v751_v1, %v735_v3  ;;  %v992_v14 = vsel %vm970_vm0, %v987_v56, %v991_v8  ;;  %v995_v16 = vrot.slane %v9502_v18, 1  ;;  %v9545_v56 = vld [vmem:[#allocation2 + $0xa8] sm:$0xff] }
 0x13c   : > { %v977_v57 = vrot.slane %v9466_v17, 1  ;;  %v9480_v60 = vrot.slane %v9466_v17, 2  ;;  %v9483_v43 = vrot.slane %v9471_v10, 2  ;;  %v785_v61 = vrot.slane %v764_v48, 2 }
 0x13d   : > { %v981_v23 = vrot.slane %v9471_v10, 1  ;;  %v694_v15 = vmul.f32 %v9422_v34, %v686_v19  ;;  %v767_v4 = vsub.f32 %v743_v58, %v759_v13  ;;  %v996_v47 = vsel %vm970_vm0, %v991_v8, %v995_v16  ;;  %v9554_v19 = vld [vmem:[#allocation2 + $0x40] sm:$0xff] }
 0x13e   : > { %v978_v63 = vsel %vm970_vm0, %v972_v39, %v977_v57  ;;  %v9495_v11 = vsel %vm1348_vm1, %v9480_v60, %v9483_v43  ;;  %787 = vst [vmem:[#allocation2 + $0x70] sm:$0xc0] %v785_v61  ;;  %788 = vst [vmem:[#allocation2 + $0x80] sm:$0x3f] %v785_v61  ;;  %v750_v39 = vmul.f32 0.5, %v582_v46  ;;  %v999_v27 = vrot.slane %v9512_v29, 1 }
 0x13f   : > { %1120 = vmatmul.mubr.f32.gmra.mrb[2].mxu1 %v978_v63  ;;  %v734_v5 = vmul.f32 %v8830_v0, %v694_v15  ;;  %v796_v34 = vrot.slane %v767_v4, 4  ;;  %v982_v40 = vsel %vm970_vm0, %v977_v57, %v981_v23  ;;  %v9505_v38 = vld [vmem:[#allocation2 + $0x50] sm:$0xff]  ;;  %v986_v21 = vsel %vm970_vm0, %v981_v23, %v985_v12  ;;  %v9514_v25 = vld [vmem:[#allocation2 + $0x60] sm:$0xff]  ;;  %v9550_v57 = vld [vmem:[#allocation2 + $0xb8] sm:$0xff] }
 0x140   : > { %1124 = vmatprep.mubr.f32.mxu1 %v984_v2  ;;  %v989_v26 = vrot.slane %v9505_v38, 1  ;;  %v993_v33 = vrot.slane %v9514_v25, 1  ;;  %v1000_v41 = vsel %vm970_vm0, %v995_v16, %v999_v27  ;;  %v1003_v30 = vrot.slane %v9520_v50, 1 }
 0x141   : > { %v758_v9 = vmul.f32 %v750_v39, %v734_v5  ;;  %798 = vst [vmem:[#allocation2 + $0xc0] ss:$-12 sps:$4 sm:$0xff] %v796_v34   ;;  %v1919_v44 = vrot.slane %v9466_v17, 3  ;;  %v1924_v35 = vrot.slane %v9471_v10, 3  ;;  %v1007_v7 = vrot.slane %v9540_v53, 1  ;;  %v9568_v39 = vld [vmem:[#allocation2 + $0xc8] sm:$0xff] }
 0x142   : > { %v990_v31 = vsel %vm970_vm0, %v985_v12, %v989_v26  ;;  %v994_v49 = vsel %vm970_vm0, %v989_v26, %v993_v33  ;;  %v1004_v51 = vsel %vm970_vm0, %v999_v27, %v1003_v30  ;;  %v1011_v3 = vrot.slane %v9545_v56, 1 }
 0x143   : > { %1125 = vmatmul.mubr.f32.gmra.mrb[4].mxu1 %v982_v40  ;;  %v766_v46 = vsub.f32 %v742_v62, %v758_v9  ;;  %v9537_v28 = vsel %vm1917_vm2, %v1919_v44, %v1924_v35  ;;  %v1008_v48 = vsel %vm970_vm0, %v1003_v30, %v1007_v7  ;;  %v12522_v61 = vrot.slane %v9466_v17, 4  ;;  %v6039_v30 = vld [vmem:[%s12511_s4 + $0x200] sm:$0xff] }
 0x144   : > { %1129 = vmatprep.mubr.f32.mxu1 %v988_v6  ;;  %v2185_v13 = vrot.slane %v9471_v10, 4  ;;  %v1005_v63 = vrot.slane %v9463_v54, 1  ;;  %v1012_v23 = vsel %vm970_vm0, %v1007_v7, %v1011_v3  ;;  %v1015_v15 = vrot.slane %v9550_v57, 1  ;;  %v2404_v7 = vld [vmem:[#allocation2 + $0x50] sm:$0xff] }
 0x145   : > { %v791_v24 = vrot.slane %v766_v46, 6  ;;  %v9522_v22 = vld [vmem:[#allocation2 + $0x70] sm:$0xff]  ;;  %v9530_v59 = vld [vmem:[#allocation2 + $0x80] sm:$0xff]  ;;  %v12521_v6 = vrot.slane %v9554_v19, 4  ;;  %v1019_v62 = vrot.slane %v9568_v39, 1 }
 0x146   : > { %v997_v45 = vrot.slane %v9522_v22, 1  ;;  %v1001_v2 = vrot.slane %v9530_v59, 1  ;;  %v9564_v0 = vsel %vm2178_vm3, %v12522_v61, %v2185_v13  ;;  %v1016_v40 = vsel %vm970_vm0, %v1011_v3, %v1015_v15  ;;  %v908_v46 = vld [vmem:[#allocation2 + $0xd8] sm:$0x1] }
 0x147   : > { %1130 = vmatmul.mubr.f32.gmra.mrb[6].mxu1 %v986_v21  ;;  %793 = vst [vmem:[#allocation2 + $0xa0] sm:$0xfc] %v791_v24  ;;  %794 = vst [vmem:[#allocation2 + $0xb0] sm:$0x3] %v791_v24  ;;  %v9576_v34 = vsel %vm2178_vm3, %v2185_v13, %v12521_v6  ;;  %v1020_v16 = vsel %vm970_vm0, %v1015_v15, %v1019_v62  ;;  %v1023_v21 = vrot.slane %v908_v46, 1  ;;  %v6058_v3 = vld [vmem:[%s12511_s4 + $0x298] sm:$0xff] }
 0x148   : > { %1134 = vmatprep.mubr.f32.mxu1 %v992_v14  ;;  %v998_v52 = vsel %vm970_vm0, %v993_v33, %v997_v45  ;;  %v1002_v1 = vsel %vm970_vm0, %v997_v45, %v1001_v2  ;;  %v1006_v4 = vsel %vm970_vm0, %v1001_v2, %v1005_v63  ;;  %v9582_v14 = vld [vmem:[#allocation2 + $0xc0] sm:$0xff] }
 0x149   : > { %v1017_v24 = vrot.slane %v9582_v14, 1  ;;  %v1024_v27 = vsel %vm970_vm0, %v1019_v62, %v1023_v21  ;;  %v2402_v45 = vld [vmem:[#allocation2 + $0x40] sm:$0xff]  ;;  %v6041_v21 = vld [vmem:[%s12511_s4 + $0x210] sm:$0xff] }
 0x14a   : > { %v847_v13 = vld [vmem:[#allocation2] sm:$0xff] }
 0x14b   : > { %1135 = vmatmul.mubr.f32.gmra.mrb[8].mxu1 %v990_v31 }
 0x14c   : > { %1139 = vmatprep.mubr.f32.mxu1 %v996_v47  ;;  %v907_v47 = vld [vmem:[#allocation2 + $0xd0] sm:$0x1] }
 0x14d   : > { %v1021_v33 = vrot.slane %v907_v47, 1 }
 0x14e   : > { %v9552_v58 = vld [vmem:[#allocation2 + $0xa0] sm:$0xff]  ;;  %v9571_v8 = vld [vmem:[#allocation2 + $0xb0] sm:$0xff] }
 0x14f   : > { %1140 = vmatmul.mubr.f32.gmra.mrb[10].mxu1 %v994_v49  ;;  %v1009_v5 = vrot.slane %v9552_v58, 1  ;;  %v1013_v12 = vrot.slane %v9571_v8, 1  ;;  %v9592_v49 = vld [vmem:[#allocation2 + $0x30] sm:$0xff]  ;;  %v1022_v2 = vsel %vm970_vm0, %v1017_v24, %v1021_v33  ;;  %v2414_v62 = vld [vmem:[#allocation2 + $0xa0] sm:$0xff]  ;;  %v6060_v33 = vld [vmem:[%s12511_s4 + $0x2a8] sm:$0xff] }
 0x150   : > { %1144 = vmatprep.mubr.f32.mxu1 %v1000_v41  ;;  %v848_v41 = vld [vmem:[#allocation2 + $0x8] sm:$0xff]  ;;  %v12519_v15 = vrot.slane %v9592_v49, 6 }
 0x151   : > { %v1010_v9 = vsel %vm970_vm0, %v1005_v63, %v1009_v5  ;;  %v1014_v26 = vsel %vm970_vm0, %v1009_v5, %v1013_v12  ;;  %v1018_v31 = vsel %vm970_vm0, %v1013_v12, %v1017_v24  ;;  %v2408_v63 = vld [vmem:[#allocation2 + $0x70] sm:$0xff]  ;;  %v3019_v12 = vrot.slane %v2404_v7, 6  ;;  %v2418_v24 = vld [vmem:[#allocation2 + $0xc0] sm:$0xff] }
 0x153   : > { %1145 = vmatmul.mubr.f32.gmra.mrb[12].mxu1 %v998_v52  ;;  %v2406_v52 = vld [vmem:[#allocation2 + $0x60] sm:$0xff] }
 0x154   : > { %1149 = vmatprep.mubr.f32.mxu1 %v1004_v51  ;;  %v6040_v51 = vld [vmem:[%s12511_s4 + $0x208] sm:$0xff]  ;;  %v3023_v46 = vrot.slane %v2406_v52, 6  ;;  %v3039_v52 = vrot.slane %v2414_v62, 6 }
 0x155   : > { %v8222_v5 = vpack.c.bf16 %v6040_v51, %v6039_v30 }
 0x156   : > { %v9629_v30 = vsel %vm3008_vm4, %v3019_v12, %v3023_v46 }
 0x157   : > { %1150 = vmatmul.mubr.f32.gmra.mrb[14].mxu1 %v1002_v1  ;;  %v9604_v1 = vld [vmem:[#allocation2 + $0xd0] sm:$0xff] }
 0x158   : > { %1154 = vmatprep.mubr.f32.mxu1 %v1008_v48  ;;  %v6057_v48 = vld [vmem:[%s12511_s4 + $0x290] sm:$0xff]  ;;  %12526 = vst [vmem:[#allocation4_spill] sm:$0xff] %v9604_v1 }
 0x15b   : > { %1155 = vmatmul.mubr.f32.gmra.mrb[16].mxu1 %v1006_v4  ;;  %v3015_v4 = vrot.slane %v2402_v45, 6  ;;  %v3027_v45 = vrot.slane %v2408_v63, 6  ;;  %v6044_v63 = vld [vmem:[%s12511_s4 + $0x228] sm:$0xff] }
 0x15c   : > { %1159 = vmatprep.mubr.f32.mxu1 %v1012_v23  ;;  %v2410_v23 = vld [vmem:[#allocation2 + $0x80] sm:$0xff] }
 0x15d   : > { %v9616_v47 = vsel %vm3008_vm4, %v12519_v15, %v3015_v4  ;;  %v3031_v51 = vrot.slane %v2410_v23, 6 }
 0x15f   : > { %1160 = vmatmul.mubr.f32.gmra.mrb[18].mxu1 %v1010_v9  ;;  %v2416_v9 = vld [vmem:[#allocation2 + $0xb0] sm:$0xff]  ;;  %v9636_v15 = vsel %vm3008_vm4, %v3027_v45, %v3031_v51 }
 0x160   : > { %1164 = vmatprep.mubr.f32.mxu1 %v1016_v40  ;;  %v2412_v40 = vld [vmem:[#allocation2 + $0x90] sm:$0xff] }
 0x161   : > { %v3035_v7 = vrot.slane %v2412_v40, 6  ;;  %v6062_v40 = vld [vmem:[%s12511_s4 + $0x2b8] sm:$0xff] }
 0x163   : > { %1165 = vmatmul.mubr.f32.gmra.mrb[20].mxu1 %v1014_v26  ;;  %v6042_v26 = vld [vmem:[%s12511_s4 + $0x218] sm:$0xff]  ;;  %v9648_v23 = vsel %vm3008_vm4, %v3035_v7, %v3039_v52 }
 0x164   : > { %1169 = vmatprep.mubr.f32.mxu1 %v1020_v16  ;;  %v8224_v16 = vpack.c.bf16 %v6058_v3, %v6057_v48  ;;  %v8226_v48 = vpack.c.bf16 %v6042_v26, %v6041_v21  ;;  %v9633_v3 = vsel %vm3008_vm4, %v3023_v46, %v3027_v45  ;;  %v6045_v26 = vld [vmem:[%s12511_s4 + $0x230] sm:$0xff]  ;;  %v6047_v45 = vld [vmem:[%s12511_s4 + $0x240] sm:$0xff] }
 0x167   : > { %1170 = vmatmul.mubr.f32.gmra.mrb[22].mxu1 %v1018_v31  ;;  %v6059_v31 = vld [vmem:[%s12511_s4 + $0x2a0] sm:$0xff] }
 0x168   : > { %1174 = vmatprep.mubr.f32.mxu1 %v1024_v27  ;;  %v12520_v27 = vrot.slane %v9604_v1, 6 }
 0x16b   : > { %1175 = vmatmul.mubr.f32.gmra.mrb[24].mxu1 %v1022_v2  ;;  %v3043_v2 = vrot.slane %v2416_v9, 6 }
 0x16c   : > { %1243 = vmatprep.mubr.f32.mxu1 %v848_v41  ;;  %v9626_v41 = vsel %vm3008_vm4, %v3015_v4, %v3019_v12  ;;  %v3047_v4 = vrot.slane %v2418_v24, 6  ;;  %v8228_v12 = vpack.c.bf16 %v6060_v33, %v6059_v31  ;;  %v6046_v24 = vld [vmem:[%s12511_s4 + $0x238] sm:$0xff]  ;;  %v6063_v31 = vld [vmem:[%s12511_s4 + $0x2c0] sm:$0xff] }
 0x16d   : > { %v9657_v62 = vsel %vm3008_vm4, %v3039_v52, %v3043_v2  ;;  %v6066_v52 = vld [vmem:[%s12511_s4 + $0x2d8] sm:$0xff] }
 0x16e   : > { %12527 = vst [vmem:[#allocation5_spill] sm:$0xff] %v9657_v62  ;;  %v9660_v9 = vsel %vm3008_vm4, %v3043_v2, %v3047_v4  ;;  %v9665_v46 = vsel %vm3008_vm4, %v3047_v4, %v12520_v27  ;;  %v9696_v2 = vld [vmem:[#allocation2 + $0x48] sm:$0xff] }
 0x16f   : > { %1244 = vmatmul.mubr.f32.vlgmr.msra.gmra.mrb[26].mxu1 %v847_v13  ;;  %v6043_v13 = vld [vmem:[%s12511_s4 + $0x220] sm:$0xff]  ;;  %12528 = vst [vmem:[#allocation6_spill] sm:$0xff] %v9660_v9  ;;  %12529 = vst [vmem:[#allocation7_spill] sm:$0xff] %v9665_v46 }
 0x170   : > { %8223 = vmatpush3.bf16.msra.mxu1 %v8222_v5  ;;  %1247 = vmatprep.mubr.f32.mxu1 %v9202_v32  ;;  %v9645_v32 = vsel %vm3008_vm4, %v3031_v51, %v3035_v7  ;;  %v6061_v5 = vld [vmem:[%s12511_s4 + $0x2b0] sm:$0xff]  ;;  %v6048_v51 = vld [vmem:[%s12511_s4 + $0x248] sm:$0xff] }
 0x171   : > { %8225 = vmatprep.subr.bf16.mxu1 %v8224_v16  ;;  %v8230_v16 = vpack.c.bf16 %v6044_v63, %v6043_v13  ;;  %v8232_v21 = vpack.c.bf16 %v6062_v40, %v6061_v5  ;;  %v6065_v7 = vld [vmem:[%s12511_s4 + $0x2d0] sm:$0xff]  ;;  %v6050_v13 = vld [vmem:[%s12511_s4 + $0x258] sm:$0xff]  ;;  %v6067_v63 = vld [vmem:[%s12511_s4 + $0x2e0] sm:$0xff] }
 0x172   : > { %v8240_v4 = vpack.c.bf16 %v6066_v52, %v6065_v7  ;;  %v6068_v5 = vld [vmem:[%s12511_s4 + $0x2e8] sm:$0xff] }
 0x173   : > { %1248 = vmatmul.mubr.f32.gmra.mrb[28].mxu1 %v9205_v36  ;;  %v6064_v36 = vld [vmem:[%s12511_s4 + $0x2c8] sm:$0xff] }
 0x174   : > { %1252 = vmatprep.mubr.f32.mxu1 %v9212_v42  ;;  %8227 = vmatpush3.bf16.msra.mxu1 %v8226_v48  ;;  %v8234_v42 = vpack.c.bf16 %v6046_v24, %v6045_v26  ;;  %v8236_v33 = vpack.c.bf16 %v6064_v36, %v6063_v31  ;;  %v8238_v48 = vpack.c.bf16 %v6048_v51, %v6047_v45  ;;  %v6052_v26 = vld [vmem:[%s12511_s4 + $0x268] sm:$0xff]  ;;  %v6069_v24 = vld [vmem:[%s12511_s4 + $0x2f0] sm:$0xff]  ;;  %v6070_v31 = vld [vmem:[%s12511_s4 + $0x2f8] sm:$0xff] }
 0x175   : > { %8229 = vmatprep.subr.bf16.mxu1 %v8228_v12  ;;  %v6049_v12 = vld [vmem:[%s12511_s4 + $0x250] sm:$0xff]  ;;  %v6054_v45 = vld [vmem:[%s12511_s4 + $0x278] sm:$0xff]  ;;  %v6087_v51 = vld [vmem:[%s12511_s4 + $0x380] sm:$0xff] }
 0x176   : > { %v8242_v40 = vpack.c.bf16 %v6050_v13, %v6049_v12  ;;  %v6088_v7 = vld [vmem:[%s12511_s4 + $0x388] sm:$0xff]  ;;  %v6469_v12 = vpop.f32.mrb[0].mxu1 }
 0x177   : > { %1253 = vmatmul.mubr.f32.gmra.mrb[30].mxu1 %v9466_v17  ;;  %v6470_v13 = vpop.f32.mrb[1].mxu1 }
 0x178   : > { %1257 = vmatprep.mubr.f32.mxu1 %v9449_v20  ;;  %8231 = vmatpush3.bf16.msra.mxu1 %v8230_v16  ;;  %v8244_v16 = vpack.c.bf16 %v6068_v5, %v6067_v63  ;;  %v8923_v5 = vld [vmem:[#allocation2 + $0x18] sm:$0xff]  ;;  %v9774_v13 = vrot.slane %v9449_v20, 2 }
 0x179   : > { %8233 = vmatprep.subr.bf16.mxu1 %v8232_v21  ;;  %v6051_v21 = vld [vmem:[%s12511_s4 + $0x260] sm:$0xff] }
 0x17a   : > { %v8246_v36 = vpack.c.bf16 %v6052_v26, %v6051_v21 }
 0x17b   : > { %1258 = vmatmul.mubr.f32.gmra.mrb[32].mxu1 %v9471_v10 }
 0x17c   : > { %1262 = vmatprep.mubr.f32.mxu1 %v9696_v2  ;;  %8235 = vmatpush3.bf16.msra.mxu1 %v8234_v42  ;;  %v8248_v42 = vpack.c.bf16 %v6070_v31, %v6069_v24  ;;  %v6071_v24 = vld [vmem:[%s12511_s4 + $0x300] sm:$0xff]  ;;  %v6072_v31 = vld [vmem:[%s12511_s4 + $0x308] sm:$0xff] }
 0x17d   : > { %8237 = vmatprep.subr.bf16.mxu1 %v8236_v33  ;;  %v6053_v33 = vld [vmem:[%s12511_s4 + $0x270] sm:$0xff] }
 0x17e   : > { %v8250_v52 = vpack.c.bf16 %v6054_v45, %v6053_v33  ;;  %v8925_v33 = vld [vmem:[#allocation2 + $0x10] sm:$0xff] }
 0x17f   : > { %1263 = vmatmul.mubr.f32.gmra.mrb[34].mxu1 %v9433_v55  ;;  %v1350_v45 = vrot.slane %v8925_v33, 2  ;;  %v6076_v33 = vld [vmem:[%s12511_s4 + $0x328] sm:$0xff] }
 0x180   : > { %1267 = vmatprep.mubr.f32.mxu1 %v9489_v37  ;;  %8239 = vmatpush3.bf16.msra.mxu1 %v8238_v48  ;;  %v8252_v48 = vpack.c.bf16 %v6088_v7, %v6087_v51  ;;  %v6089_v51 = vld [vmem:[%s12511_s4 + $0x390] sm:$0xff]  ;;  %v6090_v7 = vld [vmem:[%s12511_s4 + $0x398] sm:$0xff] }
 0x181   : > { %8241 = vmatprep.subr.bf16.mxu1 %v8240_v4  ;;  %v1308_v4 = vld [vmem:[#allocation2 + $0x8] sm:$0xfc]  ;;  %v8256_v12 = vpack.c.bf16 %v6090_v7, %v6089_v51  ;;  %v1356_v51 = vsel %vm1348_vm1, %v1350_v45, %v9480_v60  ;;  %v6093_v7 = vld [vmem:[%s12511_s4 + $0x3b0] sm:$0xff] }
 0x182   : > { %v1352_v63 = vrot.slane %v1308_v4, 2 }
 0x183   : > { %1268 = vmatmul.mubr.f32.gmra.mrb[36].mxu1 %v9505_v38 }
 0x184   : > { %1272 = vmatprep.mubr.f32.mxu1 %v9502_v18  ;;  %8243 = vmatpush3.bf16.msra.mxu1 %v8242_v40  ;;  %v1353_v40 = vrot.slane %v8923_v5, 2  ;;  %v6074_v5 = vld [vmem:[%s12511_s4 + $0x318] sm:$0xff] }
 0x185   : > { %8245 = vmatprep.subr.bf16.mxu1 %v8244_v16  ;;  %v1307_v16 = vld [vmem:[#allocation2] sm:$0xfc] }
 0x186   : > { %v1349_v21 = vrot.slane %v1307_v16, 2  ;;  %v1354_v26 = vsel %vm1348_vm1, %v1352_v63, %v1353_v40  ;;  %v6073_v63 = vld [vmem:[%s12511_s4 + $0x310] sm:$0xff]  ;;  %v6091_v16 = vld [vmem:[%s12511_s4 + $0x3a0] sm:$0xff] }
 0x187   : > { %1273 = vmatmul.mubr.f32.gmra.mrb[38].mxu1 %v9514_v25  ;;  %v8258_v20 = vpack.c.bf16 %v6074_v5, %v6073_v63  ;;  %v6078_v63 = vld [vmem:[%s12511_s4 + $0x338] sm:$0xff]  ;;  %v6095_v5 = vld [vmem:[%s12511_s4 + $0x3c0] sm:$0xff] }
 0x188   : > { %1277 = vmatprep.mubr.f32.mxu1 %v9512_v29  ;;  %8247 = vmatpush3.bf16.msra.mxu1 %v8246_v36  ;;  %v9758_v36 = vld [vmem:[#allocation2 + $0x28] sm:$0xff] }
 0x189   : > { %8249 = vmatprep.subr.bf16.mxu1 %v8248_v42  ;;  %v9761_v42 = vrot.slane %v9758_v36, 2 }
 0x18b   : > { %1278 = vmatmul.mubr.f32.gmra.mrb[40].mxu1 %v9522_v22  ;;  %v1358_v4 = vsel %vm1348_vm1, %v1353_v40, %v9761_v42  ;;  %v6092_v40 = vld [vmem:[%s12511_s4 + $0x3a8] sm:$0xff] }
 0x18c   : > { %1282 = vmatprep.mubr.f32.mxu1 %v9520_v50  ;;  %8251 = vmatpush3.bf16.msra.mxu1 %v8250_v52  ;;  %v1351_v52 = vsel %vm1348_vm1, %v1349_v21, %v1350_v45  ;;  %v9791_v21 = vsel %vm1348_vm1, %v9761_v42, %v9774_v13 }
 0x18d   : > { %8253 = vmatprep.subr.bf16.mxu1 %v8252_v48  ;;  %v8254_v48 = vpack.c.bf16 %v6072_v31, %v6071_v24  ;;  %v8260_v24 = vpack.c.bf16 %v6092_v40, %v6091_v16  ;;  %v6075_v31 = vld [vmem:[%s12511_s4 + $0x320] sm:$0xff]  ;;  %v6096_v16 = vld [vmem:[%s12511_s4 + $0x3c8] sm:$0xff] }
 0x18f   : > { %1283 = vmatmul.mubr.f32.gmra.mrb[42].mxu1 %v9530_v59 }
 0x190   : > { %1287 = vmatprep.mubr.f32.mxu1 %v9540_v53 }
 0x193   : > { %1288 = vmatmul.mubr.f32.gmra.mrb[44].mxu1 %v9463_v54 }
 0x194   : > { %1292 = vmatprep.mubr.f32.mxu1 %v9545_v56 }
 0x197   : > { %1293 = vmatmul.mubr.f32.gmra.mrb[46].mxu1 %v9552_v58 }
 0x198   : > { %1297 = vmatprep.mubr.f32.mxu1 %v9550_v57 }
 0x19b   : > { %1298 = vmatmul.mubr.f32.gmra.mrb[48].mxu1 %v9571_v8 }
 0x19c   : > { %1302 = vmatprep.mubr.f32.mxu1 %v9568_v39 }
 0x19f   : > { %1303 = vmatmul.mubr.f32.gmra.mrb[50].mxu1 %v9582_v14 }
 0x1a0   : > { %1493 = vmatprep.mubr.f32.mxu1 %v1354_v26  ;;  %v1365_v26 = vrot.slane %v9696_v2, 2  ;;  %v6094_v2 = vld [vmem:[%s12511_s4 + $0x3b8] sm:$0xff] }
 0x1a1   : > { %v8264_v45 = vpack.c.bf16 %v6094_v2, %v6093_v7  ;;  %v9840_v7 = vrot.slane %v9505_v38, 2 }
 0x1a3   : > { %1494 = vmatmul.mubr.f32.vlgmr.msra.gmra.mrb[52].mxu1 %v1351_v52  ;;  %v8262_v52 = vpack.c.bf16 %v6076_v33, %v6075_v31  ;;  %v8268_v31 = vpack.c.bf16 %v6096_v16, %v6095_v5  ;;  %v6079_v33 = vld [vmem:[%s12511_s4 + $0x340] sm:$0xff]  ;;  %v1371_v5 = vrot.slane %v9514_v25, 2 }
 0x1a4   : > { %8255 = vmatpush3.bf16.msra.mxu1 %v8254_v48  ;;  %1497 = vmatprep.mubr.f32.mxu1 %v1358_v4  ;;  %v1366_v48 = vsel %vm1348_vm1, %v9774_v13, %v1365_v26  ;;  %v9812_v4 = vrot.slane %v9489_v37, 2  ;;  %v1363_v37 = vrot.slane %v9433_v55, 2  ;;  %v6099_v16 = vld [vmem:[%s12511_s4 + $0x3e0] sm:$0xff] }
 0x1a5   : > { %8257 = vmatprep.subr.bf16.mxu1 %v8256_v12  ;;  %v6077_v12 = vld [vmem:[%s12511_s4 + $0x330] sm:$0xff] }
 0x1a6   : > { %v8266_v40 = vpack.c.bf16 %v6078_v63, %v6077_v12  ;;  %v1364_v55 = vsel %vm1348_vm1, %v9483_v43, %v1363_v37  ;;  %v6082_v12 = vld [vmem:[%s12511_s4 + $0x358] sm:$0xff]  ;;  %v1368_v63 = vsel %vm1348_vm1, %v1363_v37, %v9840_v7  ;;  %v9873_v37 = vrot.slane %v9520_v50, 2  ;;  %v6101_v50 = vld [vmem:[%s12511_s4 + $0x3f0] sm:$0xff] }
 0x1a7   : > { %1498 = vmatmul.mubr.f32.gmra.mrb[54].mxu1 %v1356_v51  ;;  %v6080_v51 = vld [vmem:[%s12511_s4 + $0x348] sm:$0xff] }
 0x1a8   : > { %1502 = vmatprep.mubr.f32.mxu1 %v9791_v21  ;;  %8259 = vmatpush3.bf16.msra.mxu1 %v8258_v20  ;;  %v1370_v20 = vsel %vm1348_vm1, %v1365_v26, %v9812_v4  ;;  %v6098_v26 = vld [vmem:[%s12511_s4 + $0x3d8] sm:$0xff]  ;;  %v8270_v2 = vpack.c.bf16 %v6080_v51, %v6079_v33  ;;  %v6084_v33 = vld [vmem:[%s12511_s4 + $0x368] sm:$0xff]  ;;  %v9883_v51 = vsel %vm1348_vm1, %v9840_v7, %v1371_v5 }
 0x1a9   : > { %8261 = vmatprep.subr.bf16.mxu1 %v8260_v24  ;;  %v1373_v24 = vrot.slane %v9502_v18, 2  ;;  %v6097_v18 = vld [vmem:[%s12511_s4 + $0x3d0] sm:$0xff] }
 0x1aa   : > { %v8272_v38 = vpack.c.bf16 %v6098_v26, %v6097_v18 }
 0x1ab   : > { %1503 = vmatmul.mubr.f32.gmra.mrb[56].mxu1 %v9495_v11 }
 0x1ac   : > { %1507 = vmatprep.mubr.f32.mxu1 %v1366_v48  ;;  %8263 = vmatpush3.bf16.msra.mxu1 %v8262_v52  ;;  %v9850_v52 = vsel %vm1348_vm1, %v9812_v4, %v1373_v24  ;;  %v1377_v48 = vrot.slane %v9512_v29, 2  ;;  %v6100_v29 = vld [vmem:[%s12511_s4 + $0x3e8] sm:$0xff] }
 0x1ad   : > { %8265 = vmatprep.subr.bf16.mxu1 %v8264_v45  ;;  %v6081_v45 = vld [vmem:[%s12511_s4 + $0x350] sm:$0xff]  ;;  %v8276_v25 = vpack.c.bf16 %v6100_v29, %v6099_v16 }
 0x1ae   : > { %v9896_v26 = vsel %vm1348_vm1, %v1377_v48, %v9873_v37 }
 0x1af   : > { %1508 = vmatmul.mubr.f32.gmra.mrb[58].mxu1 %v1364_v55  ;;  %v6102_v55 = vld [vmem:[%s12511_s4 + $0x3f8] sm:$0xff] }
 0x1b0   : > { %1512 = vmatprep.mubr.f32.mxu1 %v1370_v20  ;;  %8267 = vmatpush3.bf16.msra.mxu1 %v8266_v40  ;;  %v8274_v40 = vpack.c.bf16 %v6082_v12, %v6081_v45  ;;  %v9870_v20 = vsel %vm1348_vm1, %v1373_v24, %v1377_v48  ;;  %v1375_v24 = vrot.slane %v9522_v22, 2  ;;  %v1385_v22 = vrot.slane %v9540_v53, 2  ;;  %v6086_v45 = vld [vmem:[%s12511_s4 + $0x378] sm:$0xff]  ;;  %v6119_v53 = vld [vmem:[%s12511_s4 + $0x480] sm:$0xff]  ;;  %v6120_v48 = vld [vmem:[%s12511_s4 + $0x488] sm:$0xff] }
 0x1b1   : > { %8269 = vmatprep.subr.bf16.mxu1 %v8268_v31  ;;  %v6083_v31 = vld [vmem:[%s12511_s4 + $0x360] sm:$0xff]  ;;  %v8284_v29 = vpack.c.bf16 %v6120_v48, %v6119_v53 }
 0x1b2   : > { %v8278_v18 = vpack.c.bf16 %v6084_v33, %v6083_v31  ;;  %v9906_v12 = vsel %vm1348_vm1, %v1371_v5, %v1375_v24  ;;  %v1386_v5 = vsel %vm1348_vm1, %v9873_v37, %v1385_v22  ;;  %v1393_v33 = vrot.slane %v9550_v57, 2 }
 0x1b3   : > { %1513 = vmatmul.mubr.f32.gmra.mrb[60].mxu1 %v1368_v63  ;;  %v9909_v63 = vrot.slane %v9530_v59, 2  ;;  %v9922_v59 = vrot.slane %v9545_v56, 2  ;;  %v1391_v57 = vrot.slane %v9571_v8, 2  ;;  %v1309_v8 = vld [vmem:[#allocation2 + $0xd0] sm:$0x3] }
 0x1b4   : > { %1517 = vmatprep.mubr.f32.mxu1 %v9850_v52  ;;  %8271 = vmatpush3.bf16.msra.mxu1 %v8270_v2  ;;  %v8280_v2 = vpack.c.bf16 %v6102_v55, %v6101_v50  ;;  %v9936_v50 = vrot.slane %v9552_v58, 2 }
 0x1b5   : > { %8273 = vmatprep.subr.bf16.mxu1 %v8272_v38  ;;  %v6085_v38 = vld [vmem:[%s12511_s4 + $0x370] sm:$0xff]  ;;  %v1390_v31 = vsel %vm1348_vm1, %v1385_v22, %v9922_v59 }
 0x1b6   : > { %v8282_v16 = vpack.c.bf16 %v6086_v45, %v6085_v38  ;;  %v1569_v38 = vld [vmem:[#allocation2 + $0x18] sm:$0xfc] }
 0x1b7   : > { %1518 = vmatmul.mubr.f32.gmra.mrb[62].mxu1 %v9883_v51  ;;  %v1660_v53 = vrot.slane %v1569_v38, 2  ;;  %v6105_v38 = vld [vmem:[%s12511_s4 + $0x410] sm:$0xff] }
 0x1b8   : > { %1522 = vmatprep.mubr.f32.mxu1 %v9870_v20  ;;  %8275 = vmatpush3.bf16.msra.mxu1 %v8274_v40  ;;  %v9926_v40 = vsel %vm1348_vm1, %v1375_v24, %v9909_v63  ;;  %v9940_v24 = vsel %vm1348_vm1, %v9922_v59, %v1393_v33 }
 0x1b9   : > { %8277 = vmatprep.subr.bf16.mxu1 %v8276_v25  ;;  %v1383_v25 = vrot.slane %v9463_v54, 2  ;;  %v9943_v54 = vrot.slane %v9568_v39, 2  ;;  %v9958_v39 = vrot.slane %v9582_v14, 2  ;;  %v1662_v14 = vsel %vm1348_vm1, %v1660_v53, %v9761_v42  ;;  %v6122_v42 = vld [vmem:[%s12511_s4 + $0x498] sm:$0xff]  ;;  %v6123_v53 = vld [vmem:[%s12511_s4 + $0x4a0] sm:$0xff] }
 0x1bb   : > { %1523 = vmatmul.mubr.f32.gmra.mrb[64].mxu1 %v9906_v12  ;;  %v1384_v56 = vsel %vm1348_vm1, %v9909_v63, %v1383_v25  ;;  %v1388_v55 = vsel %vm1348_vm1, %v1383_v25, %v9936_v50  ;;  %v9951_v58 = vsel %vm1348_vm1, %v1393_v33, %v9943_v54  ;;  %v9966_v48 = vsel %vm1348_vm1, %v1391_v57, %v9958_v39  ;;  %v6104_v25 = vld [vmem:[%s12511_s4 + $0x408] sm:$0xff] }
 0x1bc   : > { %1527 = vmatprep.mubr.f32.mxu1 %v9896_v26  ;;  %8279 = vmatpush3.bf16.msra.mxu1 %v8278_v18  ;;  %v1310_v18 = vld [vmem:[#allocation2 + $0xd8] sm:$0x3] }
 0x1bd   : > { %8281 = vmatprep.subr.bf16.mxu1 %v8280_v2  ;;  %v1401_v22 = vrot.slane %v1310_v18, 2  ;;  %v9955_v2 = vsel %vm1348_vm1, %v9936_v50, %v1391_v57 }
 0x1bf   : > { %1528 = vmatmul.mubr.f32.gmra.mrb[66].mxu1 %v9926_v40  ;;  %v1402_v45 = vsel %vm1348_vm1, %v9943_v54, %v1401_v22 }
 0x1c0   : > { %1532 = vmatprep.mubr.f32.mxu1 %v1386_v5  ;;  %8283 = vmatpush3.bf16.msra.mxu1 %v8282_v16  ;;  %v1399_v16 = vrot.slane %v1309_v8, 2  ;;  %v1568_v5 = vld [vmem:[#allocation2 + $0x10] sm:$0xfc]  ;;  %v6106_v8 = vld [vmem:[%s12511_s4 + $0x418] sm:$0xff] }
 0x1c1   : > { %8285 = vmatprep.subr.bf16.mxu1 %v8284_v29  ;;  %v6103_v29 = vld [vmem:[%s12511_s4 + $0x400] sm:$0xff]  ;;  %v1657_v33 = vrot.slane %v1568_v5, 2  ;;  %v8290_v5 = vpack.c.bf16 %v6106_v8, %v6105_v38 }
 0x1c2   : > { %v8286_v57 = vpack.c.bf16 %v6104_v25, %v6103_v29  ;;  %v6108_v25 = vld [vmem:[%s12511_s4 + $0x428] sm:$0xff]  ;;  %v6127_v38 = vld [vmem:[%s12511_s4 + $0x4c0] sm:$0xff] }
 0x1c3   : > { %1533 = vmatmul.mubr.f32.gmra.mrb[68].mxu1 %v1384_v56  ;;  %v6121_v56 = vld [vmem:[%s12511_s4 + $0x490] sm:$0xff] }
 0x1c4   : > { %1537 = vmatprep.mubr.f32.mxu1 %v1390_v31  ;;  %v1400_v31 = vsel %vm1348_vm1, %v9958_v39, %v1399_v16  ;;  %v8288_v18 = vpack.c.bf16 %v6122_v42, %v6121_v56  ;;  %v6124_v16 = vld [vmem:[%s12511_s4 + $0x4a8] sm:$0xff] }
 0x1c5   : > { %v8292_v29 = vpack.c.bf16 %v6124_v16, %v6123_v53  ;;  %v6129_v16 = vld [vmem:[%s12511_s4 + $0x4d0] sm:$0xff] }
 0x1c7   : > { %1538 = vmatmul.mubr.f32.gmra.mrb[70].mxu1 %v1388_v55  ;;  %v9985_v55 = vld [vmem:[#allocation2 + $0x48] sm:$0xff] }
 0x1c8   : > { %1542 = vmatprep.mubr.f32.mxu1 %v9940_v24  ;;  %v1669_v22 = vrot.slane %v9985_v55, 2 }
 0x1ca   : > { %v1674_v56 = vsel %vm1348_vm1, %v1669_v22, %v9812_v4  ;;  %v6128_v4 = vld [vmem:[%s12511_s4 + $0x4c8] sm:$0xff] }
 0x1cb   : > { %1543 = vmatmul.mubr.f32.gmra.mrb[72].mxu1 %v9955_v2  ;;  %v8300_v8 = vpack.c.bf16 %v6128_v4, %v6127_v38  ;;  %v6117_v4 = vld [vmem:[%s12511_s4 + $0x470] sm:$0xff] }
 0x1cc   : > { %1547 = vmatprep.mubr.f32.mxu1 %v9951_v58 }
 0x1cf   : > { %1548 = vmatmul.mubr.f32.gmra.mrb[74].mxu1 %v9966_v48 }
 0x1d0   : > { %1552 = vmatprep.mubr.f32.mxu1 %v1402_v45  ;;  %v1659_v45 = vsel %vm1348_vm1, %v1657_v33, %v9480_v60  ;;  %v6107_v60 = vld [vmem:[%s12511_s4 + $0x420] sm:$0xff] }
 0x1d1   : > { %v8294_v33 = vpack.c.bf16 %v6108_v25, %v6107_v60  ;;  %v6113_v60 = vld [vmem:[%s12511_s4 + $0x450] sm:$0xff]  ;;  %v10056_v25 = vld [vmem:[#allocation2 + $0x98] sm:$0xff] }
 0x1d3   : > { %1553 = vmatmul.mubr.f32.gmra.mrb[76].mxu1 %v1400_v31  ;;  %v6125_v31 = vld [vmem:[%s12511_s4 + $0x4b0] sm:$0xff] }
 0x1d4   : > { %1801 = vmatprep.mubr.f32.mxu1 %v1662_v14  ;;  %v1670_v14 = vsel %vm1348_vm1, %v9774_v13, %v1669_v22  ;;  %v1667_v13 = vrot.slane %v9554_v19, 2 }
 0x1d6   : > { %v1672_v53 = vsel %vm1348_vm1, %v1667_v13, %v9840_v7  ;;  %v6114_v7 = vld [vmem:[%s12511_s4 + $0x458] sm:$0xff] }
 0x1d7   : > { %1802 = vmatmul.mubr.f32.vlgmr.msra.gmra.mrb[78].mxu1 %v1659_v45  ;;  %v6111_v45 = vld [vmem:[%s12511_s4 + $0x440] sm:$0xff] }
 0x1d8   : > { %8287 = vmatpush3.bf16.msra.mxu1 %v8286_v57  ;;  %1805 = vmatprep.mubr.f32.mxu1 %v9791_v21  ;;  %v6126_v21 = vld [vmem:[%s12511_s4 + $0x4b8] sm:$0xff]  ;;  %v6109_v57 = vld [vmem:[%s12511_s4 + $0x430] sm:$0xff] }
 0x1d9   : > { %8289 = vmatprep.subr.bf16.mxu1 %v8288_v18  ;;  %v8296_v42 = vpack.c.bf16 %v6126_v21, %v6125_v31  ;;  %v6110_v18 = vld [vmem:[%s12511_s4 + $0x438] sm:$0xff]  ;;  %v6131_v31 = vld [vmem:[%s12511_s4 + $0x4e0] sm:$0xff]  ;;  %v8306_v21 = vpack.c.bf16 %v6114_v7, %v6113_v60 }
 0x1da   : > { %v8298_v22 = vpack.c.bf16 %v6110_v18, %v6109_v57  ;;  %v1594_v60 = vld [vmem:[#allocation2 + $0xe0] sm:$0x3]  ;;  %v1877_v7 = vld [vmem:[#allocation2 + $0x18] sm:$0xf8] }
 0x1db   : > { %1806 = vmatmul.mubr.f32.gmra.mrb[80].mxu1 %v9495_v11  ;;  %v1668_v11 = vsel %vm1348_vm1, %v9483_v43, %v1667_v13  ;;  %v6112_v43 = vld [vmem:[%s12511_s4 + $0x448] sm:$0xff]  ;;  %v1689_v13 = vrot.slane %v10056_v25, 2 }
 0x1dc   : > { %1810 = vmatprep.mubr.f32.mxu1 %v1670_v14  ;;  %8291 = vmatpush3.bf16.msra.mxu1 %v8290_v5  ;;  %v6130_v5 = vld [vmem:[%s12511_s4 + $0x4d8] sm:$0xff]  ;;  %v8302_v14 = vpack.c.bf16 %v6112_v43, %v6111_v45 }
 0x1dd   : > { %8293 = vmatprep.subr.bf16.mxu1 %v8292_v29  ;;  %v8304_v29 = vpack.c.bf16 %v6130_v5, %v6129_v16  ;;  %v1690_v18 = vsel %vm1348_vm1, %v9873_v37, %v1689_v13  ;;  %v6152_v37 = vld [vmem:[%s12511_s4 + $0x588] sm:$0xff]  ;;  %v1694_v45 = vsel %vm1348_vm1, %v1689_v13, %v9922_v59  ;;  %v10105_v16 = vld [vmem:[#allocation2 + $0xd8] sm:$0xff] }
 0x1de   : > { %v1705_v5 = vrot.slane %v10105_v16, 2  ;;  %v1595_v59 = vld [vmem:[#allocation2 + $0xe8] sm:$0x3] }
 0x1df   : > { %1811 = vmatmul.mubr.f32.gmra.mrb[82].mxu1 %v1668_v11  ;;  %v10083_v11 = vld [vmem:[#allocation2 + $0x90] sm:$0xff] }
 0x1e0   : > { %1815 = vmatprep.mubr.f32.mxu1 %v1674_v56  ;;  %8295 = vmatpush3.bf16.msra.mxu1 %v8294_v33  ;;  %v6115_v56 = vld [vmem:[%s12511_s4 + $0x460] sm:$0xff] }
 0x1e1   : > { %8297 = vmatprep.subr.bf16.mxu1 %v8296_v42  ;;  %v6116_v42 = vld [vmem:[%s12511_s4 + $0x468] sm:$0xff] }
 0x1e2   : > { %v8310_v57 = vpack.c.bf16 %v6116_v42, %v6115_v56  ;;  %v10129_v56 = vld [vmem:[#allocation2 + $0x38] sm:$0xff] }
 0x1e3   : > { %1816 = vmatmul.mubr.f32.gmra.mrb[84].mxu1 %v1672_v53  ;;  %v1926_v42 = vrot.slane %v10129_v56, 3 }
 0x1e4   : > { %1820 = vmatprep.mubr.f32.mxu1 %v9850_v52  ;;  %8299 = vmatpush3.bf16.msra.mxu1 %v8298_v22  ;;  %v6132_v52 = vld [vmem:[%s12511_s4 + $0x4e8] sm:$0xff]  ;;  %v6118_v22 = vld [vmem:[%s12511_s4 + $0x478] sm:$0xff] }
 0x1e5   : > { %8301 = vmatprep.subr.bf16.mxu1 %v8300_v8  ;;  %v8308_v33 = vpack.c.bf16 %v6132_v52, %v6131_v31  ;;  %v8314_v8 = vpack.c.bf16 %v6118_v22, %v6117_v4  ;;  %v1921_v52 = vrot.slane %v1877_v7, 3  ;;  %v1930_v4 = vrot.slane %v9985_v55, 3  ;;  %v6137_v22 = vld [vmem:[%s12511_s4 + $0x510] sm:$0xff] }
 0x1e7   : > { %1821 = vmatmul.mubr.f32.gmra.mrb[86].mxu1 %v9883_v51  ;;  %v6133_v51 = vld [vmem:[%s12511_s4 + $0x4f0] sm:$0xff] }
 0x1e8   : > { %1825 = vmatprep.mubr.f32.mxu1 %v9870_v20  ;;  %8303 = vmatpush3.bf16.msra.mxu1 %v8302_v14  ;;  %v6134_v20 = vld [vmem:[%s12511_s4 + $0x4f8] sm:$0xff]  ;;  %v10110_v14 = vld [vmem:[#allocation2 + $0xd0] sm:$0xff] }
 0x1e9   : > { %8305 = vmatprep.subr.bf16.mxu1 %v8304_v29  ;;  %v8312_v38 = vpack.c.bf16 %v6134_v20, %v6133_v51  ;;  %v1709_v29 = vrot.slane %v1595_v59, 2  ;;  %v6153_v51 = vld [vmem:[%s12511_s4 + $0x590] sm:$0xff]  ;;  %v6154_v20 = vld [vmem:[%s12511_s4 + $0x598] sm:$0xff]  ;;  %v6140_v59 = vld [vmem:[%s12511_s4 + $0x528] sm:$0xff] }
 0x1eb   : > { %1826 = vmatmul.mubr.f32.gmra.mrb[88].mxu1 %v9906_v12  ;;  %v1687_v12 = vrot.slane %v10083_v11, 2  ;;  %v1710_v31 = vsel %vm1348_vm1, %v1705_v5, %v1709_v29  ;;  %v6158_v29 = vld [vmem:[%s12511_s4 + $0x5b8] sm:$0xff] }
 0x1ec   : > { %1830 = vmatprep.mubr.f32.mxu1 %v9896_v26  ;;  %8307 = vmatpush3.bf16.msra.mxu1 %v8306_v21  ;;  %v6151_v26 = vld [vmem:[%s12511_s4 + $0x580] sm:$0xff]  ;;  %v1876_v21 = vld [vmem:[#allocation2 + $0x10] sm:$0xf8] }
 0x1ed   : > { %8309 = vmatprep.subr.bf16.mxu1 %v8308_v33  ;;  %v8316_v43 = vpack.c.bf16 %v6152_v37, %v6151_v26  ;;  %v1688_v53 = vsel %vm1348_vm1, %v9909_v63, %v1687_v12  ;;  %v1706_v63 = vsel %vm1348_vm1, %v9943_v54, %v1705_v5  ;;  %v6136_v33 = vld [vmem:[%s12511_s4 + $0x508] sm:$0xff]  ;;  %v6138_v26 = vld [vmem:[%s12511_s4 + $0x518] sm:$0xff]  ;;  %v6139_v5 = vld [vmem:[%s12511_s4 + $0x520] sm:$0xff] }
 0x1ef   : > { %1831 = vmatmul.mubr.f32.gmra.mrb[90].mxu1 %v9926_v40  ;;  %v1692_v40 = vsel %vm1348_vm1, %v1687_v12, %v9936_v50  ;;  %v1703_v50 = vrot.slane %v10110_v14, 2  ;;  %v6155_v12 = vld [vmem:[%s12511_s4 + $0x5a0] sm:$0xff] }
 0x1f0   : > { %1835 = vmatprep.mubr.f32.mxu1 %v1690_v18  ;;  %8311 = vmatpush3.bf16.msra.mxu1 %v8310_v57 }
 0x1f1   : > { %8313 = vmatprep.subr.bf16.mxu1 %v8312_v38  ;;  %v8320_v38 = vpack.c.bf16 %v6154_v20, %v6153_v51  ;;  %v10198_v51 = vld [vmem:[#allocation2 + $0x78] sm:$0xff] }
 0x1f2   : > { %v1942_v20 = vrot.slane %v10198_v51, 3 }
 0x1f3   : > { %1836 = vmatmul.mubr.f32.gmra.mrb[92].mxu1 %v1688_v53  ;;  %v10156_v53 = vld [vmem:[#allocation2 + $0x58] sm:$0xff] }
 0x1f4   : > { %1840 = vmatprep.mubr.f32.mxu1 %v1694_v45  ;;  %8315 = vmatpush3.bf16.msra.mxu1 %v8314_v8  ;;  %v6156_v8 = vld [vmem:[%s12511_s4 + $0x5a8] sm:$0xff]  ;;  %v8322_v45 = vpack.c.bf16 %v6138_v26, %v6137_v22  ;;  %v10208_v26 = vld [vmem:[#allocation2 + $0x60] sm:$0xff] }
 0x1f5   : > { %8317 = vmatprep.subr.bf16.mxu1 %v8316_v43  ;;  %v1931_v43 = vsel %vm1917_vm2, %v1926_v42, %v1930_v4 }
 0x1f7   : > { %1841 = vmatmul.mubr.f32.gmra.mrb[94].mxu1 %v1692_v40  ;;  %v1934_v40 = vrot.slane %v10156_v53, 3 }
 0x1f8   : > { %1845 = vmatprep.mubr.f32.mxu1 %v9940_v24  ;;  %v1707_v24 = vrot.slane %v1594_v60, 2  ;;  %v1928_v60 = vrot.slane %v9554_v19, 3 }
 0x1f9   : > { %v1935_v7 = vsel %vm1917_vm2, %v1930_v4, %v1934_v40 }
 0x1fa   : > { %v1708_v54 = vsel %vm1348_vm1, %v1703_v50, %v1707_v24  ;;  %v10174_v24 = vld [vmem:[#allocation2 + $0x68] sm:$0xff] }
 0x1fb   : > { %1846 = vmatmul.mubr.f32.gmra.mrb[96].mxu1 %v9955_v2  ;;  %v1922_v2 = vrot.slane %v9758_v36, 3 }
 0x1fc   : > { %1850 = vmatprep.mubr.f32.mxu1 %v9951_v58  ;;  %v1704_v58 = vsel %vm1348_vm1, %v9958_v39, %v1703_v50  ;;  %v1918_v39 = vrot.slane %v1876_v21, 3  ;;  %v8326_v50 = vpack.c.bf16 %v6140_v59, %v6139_v5  ;;  %v1929_v21 = vsel %vm1917_vm2, %v1924_v35, %v1928_v60  ;;  %v10220_v5 = vld [vmem:[#allocation2 + $0x88] sm:$0xff] }
 0x1fd   : > { %v1923_v13 = vsel %vm1917_vm2, %v1921_v52, %v1922_v2  ;;  %v1927_v18 = vsel %vm1917_vm2, %v1922_v2, %v1926_v42  ;;  %v6141_v2 = vld [vmem:[%s12511_s4 + $0x530] sm:$0xff]  ;;  %v1946_v59 = vrot.slane %v10220_v5, 3 }
 0x1fe   : > { %v1920_v37 = vsel %vm1917_vm2, %v1918_v39, %v1919_v44  ;;  %v8324_v44 = vpack.c.bf16 %v6156_v8, %v6155_v12  ;;  %v6161_v12 = vld [vmem:[%s12511_s4 + $0x5d0] sm:$0xff]  ;;  %v6162_v8 = vld [vmem:[%s12511_s4 + $0x5d8] sm:$0xff] }
 0x1ff   : > { %1851 = vmatmul.mubr.f32.gmra.mrb[98].mxu1 %v9966_v48  ;;  %v6135_v48 = vld [vmem:[%s12511_s4 + $0x500] sm:$0xff] }
 0x200   : > { %1855 = vmatprep.mubr.f32.mxu1 %v1706_v63  ;;  %v8318_v57 = vpack.c.bf16 %v6136_v33, %v6135_v48  ;;  %v6157_v63 = vld [vmem:[%s12511_s4 + $0x5b0] sm:$0xff]  ;;  %v6159_v48 = vld [vmem:[%s12511_s4 + $0x5c0] sm:$0xff]  ;;  %v6160_v33 = vld [vmem:[%s12511_s4 + $0x5c8] sm:$0xff] }
 0x201   : > { %v8328_v52 = vpack.c.bf16 %v6158_v29, %v6157_v63  ;;  %v8336_v63 = vpack.c.bf16 %v6162_v8, %v6161_v12  ;;  %v6145_v29 = vld [vmem:[%s12511_s4 + $0x550] sm:$0xff] }
 0x203   : > { %1856 = vmatmul.mubr.f32.gmra.mrb[100].mxu1 %v1704_v58 }
 0x204   : > { %1860 = vmatprep.mubr.f32.mxu1 %v1710_v31  ;;  %v1938_v31 = vrot.slane %v10174_v24, 3 }
 0x206   : > { %v1939_v35 = vsel %vm1917_vm2, %v1934_v40, %v1938_v31 }
 0x207   : > { %1861 = vmatmul.mubr.f32.gmra.mrb[102].mxu1 %v1708_v54  ;;  %v10186_v54 = vld [vmem:[#allocation2 + $0x50] sm:$0xff] }
 0x208   : > { %2062 = vmatprep.mubr.f32.mxu1 %v1923_v13  ;;  %v1932_v13 = vrot.slane %v10186_v54, 3 }
 0x20a   : > { %v1933_v22 = vsel %vm1917_vm2, %v1928_v60, %v1932_v13  ;;  %v6146_v60 = vld [vmem:[%s12511_s4 + $0x558] sm:$0xff] }
 0x20b   : > { %2063 = vmatmul.mubr.f32.vlgmr.msra.gmra.mrb[104].mxu1 %v1920_v37  ;;  %v1936_v37 = vrot.slane %v10208_v26, 3 }
 0x20c   : > { %8319 = vmatpush3.bf16.msra.mxu1 %v8318_v57  ;;  %2066 = vmatprep.mubr.f32.mxu1 %v1927_v18  ;;  %v8332_v57 = vpack.c.bf16 %v6160_v33, %v6159_v48  ;;  %v6143_v18 = vld [vmem:[%s12511_s4 + $0x540] sm:$0xff]  ;;  %v8338_v48 = vpack.c.bf16 %v6146_v60, %v6145_v29  ;;  %v1950_v33 = vrot.slane %v10056_v25, 3  ;;  %v6149_v29 = vld [vmem:[%s12511_s4 + $0x570] sm:$0xff]  ;;  %v6150_v60 = vld [vmem:[%s12511_s4 + $0x578] sm:$0xff] }
 0x20d   : > { %8321 = vmatprep.subr.bf16.mxu1 %v8320_v38  ;;  %v6144_v38 = vld [vmem:[%s12511_s4 + $0x548] sm:$0xff] }
 0x20e   : > { %v8334_v40 = vpack.c.bf16 %v6144_v38, %v6143_v18  ;;  %v10250_v38 = vld [vmem:[#allocation2 + $0x80] sm:$0xff] }
 0x20f   : > { %2067 = vmatmul.mubr.f32.gmra.mrb[106].mxu1 %v9537_v28  ;;  %v6142_v28 = vld [vmem:[%s12511_s4 + $0x538] sm:$0xff] }
 0x210   : > { %2071 = vmatprep.mubr.f32.mxu1 %v1931_v43  ;;  %8323 = vmatpush3.bf16.msra.mxu1 %v8322_v45  ;;  %v8330_v10 = vpack.c.bf16 %v6142_v28, %v6141_v2  ;;  %v6163_v2 = vld [vmem:[%s12511_s4 + $0x5e0] sm:$0xff]  ;;  %v6164_v28 = vld [vmem:[%s12511_s4 + $0x5e8] sm:$0xff] }
 0x211   : > { %8325 = vmatprep.subr.bf16.mxu1 %v8324_v44  ;;  %v1943_v44 = vsel %vm1917_vm2, %v1938_v31, %v1942_v20 }
 0x212   : > { %v6472_v58 = vpop.f32.mrb[2].mxu1 }
 0x213   : > { %v6473_v42 = vpop.f32.mrb[3].mxu1  ;;  %2072 = vmatmul.mubr.f32.gmra.mrb[108].mxu1 %v1929_v21 }
 0x214   : > { %v10195_v39 = vadd.f32 %v6473_v42, %v6472_v58  ;;  %2076 = vmatprep.mubr.f32.mxu1 %v1935_v7  ;;  %8327 = vmatpush3.bf16.msra.mxu1 %v8326_v50  ;;  %v1937_v7 = vsel %vm1917_vm2, %v1932_v13, %v1936_v37  ;;  %v1947_v13 = vsel %vm1917_vm2, %v1942_v20, %v1946_v59  ;;  %v6165_v20 = vld [vmem:[%s12511_s4 + $0x5f0] sm:$0xff] }
 0x215   : > { %8329 = vmatprep.subr.bf16.mxu1 %v8328_v52  ;;  %v10230_v52 = vld [vmem:[#allocation2 + $0x70] sm:$0xff]  ;;  %v8340_v42 = vpack.c.bf16 %v6164_v28, %v6163_v2  ;;  %v6184_v2 = vld [vmem:[%s12511_s4 + $0x688] sm:$0xff] }
 0x216   : > { %v6475_v4 = vpop.f32.mrb[4].mxu1  ;;  %v1940_v31 = vrot.slane %v10230_v52, 3 }
 0x217   : > { %v6476_v45 = vpop.f32.mrb[5].mxu1  ;;  %2077 = vmatmul.mubr.f32.gmra.mrb[110].mxu1 %v1933_v22  ;;  %v6166_v22 = vld [vmem:[%s12511_s4 + $0x5f8] sm:$0xff] }
 0x218   : > { %v10217_v43 = vadd.f32 %v6476_v45, %v6475_v4  ;;  %2081 = vmatprep.mubr.f32.mxu1 %v1939_v35  ;;  %8331 = vmatpush3.bf16.msra.mxu1 %v8330_v10  ;;  %v6147_v10 = vld [vmem:[%s12511_s4 + $0x560] sm:$0xff]  ;;  %v6148_v35 = vld [vmem:[%s12511_s4 + $0x568] sm:$0xff]  ;;  %v1941_v18 = vsel %vm1917_vm2, %v1936_v37, %v1940_v31  ;;  %v1944_v4 = vrot.slane %v10250_v38, 3  ;;  %v1951_v37 = vsel %vm1917_vm2, %v1946_v59, %v1950_v33 }
 0x219   : > { %8333 = vmatprep.subr.bf16.mxu1 %v8332_v57  ;;  %v8342_v45 = vpack.c.bf16 %v6148_v35, %v6147_v10  ;;  %v6183_v59 = vld [vmem:[%s12511_s4 + $0x680] sm:$0xff] }
 0x21a   : > { %v6478_v50 = vpop.f32.mrb[6].mxu1  ;;  %v8348_v35 = vpack.c.bf16 %v6184_v2, %v6183_v59 }
 0x21b   : > { %v6479_v58 = vpop.f32.mrb[7].mxu1  ;;  %2082 = vmatmul.mubr.f32.gmra.mrb[112].mxu1 %v1937_v7  ;;  %v1945_v7 = vsel %vm1917_vm2, %v1940_v31, %v1944_v4  ;;  %v10282_v31 = vld [vmem:[#allocation2 + $0xb8] sm:$0xff] }
 0x21c   : > { %v10239_v21 = vadd.f32 %v6479_v58, %v6478_v50  ;;  %2086 = vmatprep.mubr.f32.mxu1 %v1943_v44  ;;  %8335 = vmatpush3.bf16.msra.mxu1 %v8334_v40  ;;  %v10262_v40 = vld [vmem:[#allocation2 + $0xa8] sm:$0xff]  ;;  %v1958_v10 = vrot.slane %v10282_v31, 3 }
 0x21d   : > { %8337 = vmatprep.subr.bf16.mxu1 %v8336_v63  ;;  %v1954_v44 = vrot.slane %v10262_v40, 3  ;;  %v8344_v63 = vpack.c.bf16 %v6166_v22, %v6165_v20  ;;  %v10286_v20 = vld [vmem:[#allocation2 + $0xa0] sm:$0xff] }
 0x21e   : > { %v6481_v57 = vpop.f32.mrb[8].mxu1  ;;  %v1952_v22 = vrot.slane %v10286_v20, 3 }
 0x21f   : > { %v6482_v12 = vpop.f32.mrb[9].mxu1  ;;  %2087 = vmatmul.mubr.f32.gmra.mrb[114].mxu1 %v1941_v18 }
 0x220   : > { %v10259_v8 = vadd.f32 %v6482_v12, %v6481_v57  ;;  %2091 = vmatprep.mubr.f32.mxu1 %v1947_v13  ;;  %8339 = vmatpush3.bf16.msra.mxu1 %v8338_v48  ;;  %v1948_v48 = vrot.slane %v10083_v11, 3  ;;  %v8346_v13 = vpack.c.bf16 %v6150_v60, %v6149_v29  ;;  %v10296_v60 = vld [vmem:[#allocation2 + $0xb0] sm:$0xff] }
 0x221   : > { %8341 = vmatprep.subr.bf16.mxu1 %v8340_v42  ;;  %v1955_v42 = vsel %vm1917_vm2, %v1950_v33, %v1954_v44  ;;  %v1959_v33 = vsel %vm1917_vm2, %v1954_v44, %v1958_v10  ;;  %v1966_v44 = vrot.slane %v10105_v16, 3 }
 0x222   : > { %v6484_v50 = vpop.f32.mrb[10].mxu1  ;;  %v1949_v18 = vsel %vm1917_vm2, %v1944_v4, %v1948_v48  ;;  %v1953_v4 = vsel %vm1917_vm2, %v1948_v48, %v1952_v22 }
 0x223   : > { %v6485_v28 = vpop.f32.mrb[11].mxu1  ;;  %2092 = vmatmul.mubr.f32.gmra.mrb[116].mxu1 %v1945_v7 }
 0x224   : > { %v10278_v58 = vadd.f32 %v6485_v28, %v6484_v50  ;;  %2096 = vmatprep.mubr.f32.mxu1 %v1951_v37  ;;  %8343 = vmatpush3.bf16.msra.mxu1 %v8342_v45  ;;  %v10292_v45 = vld [vmem:[#allocation2 + $0xc8] sm:$0xff]  ;;  %v1956_v50 = vrot.slane %v10296_v60, 3 }
 0x225   : > { %8345 = vmatprep.subr.bf16.mxu1 %v8344_v63  ;;  %v1962_v63 = vrot.slane %v10292_v45, 3 }
 0x226   : > { %v6487_v57 = vpop.f32.mrb[12].mxu1 }
 0x227   : > { %v6488_v12 = vpop.f32.mrb[13].mxu1  ;;  %2097 = vmatmul.mubr.f32.gmra.mrb[118].mxu1 %v1949_v18  ;;  %v1963_v2 = vsel %vm1917_vm2, %v1958_v10, %v1962_v63 }
 0x228   : > { %v10289_v37 = vadd.f32 %v6488_v12, %v6487_v57  ;;  %2101 = vmatprep.mubr.f32.mxu1 %v1955_v42  ;;  %8347 = vmatpush3.bf16.msra.mxu1 %v8346_v13  ;;  %v1957_v13 = vsel %vm1917_vm2, %v1952_v22, %v1956_v50  ;;  %v10304_v42 = vld [vmem:[#allocation2 + $0xc0] sm:$0xff]  ;;  %v1967_v12 = vsel %vm1917_vm2, %v1962_v63, %v1966_v44  ;;  %v2138_v22 = vld [vmem:[#allocation2 + $0x18] sm:$0xf0] }
 0x229   : > { %8349 = vmatprep.subr.bf16.mxu1 %v8348_v35  ;;  %v1960_v48 = vrot.slane %v10304_v42, 3  ;;  %v1879_v35 = vld [vmem:[#allocation2 + $0xe8] sm:$0x7] }
 0x22a   : > { %v6490_v29 = vpop.f32.mrb[14].mxu1 }
 0x22b   : > { %v6491_v7 = vpop.f32.mrb[15].mxu1  ;;  %2102 = vmatmul.mubr.f32.gmra.mrb[120].mxu1 %v1953_v4  ;;  %v1961_v4 = vsel %vm1917_vm2, %v1956_v50, %v1960_v48  ;;  %v2137_v50 = vld [vmem:[#allocation2 + $0x10] sm:$0xf0] }
 0x22c   : > { %v10299_v59 = vadd.f32 %v6491_v7, %v6490_v29  ;;  %2106 = vmatprep.mubr.f32.mxu1 %v1959_v33  ;;  %v1970_v33 = vrot.slane %v1879_v35, 3  ;;  %v1878_v29 = vld [vmem:[#allocation2 + $0xe0] sm:$0x7]  ;;  %v1964_v7 = vrot.slane %v10110_v14, 3 }
 0x22d   : > { %v1968_v61 = vrot.slane %v1878_v29, 3  ;;  %v6185_v29 = vld [vmem:[%s12511_s4 + $0x690] sm:$0xff] }
 0x22e   : > { %v6493_v28 = vpop.f32.mrb[16].mxu1  ;;  %v1965_v35 = vsel %vm1917_vm2, %v1960_v48, %v1964_v7  ;;  %v2187_v48 = vrot.slane %v10129_v56, 4  ;;  %v2191_v56 = vrot.slane %v9985_v55, 4  ;;  %v6188_v55 = vld [vmem:[%s12511_s4 + $0x6a8] sm:$0xff] }
 0x22f   : > { %v6494_v57 = vpop.f32.mrb[17].mxu1  ;;  %2107 = vmatmul.mubr.f32.gmra.mrb[122].mxu1 %v1957_v13  ;;  %v2182_v13 = vrot.slane %v2138_v22, 4 }
 0x230   : > { %v10307_v18 = vadd.f32 %v6494_v57, %v6493_v28  ;;  %2111 = vmatprep.mubr.f32.mxu1 %v1963_v2  ;;  %v1971_v28 = vsel %vm1917_vm2, %v1966_v44, %v1970_v33  ;;  %v2183_v2 = vrot.slane %v9758_v36, 4  ;;  %v6167_v44 = vld [vmem:[%s12511_s4 + $0x600] sm:$0xff]  ;;  %v6168_v36 = vld [vmem:[%s12511_s4 + $0x608] sm:$0xff]  ;;  %v2179_v33 = vrot.slane %v2137_v50, 4 }
 0x231   : > { %v8350_v22 = vpack.c.bf16 %v6168_v36, %v6167_v44  ;;  %v12530_v50 = vrot.slane %v9466_v17, 4  ;;  %v2192_v36 = vsel %vm2178_vm3, %v2187_v48, %v2191_v56  ;;  %v2195_v17 = vrot.slane %v10156_v53, 4 }
 0x232   : > { %v6496_v10 = vpop.f32.mrb[18].mxu1 }
 0x233   : > { %v6497_v27 = vpop.f32.mrb[19].mxu1  ;;  %2112 = vmatmul.mubr.f32.gmra.mrb[124].mxu1 %v1961_v4  ;;  %v1969_v4 = vsel %vm1917_vm2, %v1964_v7, %v1968_v61  ;;  %v6186_v61 = vld [vmem:[%s12511_s4 + $0x698] sm:$0xff] }
 0x234   : > { %v10312_v6 = vadd.f32 %v6497_v27, %v6496_v10  ;;  %2116 = vmatprep.mubr.f32.mxu1 %v1967_v12  ;;  %v2184_v27 = vsel %vm2178_vm3, %v2182_v13, %v2183_v2  ;;  %v8352_v13 = vpack.c.bf16 %v6186_v61, %v6185_v29  ;;  %v6172_v29 = vld [vmem:[%s12511_s4 + $0x628] sm:$0xff] }
 0x236   : > { %v6499_v63 = vpop.f32.mrb[20].mxu1 }
 0x237   : > { %v6500_v57 = vpop.f32.mrb[21].mxu1  ;;  %2117 = vmatmul.mubr.f32.gmra.mrb[126].mxu1 %v1965_v35  ;;  %v6170_v35 = vld [vmem:[%s12511_s4 + $0x618] sm:$0xff] }
 0x238   : > { %v10317_v1 = vadd.f32 %v6500_v57, %v6499_v63  ;;  %2121 = vmatprep.mubr.f32.mxu1 %v1971_v28  ;;  %v2188_v28 = vsel %vm2178_vm3, %v2183_v2, %v2187_v48  ;;  %v6169_v63 = vld [vmem:[%s12511_s4 + $0x610] sm:$0xff]  ;;  %v6187_v2 = vld [vmem:[%s12511_s4 + $0x6a0] sm:$0xff]  ;;  %v6190_v48 = vld [vmem:[%s12511_s4 + $0x6b8] sm:$0xff] }
 0x239   : > { %v8354_v44 = vpack.c.bf16 %v6170_v35, %v6169_v63  ;;  %v6173_v35 = vld [vmem:[%s12511_s4 + $0x630] sm:$0xff] }
 0x23a   : > { %v6502_v12 = vpop.f32.mrb[22].mxu1 }
 0x23b   : > { %v6503_v10 = vpop.f32.mrb[23].mxu1  ;;  %2122 = vmatmul.mubr.f32.gmra.mrb[128].mxu1 %v1969_v4  ;;  %v2181_v4 = vsel %vm2178_vm3, %v2179_v33, %v12530_v50  ;;  %v6171_v33 = vld [vmem:[%s12511_s4 + $0x620] sm:$0xff] }
 0x23c   : > { %v10334_v7 = vadd.f32 %v6503_v10, %v6502_v12  ;;  %2323 = vmatprep.mubr.f32.mxu1 %v2184_v27  ;;  %v8356_v12 = vpack.c.bf16 %v6188_v55, %v6187_v2  ;;  %v6189_v10 = vld [vmem:[%s12511_s4 + $0x6b0] sm:$0xff]  ;;  %v8358_v53 = vpack.c.bf16 %v6172_v29, %v6171_v33  ;;  %v12531_v29 = vrot.slane %v9554_v19, 4 }
 0x23d   : > { %v8360_v63 = vpack.c.bf16 %v6190_v48, %v6189_v10  ;;  %v6194_v10 = vld [vmem:[%s12511_s4 + $0x6d8] sm:$0xff] }
 0x23e   : > { %v6505_v57 = vpop.f32.mrb[24].mxu1 }
 0x23f   : > { %v6506_v27 = vpop.f32.mrb[25].mxu1  ;;  %2324 = vmatmul.mubr.f32.vlgmr.msra.gmra.mrb[130].mxu1 %v2181_v4  ;;  %v6174_v57 = vld [vmem:[%s12511_s4 + $0x638] sm:$0xff]  ;;  %v6191_v4 = vld [vmem:[%s12511_s4 + $0x6c0] sm:$0xff] }
 0x240   : > { %8351 = vmatpush3.bf16.msra.mxu1 %v8350_v22  ;;  %2327 = vmatprep.mubr.f32.mxu1 %v2188_v28  ;;  %v2196_v28 = vsel %vm2178_vm3, %v2191_v56, %v2195_v17  ;;  %v8362_v55 = vpack.c.bf16 %v6174_v57, %v6173_v35 }
 0x241   : > { %8353 = vmatprep.subr.bf16.mxu1 %v8352_v13  ;;  %v2199_v13 = vrot.slane %v10174_v24, 4  ;;  %v6192_v24 = vld [vmem:[%s12511_s4 + $0x6c8] sm:$0xff] }
 0x242   : > { %v6540_v61 = vpop.f32.mrb[26].mxu1 }
 0x243   : > { %v6541_v22 = vpop.f32.mrb[27].mxu1  ;;  %2328 = vmatmul.mubr.f32.gmra.mrb[132].mxu1 %v9564_v0  ;;  %v2193_v0 = vrot.slane %v10186_v54, 4  ;;  %v2200_v27 = vsel %vm2178_vm3, %v2195_v17, %v2199_v13  ;;  %v8364_v54 = vpack.c.bf16 %v6192_v24, %v6191_v4  ;;  %v6193_v61 = vld [vmem:[%s12511_s4 + $0x6d0] sm:$0xff]  ;;  %v6196_v4 = vld [vmem:[%s12511_s4 + $0x6e8] sm:$0xff] }
 0x244   : > { %2332 = vmatprep.mubr.f32.mxu1 %v2192_v36  ;;  %8355 = vmatpush3.bf16.msra.mxu1 %v8354_v44  ;;  %v2203_v44 = vrot.slane %v10198_v51, 4  ;;  %v6175_v36 = vld [vmem:[%s12511_s4 + $0x640] sm:$0xff]  ;;  %v2197_v51 = vrot.slane %v10208_v26, 4  ;;  %v8368_v26 = vpack.c.bf16 %v6194_v10, %v6193_v61  ;;  %v6181_v10 = vld [vmem:[%s12511_s4 + $0x670] sm:$0xff] }
 0x245   : > { %8357 = vmatprep.subr.bf16.mxu1 %v8356_v12  ;;  %v6176_v12 = vld [vmem:[%s12511_s4 + $0x648] sm:$0xff]  ;;  %v2194_v17 = vsel %vm2178_vm3, %v12531_v29, %v2193_v0 }
 0x246   : > { %v6543_v50 = vpop.f32.mrb[28].mxu1  ;;  %v2204_v19 = vsel %vm2178_vm3, %v2199_v13, %v2203_v44  ;;  %v2201_v13 = vrot.slane %v10230_v52, 4 }
 0x247   : > { %v6544_v56 = vpop.f32.mrb[29].mxu1  ;;  %2333 = vmatmul.mubr.f32.gmra.mrb[134].mxu1 %v9576_v34 }
 0x248   : > { %v6545_v2 = vadd.f32 %v6544_v56, %v6543_v50  ;;  %2337 = vmatprep.mubr.f32.mxu1 %v2196_v28  ;;  %8359 = vmatpush3.bf16.msra.mxu1 %v8358_v53  ;;  %v2207_v53 = vrot.slane %v10220_v5, 4  ;;  %v6177_v28 = vld [vmem:[%s12511_s4 + $0x650] sm:$0xff]  ;;  %v2198_v50 = vsel %vm2178_vm3, %v2193_v0, %v2197_v51  ;;  %v6195_v5 = vld [vmem:[%s12511_s4 + $0x6e0] sm:$0xff]  ;;  %v2211_v0 = vrot.slane %v10056_v25, 4 }
 0x249   : > { %8361 = vmatprep.subr.bf16.mxu1 %v8360_v63  ;;  %v6178_v63 = vld [vmem:[%s12511_s4 + $0x658] sm:$0xff]  ;;  %v8372_v52 = vpack.c.bf16 %v6196_v4, %v6195_v5  ;;  %v6197_v25 = vld [vmem:[%s12511_s4 + $0x6f0] sm:$0xff] }
 0x24a   : > { %v10393_v34 = vadd.f32 %v6545_v2, %v10195_v39  ;;  %v6546_v33 = vpop.f32.mrb[30].mxu1  ;;  %v8366_v39 = vpack.c.bf16 %v6176_v12, %v6175_v36  ;;  %v2208_v2 = vsel %vm2178_vm3, %v2203_v44, %v2207_v53  ;;  %v2202_v12 = vsel %vm2178_vm3, %v2197_v51, %v2201_v13 }
 0x24b   : > { %v6547_v48 = vpop.f32.mrb[31].mxu1  ;;  %2338 = vmatmul.mubr.f32.gmra.mrb[136].mxu1 %v2194_v17  ;;  %v2205_v44 = vrot.slane %v10250_v38, 4  ;;  %v2212_v61 = vsel %vm2178_vm3, %v2207_v53, %v2211_v0  ;;  %v2215_v51 = vrot.slane %v10262_v40, 4  ;;  %v6215_v40 = vld [vmem:[%s12511_s4 + $0x780] sm:$0xff]  ;;  %v6216_v53 = vld [vmem:[%s12511_s4 + $0x788] sm:$0xff] }
 0x24c   : > { %v6548_v22 = vadd.f32 %v6547_v48, %v6546_v33  ;;  %2342 = vmatprep.mubr.f32.mxu1 %v2200_v27  ;;  %8363 = vmatpush3.bf16.msra.mxu1 %v8362_v55  ;;  %v6179_v55 = vld [vmem:[%s12511_s4 + $0x660] sm:$0xff]  ;;  %v6180_v27 = vld [vmem:[%s12511_s4 + $0x668] sm:$0xff]  ;;  %v6198_v33 = vld [vmem:[%s12511_s4 + $0x6f8] sm:$0xff] }
 0x24d   : > { %8365 = vmatprep.subr.bf16.mxu1 %v8364_v54  ;;  %v8376_v38 = vpack.c.bf16 %v6198_v33, %v6197_v25  ;;  %v6182_v48 = vld [vmem:[%s12511_s4 + $0x678] sm:$0xff]  ;;  %v2221_v25 = vrot.slane %v10304_v42, 4  ;;  %v2140_v33 = vld [vmem:[#allocation2 + $0xe8] sm:$0xf] }
 0x24e   : > { %v10414_v35 = vadd.f32 %v6548_v22, %v10217_v43  ;;  %v6549_v57 = vpop.f32.mrb[32].mxu1  ;;  %v8370_v43 = vpack.c.bf16 %v6178_v63, %v6177_v28  ;;  %v2209_v63 = vrot.slane %v10083_v11, 4 }
 0x24f   : > { %v6550_v24 = vpop.f32.mrb[33].mxu1  ;;  %2343 = vmatmul.mubr.f32.gmra.mrb[138].mxu1 %v2198_v50  ;;  %v2219_v50 = vrot.slane %v10282_v31, 4 }
 0x250   : > { %v6551_v56 = vadd.f32 %v6550_v24, %v6549_v57  ;;  %2347 = vmatprep.mubr.f32.mxu1 %v2204_v19  ;;  %8367 = vmatpush3.bf16.msra.mxu1 %v8366_v39  ;;  %v2206_v19 = vsel %vm2178_vm3, %v2201_v13, %v2205_v44  ;;  %v2216_v57 = vsel %vm2178_vm3, %v2211_v0, %v2215_v51  ;;  %v2223_v0 = vrot.slane %v10292_v45, 4 }
 0x251   : > { %8369 = vmatprep.subr.bf16.mxu1 %v8368_v26  ;;  %v8380_v13 = vpack.c.bf16 %v6216_v53, %v6215_v40  ;;  %v2210_v24 = vsel %vm2178_vm3, %v2205_v44, %v2209_v63  ;;  %v2220_v11 = vsel %vm2178_vm3, %v2215_v51, %v2219_v50 }
 0x252   : > { %v10433_v54 = vadd.f32 %v6551_v56, %v10239_v21  ;;  %v6552_v36 = vpop.f32.mrb[34].mxu1  ;;  %v8374_v21 = vpack.c.bf16 %v6180_v27, %v6179_v55  ;;  %v2213_v56 = vrot.slane %v10286_v20, 4  ;;  %v2217_v55 = vrot.slane %v10296_v60, 4 }
 0x253   : > { %v6553_v29 = vpop.f32.mrb[35].mxu1  ;;  %2348 = vmatmul.mubr.f32.gmra.mrb[140].mxu1 %v2202_v12  ;;  %v2227_v12 = vrot.slane %v10105_v16, 4 }
 0x254   : > { %v6554_v17 = vadd.f32 %v6553_v29, %v6552_v36  ;;  %2352 = vmatprep.mubr.f32.mxu1 %v2208_v2  ;;  %8371 = vmatpush3.bf16.msra.mxu1 %v8370_v43  ;;  %v2224_v36 = vsel %vm2178_vm3, %v2219_v50, %v2223_v0 }
 0x255   : > { %8373 = vmatprep.subr.bf16.mxu1 %v8372_v52  ;;  %v2214_v52 = vsel %vm2178_vm3, %v2209_v63, %v2213_v56 }
 0x256   : > { %v10452_v22 = vadd.f32 %v6554_v17, %v10259_v8  ;;  %v6555_v39 = vpop.f32.mrb[36].mxu1  ;;  %v8378_v8 = vpack.c.bf16 %v6182_v48, %v6181_v10  ;;  %v2228_v17 = vsel %vm2178_vm3, %v2223_v0, %v2227_v12  ;;  %v2399_v10 = vld [vmem:[#allocation2 + $0x28] sm:$0xf0]  ;;  %v10489_v48 = vld [vmem:[#allocation2 + $0x38] sm:$0xff]  ;;  %v10511_v0 = vld [vmem:[#allocation2 + $0x30] sm:$0xff] }
 0x257   : > { %v6556_v26 = vpop.f32.mrb[37].mxu1  ;;  %2353 = vmatmul.mubr.f32.gmra.mrb[142].mxu1 %v2206_v19  ;;  %v2490_v53 = vrot.slane %v2399_v10, 4 }
 0x258   : > { %v6557_v28 = vadd.f32 %v6556_v26, %v6555_v39  ;;  %2357 = vmatprep.mubr.f32.mxu1 %v2212_v61  ;;  %8375 = vmatpush3.bf16.msra.mxu1 %v8374_v21  ;;  %v2231_v21 = vrot.slane %v2140_v33, 4  ;;  %v2139_v61 = vld [vmem:[#allocation2 + $0xe0] sm:$0xf]  ;;  %v2491_v26 = vrot.slane %v10489_v48, 4  ;;  %v6202_v33 = vld [vmem:[%s12511_s4 + $0x718] sm:$0xff] }
 0x259   : > { %8377 = vmatprep.subr.bf16.mxu1 %v8376_v38  ;;  %v2225_v38 = vrot.slane %v10110_v14, 4  ;;  %v2229_v19 = vrot.slane %v2139_v61, 4  ;;  %v10497_v14 = vld [vmem:[#allocation2 + $0x48] sm:$0xff]  ;;  %v6219_v61 = vld [vmem:[%s12511_s4 + $0x7a0] sm:$0xff] }
 0x25a   : > { %v10465_v5 = vadd.f32 %v6557_v28, %v10278_v58  ;;  %v6558_v4 = vpop.f32.mrb[38].mxu1  ;;  %v2232_v40 = vsel %vm2178_vm3, %v2227_v12, %v2231_v21  ;;  %v10534_v21 = vld [vmem:[#allocation2 + $0x68] sm:$0xff] }
 0x25b   : > { %v6559_v43 = vpop.f32.mrb[39].mxu1  ;;  %2358 = vmatmul.mubr.f32.gmra.mrb[144].mxu1 %v2210_v24  ;;  %v2226_v63 = vsel %vm2178_vm3, %v2221_v25, %v2225_v38  ;;  %v6199_v24 = vld [vmem:[%s12511_s4 + $0x700] sm:$0xff] }
 0x25c   : > { %v6560_v2 = vadd.f32 %v6559_v43, %v6558_v4  ;;  %2362 = vmatprep.mubr.f32.mxu1 %v2216_v57  ;;  %8379 = vmatpush3.bf16.msra.mxu1 %v8378_v8  ;;  %v2398_v57 = vld [vmem:[#allocation2 + $0x20] sm:$0xf0]  ;;  %v2492_v4 = vsel %vm2178_vm3, %v2490_v53, %v2491_v26  ;;  %v6204_v53 = vld [vmem:[%s12511_s4 + $0x728] sm:$0xff] }
 0x25d   : > { %8381 = vmatprep.subr.bf16.mxu1 %v8380_v13  ;;  %v2230_v13 = vsel %vm2178_vm3, %v2225_v38, %v2229_v19  ;;  %v10542_v38 = vld [vmem:[#allocation2 + $0x40] sm:$0xff] }
 0x25e   : > { %v10472_v31 = vadd.f32 %v6560_v2, %v10289_v37  ;;  %v6561_v58 = vpop.f32.mrb[40].mxu1  ;;  %v2218_v37 = vsel %vm2178_vm3, %v2213_v56, %v2217_v55  ;;  %v2495_v56 = vrot.slane %v10497_v14, 4 }
 0x25f   : > { %v6562_v27 = vpop.f32.mrb[41].mxu1  ;;  %2363 = vmatmul.mubr.f32.gmra.mrb[146].mxu1 %v2214_v52  ;;  %v6217_v52 = vld [vmem:[%s12511_s4 + $0x790] sm:$0xff] }
 0x260   : > { %v6563_v20 = vadd.f32 %v6562_v27, %v6561_v58  ;;  %2367 = vmatprep.mubr.f32.mxu1 %v2220_v11  ;;  %v2487_v11 = vrot.slane %v2398_v57, 4  ;;  %v2488_v58 = vrot.slane %v10511_v0, 4  ;;  %v10520_v27 = vld [vmem:[#allocation2 + $0x58] sm:$0xff]  ;;  %v2496_v12 = vsel %vm2178_vm3, %v2491_v26, %v2495_v56 }
 0x261   : > { %v10557_v57 = vld [vmem:[#allocation2 + $0x78] sm:$0xff] }
 0x262   : > { %v10479_v44 = vadd.f32 %v6563_v20, %v10299_v59  ;;  %v6564_v45 = vpop.f32.mrb[42].mxu1  ;;  %v2222_v59 = vsel %vm2178_vm3, %v2217_v55, %v2221_v25  ;;  %v6218_v55 = vld [vmem:[%s12511_s4 + $0x798] sm:$0xff]  ;;  %v6201_v25 = vld [vmem:[%s12511_s4 + $0x710] sm:$0xff] }
 0x263   : > { %v6565_v29 = vpop.f32.mrb[43].mxu1  ;;  %2368 = vmatmul.mubr.f32.gmra.mrb[148].mxu1 %v2218_v37  ;;  %v2499_v37 = vrot.slane %v10520_v27, 4  ;;  %v8386_v10 = vpack.c.bf16 %v6202_v33, %v6201_v25 }
 0x264   : > { %v6566_v60 = vadd.f32 %v6565_v29, %v6564_v45  ;;  %2372 = vmatprep.mubr.f32.mxu1 %v2224_v36  ;;  %v8384_v45 = vpack.c.bf16 %v6218_v55, %v6217_v52 }
 0x266   : > { %v10485_v51 = vadd.f32 %v6566_v60, %v10307_v18  ;;  %v6567_v16 = vpop.f32.mrb[44].mxu1 }
 0x267   : > { %v6568_v42 = vpop.f32.mrb[45].mxu1  ;;  %2373 = vmatmul.mubr.f32.gmra.mrb[150].mxu1 %v2222_v59 }
 0x268   : > { %v6569_v39 = vadd.f32 %v6568_v42, %v6567_v16  ;;  %2377 = vmatprep.mubr.f32.mxu1 %v2228_v17  ;;  %v2489_v17 = vsel %vm2178_vm3, %v2487_v11, %v2488_v58  ;;  %v6220_v16 = vld [vmem:[%s12511_s4 + $0x7a8] sm:$0xff]  ;;  %v2500_v42 = vsel %vm2178_vm3, %v2495_v56, %v2499_v37  ;;  %v2507_v56 = vrot.slane %v10557_v57, 4  ;;  %v6205_v11 = vld [vmem:[%s12511_s4 + $0x730] sm:$0xff] }
 0x269   : > { %v8388_v19 = vpack.c.bf16 %v6220_v16, %v6219_v61  ;;  %v6207_v16 = vld [vmem:[%s12511_s4 + $0x740] sm:$0xff] }
 0x26a   : > { %v10494_v18 = vadd.f32 %v6569_v39, %v10312_v6  ;;  %v6570_v28 = vpop.f32.mrb[46].mxu1  ;;  %v6200_v6 = vld [vmem:[%s12511_s4 + $0x708] sm:$0xff]  ;;  %v2503_v39 = vrot.slane %v10534_v21, 4 }
 0x26b   : > { %v6571_v8 = vpop.f32.mrb[47].mxu1  ;;  %2378 = vmatmul.mubr.f32.gmra.mrb[152].mxu1 %v2226_v63  ;;  %v8382_v36 = vpack.c.bf16 %v6200_v6, %v6199_v24  ;;  %v10554_v63 = vld [vmem:[#allocation2 + $0x50] sm:$0xff] }
 0x26c   : > { %v6572_v50 = vadd.f32 %v6571_v8, %v6570_v28  ;;  %2382 = vmatprep.mubr.f32.mxu1 %v2232_v40  ;;  %v6203_v40 = vld [vmem:[%s12511_s4 + $0x720] sm:$0xff]  ;;  %v2497_v8 = vrot.slane %v10554_v63, 4  ;;  %v2504_v6 = vsel %vm2178_vm3, %v2499_v37, %v2503_v39 }
 0x26d   : > { %v8390_v24 = vpack.c.bf16 %v6204_v53, %v6203_v40  ;;  %v10600_v40 = vld [vmem:[#allocation2 + $0x98] sm:$0xff]  ;;  %v6225_v53 = vld [vmem:[%s12511_s4 + $0x7d0] sm:$0xff] }
 0x26e   : > { %v10509_v43 = vadd.f32 %v6572_v50, %v10317_v1  ;;  %v6573_v2 = vpop.f32.mrb[48].mxu1  ;;  %v6221_v50 = vld [vmem:[%s12511_s4 + $0x7b0] sm:$0xff] }
 0x26f   : > { %v6574_v20 = vpop.f32.mrb[49].mxu1  ;;  %2383 = vmatmul.mubr.f32.gmra.mrb[154].mxu1 %v2230_v13  ;;  %v6222_v13 = vld [vmem:[%s12511_s4 + $0x7b8] sm:$0xff] }
 0x270   : > { %v6575_v1 = vadd.f32 %v6574_v20, %v6573_v2  ;;  %2631 = vmatprep.mubr.f32.mxu1 %v2492_v4  ;;  %v8392_v2 = vpack.c.bf16 %v6222_v13, %v6221_v50  ;;  %v10574_v20 = vld [vmem:[#allocation2 + $0x60] sm:$0xff]  ;;  %v2515_v13 = vrot.slane %v10600_v40, 4 }
 0x272   : > { %v10531_v29 = vadd.f32 %v6575_v1, %v10334_v7  ;;  %v6576_v60 = vpop.f32.mrb[50].mxu1  ;;  %v2493_v7 = vrot.slane %v10542_v38, 4  ;;  %v2501_v1 = vrot.slane %v10574_v20, 4 }
 0x273   : > { %v6577_v59 = vpop.f32.mrb[51].mxu1  ;;  %2632 = vmatmul.mubr.f32.vlgmr.msra.gmra.mrb[156].mxu1 %v2489_v17  ;;  %v2508_v60 = vsel %vm2178_vm3, %v2503_v39, %v2507_v56 }
 0x274   : > { %8383 = vmatpush3.bf16.msra.mxu1 %v8382_v36  ;;  %2635 = vmatprep.mubr.f32.mxu1 %v2496_v12  ;;  %v2494_v28 = vsel %vm2178_vm3, %v2488_v58, %v2493_v7  ;;  %v6206_v58 = vld [vmem:[%s12511_s4 + $0x738] sm:$0xff]  ;;  %v2498_v55 = vsel %vm2178_vm3, %v2493_v7, %v2497_v8  ;;  %v10577_v36 = vld [vmem:[#allocation2 + $0x88] sm:$0xff]  ;;  %v6223_v12 = vld [vmem:[%s12511_s4 + $0x7c0] sm:$0xff] }
 0x275   : > { %8385 = vmatprep.subr.bf16.mxu1 %v8384_v45  ;;  %v6224_v45 = vld [vmem:[%s12511_s4 + $0x7c8] sm:$0xff]  ;;  %v8394_v33 = vpack.c.bf16 %v6206_v58, %v6205_v11  ;;  %v2511_v17 = vrot.slane %v10577_v36, 4 }
 0x276   : > { %v6611_v26 = vpop.f32.mrb[52].mxu1  ;;  %v8396_v61 = vpack.c.bf16 %v6224_v45, %v6223_v12  ;;  %v6208_v59 = vld [vmem:[%s12511_s4 + $0x748] sm:$0xff]  ;;  %v6227_v12 = vld [vmem:[%s12511_s4 + $0x7e0] sm:$0xff] }
 0x277   : > { %v6612_v4 = vpop.f32.mrb[53].mxu1  ;;  %2636 = vmatmul.mubr.f32.gmra.mrb[158].mxu1 %v2494_v28  ;;  %v6226_v26 = vld [vmem:[%s12511_s4 + $0x7d8] sm:$0xff]  ;;  %v2512_v50 = vsel %vm2178_vm3, %v2507_v56, %v2511_v17  ;;  %v6228_v45 = vld [vmem:[%s12511_s4 + $0x7e8] sm:$0xff] }
 0x278   : > { %2640 = vmatprep.mubr.f32.mxu1 %v2500_v42  ;;  %8387 = vmatpush3.bf16.msra.mxu1 %v8386_v10  ;;  %v2502_v42 = vsel %vm2178_vm3, %v2497_v8, %v2501_v1  ;;  %v8398_v8 = vpack.c.bf16 %v6208_v59, %v6207_v16  ;;  %v8400_v4 = vpack.c.bf16 %v6226_v26, %v6225_v53  ;;  %v6212_v16 = vld [vmem:[%s12511_s4 + $0x768] sm:$0xff]  ;;  %v10643_v53 = vld [vmem:[#allocation2 + $0xb8] sm:$0xff] }
 0x279   : > { %8389 = vmatprep.subr.bf16.mxu1 %v8388_v19  ;;  %v10597_v19 = vld [vmem:[#allocation2 + $0x70] sm:$0xff]  ;;  %v6230_v26 = vld [vmem:[%s12511_s4 + $0x7f8] sm:$0xff] }
 0x27a   : > { %v6614_v52 = vpop.f32.mrb[54].mxu1  ;;  %v2505_v39 = vrot.slane %v10597_v19, 4 }
 0x27b   : > { %v6615_v37 = vpop.f32.mrb[55].mxu1  ;;  %2641 = vmatmul.mubr.f32.gmra.mrb[160].mxu1 %v2498_v55  ;;  %v10623_v55 = vld [vmem:[#allocation2 + $0xa8] sm:$0xff] }
 0x27c   : > { %v6616_v25 = vadd.f32 %v6615_v37, %v6614_v52  ;;  %2645 = vmatprep.mubr.f32.mxu1 %v2504_v6  ;;  %8391 = vmatpush3.bf16.msra.mxu1 %v8390_v24  ;;  %v6209_v24 = vld [vmem:[%s12511_s4 + $0x750] sm:$0xff]  ;;  %v6210_v6 = vld [vmem:[%s12511_s4 + $0x758] sm:$0xff]  ;;  %v2506_v58 = vsel %vm2178_vm3, %v2501_v1, %v2505_v39  ;;  %v10620_v52 = vld [vmem:[#allocation2 + $0x80] sm:$0xff] }
 0x27d   : > { %8393 = vmatprep.subr.bf16.mxu1 %v8392_v2  ;;  %v2509_v56 = vrot.slane %v10620_v52, 4  ;;  %v8402_v1 = vpack.c.bf16 %v6210_v6, %v6209_v24  ;;  %v6213_v6 = vld [vmem:[%s12511_s4 + $0x770] sm:$0xff] }
 0x27e   : > { %v10594_v7 = vadd.f32 %v6616_v25, %v10393_v34  ;;  %v6617_v10 = vpop.f32.mrb[56].mxu1  ;;  %v2516_v25 = vsel %vm2178_vm3, %v2511_v17, %v2515_v13  ;;  %v6229_v17 = vld [vmem:[%s12511_s4 + $0x7f0] sm:$0xff] }
 0x27f   : > { %v6618_v28 = vpop.f32.mrb[57].mxu1  ;;  %2646 = vmatmul.mubr.f32.gmra.mrb[162].mxu1 %v2502_v42  ;;  %v2510_v42 = vsel %vm2178_vm3, %v2505_v39, %v2509_v56  ;;  %v8408_v24 = vpack.c.bf16 %v6230_v26, %v6229_v17 }
 0x280   : > { %v6619_v34 = vadd.f32 %v6618_v28, %v6617_v10  ;;  %2650 = vmatprep.mubr.f32.mxu1 %v2508_v60  ;;  %8395 = vmatpush3.bf16.msra.mxu1 %v8394_v33  ;;  %v2519_v33 = vrot.slane %v10623_v55, 4  ;;  %v8404_v60 = vpack.c.bf16 %v6228_v45, %v6227_v12 }
 0x281   : > { %8397 = vmatprep.subr.bf16.mxu1 %v8396_v61  ;;  %v6211_v61 = vld [vmem:[%s12511_s4 + $0x760] sm:$0xff] }
 0x282   : > { %v10617_v2 = vadd.f32 %v6619_v34, %v10414_v35  ;;  %v6620_v11 = vpop.f32.mrb[58].mxu1  ;;  %v8406_v39 = vpack.c.bf16 %v6212_v16, %v6211_v61 }
 0x283   : > { %v6621_v37 = vpop.f32.mrb[59].mxu1  ;;  %2651 = vmatmul.mubr.f32.gmra.mrb[164].mxu1 %v2506_v58 }
 0x284   : > { %v6622_v35 = vadd.f32 %v6621_v37, %v6620_v11  ;;  %2655 = vmatprep.mubr.f32.mxu1 %v2512_v50  ;;  %8399 = vmatpush3.bf16.msra.mxu1 %v8398_v8  ;;  %v10651_v8 = vld [vmem:[#allocation2 + $0x90] sm:$0xff]  ;;  %v2520_v50 = vsel %vm2178_vm3, %v2515_v13, %v2519_v33  ;;  %v6214_v11 = vld [vmem:[%s12511_s4 + $0x778] sm:$0xff]  ;;  %v10666_v37 = vld [vmem:[#allocation2 + $0xa0] sm:$0xff] }
 0x285   : > { %8401 = vmatprep.subr.bf16.mxu1 %v8400_v4  ;;  %v2523_v4 = vrot.slane %v10643_v53, 4  ;;  %v2517_v13 = vrot.slane %v10666_v37, 4 }
 0x286   : > { %v10640_v59 = vadd.f32 %v6622_v35, %v10433_v54  ;;  %v6623_v10 = vpop.f32.mrb[60].mxu1  ;;  %v2513_v54 = vrot.slane %v10651_v8, 4  ;;  %v10669_v35 = vld [vmem:[#allocation2 + $0xc8] sm:$0xff] }
 0x287   : > { %v6624_v28 = vpop.f32.mrb[61].mxu1  ;;  %2656 = vmatmul.mubr.f32.gmra.mrb[166].mxu1 %v2510_v42  ;;  %v2524_v61 = vsel %vm2178_vm3, %v2519_v33, %v2523_v4  ;;  %v2527_v16 = vrot.slane %v10669_v35, 4 }
 0x288   : > { %v6625_v34 = vadd.f32 %v6624_v28, %v6623_v10  ;;  %2660 = vmatprep.mubr.f32.mxu1 %v2516_v25  ;;  %8403 = vmatpush3.bf16.msra.mxu1 %v8402_v1  ;;  %v2514_v45 = vsel %vm2178_vm3, %v2509_v56, %v2513_v54  ;;  %v6247_v1 = vld [vmem:[%s12511_s4 + $0x880] sm:$0xff]  ;;  %v6248_v25 = vld [vmem:[%s12511_s4 + $0x888] sm:$0xff]  ;;  %v8410_v56 = vpack.c.bf16 %v6214_v11, %v6213_v6  ;;  %v10683_v28 = vld [vmem:[#allocation2 + $0xb0] sm:$0xff] }
 0x289   : > { %8405 = vmatprep.subr.bf16.mxu1 %v8404_v60  ;;  %v8412_v10 = vpack.c.bf16 %v6248_v25, %v6247_v1  ;;  %v2518_v26 = vsel %vm2178_vm3, %v2513_v54, %v2517_v13  ;;  %v2528_v33 = vsel %vm2178_vm3, %v2523_v4, %v2527_v16  ;;  %v10694_v11 = vld [vmem:[#allocation2 + $0xc0] sm:$0xff]  ;;  %v10697_v1 = vld [vmem:[#allocation2 + $0xe8] sm:$0xff] }
 0x28a   : > { %v10663_v58 = vadd.f32 %v6625_v34, %v10452_v22  ;;  %v6626_v12 = vpop.f32.mrb[62].mxu1  ;;  %v2521_v34 = vrot.slane %v10683_v28, 4 }
 0x28b   : > { %v6627_v60 = vpop.f32.mrb[63].mxu1  ;;  %2661 = vmatmul.mubr.f32.gmra.mrb[168].mxu1 %v2514_v45  ;;  %v2525_v45 = vrot.slane %v10694_v11, 4 }
 0x28c   : > { %v6628_v22 = vadd.f32 %v6627_v60, %v6626_v12  ;;  %2665 = vmatprep.mubr.f32.mxu1 %v2520_v50  ;;  %8407 = vmatpush3.bf16.msra.mxu1 %v8406_v39  ;;  %v10686_v12 = vld [vmem:[#allocation2 + $0xd8] sm:$0xff]  ;;  %v2522_v6 = vsel %vm2178_vm3, %v2517_v13, %v2521_v34 }
 0x28d   : > { %8409 = vmatprep.subr.bf16.mxu1 %v8408_v24  ;;  %v2531_v24 = vrot.slane %v10686_v12, 4 }
 0x28e   : > { %v10680_v42 = vadd.f32 %v6628_v22, %v10465_v5  ;;  %v6629_v17 = vpop.f32.mrb[64].mxu1  ;;  %v2535_v22 = vrot.slane %v10697_v1, 4 }
 0x28f   : > { %v6630_v39 = vpop.f32.mrb[65].mxu1  ;;  %2666 = vmatmul.mubr.f32.gmra.mrb[170].mxu1 %v2518_v26  ;;  %v2532_v4 = vsel %vm2178_vm3, %v2527_v16, %v2531_v24  ;;  %v2425_v26 = vld [vmem:[#allocation2 + $0xf8] sm:$0xf] }
 0x290   : > { %v6631_v50 = vadd.f32 %v6630_v39, %v6629_v17  ;;  %2670 = vmatprep.mubr.f32.mxu1 %v2524_v61  ;;  %8411 = vmatpush3.bf16.msra.mxu1 %v8410_v56  ;;  %v10701_v56 = vld [vmem:[#allocation2 + $0xe0] sm:$0xff]  ;;  %v2526_v61 = vsel %vm2178_vm3, %v2521_v34, %v2525_v45 }
 0x291   : > { %8413 = vmatprep.subr.bf16.mxu1 %v8412_v10  ;;  %v10707_v10 = vld [vmem:[#allocation2 + $0xd0] sm:$0xff]  ;;  %v2533_v16 = vrot.slane %v10701_v56, 4 }
 0x292   : > { %v10691_v5 = vadd.f32 %v6631_v50, %v10472_v31  ;;  %v6632_v54 = vpop.f32.mrb[66].mxu1  ;;  %v2529_v17 = vrot.slane %v10707_v10, 4 }
 0x293   : > { %v6633_v25 = vpop.f32.mrb[67].mxu1  ;;  %2671 = vmatmul.mubr.f32.gmra.mrb[172].mxu1 %v2522_v6  ;;  %v2424_v6 = vld [vmem:[#allocation2 + $0xf0] sm:$0xf] }
 0x294   : > { %v6634_v60 = vadd.f32 %v6633_v25, %v6632_v54  ;;  %2675 = vmatprep.mubr.f32.mxu1 %v2528_v33  ;;  %v2536_v33 = vsel %vm2178_vm3, %v2531_v24, %v2535_v22  ;;  %v2539_v54 = vrot.slane %v2425_v26, 4  ;;  %v2530_v34 = vsel %vm2178_vm3, %v2525_v45, %v2529_v17  ;;  %v2706_v45 = vld [vmem:[#allocation2 + $0x20] sm:$0xe0] }
 0x295   : > { %v2752_v24 = vrot.slane %v10489_v48, 5 }
 0x296   : > { %v10704_v31 = vadd.f32 %v6634_v60, %v10479_v44  ;;  %v6635_v13 = vpop.f32.mrb[68].mxu1  ;;  %v2707_v60 = vld [vmem:[#allocation2 + $0x28] sm:$0xe0] }
 0x297   : > { %v6636_v39 = vpop.f32.mrb[69].mxu1  ;;  %2676 = vmatmul.mubr.f32.gmra.mrb[174].mxu1 %v2526_v61  ;;  %v2540_v61 = vsel %vm2178_vm3, %v2535_v22, %v2539_v54  ;;  %v6231_v22 = vld [vmem:[%s12511_s4 + $0x800] sm:$0xff] }
 0x298   : > { %v6637_v50 = vadd.f32 %v6636_v39, %v6635_v13  ;;  %2680 = vmatprep.mubr.f32.mxu1 %v2532_v4  ;;  %v2534_v13 = vsel %vm2178_vm3, %v2529_v17, %v2533_v16  ;;  %v2537_v4 = vrot.slane %v2424_v6, 4  ;;  %v2751_v39 = vrot.slane %v2707_v60, 5 }
 0x299   : > { %v2748_v6 = vrot.slane %v2706_v45, 5 }
 0x29a   : > { %v10713_v44 = vadd.f32 %v6637_v50, %v10485_v51  ;;  %v6638_v25 = vpop.f32.mrb[70].mxu1  ;;  %v2753_v17 = vsel %vm2747_vm5, %v2751_v39, %v2752_v24  ;;  %v6234_v39 = vld [vmem:[%s12511_s4 + $0x818] sm:$0xff] }
 0x29b   : > { %v6639_v46 = vpop.f32.mrb[71].mxu1  ;;  %2681 = vmatmul.mubr.f32.gmra.mrb[176].mxu1 %v2530_v34  ;;  %v6250_v34 = vld [vmem:[%s12511_s4 + $0x898] sm:$0xff] }
 0x29c   : > { %v6640_v9 = vadd.f32 %v6639_v46, %v6638_v25  ;;  %2685 = vmatprep.mubr.f32.mxu1 %v2536_v33  ;;  %v2538_v46 = vsel %vm2178_vm3, %v2533_v16, %v2537_v4  ;;  %v2749_v16 = vrot.slane %v10511_v0, 5  ;;  %v6249_v25 = vld [vmem:[%s12511_s4 + $0x890] sm:$0xff] }
 0x29d   : > { %v6233_v0 = vld [vmem:[%s12511_s4 + $0x810] sm:$0xff] }
 0x29e   : > { %v10720_v26 = vadd.f32 %v6640_v9, %v10494_v18  ;;  %v6641_v51 = vpop.f32.mrb[72].mxu1  ;;  %v6232_v9 = vld [vmem:[%s12511_s4 + $0x808] sm:$0xff]  ;;  %v2756_v18 = vrot.slane %v10497_v14, 5  ;;  %v2750_v45 = vsel %vm2747_vm5, %v2748_v6, %v2749_v16 }
 0x29f   : > { %v6642_v50 = vpop.f32.mrb[73].mxu1  ;;  %2686 = vmatmul.mubr.f32.gmra.mrb[178].mxu1 %v2534_v13  ;;  %v8414_v4 = vpack.c.bf16 %v6232_v9, %v6231_v22  ;;  %v2754_v22 = vrot.slane %v10542_v38, 5  ;;  %v8418_v9 = vpack.c.bf16 %v6234_v39, %v6233_v0  ;;  %v2758_v38 = vrot.slane %v10554_v63, 5  ;;  %v6237_v63 = vld [vmem:[%s12511_s4 + $0x830] sm:$0xff] }
 0x2a0   : > { %v6643_v62 = vadd.f32 %v6642_v50, %v6641_v51  ;;  %2690 = vmatprep.mubr.f32.mxu1 %v2540_v61  ;;  %v2760_v61 = vrot.slane %v10520_v27, 5 }
 0x2a2   : > { %v10732_v33 = vadd.f32 %v6643_v62, %v10509_v43  ;;  %v6644_v54 = vpop.f32.mrb[74].mxu1  ;;  %v2757_v62 = vsel %vm2747_vm5, %v2752_v24, %v2756_v18  ;;  %v8416_v43 = vpack.c.bf16 %v6250_v34, %v6249_v25  ;;  %v6251_v24 = vld [vmem:[%s12511_s4 + $0x8a0] sm:$0xff]  ;;  %v6236_v34 = vld [vmem:[%s12511_s4 + $0x828] sm:$0xff] }
 0x2a3   : > { %v6645_v60 = vpop.f32.mrb[75].mxu1  ;;  %2691 = vmatmul.mubr.f32.gmra.mrb[180].mxu1 %v2538_v46  ;;  %v6252_v46 = vld [vmem:[%s12511_s4 + $0x8a8] sm:$0xff]  ;;  %v6235_v25 = vld [vmem:[%s12511_s4 + $0x820] sm:$0xff] }
 0x2a4   : > { %v6646_v13 = vadd.f32 %v6645_v60, %v6644_v54  ;;  %2892 = vmatprep.mubr.f32.mxu1 %v2753_v17  ;;  %v2764_v54 = vrot.slane %v10534_v21, 5  ;;  %v8420_v6 = vpack.c.bf16 %v6252_v46, %v6251_v24  ;;  %v2759_v24 = vsel %vm2747_vm5, %v2754_v22, %v2758_v38 }
 0x2a5   : > { %v2762_v46 = vrot.slane %v10574_v20, 5 }
 0x2a6   : > { %v10750_v51 = vadd.f32 %v6646_v13, %v10531_v29  ;;  %v6647_v50 = vpop.f32.mrb[76].mxu1  ;;  %v2761_v29 = vsel %vm2747_vm5, %v2756_v18, %v2760_v61  ;;  %v2755_v13 = vsel %vm2747_vm5, %v2749_v16, %v2754_v22  ;;  %v6253_v18 = vld [vmem:[%s12511_s4 + $0x8b0] sm:$0xff]  ;;  %v2765_v0 = vsel %vm2747_vm5, %v2760_v61, %v2764_v54  ;;  %v6255_v61 = vld [vmem:[%s12511_s4 + $0x8c0] sm:$0xff] }
 0x2a7   : > { %v6648_v17 = vpop.f32.mrb[77].mxu1  ;;  %2893 = vmatmul.mubr.f32.vlgmr.msra.gmra.mrb[182].mxu1 %v2750_v45  ;;  %v2768_v16 = vrot.slane %v10557_v57, 5  ;;  %v6238_v50 = vld [vmem:[%s12511_s4 + $0x838] sm:$0xff]  ;;  %v2772_v22 = vrot.slane %v10577_v36, 5 }
 0x2a8   : > { %8415 = vmatpush3.bf16.msra.mxu1 %v8414_v4  ;;  %2896 = vmatprep.mubr.f32.mxu1 %v2757_v62  ;;  %v6254_v4 = vld [vmem:[%s12511_s4 + $0x8b8] sm:$0xff]  ;;  %v6256_v17 = vld [vmem:[%s12511_s4 + $0x8c8] sm:$0xff] }
 0x2a9   : > { %8417 = vmatprep.subr.bf16.mxu1 %v8416_v43  ;;  %v8422_v43 = vpack.c.bf16 %v6236_v34, %v6235_v25  ;;  %v8424_v39 = vpack.c.bf16 %v6254_v4, %v6253_v18  ;;  %v2769_v25 = vsel %vm2747_vm5, %v2764_v54, %v2768_v16  ;;  %v8428_v20 = vpack.c.bf16 %v6256_v17, %v6255_v61  ;;  %v6239_v34 = vld [vmem:[%s12511_s4 + $0x840] sm:$0xff] }
 0x2aa   : > { %v6682_v60 = vpop.f32.mrb[78].mxu1  ;;  %v2763_v4 = vsel %vm2747_vm5, %v2758_v38, %v2762_v46  ;;  %v2766_v54 = vrot.slane %v10597_v19, 5  ;;  %v2776_v38 = vrot.slane %v10600_v40, 5 }
 0x2ab   : > { %v6683_v62 = vpop.f32.mrb[79].mxu1  ;;  %2897 = vmatmul.mubr.f32.gmra.mrb[184].mxu1 %v2755_v13  ;;  %v6240_v60 = vld [vmem:[%s12511_s4 + $0x848] sm:$0xff] }
 0x2ac   : > { %2901 = vmatprep.mubr.f32.mxu1 %v2761_v29  ;;  %8419 = vmatpush3.bf16.msra.mxu1 %v8418_v9  ;;  %v6257_v62 = vld [vmem:[%s12511_s4 + $0x8d0] sm:$0xff]  ;;  %v2767_v17 = vsel %vm2747_vm5, %v2762_v46, %v2766_v54  ;;  %v2780_v46 = vrot.slane %v10623_v55, 5 }
 0x2ad   : > { %8421 = vmatprep.subr.bf16.mxu1 %v8420_v6  ;;  %v8426_v6 = vpack.c.bf16 %v6238_v50, %v6237_v63  ;;  %v2773_v63 = vsel %vm2747_vm5, %v2768_v16, %v2772_v22  ;;  %v6241_v50 = vld [vmem:[%s12511_s4 + $0x850] sm:$0xff]  ;;  %v2770_v16 = vrot.slane %v10620_v52, 5 }
 0x2ae   : > { %v6685_v45 = vpop.f32.mrb[80].mxu1 }
 0x2af   : > { %v6686_v9 = vpop.f32.mrb[81].mxu1  ;;  %2902 = vmatmul.mubr.f32.gmra.mrb[186].mxu1 %v2759_v24 }
 0x2b0   : > { %v6687_v29 = vadd.f32 %v6686_v9, %v6685_v45  ;;  %2906 = vmatprep.mubr.f32.mxu1 %v2765_v0  ;;  %8423 = vmatpush3.bf16.msra.mxu1 %v8422_v43  ;;  %v6258_v43 = vld [vmem:[%s12511_s4 + $0x8d8] sm:$0xff]  ;;  %v6259_v9 = vld [vmem:[%s12511_s4 + $0x8e0] sm:$0xff] }
 0x2b1   : > { %8425 = vmatprep.subr.bf16.mxu1 %v8424_v39  ;;  %v8432_v19 = vpack.c.bf16 %v6258_v43, %v6257_v62  ;;  %v6242_v45 = vld [vmem:[%s12511_s4 + $0x858] sm:$0xff]  ;;  %v2771_v62 = vsel %vm2747_vm5, %v2766_v54, %v2770_v16  ;;  %v2784_v54 = vrot.slane %v10643_v53, 5 }
 0x2b2   : > { %v10801_v13 = vadd.f32 %v6687_v29, %v10594_v7  ;;  %v6688_v18 = vpop.f32.mrb[82].mxu1  ;;  %v8430_v7 = vpack.c.bf16 %v6240_v60, %v6239_v34  ;;  %v6260_v29 = vld [vmem:[%s12511_s4 + $0x8e8] sm:$0xff]  ;;  %v6243_v34 = vld [vmem:[%s12511_s4 + $0x860] sm:$0xff]  ;;  %v6262_v43 = vld [vmem:[%s12511_s4 + $0x8f8] sm:$0xff] }
 0x2b3   : > { %v6689_v0 = vpop.f32.mrb[83].mxu1  ;;  %2907 = vmatmul.mubr.f32.gmra.mrb[188].mxu1 %v2763_v4  ;;  %v8436_v52 = vpack.c.bf16 %v6260_v29, %v6259_v9  ;;  %v6244_v60 = vld [vmem:[%s12511_s4 + $0x868] sm:$0xff] }
 0x2b4   : > { %v6690_v39 = vadd.f32 %v6689_v0, %v6688_v18  ;;  %2911 = vmatprep.mubr.f32.mxu1 %v2769_v25  ;;  %8427 = vmatpush3.bf16.msra.mxu1 %v8426_v6 }
 0x2b5   : > { %8429 = vmatprep.subr.bf16.mxu1 %v8428_v20  ;;  %v2777_v20 = vsel %vm2747_vm5, %v2772_v22, %v2776_v38  ;;  %v6261_v22 = vld [vmem:[%s12511_s4 + $0x8f0] sm:$0xff] }
 0x2b6   : > { %v10820_v24 = vadd.f32 %v6690_v39, %v10617_v2  ;;  %v6691_v61 = vpop.f32.mrb[84].mxu1  ;;  %v8434_v2 = vpack.c.bf16 %v6242_v45, %v6241_v50  ;;  %v6245_v50 = vld [vmem:[%s12511_s4 + $0x870] sm:$0xff]  ;;  %v6246_v45 = vld [vmem:[%s12511_s4 + $0x878] sm:$0xff] }
 0x2b7   : > { %v6692_v6 = vpop.f32.mrb[85].mxu1  ;;  %2912 = vmatmul.mubr.f32.gmra.mrb[190].mxu1 %v2767_v17 }
 0x2b8   : > { %v6693_v25 = vadd.f32 %v6692_v6, %v6691_v61  ;;  %2916 = vmatprep.mubr.f32.mxu1 %v2773_v63  ;;  %8431 = vmatpush3.bf16.msra.mxu1 %v8430_v7  ;;  %v2774_v7 = vrot.slane %v10651_v8, 5  ;;  %v2781_v63 = vsel %vm2747_vm5, %v2776_v38, %v2780_v46  ;;  %v2778_v38 = vrot.slane %v10666_v37, 5 }
 0x2b9   : > { %8433 = vmatprep.subr.bf16.mxu1 %v8432_v19  ;;  %v8440_v19 = vpack.c.bf16 %v6262_v43, %v6261_v22  ;;  %v8442_v6 = vpack.c.bf16 %v6246_v45, %v6245_v50  ;;  %v2786_v22 = vrot.slane %v10694_v11, 5  ;;  %v2794_v50 = vrot.slane %v10701_v56, 5 }
 0x2ba   : > { %v10839_v18 = vadd.f32 %v6693_v25, %v10640_v59  ;;  %v6694_v4 = vpop.f32.mrb[86].mxu1  ;;  %v8438_v59 = vpack.c.bf16 %v6244_v60, %v6243_v34  ;;  %v2775_v17 = vsel %vm2747_vm5, %v2770_v16, %v2774_v7  ;;  %v2785_v25 = vsel %vm2747_vm5, %v2780_v46, %v2784_v54 }
 0x2bb   : > { %v6695_v0 = vpop.f32.mrb[87].mxu1  ;;  %2917 = vmatmul.mubr.f32.gmra.mrb[192].mxu1 %v2771_v62  ;;  %v2782_v16 = vrot.slane %v10683_v28, 5  ;;  %v2792_v46 = vrot.slane %v10686_v12, 5 }
 0x2bc   : > { %v6696_v39 = vadd.f32 %v6695_v0, %v6694_v4  ;;  %2921 = vmatprep.mubr.f32.mxu1 %v2777_v20  ;;  %8435 = vmatpush3.bf16.msra.mxu1 %v8434_v2  ;;  %v2788_v2 = vrot.slane %v10669_v35, 5 }
 0x2bd   : > { %8437 = vmatprep.subr.bf16.mxu1 %v8436_v52  ;;  %v2779_v52 = vsel %vm2747_vm5, %v2774_v7, %v2778_v38 }
 0x2be   : > { %v10858_v61 = vadd.f32 %v6696_v39, %v10663_v58  ;;  %v6697_v8 = vpop.f32.mrb[88].mxu1  ;;  %v2789_v60 = vsel %vm2747_vm5, %v2784_v54, %v2788_v2  ;;  %v2793_v0 = vsel %vm2747_vm5, %v2788_v2, %v2792_v46  ;;  %v2796_v39 = vrot.slane %v10697_v1, 5  ;;  %v2709_v54 = vld [vmem:[#allocation2 + $0xf8] sm:$0x1f] }
 0x2bf   : > { %v6698_v9 = vpop.f32.mrb[89].mxu1  ;;  %2922 = vmatmul.mubr.f32.gmra.mrb[194].mxu1 %v2775_v17  ;;  %v2708_v17 = vld [vmem:[#allocation2 + $0xf0] sm:$0x1f] }
 0x2c0   : > { %v6699_v29 = vadd.f32 %v6698_v9, %v6697_v8  ;;  %2926 = vmatprep.mubr.f32.mxu1 %v2781_v63  ;;  %8439 = vmatpush3.bf16.msra.mxu1 %v8438_v59  ;;  %v2790_v63 = vrot.slane %v10707_v10, 5  ;;  %v2797_v45 = vsel %vm2747_vm5, %v2792_v46, %v2796_v39  ;;  %v2800_v8 = vrot.slane %v2709_v54, 5 }
 0x2c1   : > { %8441 = vmatprep.subr.bf16.mxu1 %v8440_v19  ;;  %v2798_v2 = vrot.slane %v2708_v17, 5  ;;  %v12532_v54 = vrot.slane %v9592_v49, 6 }
 0x2c2   : > { %v10865_v20 = vadd.f32 %v6699_v29, %v10680_v42  ;;  %v6700_v58 = vpop.f32.mrb[90].mxu1  ;;  %v2783_v42 = vsel %vm2747_vm5, %v2778_v38, %v2782_v16  ;;  %v2791_v9 = vsel %vm2747_vm5, %v2786_v22, %v2790_v63  ;;  %v2968_v29 = vld [vmem:[#allocation2 + $0x28] sm:$0xc0] }
 0x2c3   : > { %v6701_v37 = vpop.f32.mrb[91].mxu1  ;;  %2927 = vmatmul.mubr.f32.gmra.mrb[196].mxu1 %v2779_v52  ;;  %v3012_v52 = vrot.slane %v2968_v29, 6 }
 0x2c4   : > { %v6702_v34 = vadd.f32 %v6701_v37, %v6700_v58  ;;  %2931 = vmatprep.mubr.f32.mxu1 %v2785_v25  ;;  %8443 = vmatpush3.bf16.msra.mxu1 %v8442_v6  ;;  %v2795_v25 = vsel %vm2747_vm5, %v2790_v63, %v2794_v50  ;;  %v2801_v58 = vsel %vm2747_vm5, %v2796_v39, %v2800_v8 }
 0x2c6   : > { %v10872_v4 = vadd.f32 %v6702_v34, %v10691_v5  ;;  %v6703_v62 = vpop.f32.mrb[92].mxu1  ;;  %v2787_v5 = vsel %vm2747_vm5, %v2782_v16, %v2786_v22  ;;  %v3013_v16 = vrot.slane %v10489_v48, 6  ;;  %v3017_v22 = vrot.slane %v10497_v14, 6 }
 0x2c7   : > { %v6704_v43 = vpop.f32.mrb[93].mxu1  ;;  %2932 = vmatmul.mubr.f32.gmra.mrb[198].mxu1 %v2783_v42 }
 0x2c8   : > { %v6705_v28 = vadd.f32 %v6704_v43, %v6703_v62  ;;  %2936 = vmatprep.mubr.f32.mxu1 %v2789_v60  ;;  %v2967_v60 = vld [vmem:[#allocation2 + $0x20] sm:$0xc0]  ;;  %v2799_v62 = vsel %vm2747_vm5, %v2794_v50, %v2798_v2  ;;  %v3014_v42 = vsel %vm3008_vm4, %v3012_v52, %v3013_v16  ;;  %v3018_v39 = vsel %vm3008_vm4, %v3013_v16, %v3017_v22 }
 0x2c9   : > { %v3009_v48 = vrot.slane %v2967_v60, 6 }
 0x2ca   : > { %v10879_v7 = vadd.f32 %v6705_v28, %v10704_v31  ;;  %v6706_v59 = vpop.f32.mrb[94].mxu1 }
 0x2cb   : > { %v6707_v19 = vpop.f32.mrb[95].mxu1  ;;  %2937 = vmatmul.mubr.f32.gmra.mrb[200].mxu1 %v2787_v5  ;;  %v3011_v14 = vsel %vm3008_vm4, %v3009_v48, %v12532_v54 }
 0x2cc   : > { %v6708_v11 = vadd.f32 %v6707_v19, %v6706_v59  ;;  %2941 = vmatprep.mubr.f32.mxu1 %v2793_v0  ;;  %v3021_v59 = vrot.slane %v10520_v27, 6 }
 0x2ce   : > { %v10886_v38 = vadd.f32 %v6708_v11, %v10713_v44  ;;  %v6709_v31 = vpop.f32.mrb[96].mxu1  ;;  %v3022_v19 = vsel %vm3008_vm4, %v3017_v22, %v3021_v59  ;;  %v3025_v11 = vrot.slane %v10534_v21, 6  ;;  %v3053_v22 = vrot.slane %v10686_v12, 6 }
 0x2cf   : > { %v6710_v6 = vpop.f32.mrb[97].mxu1  ;;  %2942 = vmatmul.mubr.f32.gmra.mrb[202].mxu1 %v2791_v9  ;;  %v3033_v9 = vrot.slane %v10577_v36, 6  ;;  %v3055_v12 = vrot.slane %v10701_v56, 6  ;;  %v5699_v56 = vld [vmem:[%s12517_s10 + $0x40] sm:$0xff] }
 0x2d0   : > { %v6711_v10 = vadd.f32 %v6710_v6, %v6709_v31  ;;  %2946 = vmatprep.mubr.f32.mxu1 %v2797_v45  ;;  %v3026_v27 = vsel %vm3008_vm4, %v3021_v59, %v3025_v11 }
 0x2d2   : > { %v10893_v37 = vadd.f32 %v6711_v10, %v10720_v26  ;;  %v6712_v44 = vpop.f32.mrb[98].mxu1  ;;  %v3037_v10 = vrot.slane %v10600_v40, 6 }
 0x2d3   : > { %v6713_v34 = vpop.f32.mrb[99].mxu1  ;;  %2947 = vmatmul.mubr.f32.gmra.mrb[204].mxu1 %v2795_v25 }
 0x2d4   : > { %v6714_v46 = vadd.f32 %v6713_v34, %v6712_v44  ;;  %2951 = vmatprep.mubr.f32.mxu1 %v2801_v58  ;;  %v3041_v58 = vrot.slane %v10623_v55, 6  ;;  %v3045_v44 = vrot.slane %v10643_v53, 6 }
 0x2d6   : > { %v10899_v43 = vadd.f32 %v6714_v46, %v10732_v33  ;;  %v6715_v28 = vpop.f32.mrb[100].mxu1  ;;  %v3049_v46 = vrot.slane %v10669_v35, 6 }
 0x2d7   : > { %v6716_v0 = vpop.f32.mrb[101].mxu1  ;;  %2952 = vmatmul.mubr.f32.gmra.mrb[206].mxu1 %v2799_v62 }
 0x2d8   : > { %v6717_v26 = vadd.f32 %v6716_v0, %v6715_v28  ;;  %3153 = vmatprep.mubr.f32.mxu1 %v3014_v42  ;;  %v12533_v0 = vld [vmem:[#allocation5_spill] sm:$0xff] }
 0x2da   : > { %v10904_v5 = vadd.f32 %v6717_v26, %v10750_v51  ;;  %v6718_v63 = vpop.f32.mrb[102].mxu1  ;;  %v3029_v51 = vrot.slane %v10557_v57, 6  ;;  %v3057_v26 = vrot.slane %v10697_v1, 6 }
 0x2db   : > { %v6719_v33 = vpop.f32.mrb[103].mxu1  ;;  %3154 = vmatmul.mubr.f32.vlgmr.msra.gmra.mrb[208].mxu1 %v3011_v14  ;;  %v12534_v63 = vld [vmem:[#allocation6_spill] sm:$0xff] }
 0x2dc   : > { %3157 = vmatprep.mubr.f32.mxu1 %v3018_v39  ;;  %v3030_v31 = vsel %vm3008_vm4, %v3025_v11, %v3029_v51  ;;  %v3034_v57 = vsel %vm3008_vm4, %v3029_v51, %v3033_v9  ;;  %v12535_v11 = vld [vmem:[#allocation7_spill] sm:$0xff] }
 0x2de   : > { %v6753_v50 = vpop.f32.mrb[104].mxu1 }
 0x2df   : > { %v6754_v45 = vpop.f32.mrb[105].mxu1  ;;  %3158 = vmatmul.mubr.f32.gmra.mrb[210].mxu1 %v9616_v47 }
 0x2e0   : > { %3162 = vmatprep.mubr.f32.mxu1 %v3022_v19 }
 0x2e2   : > { %v6756_v8 = vpop.f32.mrb[106].mxu1 }
 0x2e3   : > { %v6757_v49 = vpop.f32.mrb[107].mxu1  ;;  %3163 = vmatmul.mubr.f32.gmra.mrb[212].mxu1 %v9626_v41 }
 0x2e4   : > { %v6758_v17 = vadd.f32 %v6757_v49, %v6756_v8  ;;  %3167 = vmatprep.mubr.f32.mxu1 %v3026_v27 }
 0x2e6   : > { %v10918_v21 = vadd.f32 %v6758_v17, %v10801_v13  ;;  %v6759_v29 = vpop.f32.mrb[108].mxu1  ;;  %v3038_v13 = vsel %vm3008_vm4, %v3033_v9, %v3037_v10 }
 0x2e7   : > { %v6760_v47 = vpop.f32.mrb[109].mxu1  ;;  %3168 = vmatmul.mubr.f32.gmra.mrb[214].mxu1 %v9629_v30 }
 0x2e8   : > { %v6761_v6 = vadd.f32 %v6760_v47, %v6759_v29  ;;  %3172 = vmatprep.mubr.f32.mxu1 %v3030_v31 }
 0x2ea   : > { %v10924_v41 = vadd.f32 %v6761_v6, %v10820_v24  ;;  %v6762_v25 = vpop.f32.mrb[110].mxu1  ;;  %v3042_v24 = vsel %vm3008_vm4, %v3037_v10, %v3041_v58 }
 0x2eb   : > { %v6763_v2 = vpop.f32.mrb[111].mxu1  ;;  %3173 = vmatmul.mubr.f32.gmra.mrb[216].mxu1 %v9633_v3 }
 0x2ec   : > { %v6764_v36 = vadd.f32 %v6763_v2, %v6762_v25  ;;  %3177 = vmatprep.mubr.f32.mxu1 %v3034_v57 }
 0x2ee   : > { %v10930_v30 = vadd.f32 %v6764_v36, %v10839_v18  ;;  %v6765_v52 = vpop.f32.mrb[112].mxu1  ;;  %v3046_v18 = vsel %vm3008_vm4, %v3041_v58, %v3045_v44 }
 0x2ef   : > { %v6766_v16 = vpop.f32.mrb[113].mxu1  ;;  %3178 = vmatmul.mubr.f32.gmra.mrb[218].mxu1 %v9636_v15 }
 0x2f0   : > { %v6767_v40 = vadd.f32 %v6766_v16, %v6765_v52  ;;  %3182 = vmatprep.mubr.f32.mxu1 %v3038_v13 }
 0x2f2   : > { %v10936_v3 = vadd.f32 %v6767_v40, %v10858_v61  ;;  %v6768_v34 = vpop.f32.mrb[114].mxu1  ;;  %v3050_v61 = vsel %vm3008_vm4, %v3045_v44, %v3049_v46 }
 0x2f3   : > { %v6769_v60 = vpop.f32.mrb[115].mxu1  ;;  %3183 = vmatmul.mubr.f32.gmra.mrb[220].mxu1 %v9645_v32 }
 0x2f4   : > { %v6770_v55 = vadd.f32 %v6769_v60, %v6768_v34  ;;  %3187 = vmatprep.mubr.f32.mxu1 %v3042_v24 }
 0x2f6   : > { %v10942_v15 = vadd.f32 %v6770_v55, %v10865_v20  ;;  %v6771_v62 = vpop.f32.mrb[116].mxu1  ;;  %v3054_v20 = vsel %vm3008_vm4, %v3049_v46, %v3053_v22 }
 0x2f7   : > { %v6772_v42 = vpop.f32.mrb[117].mxu1  ;;  %3188 = vmatmul.mubr.f32.gmra.mrb[222].mxu1 %v9648_v23 }
 0x2f8   : > { %v6773_v53 = vadd.f32 %v6772_v42, %v6771_v62  ;;  %3192 = vmatprep.mubr.f32.mxu1 %v3046_v18 }
 0x2fa   : > { %v2131_v32 = vadd.f32 %v6773_v53, %v10872_v4  ;;  %v6774_v28 = vpop.f32.mrb[118].mxu1  ;;  %v3058_v4 = vsel %vm3008_vm4, %v3053_v22, %v3057_v26 }
 0x2fb   : > { %v6775_v48 = vpop.f32.mrb[119].mxu1  ;;  %3193 = vmatmul.mubr.f32.gmra.mrb[224].mxu1 %v12533_v0 }
 0x2fc   : > { %v6776_v35 = vadd.f32 %v6775_v48, %v6774_v28  ;;  %3197 = vmatprep.mubr.f32.mxu1 %v3050_v61 }
 0x2fe   : > { %v2132_v23 = vadd.f32 %v6776_v35, %v10879_v7  ;;  %v6777_v39 = vpop.f32.mrb[120].mxu1  ;;  %v12536_v7 = vld [vmem:[#allocation4_spill] sm:$0xff] }
 0x2ff   : > { %v6778_v59 = vpop.f32.mrb[121].mxu1  ;;  %3198 = vmatmul.mubr.f32.gmra.mrb[226].mxu1 %v12534_v63  ;;  %v12537_v45 = vrot.slane %v12536_v7, 6 }
 0x300   : > { %v6779_v54 = vadd.f32 %v6778_v59, %v6777_v39  ;;  %3202 = vmatprep.mubr.f32.mxu1 %v3054_v20 }
 0x301   : > { %v3056_v27 = vsel %vm3008_vm4, %v12537_v45, %v3055_v12 }
 0x302   : > { %v2133_v14 = vadd.f32 %v6779_v54, %v10886_v38  ;;  %v6780_v33 = vpop.f32.mrb[122].mxu1 }
 0x303   : > { %v6781_v19 = vpop.f32.mrb[123].mxu1  ;;  %3203 = vmatmul.mubr.f32.gmra.mrb[228].mxu1 %v12535_v11 }
 0x304   : > { %v6782_v50 = vadd.f32 %v6781_v19, %v6780_v33  ;;  %3207 = vmatprep.mubr.f32.mxu1 %v3058_v4 }
 0x306   : > { %v2134_v51 = vadd.f32 %v6782_v50, %v10893_v37  ;;  %v6783_v8 = vpop.f32.mrb[124].mxu1 }
 0x307   : > { %v6784_v49 = vpop.f32.mrb[125].mxu1  ;;  %3208 = vmatmul.mubr.f32.gmra.mrb[230].mxu1 %v3056_v27 }
 0x308   : > { %v6785_v17 = vadd.f32 %v6784_v49, %v6783_v8 }
 0x30a   : > { %v2135_v38 = vadd.f32 %v6785_v17, %v10899_v43  ;;  %v6786_v31 = vpop.f32.mrb[126].mxu1 }
 0x30b   : > { %v6787_v9 = vpop.f32.mrb[127].mxu1 }
 0x30c   : > { %v6788_v29 = vadd.f32 %v6787_v9, %v6786_v31 }
 0x30e   : > { %v2136_v47 = vadd.f32 %v6788_v29, %v10904_v5  ;;  %v6789_v6 = vpop.f32.mrb[128].mxu1 }
 0x30f   : > { %v6790_v57 = vpop.f32.mrb[129].mxu1 }
 0x312   : > { %v6824_v10 = vpop.f32.mrb[130].mxu1 }
 0x313   : > { %v6825_v25 = vpop.f32.mrb[131].mxu1 }
 0x316   : > { %v6827_v2 = vpop.f32.mrb[132].mxu1 }
 0x317   : > { %v6828_v36 = vpop.f32.mrb[133].mxu1 }
 0x318   : > { %v6829_v13 = vadd.f32 %v6828_v36, %v6827_v2 }
 0x31a   : > { %v2387_v37 = vadd.f32 %v6829_v13, %v10918_v21  ;;  %v6830_v58 = vpop.f32.mrb[134].mxu1 }
 0x31b   : > { %v6831_v52 = vpop.f32.mrb[135].mxu1 }
 0x31c   : > { %v6832_v16 = vadd.f32 %v6831_v52, %v6830_v58 }
 0x31e   : > { %v2388_v40 = vadd.f32 %v6832_v16, %v10924_v41  ;;  %v6833_v43 = vpop.f32.mrb[136].mxu1 }
 0x31f   : > { %v6834_v24 = vpop.f32.mrb[137].mxu1 }
 0x320   : > { %v6835_v44 = vadd.f32 %v6834_v24, %v6833_v43 }
 0x322   : > { %v2389_v34 = vadd.f32 %v6835_v44, %v10930_v30  ;;  %v6836_v5 = vpop.f32.mrb[138].mxu1 }
 0x323   : > { %v6837_v60 = vpop.f32.mrb[139].mxu1 }
 0x324   : > { %v6838_v55 = vadd.f32 %v6837_v60, %v6836_v5 }
 0x326   : > { %v2390_v18 = vadd.f32 %v6838_v55, %v10936_v3  ;;  %v6839_v46 = vpop.f32.mrb[140].mxu1 }
 0x327   : > { %v6840_v62 = vpop.f32.mrb[141].mxu1 }
 0x328   : > { %v6841_v42 = vadd.f32 %v6840_v62, %v6839_v46 }
 0x32a   : > { %v2391_v21 = vadd.f32 %v6841_v42, %v10942_v15  ;;  %v6842_v53 = vpop.f32.mrb[142].mxu1 }
 0x32b   : > { %v6843_v61 = vpop.f32.mrb[143].mxu1 }
 0x32c   : > { %v6844_v22 = vadd.f32 %v6843_v61, %v6842_v53 }
 0x32e   : > { %v2392_v28 = vadd.f32 %v6844_v22, %v2131_v32  ;;  %v6845_v41 = vpop.f32.mrb[144].mxu1 }
 0x32f   : > { %v6846_v48 = vpop.f32.mrb[145].mxu1 }
 0x330   : > { %v6847_v0 = vadd.f32 %v6846_v48, %v6845_v41 }
 0x332   : > { %v2393_v35 = vadd.f32 %v6847_v0, %v2132_v23  ;;  %v6848_v20 = vpop.f32.mrb[146].mxu1 }
 0x333   : > { %v6849_v30 = vpop.f32.mrb[147].mxu1 }
 0x334   : > { %v6850_v39 = vadd.f32 %v6849_v30, %v6848_v20 }
 0x336   : > { %v2394_v59 = vadd.f32 %v6850_v39, %v2133_v14  ;;  %v6851_v63 = vpop.f32.mrb[148].mxu1 }
 0x337   : > { %v6852_v54 = vpop.f32.mrb[149].mxu1 }
 0x338   : > { %v6853_v3 = vadd.f32 %v6852_v54, %v6851_v63 }
 0x33a   : > { %v2395_v4 = vadd.f32 %v6853_v3, %v2134_v51  ;;  %v6854_v33 = vpop.f32.mrb[150].mxu1 }
 0x33b   : > { %v6855_v19 = vpop.f32.mrb[151].mxu1 }
 0x33c   : > { %v6856_v11 = vadd.f32 %v6855_v19, %v6854_v33  ;;  %v12524_v33 = vmov 0.0|0.0  }
 0x33d   : > { %8444 = vmatprep.subr.bf16.mxu0 %v12524_v33  ;;  %8660 = vmatprep.subr.bf16.mxu1 %v12524_v33 }
 0x33e   : > { %v2396_v15 = vadd.f32 %v6856_v11, %v2135_v38  ;;  %v6857_v50 = vpop.f32.mrb[152].mxu1  ;;  %v6273_v11 = vld [vmem:[%s12513_s6 + $0x90] sm:$0xff] }
 0x33f   : > { %v6858_v7 = vpop.f32.mrb[153].mxu1 }
 0x340   : > { %v6859_v45 = vadd.f32 %v6858_v7, %v6857_v50 }
 0x342   : > { %v2397_v32 = vadd.f32 %v6859_v45, %v2136_v47  ;;  %v6860_v27 = vpop.f32.mrb[154].mxu1 }
 0x343   : > { %v6861_v8 = vpop.f32.mrb[155].mxu1  ;;  %v6276_v27 = vld [vmem:[%s12513_s6 + $0xa8] sm:$0xff] }
 0x346   : > { %v6895_v49 = vpop.f32.mrb[156].mxu1 }
 0x347   : > { %v6896_v23 = vpop.f32.mrb[157].mxu1 }
 0x34a   : > { %v6898_v17 = vpop.f32.mrb[158].mxu1 }
 0x34b   : > { %v6899_v31 = vpop.f32.mrb[159].mxu1 }
 0x34c   : > { %v6900_v9 = vadd.f32 %v6899_v31, %v6898_v17  ;;  %v6277_v31 = vld [vmem:[%s12513_s6 + $0xb0] sm:$0xff] }
 0x34e   : > { %v10972_v14 = vadd.f32 %v6900_v9, %v2387_v37  ;;  %v6901_v29 = vpop.f32.mrb[160].mxu1  ;;  %v6278_v9 = vld [vmem:[%s12513_s6 + $0xb8] sm:$0xff] }
 0x34f   : > { %v6902_v6 = vpop.f32.mrb[161].mxu1 }
 0x350   : > { %v6903_v51 = vadd.f32 %v6902_v6, %v6901_v29  ;;  %v8454_v29 = vpack.c.bf16 %v6278_v9, %v6277_v31 }
 0x352   : > { %v10974_v57 = vadd.f32 %v6903_v51, %v2388_v40  ;;  %v6904_v10 = vpop.f32.mrb[162].mxu1 }
 0x353   : > { %v6905_v38 = vpop.f32.mrb[163].mxu1 }
 0x354   : > { %v6906_v25 = vadd.f32 %v6905_v38, %v6904_v10 }
 0x356   : > { %v10976_v2 = vadd.f32 %v6906_v25, %v2389_v34  ;;  %v6907_v47 = vpop.f32.mrb[164].mxu1  ;;  %v6279_v25 = vld [vmem:[%s12513_s6 + $0xc0] sm:$0xff] }
 0x357   : > { %v6908_v36 = vpop.f32.mrb[165].mxu1 }
 0x358   : > { %v6909_v13 = vadd.f32 %v6908_v36, %v6907_v47  ;;  %v6280_v47 = vld [vmem:[%s12513_s6 + $0xc8] sm:$0xff] }
 0x359   : > { %v8457_v36 = vpack.c.bf16 %v6280_v47, %v6279_v25  ;;  %v3717_v25 = vld [vmem:[%s12513_s6 + $0x20] sm:$0xff]  ;;  %v3718_v47 = vld [vmem:[%s12513_s6 + $0x28] sm:$0xff] }
 0x35a   : > { %v10978_v58 = vadd.f32 %v6909_v13, %v2390_v18  ;;  %v6910_v52 = vpop.f32.mrb[166].mxu1 }
 0x35b   : > { %v6911_v16 = vpop.f32.mrb[167].mxu1 }
 0x35c   : > { %v6912_v43 = vadd.f32 %v6911_v16, %v6910_v52 }
 0x35e   : > { %v10980_v37 = vadd.f32 %v6912_v43, %v2391_v21  ;;  %v6913_v24 = vpop.f32.mrb[168].mxu1  ;;  %v6281_v43 = vld [vmem:[%s12513_s6 + $0xd0] sm:$0xff] }
 0x35f   : > { %v6914_v44 = vpop.f32.mrb[169].mxu1 }
 0x360   : > { %v6915_v5 = vadd.f32 %v6914_v44, %v6913_v24  ;;  %v6282_v24 = vld [vmem:[%s12513_s6 + $0xd8] sm:$0xff] }
 0x361   : > { %v8460_v44 = vpack.c.bf16 %v6282_v24, %v6281_v43  ;;  %v3719_v43 = vld [vmem:[%s12513_s6 + $0x30] sm:$0xff]  ;;  %v3720_v24 = vld [vmem:[%s12513_s6 + $0x38] sm:$0xff] }
 0x362   : > { %v10982_v40 = vadd.f32 %v6915_v5, %v2392_v28  ;;  %v6916_v60 = vpop.f32.mrb[170].mxu1 }
 0x363   : > { %v6917_v55 = vpop.f32.mrb[171].mxu1 }
 0x364   : > { %v6918_v46 = vadd.f32 %v6917_v55, %v6916_v60 }
 0x366   : > { %v10984_v34 = vadd.f32 %v6918_v46, %v2393_v35  ;;  %v6919_v62 = vpop.f32.mrb[172].mxu1  ;;  %v6271_v35 = vld [vmem:[%s12513_s6 + $0x80] sm:$0xff] }
 0x367   : > { %v6920_v42 = vpop.f32.mrb[173].mxu1  ;;  %v6283_v46 = vld [vmem:[%s12513_s6 + $0xe0] sm:$0xff] }
 0x368   : > { %v6921_v53 = vadd.f32 %v6920_v42, %v6919_v62  ;;  %v6284_v62 = vld [vmem:[%s12513_s6 + $0xe8] sm:$0xff] }
 0x369   : > { %v8463_v42 = vpack.c.bf16 %v6284_v62, %v6283_v46 }
 0x36a   : > { %v10986_v18 = vadd.f32 %v6921_v53, %v2394_v59  ;;  %v6922_v61 = vpop.f32.mrb[174].mxu1  ;;  %v6272_v59 = vld [vmem:[%s12513_s6 + $0x88] sm:$0xff] }
 0x36b   : > { %v6923_v22 = vpop.f32.mrb[175].mxu1  ;;  %v8445_v54 = vpack.c.bf16 %v6272_v59, %v6271_v35  ;;  %v3729_v35 = vld [vmem:[#allocation3 + $0x1] sm:$0xff] }
 0x36c   : > { %v6924_v41 = vadd.f32 %v6923_v22, %v6922_v61 }
 0x36d   : > { %8446 = vmatpush3.bf16.msra.mxu0 %v8445_v54 }
 0x36e   : > { %v10988_v21 = vadd.f32 %v6924_v41, %v2395_v4  ;;  %v6925_v48 = vpop.f32.mrb[176].mxu1  ;;  %8447 = vmatprep.subr.bf16.mxu0 %v12524_v33  ;;  %v6285_v41 = vld [vmem:[%s12513_s6 + $0xf0] sm:$0xff] }
 0x36f   : > { %v6926_v0 = vpop.f32.mrb[177].mxu1 }
 0x370   : > { %v6927_v20 = vadd.f32 %v6926_v0, %v6925_v48  ;;  %v6286_v48 = vld [vmem:[%s12513_s6 + $0xf8] sm:$0xff] }
 0x371   : > { %v8466_v0 = vpack.c.bf16 %v6286_v48, %v6285_v41  ;;  %v11136_v41 = vld [vmem:[%s12512_s5] ss:$0 sm:$0xff] }
 0x372   : > { %v10990_v28 = vadd.f32 %v6927_v20, %v2396_v15  ;;  %v6928_v30 = vpop.f32.mrb[178].mxu1  ;;  %v6274_v15 = vld [vmem:[%s12513_s6 + $0x98] sm:$0xff] }
 0x373   : > { %v6929_v39 = vpop.f32.mrb[179].mxu1  ;;  %v8448_v50 = vpack.c.bf16 %v6274_v15, %v6273_v11 }
 0x374   : > { %v6930_v63 = vadd.f32 %v6929_v39, %v6928_v30 }
 0x375   : > { %8449 = vmatpush3.bf16.msra.mxu0 %v8448_v50 }
 0x376   : > { %v10998_v3 = vadd.f32 %v6930_v63, %v2397_v32  ;;  %v6931_v4 = vpop.f32.mrb[180].mxu1  ;;  %8450 = vmatprep.subr.bf16.mxu0 %v12524_v33  ;;  %v6275_v32 = vld [vmem:[%s12513_s6 + $0xa0] sm:$0xff]  ;;  %v11067_v63 = vld [vmem:[#allocation3 + $0xb] sm:$0xff] }
 0x377   : > { %v6932_v19 = vpop.f32.mrb[181].mxu1  ;;  %v8451_v8 = vpack.c.bf16 %v6276_v27, %v6275_v32  ;;  %7447 = vmatprep.mubr.msk.f32.mxu0 %vm8966_vm6, %v11067_v63 }
 0x378   : > { %v3730_v19 = vld [vmem:[#allocation3 + $0x9] sm:$0xff] }
 0x379   : > { %8452 = vmatpush3.bf16.msra.mxu0 %v8451_v8 }
 0x37a   : > { %v6966_v7 = vpop.f32.mrb[182].mxu1  ;;  %8453 = vmatprep.subr.bf16.mxu0 %v12524_v33 }
 0x37b   : > { %v6967_v45 = vpop.f32.mrb[183].mxu1 }
 0x37d   : > { %8455 = vmatpush3.bf16.msra.mxu0 %v8454_v29 }
 0x37e   : > { %v6969_v49 = vpop.f32.mrb[184].mxu1  ;;  %8456 = vmatprep.subr.bf16.mxu0 %v12524_v33 }
 0x37f   : > { %v6970_v23 = vpop.f32.mrb[185].mxu1 }
 0x380   : > { %v6971_v17 = vadd.f32 %v6970_v23, %v6969_v49 }
 0x381   : > { %8458 = vmatpush3.bf16.msra.mxu0 %v8457_v36 }
 0x382   : > { %v11024_v6 = vadd.f32 %v6971_v17, %v10972_v14  ;;  %v6972_v51 = vpop.f32.mrb[186].mxu1  ;;  %8459 = vmatprep.subr.bf16.mxu0 %v12524_v33  ;;  %v3714_v17 = vld [vmem:[%s12513_s6 + $0x8] sm:$0xff] }
 0x383   : > { %v6973_v10 = vpop.f32.mrb[187].mxu1 }
 0x384   : > { %v6974_v38 = vadd.f32 %v6973_v10, %v6972_v51 }
 0x385   : > { %8461 = vmatpush3.bf16.msra.mxu0 %v8460_v44 }
 0x386   : > { %v11034_v13 = vadd.f32 %v6974_v38, %v10974_v57  ;;  %v6975_v14 = vpop.f32.mrb[188].mxu1  ;;  %8462 = vmatprep.subr.bf16.mxu0 %v12524_v33 }
 0x387   : > { %v6976_v52 = vpop.f32.mrb[189].mxu1 }
 0x388   : > { %v6977_v16 = vadd.f32 %v6976_v52, %v6975_v14  ;;  %v8475_v52 = vpack.c.bf16 %v3718_v47, %v3717_v25 }
 0x389   : > { %8464 = vmatpush3.bf16.msra.mxu0 %v8463_v42 }
 0x38a   : > { %v11044_v5 = vadd.f32 %v6977_v16, %v10976_v2  ;;  %v6978_v57 = vpop.f32.mrb[190].mxu1  ;;  %8465 = vmatprep.subr.bf16.mxu0 %v12524_v33 }
 0x38b   : > { %v6979_v60 = vpop.f32.mrb[191].mxu1 }
 0x38c   : > { %v6980_v55 = vadd.f32 %v6979_v60, %v6978_v57  ;;  %v8478_v57 = vpack.c.bf16 %v3720_v24, %v3719_v43 }
 0x38d   : > { %8467 = vmatpush3.bf16.msra.mxu0 %v8466_v0 }
 0x38e   : > { %v11054_v53 = vadd.f32 %v6980_v55, %v10978_v58  ;;  %v6981_v2 = vpop.f32.mrb[192].mxu1  ;;  %8468 = vmatprep.subr.bf16.mxu0 %v12524_v33  ;;  %v3722_v55 = vld [vmem:[%s12513_s6 + $0x48] sm:$0xff] }
 0x38f   : > { %v6982_v61 = vpop.f32.mrb[193].mxu1 }
 0x390   : > { %v6983_v22 = vadd.f32 %v6982_v61, %v6981_v2  ;;  %7448 = vmatmul.mubr.f32.vlgmr.msra.gmra.mrb[8].mxu0 %v3729_v35  ;;  %v3723_v2 = vld [vmem:[%s12513_s6 + $0x50] sm:$0xff]  ;;  %v3724_v61 = vld [vmem:[%s12513_s6 + $0x58] sm:$0xff]  ;;  %v3726_v35 = vld [vmem:[%s12513_s6 + $0x68] sm:$0xff] }
 0x391   : > { %7450 = vmatprep.mubr.msk.f32.mxu0 %vm8966_vm6, %v11067_v63 }
 0x392   : > { %v11064_v20 = vadd.f32 %v6983_v22, %v10980_v37  ;;  %v6984_v58 = vpop.f32.mrb[194].mxu1 }
 0x393   : > { %v6985_v30 = vpop.f32.mrb[195].mxu1 }
 0x394   : > { %v6986_v39 = vadd.f32 %v6985_v30, %v6984_v58  ;;  %7451 = vmatmul.mubr.f32.gmra.mrb[10].mxu0 %v3730_v19  ;;  %v8484_v58 = vpack.c.bf16 %v3724_v61, %v3723_v2 }
 0x395   : > { %7453 = vmatprep.mubr.msk.f32.mxu0 %vm8966_vm6, %v11067_v63 }
 0x396   : > { %v11072_v59 = vadd.f32 %v6986_v39, %v10982_v40  ;;  %v6987_v54 = vpop.f32.mrb[196].mxu1  ;;  %v3725_v39 = vld [vmem:[%s12513_s6 + $0x60] sm:$0xff] }
 0x397   : > { %v6988_v37 = vpop.f32.mrb[197].mxu1 }
 0x398   : > { %v6989_v4 = vadd.f32 %v6988_v37, %v6987_v54 }
 0x39a   : > { %v11077_v11 = vadd.f32 %v6989_v4, %v10984_v34  ;;  %v6990_v15 = vpop.f32.mrb[198].mxu1  ;;  %v3713_v34 = vld [vmem:[%s12513_s6] sm:$0xff] }
 0x39b   : > { %v6991_v50 = vpop.f32.mrb[199].mxu1  ;;  %v8469_v9 = vpack.c.bf16 %v3714_v17, %v3713_v34 }
 0x39c   : > { %v6992_v7 = vadd.f32 %v6991_v50, %v6990_v15  ;;  %v8487_v15 = vpack.c.bf16 %v3726_v35, %v3725_v39 }
 0x39d   : > { %8470 = vmatpush3.bf16.msra.mxu0 %v8469_v9 }
 0x39e   : > { %v11082_v40 = vadd.f32 %v6992_v7, %v10986_v18  ;;  %v6993_v45 = vpop.f32.mrb[200].mxu1  ;;  %v3715_v18 = vld [vmem:[%s12513_s6 + $0x10] sm:$0xff]  ;;  %8471 = vmatprep.subr.bf16.mxu0 %v12524_v33 }
 0x39f   : > { %v6994_v32 = vpop.f32.mrb[201].mxu1  ;;  %v3727_v7 = vld [vmem:[%s12513_s6 + $0x70] sm:$0xff] }
 0x3a0   : > { %v6995_v27 = vadd.f32 %v6994_v32, %v6993_v45  ;;  %v3728_v45 = vld [vmem:[%s12513_s6 + $0x78] sm:$0xff] }
 0x3a1   : > { %v8490_v34 = vpack.c.bf16 %v3728_v45, %v3727_v7 }
 0x3a2   : > { %v11085_v8 = vadd.f32 %v6995_v27, %v10988_v21  ;;  %v6996_v49 = vpop.f32.mrb[202].mxu1  ;;  %v3716_v21 = vld [vmem:[%s12513_s6 + $0x18] sm:$0xff] }
 0x3a3   : > { %v6997_v23 = vpop.f32.mrb[203].mxu1  ;;  %v8472_v10 = vpack.c.bf16 %v3716_v21, %v3715_v18 }
 0x3a4   : > { %v6998_v31 = vadd.f32 %v6997_v23, %v6996_v49 }
 0x3a5   : > { %8473 = vmatpush3.bf16.msra.mxu0 %v8472_v10 }
 0x3a6   : > { %v11100_v29 = vadd.f32 %v6998_v31, %v10990_v28  ;;  %v6999_v51 = vpop.f32.mrb[204].mxu1  ;;  %8474 = vmatprep.subr.bf16.mxu0 %v12524_v33 }
 0x3a7   : > { %v7000_v38 = vpop.f32.mrb[205].mxu1 }
 0x3a8   : > { %v7001_v36 = vadd.f32 %v7000_v38, %v6999_v51 }
 0x3a9   : > { %8476 = vmatpush3.bf16.msra.mxu0 %v8475_v52 }
 0x3aa   : > { %v11110_v14 = vadd.f32 %v7001_v36, %v10998_v3  ;;  %v7002_v28 = vpop.f32.mrb[206].mxu1  ;;  %8477 = vmatprep.subr.bf16.mxu0 %v12524_v33  ;;  %v3721_v3 = vld [vmem:[%s12513_s6 + $0x40] sm:$0xff] }
 0x3ab   : > { %v7003_v16 = vpop.f32.mrb[207].mxu1  ;;  %v8481_v62 = vpack.c.bf16 %v3722_v55, %v3721_v3 }
 0x3ad   : > { %8479 = vmatpush3.bf16.msra.mxu0 %v8478_v57 }
 0x3ae   : > { %v7037_v44 = vpop.f32.mrb[208].mxu1  ;;  %8480 = vmatprep.subr.bf16.mxu0 %v12524_v33 }
 0x3af   : > { %v7038_v60 = vpop.f32.mrb[209].mxu1 }
 0x3b1   : > { %8482 = vmatpush3.bf16.msra.mxu0 %v8481_v62 }
 0x3b2   : > { %v7040_v46 = vpop.f32.mrb[210].mxu1  ;;  %8483 = vmatprep.subr.bf16.mxu0 %v12524_v33 }
 0x3b3   : > { %v7041_v42 = vpop.f32.mrb[211].mxu1 }
 0x3b4   : > { %v7042_v22 = vadd.f32 %v7041_v42, %v7040_v46 }
 0x3b5   : > { %8485 = vmatpush3.bf16.msra.mxu0 %v8484_v58 }
 0x3b6   : > { %v3217_v48 = vadd.f32 %v7042_v22, %v11024_v6  ;;  %v7043_v0 = vpop.f32.mrb[212].mxu1  ;;  %8486 = vmatprep.subr.bf16.mxu0 %v12524_v33 }
 0x3b7   : > { %v7044_v30 = vpop.f32.mrb[213].mxu1 }
 0x3b8   : > { %v11147_v54 = vadd.f32 %v11136_v41, %v3217_v48  ;;  %v7045_v37 = vadd.f32 %v7044_v30, %v7043_v0 }
 0x3b9   : > { %8488 = vmatpush3.bf16.msra.mxu0 %v8487_v15 }
 0x3ba   : > { %v3237_v6 = vand.u32 2147483647, %v11147_v54  ;;  %v3218_v4 = vadd.f32 %v7045_v37, %v11034_v13  ;;  %v7046_v19 = vpop.f32.mrb[214].mxu1  ;;  %8489 = vmatprep.subr.bf16.mxu0 %v12524_v33  ;;  %v3267_v47 = vmul.f32 -0.5, %v11147_v54 }
 0x3bb   : > { %v7047_v50 = vpop.f32.mrb[215].mxu1 }
 0x3bc   : > { %v3239_v32 = vmul.f32 0.70710677, %v3237_v6  ;;  %v11161_v27 = vadd.f32 %v11136_v41, %v3218_v4  ;;  %v7048_v13 = vadd.f32 %v7047_v50, %v7046_v19  ;;  %v3269_v60 = vmul.f32 %v3267_v47, %v11147_v54 }
 0x3bd   : > { %8491 = vmatpush3.bf16.msra.mxu0 %v8490_v34  ;;  %v3277_v34 = vmax.f32 %v11147_v54, 0.0 }
 0x3be   : > { %v3241_v49 = vmul.f32 0.3275911, %v3239_v32  ;;  %v3238_v23 = vand.u32 2147483647, %v11161_v27  ;;  %v3219_v17 = vadd.f32 %v7048_v13, %v11044_v5  ;;  %v7049_v18 = vpop.f32.mrb[216].mxu1  ;;  %8492 = vmatprep.subr.bf16.mxu0 %v12524_v33  ;;  %v3268_v43 = vmul.f32 -0.5, %v11161_v27 }
 0x3bf   : > { %v7050_v21 = vpop.f32.mrb[217].mxu1  ;;  %v3271_v58 = vmul.f32 1.442695, %v3269_v60  ;;  %v3278_v60 = vmax.f32 %v11161_v27, 0.0 }
 0x3c0   : > { %v3243_v31 = vadd.f32 1.0, %v3241_v49  ;;  %v3240_v9 = vmul.f32 0.70710677, %v3238_v23  ;;  %v11169_v51 = vadd.f32 %v11136_v41, %v3219_v17  ;;  %v7051_v10 = vadd.f32 %v7050_v21, %v7049_v18 }
 0x3c1   : > { %v3270_v2 = vmul.f32 %v3268_v43, %v11161_v27 }
 0x3c2   : > { %8831 = vrcp.f32 %v3243_v31  ;;  %v3242_v38 = vmul.f32 0.3275911, %v3240_v9  ;;  %v7052_v25 = vpop.f32.mrb[218].mxu1  ;;  %v3297_v5 = vand.u32 2147483647, %v11169_v51  ;;  %v3220_v28 = vadd.f32 %v7051_v10, %v11054_v53 }
 0x3c3   : > { %v7053_v52 = vpop.f32.mrb[219].mxu1  ;;  %v3327_v61 = vmul.f32 -0.5, %v11169_v51  ;;  %v3273_v7 = vmul.f32 1.442695, %v3270_v2  ;;  %v11209_v9 = vmul.f32 0.5, %v3237_v6 }
 0x3c4   : > { %v3244_v36 = vadd.f32 1.0, %v3242_v38  ;;  %v3299_v16 = vmul.f32 0.70710677, %v3297_v5  ;;  %v11179_v24 = vadd.f32 %v11136_v41, %v3220_v28  ;;  %v7054_v44 = vadd.f32 %v7053_v52, %v7052_v25 }
 0x3c5   : > { %v3329_v45 = vmul.f32 %v3327_v61, %v11169_v51 }
 0x3c6   : > { %8833 = vrcp.f32 %v3244_v36  ;;  %v7055_v57 = vpop.f32.mrb[220].mxu1  ;;  %v3301_v3 = vmul.f32 0.3275911, %v3299_v16  ;;  %v3356_v46 = vand.u32 2147483647, %v11179_v24  ;;  %v3221_v53 = vadd.f32 %v7054_v44, %v11064_v20 }
 0x3c7   : > { %v7056_v55 = vpop.f32.mrb[221].mxu1  ;;  %v3386_v15 = vmul.f32 -0.5, %v11179_v24  ;;  %v3332_v28 = vmul.f32 1.442695, %v3329_v45 }
 0x3c8   : > { %v3303_v62 = vadd.f32 1.0, %v3301_v3  ;;  %v7057_v42 = vadd.f32 %v7056_v55, %v7055_v57  ;;  %v3358_v22 = vmul.f32 0.70710677, %v3356_v46  ;;  %v11189_v48 = vadd.f32 %v11136_v41, %v3221_v53 }
 0x3c9   : > { %v3388_v47 = vmul.f32 %v3386_v15, %v11179_v24  ;;  %v11224_v3 = vmul.f32 0.5, %v3238_v23 }
 0x3ca   : > { %v7058_v0 = vpop.f32.mrb[222].mxu1  ;;  %8835 = vrcp.f32 %v3303_v62  ;;  %v3222_v30 = vadd.f32 %v7057_v42, %v11072_v59  ;;  %v3360_v20 = vmul.f32 0.3275911, %v3358_v22  ;;  %v3414_v37 = vand.u32 2147483647, %v11189_v48 }
 0x3cb   : > { %v7059_v39 = vpop.f32.mrb[223].mxu1  ;;  %8837 = vpow2.f32 %v3271_v58  ;;  %v3444_v16 = vmul.f32 -0.5, %v11189_v48  ;;  %v3391_v61 = vmul.f32 1.442695, %v3388_v47 }
 0x3cc   : > { %v11192_v35 = vpop.eup %8831  ;;  %v7060_v4 = vadd.f32 %v7059_v39, %v7058_v0  ;;  %v11198_v50 = vadd.f32 %v11136_v41, %v3222_v30  ;;  %v3362_v32 = vadd.f32 1.0, %v3360_v20  ;;  %v3416_v59 = vmul.f32 0.70710677, %v3414_v37 }
 0x3cd   : > { %v3249_v19 = vmul.f32 1.0614054, %v11192_v35  ;;  %v3446_v58 = vmul.f32 %v3444_v16, %v11189_v48 }
 0x3ce   : > { %v7061_v13 = vpop.f32.mrb[224].mxu1  ;;  %v3415_v17 = vand.u32 2147483647, %v11198_v50  ;;  %8839 = vrcp.f32 %v3362_v32  ;;  %v3418_v21 = vmul.f32 0.3275911, %v3416_v59  ;;  %v3223_v10 = vadd.f32 %v7060_v4, %v11077_v11 }
 0x3cf   : > { %v3251_v49 = vadd.f32 -1.4531521, %v3249_v19  ;;  %v7062_v18 = vpop.f32.mrb[225].mxu1  ;;  %8841 = vpow2.f32 %v3273_v7  ;;  %v3337_v4 = vmax.f32 %v11169_v51, 0.0  ;;  %v3445_v7 = vmul.f32 -0.5, %v11198_v50 }
 0x3d0   : > { %v11205_v31 = vpop.eup %8833  ;;  %v3417_v36 = vmul.f32 0.70710677, %v3415_v17  ;;  %v3420_v52 = vadd.f32 1.0, %v3418_v21  ;;  %v11219_v6 = vadd.f32 %v11136_v41, %v3223_v10  ;;  %v7063_v32 = vadd.f32 %v7062_v18, %v7061_v13 }
 0x3d1   : > { %v3253_v38 = vmul.f32 %v11192_v35, %v3251_v49  ;;  %v3250_v25 = vmul.f32 1.0614054, %v11205_v31 }
 0x3d2   : > { %v7064_v43 = vpop.f32.mrb[226].mxu1  ;;  %v3419_v11 = vmul.f32 0.3275911, %v3417_v36  ;;  %8843 = vrcp.f32 %v3420_v52  ;;  %v3474_v55 = vand.u32 2147483647, %v11219_v6  ;;  %v3224_v52 = vadd.f32 %v7063_v32, %v11082_v40 }
 0x3d3   : > { %v3255_v44 = vadd.f32 1.4214138, %v3253_v38  ;;  %v3252_v57 = vadd.f32 -1.4531521, %v3250_v25  ;;  %v7065_v53 = vpop.f32.mrb[227].mxu1  ;;  %8845 = vpow2.f32 %v3332_v28 }
 0x3d4   : > { %v11227_v62 = vpop.eup %8835  ;;  %v3421_v22 = vadd.f32 1.0, %v3419_v11  ;;  %v3476_v23 = vmul.f32 0.70710677, %v3474_v55  ;;  %v7066_v10 = vadd.f32 %v7065_v53, %v7064_v43  ;;  %v3448_v36 = vmul.f32 1.442695, %v3446_v58 }
 0x3d5   : > { %v3257_v42 = vmul.f32 %v11192_v35, %v3255_v44  ;;  %v3254_v2 = vmul.f32 %v11205_v31, %v3252_v57  ;;  %v3309_v0 = vmul.f32 1.0614054, %v11227_v62  ;;  %v8838_v59 = vpop.eup %8837  ;;  %v11248_v43 = vadd.f32 %v11136_v41, %v3224_v52 }
 0x3d6   : > { %v7067_v30 = vpop.f32.mrb[228].mxu1  ;;  %8847 = vrcp.f32 %v3421_v22  ;;  %v3478_v45 = vmul.f32 0.3275911, %v3476_v23  ;;  %v3225_v18 = vadd.f32 %v7066_v10, %v11085_v8  ;;  %v3447_v23 = vmul.f32 %v3445_v7, %v11198_v50 }
 0x3d7   : > { %v3259_v39 = vadd.f32 -0.28449672, %v3257_v42  ;;  %v3256_v20 = vadd.f32 1.4214138, %v3254_v2  ;;  %v7068_v19 = vpop.f32.mrb[229].mxu1 }
 0x3d8   : > { %v3311_v15 = vadd.f32 -1.4531521, %v3309_v0  ;;  %v7069_v38 = vadd.f32 %v7068_v19, %v7067_v30  ;;  %v11239_v25 = vpop.eup %8839  ;;  %v3480_v28 = vadd.f32 1.0, %v3478_v45  ;;  %v3533_v30 = vand.u32 2147483647, %v11248_v43 }
 0x3d9   : > { %v3261_v49 = vmul.f32 %v11192_v35, %v3259_v39  ;;  %v3258_v21 = vmul.f32 %v11205_v31, %v3256_v20  ;;  %v3368_v13 = vmul.f32 1.0614054, %v11239_v25  ;;  %v8842_v2 = vpop.eup %8841  ;;  %v3504_v45 = vmul.f32 -0.5, %v11219_v6 }
 0x3da   : > { %v3313_v47 = vmul.f32 %v11227_v62, %v3311_v15  ;;  %v11243_v16 = vpop.f32.mrb[230].mxu1  ;;  %8849 = vrcp.f32 %v3480_v28  ;;  %v11251_v53 = vadd.f32 %v7069_v38, %v11100_v29  ;;  %v11268_v32 = vadd.f32 %v11136_v41, %v3225_v18 }
 0x3db   : > { %v3263_v44 = vadd.f32 0.2548296, %v3261_v49  ;;  %v3260_v57 = vadd.f32 -0.28449672, %v3258_v21  ;;  %v11253_v42 = vpop.f32.mrb[231].mxu1  ;;  %8851 = vpow2.f32 %v3391_v61 }
 0x3dc   : > { %v3315_v11 = vadd.f32 1.4214138, %v3313_v47  ;;  %v3370_v0 = vadd.f32 -1.4531521, %v3368_v13  ;;  %v11257_v58 = vpop.eup %8843  ;;  %8853 = vpow2.f32 %v3448_v36  ;;  %v3535_v61 = vmul.f32 0.70710677, %v3533_v30 }
 0x3dd   : > { %v3265_v40 = vmul.f32 %v11192_v35, %v3263_v44  ;;  %v3262_v22 = vmul.f32 %v11205_v31, %v3260_v57  ;;  %v3426_v19 = vmul.f32 1.0614054, %v11257_v58  ;;  %v8846_v35 = vpop.eup %8845  ;;  %v3450_v36 = vmul.f32 1.442695, %v3447_v23 }
 0x3de   : > { %v3317_v8 = vmul.f32 %v11227_v62, %v3315_v11  ;;  %v3372_v20 = vmul.f32 %v11239_v25, %v3370_v0  ;;  %v3537_v28 = vmul.f32 0.3275911, %v3535_v61 }
 0x3df   : > { %v3275_v29 = vmul.f32 %v8838_v59, %v3265_v40  ;;  %v3264_v39 = vadd.f32 0.2548296, %v3262_v22  ;;  %v3428_v10 = vadd.f32 -1.4531521, %v3426_v19 }
 0x3e0   : > { %v3319_v15 = vadd.f32 -0.28449672, %v3317_v8  ;;  %v11270_v49 = vpop.eup %8847  ;;  %v3374_v21 = vadd.f32 1.4214138, %v3372_v20  ;;  %v3539_v11 = vadd.f32 1.0, %v3537_v28 }
 0x3e1   : > { %v3281_v7 = vmul.f32 %v11209_v9, %v3275_v29  ;;  %v3266_v59 = vmul.f32 %v11205_v31, %v3264_v39  ;;  %v3427_v47 = vmul.f32 1.0614054, %v11270_v49  ;;  %v3430_v13 = vmul.f32 %v11257_v58, %v3428_v10 }
 0x3e2   : > { %v3321_v38 = vmul.f32 %v11227_v62, %v3319_v15  ;;  %v3376_v57 = vmul.f32 %v11239_v25, %v3374_v21  ;;  %v3506_v31 = vmul.f32 %v3504_v45, %v11219_v6  ;;  %v3592_v8 = vand.u32 2147483647, %v11268_v32 }
 0x3e3   : > { %v3283_v52 = vsub.f32 %v3277_v34, %v3281_v7  ;;  %v3276_v44 = vmul.f32 %v8842_v2, %v3266_v59  ;;  %v3429_v9 = vadd.f32 -1.4531521, %v3427_v47  ;;  %v3432_v0 = vadd.f32 1.4214138, %v3430_v13 }
 0x3e4   : > { %v3323_v18 = vadd.f32 0.2548296, %v3321_v38  ;;  %v3378_v22 = vadd.f32 -0.28449672, %v3376_v57  ;;  %v11283_v23 = vpop.eup %8849  ;;  %v3339_v34 = vmul.f32 0.5, %v3297_v5  ;;  %8855 = vrcp.f32 %v3539_v11 }
 0x3e5   : > { %3285 = vst [vmem:[#allocation3 + $0x13] sm:$0xf8] %v3283_v52  ;;  %v3282_v40 = vmul.f32 %v11224_v3, %v3276_v44  ;;  %v3431_v2 = vmul.f32 %v11270_v49, %v3429_v9  ;;  %v8852_v29 = vpop.eup %8851  ;;  %v3434_v20 = vmul.f32 %v11257_v58, %v3432_v0  ;;  %v3486_v19 = vmul.f32 1.0614054, %v11283_v23 }
 0x3e6   : > { %v3325_v54 = vmul.f32 %v11227_v62, %v3323_v18  ;;  %v3380_v3 = vmul.f32 %v11239_v25, %v3378_v22  ;;  %v8854_v15 = vpop.eup %8853  ;;  %v3509_v62 = vmul.f32 1.442695, %v3506_v31  ;;  %v3594_v5 = vmul.f32 0.70710677, %v3592_v8 }
 0x3e7   : > { %v3284_v39 = vsub.f32 %v3278_v60, %v3282_v40  ;;  %v3433_v61 = vadd.f32 1.4214138, %v3431_v2  ;;  %v3436_v59 = vadd.f32 -0.28449672, %v3434_v20  ;;  %8857 = vpow2.f32 %v3450_v36 }
 0x3e8   : > { %v3335_v45 = vmul.f32 %v8846_v35, %v3325_v54  ;;  %v3382_v7 = vadd.f32 0.2548296, %v3380_v3  ;;  %v3488_v21 = vadd.f32 -1.4531521, %v3486_v19  ;;  %v3596_v10 = vmul.f32 0.3275911, %v3594_v5 }
 0x3e9   : > { %3286 = vst [vmem:[#allocation3 + $0x1b] sm:$0xe7] %v3284_v39   ;;  %v3435_v60 = vmul.f32 %v11270_v49, %v3433_v61  ;;  %v11299_v38 = vadd.f32 %v11136_v41, %v11251_v53  ;;  %v3398_v47 = vmul.f32 0.5, %v3356_v46  ;;  %v3438_v28 = vmul.f32 %v11257_v58, %v3436_v59 }
 0x3ea   : > { %v3341_v27 = vmul.f32 %v3339_v34, %v3335_v45  ;;  %v3384_v35 = vmul.f32 %v11239_v25, %v3382_v7  ;;  %v3490_v52 = vmul.f32 %v11283_v23, %v3488_v21  ;;  %v3563_v57 = vmul.f32 -0.5, %v11248_v43 }
 0x3eb   : > { %v3437_v44 = vadd.f32 -0.28449672, %v3435_v60  ;;  %v3598_v13 = vadd.f32 1.0, %v3596_v10  ;;  %v3440_v53 = vadd.f32 0.2548296, %v3438_v28  ;;  %8859 = vpow2.f32 %v3509_v62 }
 0x3ec   : > { %v3343_v36 = vsub.f32 %v3337_v4, %v3341_v27  ;;  %v3731_v18 = vld [vmem:[#allocation3 + $0x11] sm:$0xff]  ;;  %v3394_v9 = vmul.f32 %v8852_v29, %v3384_v35  ;;  %v3492_v31 = vadd.f32 1.4214138, %v3490_v52  ;;  %v3396_v46 = vmax.f32 %v11179_v24, 0.0 }
 0x3ed   : > { %7454 = vmatmul.mubr.f32.gmra.mrb[12].mxu0 %v3731_v18  ;;  %v3439_v25 = vmul.f32 %v11270_v49, %v3437_v44  ;;  %8861 = vrcp.f32 %v3598_v13  ;;  %v3650_v11 = vand.u32 2147483647, %v11299_v38  ;;  %v3442_v4 = vmul.f32 %v11257_v58, %v3440_v53 }
 0x3ee   : > { %3345 = vst [vmem:[#allocation3 + $0x23] sm:$0x9f] %v3343_v36   ;;  %7456 = vmatprep.mubr.msk.f32.mxu0 %vm8966_vm6, %v11067_v63  ;;  %v3400_v51 = vmul.f32 %v3398_v47, %v3394_v9  ;;  %v3454_v40 = vmax.f32 %v11189_v48, 0.0  ;;  %v3494_v22 = vmul.f32 %v11283_v23, %v3492_v31  ;;  %v11317_v0 = vpop.eup %8855  ;;  %v3456_v24 = vmul.f32 0.5, %v3414_v37 }
 0x3ef   : > { %v3441_v54 = vadd.f32 0.2548296, %v3439_v25  ;;  %v3565_v34 = vmul.f32 %v3563_v57, %v11248_v43  ;;  %v3652_v2 = vmul.f32 0.70710677, %v3650_v11  ;;  %v3452_v3 = vmul.f32 %v8854_v15, %v3442_v4 }
 0x3f0   : > { %v3732_v29 = vld [vmem:[#allocation3 + $0x19] sm:$0xff]  ;;  %v3402_v39 = vsub.f32 %v3396_v46, %v3400_v51  ;;  %v3496_v20 = vadd.f32 -0.28449672, %v3494_v22  ;;  %v3545_v58 = vmul.f32 1.0614054, %v11317_v0  ;;  %v3457_v45 = vmul.f32 0.5, %v3415_v17 }
 0x3f1   : > { %7457 = vmatmul.mubr.f32.gmra.mrb[14].mxu0 %v3732_v29  ;;  %v3443_v19 = vmul.f32 %v11270_v49, %v3441_v54  ;;  %v3654_v48 = vmul.f32 0.3275911, %v3652_v2  ;;  %v7072_v37 = vadd.f32 %v11253_v42, %v11243_v16  ;;  %v8858_v61 = vpop.eup %8857  ;;  %v3458_v62 = vmul.f32 %v3456_v24, %v3452_v3 }
 0x3f2   : > { %7459 = vmatprep.mubr.msk.f32.mxu0 %vm8966_vm6, %v11067_v63  ;;  %3404 = vst [vmem:[#allocation3 + $0x2b] sm:$0x7f] %v3402_v39  ;;  %v3498_v15 = vmul.f32 %v11283_v23, %v3496_v20  ;;  %v3547_v5 = vadd.f32 -1.4531521, %v3545_v58  ;;  %v3622_v7 = vmul.f32 -0.5, %v11268_v32  ;;  %v3455_v10 = vmax.f32 %v11198_v50, 0.0 }
 0x3f3   : > { %v3453_v59 = vmul.f32 %v8858_v61, %v3443_v19  ;;  %v3568_v49 = vmul.f32 1.442695, %v3565_v34  ;;  %v3656_v21 = vadd.f32 1.0, %v3654_v48  ;;  %v3227_v17 = vadd.f32 %v7072_v37, %v11110_v14 }
 0x3f4   : > { %v3460_v27 = vsub.f32 %v3454_v40, %v3458_v62  ;;  %v3500_v60 = vadd.f32 0.2548296, %v3498_v15  ;;  %v3549_v16 = vmul.f32 %v11317_v0, %v3547_v5  ;;  %v3624_v14 = vmul.f32 %v3622_v7, %v11268_v32 }
 0x3f5   : > { %v3733_v42 = vld [vmem:[#allocation3 + $0x21] sm:$0xff]  ;;  %v3459_v35 = vmul.f32 %v3457_v45, %v3453_v59  ;;  %8863 = vrcp.f32 %v3656_v21  ;;  %v11338_v47 = vadd.f32 %v11136_v41, %v3227_v17  ;;  %v8860_v28 = vpop.eup %8859  ;;  %v3516_v41 = vmul.f32 0.5, %v3474_v55 }
 0x3f6   : > { %7460 = vmatmul.mubr.f32.gmra.mrb[16].mxu0 %v3733_v42  ;;  %3462 = vst [vmem:[#allocation3 + $0x33] sm:$0xfe] %v3460_v27  ;;  %v3502_v52 = vmul.f32 %v11283_v23, %v3500_v60  ;;  %v3551_v36 = vadd.f32 1.4214138, %v3549_v16  ;;  %8865 = vpow2.f32 %v3568_v49  ;;  %v3514_v23 = vmax.f32 %v11219_v6, 0.0 }
 0x3f7   : > { %7462 = vmatprep.mubr.msk.f32.mxu0 %vm8966_vm6, %v11067_v63  ;;  %v8862_v44 = vpop.eup %8861  ;;  %v3461_v57 = vsub.f32 %v3455_v10, %v3459_v35  ;;  %v3651_v50 = vand.u32 2147483647, %v11338_v47  ;;  %v3627_v4 = vmul.f32 1.442695, %v3624_v14  ;;  %v3680_v40 = vmul.f32 -0.5, %v11299_v38 }
 0x3f8   : > { %v3512_v13 = vmul.f32 %v8860_v28, %v3502_v52  ;;  %v3553_v18 = vmul.f32 %v11317_v0, %v3551_v36  ;;  %v3604_v9 = vmul.f32 1.0614054, %v8862_v44  ;;  %v3575_v61 = vmul.f32 0.5, %v3533_v30 }
 0x3f9   : > { %3463 = vst [vmem:[#allocation3 + $0x3b] sm:$0xf9] %v3461_v57   ;;  %v3653_v53 = vmul.f32 0.70710677, %v3651_v50  ;;  %v3734_v31 = vld [vmem:[#allocation3 + $0x29] sm:$0xff]  ;;  %8867 = vpow2.f32 %v3627_v4  ;;  %v3682_v3 = vmul.f32 %v3680_v40, %v11299_v38  ;;  %v3573_v7 = vmax.f32 %v11248_v43, 0.0 }
 0x3fa   : > { %v3518_v46 = vmul.f32 %v3516_v41, %v3512_v13  ;;  %v3555_v25 = vadd.f32 -0.28449672, %v3553_v18  ;;  %v3606_v51 = vadd.f32 -1.4531521, %v3604_v9  ;;  %7463 = vmatmul.mubr.f32.gmra.mrb[18].mxu0 %v3734_v31  ;;  %v3681_v21 = vmul.f32 -0.5, %v11338_v47 }
 0x3fb   : > { %v3655_v22 = vmul.f32 0.3275911, %v3653_v53  ;;  %7465 = vmatprep.mubr.msk.f32.mxu0 %vm8966_vm6, %v11067_v63  ;;  %v3684_v5 = vmul.f32 1.442695, %v3682_v3  ;;  %v3634_v52 = vmul.f32 0.5, %v3592_v8  ;;  %v3632_v57 = vmax.f32 %v11268_v32, 0.0 }
 0x3fc   : > { %v3520_v55 = vsub.f32 %v3514_v23, %v3518_v46  ;;  %v3557_v24 = vmul.f32 %v11317_v0, %v3555_v25  ;;  %v3608_v54 = vmul.f32 %v8862_v44, %v3606_v51  ;;  %v3683_v43 = vmul.f32 %v3681_v21, %v11338_v47  ;;  %v3702_v21 = vld [vmem:[#allocation3 + $0x10] sm:$0xff] }
 0x3fd   : > { %v3657_v6 = vadd.f32 1.0, %v3655_v22  ;;  %v3735_v34 = vld [vmem:[#allocation3 + $0x31] sm:$0xff]  ;;  %v3692_v32 = vmul.f32 0.5, %v3650_v11  ;;  %v3690_v40 = vmax.f32 %v11299_v38, 0.0  ;;  %v3693_v11 = vmul.f32 0.5, %v3651_v50 }
 0x3fe   : > { %3522 = vst [vmem:[#allocation3 + $0x43] sm:$0xe7] %v3520_v55   ;;  %v3559_v2 = vadd.f32 0.2548296, %v3557_v24  ;;  %v3610_v29 = vadd.f32 1.4214138, %v3608_v54  ;;  %7466 = vmatmul.mubr.f32.gmra.mrb[20].mxu0 %v3735_v34 }
 0x3ff   : > { %v8864_v39 = vpop.eup %8863  ;;  %8869 = vrcp.f32 %v3657_v6  ;;  %7468 = vmatprep.mubr.msk.f32.mxu0 %vm8966_vm6, %v11067_v63  ;;  %v3686_v9 = vmul.f32 1.442695, %v3683_v43  ;;  %v3691_v3 = vmax.f32 %v11338_v47, 0.0  ;;  %v3700_v47 = vld [vmem:[#allocation3] sm:$0xff] }
 0x400   : > { %v3561_v20 = vmul.f32 %v11317_v0, %v3559_v2  ;;  %v3612_v58 = vmul.f32 %v8862_v44, %v3610_v29  ;;  %v3662_v19 = vmul.f32 1.0614054, %v8864_v39  ;;  %v3736_v45 = vld [vmem:[#allocation3 + $0x39] sm:$0xff]  ;;  %v8866_v48 = vpop.eup %8865  ;;  %8871 = vpow2.f32 %v3684_v5 }
 0x401   : > { %8873 = vpow2.f32 %v3686_v9  ;;  %v6291_v5 = vld [vmem:[%s12513_s6 + $0x120] sm:$0xff]  ;;  %v3707_v9 = vld [vmem:[#allocation3 + $0x38] sm:$0xff] }
 0x402   : > { %v3571_v37 = vmul.f32 %v8866_v48, %v3561_v20  ;;  %v3614_v62 = vadd.f32 -0.28449672, %v3612_v58  ;;  %v3664_v15 = vadd.f32 -1.4531521, %v3662_v19  ;;  %7469 = vmatmul.mubr.f32.gmra.mrb[22].mxu0 %v3736_v45  ;;  %v6287_v19 = vld [vmem:[%s12513_s6 + $0x100] sm:$0xff]  ;;  %v6288_v45 = vld [vmem:[%s12513_s6 + $0x108] sm:$0xff] }
 0x403   : > { %7471 = vmatprep.mubr.msk.f32.mxu0 %vm8966_vm6, %v11067_v63  ;;  %v8868_v30 = vpop.eup %8867  ;;  %v8493_v50 = vpack.c.bf16 %v6288_v45, %v6287_v19  ;;  %v11516_v19 = vld [vmem:[#allocation3 + $0x1a] sm:$0xff] }
 0x404   : > { %v3577_v59 = vmul.f32 %v3575_v61, %v3571_v37  ;;  %v3616_v49 = vmul.f32 %v8862_v44, %v3614_v62  ;;  %v3666_v0 = vmul.f32 %v8864_v39, %v3664_v15  ;;  %v6289_v37 = vld [vmem:[%s12513_s6 + $0x110] sm:$0xff]  ;;  %v6290_v61 = vld [vmem:[%s12513_s6 + $0x118] sm:$0xff]  ;;  %v3701_v62 = vld [vmem:[#allocation3 + $0x8] sm:$0xff] }
 0x405   : > { %v3737_v17 = vld [vmem:[#allocation3 + $0x41] sm:$0xff]  ;;  %v8496_v15 = vpack.c.bf16 %v6290_v61, %v6289_v37 }
 0x406   : > { %v3579_v27 = vsub.f32 %v3573_v7, %v3577_v59  ;;  %v3618_v60 = vadd.f32 0.2548296, %v3616_v49  ;;  %v3668_v16 = vadd.f32 1.4214138, %v3666_v0  ;;  %7472 = vmatmul.mubr.f32.gmra.mrb[24].mxu0 %v3737_v17  ;;  %v6292_v7 = vld [vmem:[%s12513_s6 + $0x128] sm:$0xff]  ;;  %v6293_v49 = vld [vmem:[%s12513_s6 + $0x130] sm:$0xff] }
 0x407   : > { %7474 = vmatprep.mubr.msk.f32.mxu0 %vm8966_vm6, %v11067_v63  ;;  %v8499_v59 = vpack.c.bf16 %v6292_v7, %v6291_v5  ;;  %v6294_v0 = vld [vmem:[%s12513_s6 + $0x138] sm:$0xff]  ;;  %v11528_v37 = vld [vmem:[#allocation3 + $0x22] sm:$0xff]  ;;  %v11540_v5 = vld [vmem:[#allocation3 + $0x2a] sm:$0xff] }
 0x408   : > { %3581 = vst [vmem:[#allocation3 + $0x4b] sm:$0x9f] %v3579_v27   ;;  %v3620_v42 = vmul.f32 %v8862_v44, %v3618_v60  ;;  %v3670_v10 = vmul.f32 %v8864_v39, %v3668_v16  ;;  %v8502_v17 = vpack.c.bf16 %v6294_v0, %v6293_v49  ;;  %v6295_v27 = vld [vmem:[%s12513_s6 + $0x140] sm:$0xff]  ;;  %v6296_v60 = vld [vmem:[%s12513_s6 + $0x148] sm:$0xff]  ;;  %v3703_v16 = vld [vmem:[#allocation3 + $0x18] sm:$0xff] }
 0x409   : > { %v8870_v35 = vpop.eup %8869  ;;  %v6318_v49 = vld [vmem:[%s12513_s6 + $0x1f8] sm:$0xff] }
 0x40a   : > { %v3630_v28 = vmul.f32 %v8868_v30, %v3620_v42  ;;  %v3672_v36 = vadd.f32 -0.28449672, %v3670_v10  ;;  %v3663_v14 = vmul.f32 1.0614054, %v8870_v35  ;;  %v8872_v51 = vpop.eup %8871  ;;  %v8505_v30 = vpack.c.bf16 %v6296_v60, %v6295_v27  ;;  %v6297_v42 = vld [vmem:[%s12513_s6 + $0x150] sm:$0xff]  ;;  %v6298_v10 = vld [vmem:[%s12513_s6 + $0x158] sm:$0xff] }
 0x40b   : > { %v8874_v29 = vpop.eup %8873  ;;  %v8508_v43 = vpack.c.bf16 %v6298_v10, %v6297_v42  ;;  %v11552_v0 = vld [vmem:[#allocation3 + $0x32] sm:$0xff]  ;;  %v11564_v27 = vld [vmem:[#allocation3 + $0x42] sm:$0xff] }
 0x40c   : > { %v3636_v13 = vmul.f32 %v3634_v52, %v3630_v28  ;;  %v3674_v41 = vmul.f32 %v8864_v39, %v3672_v36  ;;  %v3665_v18 = vadd.f32 -1.4531521, %v3663_v14  ;;  %v6299_v28 = vld [vmem:[%s12513_s6 + $0x160] sm:$0xff]  ;;  %v6300_v52 = vld [vmem:[%s12513_s6 + $0x168] sm:$0xff] }
 0x40d   : > { %v3705_v36 = vld [vmem:[#allocation3 + $0x28] sm:$0xff]  ;;  %v8511_v14 = vpack.c.bf16 %v6300_v52, %v6299_v28  ;;  %v6319_v42 = vld [vmem:[%s12513_s6 + $0x200] sm:$0xff]  ;;  %v6321_v28 = vld [vmem:[%s12513_s6 + $0x210] sm:$0xff] }
 0x40e   : > { %v3638_v23 = vsub.f32 %v3632_v57, %v3636_v13  ;;  %v3676_v53 = vadd.f32 0.2548296, %v3674_v41  ;;  %v3667_v31 = vmul.f32 %v8870_v35, %v3665_v18  ;;  %v6301_v57 = vld [vmem:[%s12513_s6 + $0x170] sm:$0xff]  ;;  %v6302_v13 = vld [vmem:[%s12513_s6 + $0x178] sm:$0xff]  ;;  %v6320_v10 = vld [vmem:[%s12513_s6 + $0x208] sm:$0xff] }
 0x40f   : > { %v3738_v44 = vld [vmem:[#allocation3 + $0x49] sm:$0xff]  ;;  %v8514_v18 = vpack.c.bf16 %v6302_v13, %v6301_v57  ;;  %v6322_v52 = vld [vmem:[%s12513_s6 + $0x218] sm:$0xff] }
 0x410   : > { %3640 = vst [vmem:[#allocation3 + $0x53] sm:$0x7f] %v3638_v23  ;;  %v3678_v46 = vmul.f32 %v8864_v39, %v3676_v53  ;;  %v3669_v25 = vadd.f32 1.4214138, %v3667_v31  ;;  %7475 = vmatmul.mubr.f32.gmra.mrb[26].mxu0 %v3738_v44  ;;  %v3706_v41 = vld [vmem:[#allocation3 + $0x30] sm:$0xff]  ;;  %v3708_v23 = vld [vmem:[#allocation3 + $0x40] sm:$0xff] }
 0x411   : > { %7477 = vmatprep.mubr.msk.f32.mxu0 %vm8966_vm6, %v11067_v63  ;;  %v11457_v53 = vld [vmem:[#allocation3 + $0xb] sm:$0xff] }
 0x412   : > { %v3688_v8 = vmul.f32 %v8872_v51, %v3678_v46  ;;  %v3671_v4 = vmul.f32 %v8870_v35, %v3669_v25  ;;  %v3709_v31 = vld [vmem:[#allocation3 + $0x48] sm:$0xff]  ;;  %v6303_v46 = vld [vmem:[%s12513_s6 + $0x180] sm:$0xff] }
 0x413   : > { %v6304_v25 = vld [vmem:[%s12513_s6 + $0x188] sm:$0xff] }
 0x414   : > { %v3694_v22 = vmul.f32 %v3692_v32, %v3688_v8  ;;  %v3673_v55 = vadd.f32 -0.28449672, %v3671_v4  ;;  %v4015_v8 = vld [vmem:[#allocation3 + $0x2] sm:$0xff]  ;;  %v8517_v32 = vpack.c.bf16 %v6304_v25, %v6303_v46  ;;  %v6305_v4 = vld [vmem:[%s12513_s6 + $0x190] sm:$0xff]  ;;  %v6330_v46 = vld [vmem:[%s12513_s6 + $0x258] sm:$0xff] }
 0x415   : > { %v11569_v60 = vld [vmem:[#allocation3 + $0x4a] sm:$0xff] }
 0x416   : > { %v3696_v24 = vsub.f32 %v3690_v40, %v3694_v22  ;;  %v3675_v54 = vmul.f32 %v8870_v35, %v3673_v55  ;;  %v6306_v40 = vld [vmem:[%s12513_s6 + $0x198] sm:$0xff]  ;;  %v11483_v22 = vld [vmem:[#allocation3 + $0xa] sm:$0xff] }
 0x417   : > { %v3739_v6 = vld [vmem:[#allocation3 + $0x51] sm:$0xff]  ;;  %v8520_v55 = vpack.c.bf16 %v6306_v40, %v6305_v4  ;;  %v6324_v57 = vld [vmem:[%s12513_s6 + $0x228] sm:$0xff] }
 0x418   : > { %3698 = vst [vmem:[#allocation3 + $0x5b] sm:$0xfe] %v3696_v24  ;;  %v3677_v34 = vadd.f32 0.2548296, %v3675_v54  ;;  %7478 = vmatmul.mubr.f32.gmra.mrb[28].mxu0 %v3739_v6  ;;  %v3710_v44 = vld [vmem:[#allocation3 + $0x50] sm:$0xff]  ;;  %v6307_v24 = vld [vmem:[%s12513_s6 + $0x1a0] sm:$0xff] }
 0x419   : > { %7480 = vmatprep.mubr.msk.f32.mxu0 %vm8966_vm6, %v11067_v63  ;;  %v6308_v54 = vld [vmem:[%s12513_s6 + $0x1a8] sm:$0xff]  ;;  %v6333_v4 = vld [vmem:[%s12513_s6 + $0x270] sm:$0xff]  ;;  %v6334_v40 = vld [vmem:[%s12513_s6 + $0x278] sm:$0xff] }
 0x41a   : > { %v3679_v2 = vmul.f32 %v8870_v35, %v3677_v34  ;;  %v3704_v35 = vld [vmem:[#allocation3 + $0x20] sm:$0xff]  ;;  %v8523_v6 = vpack.c.bf16 %v6308_v54, %v6307_v24  ;;  %v6309_v34 = vld [vmem:[%s12513_s6 + $0x1b0] sm:$0xff]  ;;  %v6336_v54 = vld [vmem:[%s12513_s6 + $0x288] sm:$0xff] }
 0x41b   : > { %v6335_v24 = vld [vmem:[%s12513_s6 + $0x280] sm:$0xff] }
 0x41c   : > { %v3689_v39 = vmul.f32 %v8874_v29, %v3679_v2  ;;  %v6310_v2 = vld [vmem:[%s12513_s6 + $0x1b8] sm:$0xff] }
 0x41e   : > { %v3695_v38 = vmul.f32 %v3693_v11, %v3689_v39  ;;  %v11502_v39 = vld [vmem:[#allocation3 + $0x12] sm:$0xff] }
 0x41f   : > { %v3740_v20 = vld [vmem:[#allocation3 + $0x59] sm:$0xff] }
 0x420   : > { %v3697_v58 = vsub.f32 %v3691_v3, %v3695_v38  ;;  %7481 = vmatmul.mubr.f32.gmra.mrb[30].mxu0 %v3740_v20  ;;  %v8526_v3 = vpack.c.bf16 %v6310_v2, %v6309_v34  ;;  %v6311_v38 = vld [vmem:[%s12513_s6 + $0x1c0] sm:$0xff]  ;;  %v6312_v20 = vld [vmem:[%s12513_s6 + $0x1c8] sm:$0xff]  ;;  %v6337_v34 = vld [vmem:[%s12513_s6 + $0x290] sm:$0xff] }
 0x421   : > { %7483 = vmatprep.mubr.msk.f32.mxu0 %vm8966_vm6, %v11067_v63  ;;  %v6338_v2 = vld [vmem:[%s12513_s6 + $0x298] sm:$0xff] }
 0x422   : > { %3699 = vst [vmem:[#allocation3 + $0x63] sm:$0x1] %v3697_v58 }
 0x429   : > { %v3741_v48 = vld [vmem:[#allocation3 + $0x61] sm:$0xff] }
 0x42a   : > { %7484 = vmatmul.mubr.f32.gmra.mrb[32].mxu0 %v3741_v48  ;;  %v3712_v51 = vld [vmem:[#allocation3 + $0x60] sm:$0xff]  ;;  %v8529_v48 = vpack.c.bf16 %v6312_v20, %v6311_v38  ;;  %v6340_v38 = vld [vmem:[%s12513_s6 + $0x2a8] sm:$0xff]  ;;  %v4354_v20 = vld [vmem:[#allocation3 + $0x13] sm:$0xff] }
 0x42b   : > { %7518 = vmatprep.mubr.msk.f32.mxu0 %vm8966_vm6, %v11067_v63 }
 0x42e   : > { %7519 = vmatmul.mubr.f32.vlgmr.msra.gmra.mrb[34].mxu0 %v3700_v47  ;;  %v6313_v47 = vld [vmem:[%s12513_s6 + $0x1d0] sm:$0xff] }
 0x42f   : > { %8494 = vmatpush3.bf16.msra.mxu0 %v8493_v50  ;;  %7521 = vmatprep.mubr.msk.f32.mxu0 %vm8966_vm6, %v11067_v63  ;;  %v6314_v50 = vld [vmem:[%s12513_s6 + $0x1d8] sm:$0xff] }
 0x430   : > { %8495 = vmatprep.subr.bf16.mxu0 %v12524_v33  ;;  %v8532_v61 = vpack.c.bf16 %v6314_v50, %v6313_v47  ;;  %v6341_v47 = vld [vmem:[%s12513_s6 + $0x2b0] sm:$0xff]  ;;  %v6342_v50 = vld [vmem:[%s12513_s6 + $0x2b8] sm:$0xff] }
 0x432   : > { %7522 = vmatmul.mubr.f32.gmra.mrb[36].mxu0 %v3701_v62  ;;  %v6315_v62 = vld [vmem:[%s12513_s6 + $0x1e0] sm:$0xff] }
 0x433   : > { %7524 = vmatprep.mubr.msk.f32.mxu0 %vm8966_vm6, %v11067_v63  ;;  %8497 = vmatpush3.bf16.msra.mxu0 %v8496_v15  ;;  %v6316_v15 = vld [vmem:[%s12513_s6 + $0x1e8] sm:$0xff] }
 0x434   : > { %8498 = vmatprep.subr.bf16.mxu0 %v12524_v33  ;;  %v8535_v7 = vpack.c.bf16 %v6316_v15, %v6315_v62  ;;  %v6343_v62 = vld [vmem:[%s12513_s6 + $0x2c0] sm:$0xff]  ;;  %v6344_v15 = vld [vmem:[%s12513_s6 + $0x2c8] sm:$0xff] }
 0x436   : > { %7525 = vmatmul.mubr.f32.gmra.mrb[12].mxu0 %v3702_v21 }
 0x437   : > { %7527 = vmatprep.mubr.msk.f32.mxu0 %vm8966_vm6, %v11067_v63  ;;  %8500 = vmatpush3.bf16.msra.mxu0 %v8499_v59  ;;  %v6317_v59 = vld [vmem:[%s12513_s6 + $0x1f0] sm:$0xff] }
 0x438   : > { %8501 = vmatprep.subr.bf16.mxu0 %v12524_v33  ;;  %v8538_v21 = vpack.c.bf16 %v6318_v49, %v6317_v59  ;;  %v6345_v59 = vld [vmem:[%s12513_s6 + $0x2d0] sm:$0xff]  ;;  %v6346_v49 = vld [vmem:[%s12513_s6 + $0x2d8] sm:$0xff] }
 0x43a   : > { %7528 = vmatmul.mubr.f32.gmra.mrb[14].mxu0 %v3703_v16  ;;  %v11574_v16 = vld [vmem:[#allocation3 + $0x52] sm:$0xff] }
 0x43b   : > { %7530 = vmatprep.mubr.msk.f32.mxu0 %vm8966_vm6, %v11067_v63  ;;  %8503 = vmatpush3.bf16.msra.mxu0 %v8502_v17  ;;  %v11558_v17 = vld [vmem:[#allocation3 + $0x3a] sm:$0xff] }
 0x43c   : > { %8504 = vmatprep.subr.bf16.mxu0 %v12524_v33 }
 0x43e   : > { %7531 = vmatmul.mubr.f32.gmra.mrb[38].mxu0 %v3704_v35  ;;  %v11590_v35 = vld [vmem:[#allocation3 + $0x62] sm:$0xff] }
 0x43f   : > { %7533 = vmatprep.mubr.msk.f32.mxu0 %vm8966_vm6, %v11067_v63  ;;  %8506 = vmatpush3.bf16.msra.mxu0 %v8505_v30  ;;  %v11579_v30 = vld [vmem:[#allocation3 + $0x5a] sm:$0xff] }
 0x440   : > { %8507 = vmatprep.subr.bf16.mxu0 %v12524_v33 }
 0x442   : > { %7534 = vmatmul.mubr.f32.gmra.mrb[40].mxu0 %v3705_v36  ;;  %v8544_v36 = vpack.c.bf16 %v6322_v52, %v6321_v28  ;;  %v4360_v52 = vld [vmem:[#allocation3 + $0x43] sm:$0xff] }
 0x443   : > { %7536 = vmatprep.mubr.msk.f32.mxu0 %vm8966_vm6, %v11067_v63  ;;  %8509 = vmatpush3.bf16.msra.mxu0 %v8508_v43  ;;  %v8541_v43 = vpack.c.bf16 %v6320_v10, %v6319_v42  ;;  %v6350_v42 = vld [vmem:[%s12513_s6 + $0x2f8] sm:$0xff] }
 0x444   : > { %8510 = vmatprep.subr.bf16.mxu0 %v12524_v33  ;;  %v4359_v10 = vld [vmem:[#allocation3 + $0x3b] sm:$0xff] }
 0x446   : > { %7537 = vmatmul.mubr.f32.gmra.mrb[20].mxu0 %v3706_v41  ;;  %v6325_v41 = vld [vmem:[%s12513_s6 + $0x230] sm:$0xff] }
 0x447   : > { %7539 = vmatprep.mubr.msk.f32.mxu0 %vm8966_vm6, %v11067_v63  ;;  %8512 = vmatpush3.bf16.msra.mxu0 %v8511_v14  ;;  %v6323_v14 = vld [vmem:[%s12513_s6 + $0x220] sm:$0xff] }
 0x448   : > { %8513 = vmatprep.subr.bf16.mxu0 %v12524_v33  ;;  %v8547_v13 = vpack.c.bf16 %v6324_v57, %v6323_v14 }
 0x44a   : > { %7540 = vmatmul.mubr.f32.gmra.mrb[22].mxu0 %v3707_v9 }
 0x44b   : > { %7542 = vmatprep.mubr.msk.f32.mxu0 %vm8966_vm6, %v11067_v63  ;;  %8515 = vmatpush3.bf16.msra.mxu0 %v8514_v18  ;;  %v3711_v63 = vld [vmem:[#allocation3 + $0x58] sm:$0xff] }
 0x44c   : > { %8516 = vmatprep.subr.bf16.mxu0 %v12524_v33  ;;  %v6326_v18 = vld [vmem:[%s12513_s6 + $0x238] sm:$0xff] }
 0x44d   : > { %v8550_v9 = vpack.c.bf16 %v6326_v18, %v6325_v41  ;;  %v4363_v41 = vld [vmem:[#allocation3 + $0x5b] sm:$0xff] }
 0x44e   : > { %7543 = vmatmul.mubr.f32.gmra.mrb[24].mxu0 %v3708_v23  ;;  %v6327_v23 = vld [vmem:[%s12513_s6 + $0x240] sm:$0xff] }
 0x44f   : > { %7545 = vmatprep.mubr.msk.f32.mxu0 %vm8966_vm6, %v11457_v53 }
 0x452   : > { %7546 = vmatmul.mubr.f32.gmra.mrb[42].mxu0 %v3709_v31  ;;  %v6328_v31 = vld [vmem:[%s12513_s6 + $0x248] sm:$0xff] }
 0x453   : > { %7548 = vmatprep.mubr.msk.f32.mxu0 %vm8966_vm6, %v11457_v53 }
 0x456   : > { %7549 = vmatmul.mubr.f32.gmra.mrb[44].mxu0 %v3710_v44  ;;  %v8553_v44 = vpack.c.bf16 %v6328_v31, %v6327_v23  ;;  %v4364_v23 = vld [vmem:[#allocation3 + $0x63] sm:$0xff]  ;;  %v4365_v31 = vld [vmem:[#allocation3 + $0x6b] sm:$0xff] }
 0x457   : > { %7551 = vmatprep.mubr.msk.f32.mxu0 %vm8966_vm6, %v11457_v53 }
 0x45a   : > { %7552 = vmatmul.mubr.f32.gmra.mrb[46].mxu0 %v3711_v63  ;;  %v6329_v63 = vld [vmem:[%s12513_s6 + $0x250] sm:$0xff] }
 0x45b   : > { %7554 = vmatprep.mubr.msk.f32.mxu0 %vm8966_vm6, %v11457_v53  ;;  %v8556_v25 = vpack.c.bf16 %v6330_v46, %v6329_v63  ;;  %v6352_v63 = vld [vmem:[%s12513_s6 + $0x308] sm:$0xff] }
 0x45c   : > { %v4522_v46 = vld [vmem:[#allocation3 + $0xc] sm:$0xff] }
 0x45e   : > { %7555 = vmatmul.mubr.f32.gmra.mrb[48].mxu0 %v3712_v51  ;;  %v6331_v51 = vld [vmem:[%s12513_s6 + $0x260] sm:$0xff] }
 0x45f   : > { %7589 = vmatprep.mubr.msk.f32.mxu0 %vm8966_vm6, %v11457_v53 }
 0x462   : > { %7590 = vmatmul.mubr.f32.vlgmr.msra.gmra.mrb[50].mxu0 %v4015_v8  ;;  %v6332_v8 = vld [vmem:[%s12513_s6 + $0x268] sm:$0xff] }
 0x463   : > { %8518 = vmatpush3.bf16.msra.mxu0 %v8517_v32  ;;  %7592 = vmatprep.mubr.msk.f32.mxu0 %vm8966_vm6, %v11457_v53  ;;  %v3825_v29 = vpop.f32.mrb[8].mxu0  ;;  %v8559_v32 = vpack.c.bf16 %v6332_v8, %v6331_v51  ;;  %v6353_v51 = vld [vmem:[%s12513_s6 + $0x310] sm:$0xff]  ;;  %v6354_v8 = vld [vmem:[%s12513_s6 + $0x318] sm:$0xff] }
 0x464   : > { %8519 = vmatprep.subr.bf16.mxu0 %v12524_v33  ;;  %v7449_v11 = vpop.f32.mrb[9].mxu0 }
 0x465   : > { %v8568_v11 = vpack.c.bf16 %v6338_v2, %v6337_v34  ;;  %v6357_v2 = vld [vmem:[%s12513_s6 + $0x330] sm:$0xff] }
 0x466   : > { %7593 = vmatmul.mubr.f32.gmra.mrb[52].mxu0 %v11483_v22 }
 0x467   : > { %7595 = vmatprep.mubr.msk.f32.mxu0 %vm8966_vm6, %v11457_v53  ;;  %8521 = vmatpush3.bf16.msra.mxu0 %v8520_v55  ;;  %v11514_v58 = vpop.f32.mrb[10].mxu0  ;;  %v4196_v55 = vld [vmem:[#allocation3 + $0x6a] sm:$0xff] }
 0x468   : > { %8522 = vmatprep.subr.bf16.mxu0 %v12524_v33  ;;  %v7452_v45 = vpop.f32.mrb[11].mxu0 }
 0x46a   : > { %7596 = vmatmul.mubr.f32.gmra.mrb[12].mxu0 %v11502_v39 }
 0x46b   : > { %7598 = vmatprep.mubr.msk.f32.mxu0 %vm8966_vm6, %v11457_v53  ;;  %8524 = vmatpush3.bf16.msra.mxu0 %v8523_v6  ;;  %v8565_v6 = vpack.c.bf16 %v6336_v54, %v6335_v24  ;;  %v11797_v54 = vld [vmem:[#allocation3 + $0x14] sm:$0xff] }
 0x46c   : > { %8525 = vmatprep.subr.bf16.mxu0 %v12524_v33 }
 0x46e   : > { %7599 = vmatmul.mubr.f32.gmra.mrb[14].mxu0 %v11516_v19 }
 0x46f   : > { %7601 = vmatprep.mubr.msk.f32.mxu0 %vm8966_vm6, %v11457_v53  ;;  %8527 = vmatpush3.bf16.msra.mxu0 %v8526_v3  ;;  %v6339_v3 = vld [vmem:[%s12513_s6 + $0x2a0] sm:$0xff] }
 0x470   : > { %8528 = vmatprep.subr.bf16.mxu0 %v12524_v33 }
 0x472   : > { %7602 = vmatmul.mubr.f32.gmra.mrb[54].mxu0 %v11528_v37 }
 0x473   : > { %7604 = vmatprep.mubr.msk.f32.mxu0 %vm8966_vm6, %v11457_v53  ;;  %8530 = vmatpush3.bf16.msra.mxu0 %v8529_v48  ;;  %v8571_v48 = vpack.c.bf16 %v6340_v38, %v6339_v3  ;;  %v11809_v3 = vld [vmem:[#allocation3 + $0x1c] sm:$0xff] }
 0x474   : > { %8531 = vmatprep.subr.bf16.mxu0 %v12524_v33 }
 0x476   : > { %7605 = vmatmul.mubr.f32.gmra.mrb[56].mxu0 %v11540_v5 }
 0x477   : > { %7607 = vmatprep.mubr.msk.f32.mxu0 %vm8966_vm6, %v11457_v53  ;;  %8533 = vmatpush3.bf16.msra.mxu0 %v8532_v61  ;;  %v8574_v61 = vpack.c.bf16 %v6342_v50, %v6341_v47  ;;  %v6360_v47 = vld [vmem:[%s12513_s6 + $0x348] sm:$0xff] }
 0x478   : > { %8534 = vmatprep.subr.bf16.mxu0 %v12524_v33 }
 0x47a   : > { %7608 = vmatmul.mubr.f32.gmra.mrb[20].mxu0 %v11552_v0 }
 0x47b   : > { %7610 = vmatprep.mubr.msk.f32.mxu0 %vm8966_vm6, %v11457_v53  ;;  %8536 = vmatpush3.bf16.msra.mxu0 %v8535_v7  ;;  %v8577_v7 = vpack.c.bf16 %v6344_v15, %v6343_v62  ;;  %v11836_v62 = vld [vmem:[#allocation3 + $0x2c] sm:$0xff] }
 0x47c   : > { %8537 = vmatprep.subr.bf16.mxu0 %v12524_v33 }
 0x47e   : > { %7611 = vmatmul.mubr.f32.gmra.mrb[22].mxu0 %v11558_v17 }
 0x47f   : > { %7613 = vmatprep.mubr.msk.f32.mxu0 %vm8966_vm6, %v11457_v53  ;;  %8539 = vmatpush3.bf16.msra.mxu0 %v8538_v21  ;;  %v8580_v21 = vpack.c.bf16 %v6346_v49, %v6345_v59  ;;  %v11848_v49 = vld [vmem:[#allocation3 + $0x34] sm:$0xff] }
 0x480   : > { %8540 = vmatprep.subr.bf16.mxu0 %v12524_v33 }
 0x482   : > { %7614 = vmatmul.mubr.f32.gmra.mrb[24].mxu0 %v11564_v27 }
 0x483   : > { %7616 = vmatprep.mubr.msk.f32.mxu0 %vm8966_vm6, %v11457_v53 }
 0x486   : > { %7617 = vmatmul.mubr.f32.gmra.mrb[58].mxu0 %v11569_v60 }
 0x487   : > { %7619 = vmatprep.mubr.msk.f32.mxu0 %vm8966_vm6, %v11457_v53 }
 0x48a   : > { %7620 = vmatmul.mubr.f32.gmra.mrb[60].mxu0 %v11574_v16 }
 0x48b   : > { %7622 = vmatprep.mubr.msk.f32.mxu0 %vm8966_vm6, %v11457_v53 }
 0x48e   : > { %7623 = vmatmul.mubr.f32.gmra.mrb[62].mxu0 %v11579_v30 }
 0x48f   : > { %7625 = vmatprep.mubr.msk.f32.mxu0 %vm8966_vm6, %v11457_v53 }
 0x492   : > { %7626 = vmatmul.mubr.f32.gmra.mrb[64].mxu0 %v11590_v35 }
 0x493   : > { %7660 = vmatprep.mubr.msk.f32.mxu0 %vm8966_vm6, %v11457_v53 }
 0x496   : > { %7661 = vmatmul.mubr.f32.vlgmr.msra.gmra.mrb[66].mxu0 %v11483_v22  ;;  %v8562_v22 = vpack.c.bf16 %v6334_v40, %v6333_v4  ;;  %v8592_v40 = vpack.c.bf16 %v6354_v8, %v6353_v51  ;;  %v6369_v51 = vld [vmem:[%s12513_s6 + $0x390] sm:$0xff]  ;;  %v6370_v8 = vld [vmem:[%s12513_s6 + $0x398] sm:$0xff] }
 0x497   : > { %8542 = vmatpush3.bf16.msra.mxu0 %v8541_v43  ;;  %7663 = vmatprep.mubr.msk.f32.mxu0 %vm8966_vm6, %v11457_v53 }
 0x498   : > { %8543 = vmatprep.subr.bf16.mxu0 %v12524_v33 }
 0x49a   : > { %7664 = vmatmul.mubr.f32.gmra.mrb[68].mxu0 %v11502_v39 }
 0x49b   : > { %7666 = vmatprep.mubr.msk.f32.mxu0 %vm8966_vm6, %v11457_v53  ;;  %8545 = vmatpush3.bf16.msra.mxu0 %v8544_v36  ;;  %v4361_v36 = vld [vmem:[#allocation3 + $0x4b] sm:$0xff] }
 0x49c   : > { %8546 = vmatprep.subr.bf16.mxu0 %v12524_v33 }
 0x49e   : > { %7667 = vmatmul.mubr.f32.gmra.mrb[12].mxu0 %v11516_v19 }
 0x49f   : > { %7669 = vmatprep.mubr.msk.f32.mxu0 %vm8966_vm6, %v11457_v53  ;;  %8548 = vmatpush3.bf16.msra.mxu0 %v8547_v13  ;;  %v4362_v13 = vld [vmem:[#allocation3 + $0x53] sm:$0xff] }
 0x4a0   : > { %8549 = vmatprep.subr.bf16.mxu0 %v12524_v33 }
 0x4a2   : > { %7670 = vmatmul.mubr.f32.gmra.mrb[14].mxu0 %v11528_v37  ;;  %v4355_v37 = vld [vmem:[#allocation3 + $0x1b] sm:$0xff] }
 0x4a3   : > { %7672 = vmatprep.mubr.msk.f32.mxu0 %vm8966_vm6, %v11457_v53  ;;  %8551 = vmatpush3.bf16.msra.mxu0 %v8550_v9 }
 0x4a4   : > { %8552 = vmatprep.subr.bf16.mxu0 %v12524_v33 }
 0x4a6   : > { %7673 = vmatmul.mubr.f32.gmra.mrb[70].mxu0 %v11540_v5  ;;  %v4356_v5 = vld [vmem:[#allocation3 + $0x23] sm:$0xff] }
 0x4a7   : > { %7675 = vmatprep.mubr.msk.f32.mxu0 %vm8966_vm6, %v11457_v53  ;;  %8554 = vmatpush3.bf16.msra.mxu0 %v8553_v44  ;;  %v6351_v44 = vld [vmem:[%s12513_s6 + $0x300] sm:$0xff] }
 0x4a8   : > { %8555 = vmatprep.subr.bf16.mxu0 %v12524_v33 }
 0x4aa   : > { %7676 = vmatmul.mubr.f32.gmra.mrb[72].mxu0 %v11552_v0  ;;  %v4357_v0 = vld [vmem:[#allocation3 + $0x2b] sm:$0xff] }
 0x4ab   : > { %7678 = vmatprep.mubr.msk.f32.mxu0 %vm8966_vm6, %v11457_v53  ;;  %8557 = vmatpush3.bf16.msra.mxu0 %v8556_v25  ;;  %v8589_v25 = vpack.c.bf16 %v6352_v63, %v6351_v44  ;;  %v6368_v44 = vld [vmem:[%s12513_s6 + $0x388] sm:$0xff] }
 0x4ac   : > { %8558 = vmatprep.subr.bf16.mxu0 %v12524_v33 }
 0x4ae   : > { %7679 = vmatmul.mubr.f32.gmra.mrb[20].mxu0 %v11558_v17  ;;  %v6347_v17 = vld [vmem:[%s12513_s6 + $0x2e0] sm:$0xff] }
 0x4af   : > { %7681 = vmatprep.mubr.msk.f32.mxu0 %vm8966_vm6, %v11457_v53  ;;  %8560 = vmatpush3.bf16.msra.mxu0 %v8559_v32 }
 0x4b0   : > { %8561 = vmatprep.subr.bf16.mxu0 %v12524_v33 }
 0x4b2   : > { %7682 = vmatmul.mubr.f32.gmra.mrb[22].mxu0 %v11564_v27  ;;  %v6348_v27 = vld [vmem:[%s12513_s6 + $0x2e8] sm:$0xff] }
 0x4b3   : > { %7684 = vmatprep.mubr.msk.f32.mxu0 %vm8966_vm6, %v11457_v53  ;;  %8563 = vmatpush3.bf16.msra.mxu0 %v8562_v22  ;;  %v6355_v22 = vld [vmem:[%s12513_s6 + $0x320] sm:$0xff] }
 0x4b4   : > { %8564 = vmatprep.subr.bf16.mxu0 %v12524_v33 }
 0x4b6   : > { %7685 = vmatmul.mubr.f32.gmra.mrb[24].mxu0 %v11569_v60  ;;  %v4358_v60 = vld [vmem:[#allocation3 + $0x33] sm:$0xff] }
 0x4b7   : > { %7687 = vmatprep.mubr.msk.f32.mxu0 %vm8966_vm6, %v11457_v53 }
 0x4ba   : > { %7688 = vmatmul.mubr.f32.gmra.mrb[74].mxu0 %v11574_v16  ;;  %v8583_v16 = vpack.c.bf16 %v6348_v27, %v6347_v17  ;;  %v6365_v27 = vld [vmem:[%s12513_s6 + $0x370] sm:$0xff] }
 0x4bb   : > { %7690 = vmatprep.mubr.msk.f32.mxu0 %vm8966_vm6, %v11457_v53 }
 0x4be   : > { %7691 = vmatmul.mubr.f32.gmra.mrb[76].mxu0 %v11579_v30  ;;  %v6349_v30 = vld [vmem:[%s12513_s6 + $0x2f0] sm:$0xff] }
 0x4bf   : > { %7693 = vmatprep.mubr.msk.f32.mxu0 %vm8966_vm6, %v11457_v53  ;;  %v8586_v43 = vpack.c.bf16 %v6350_v42, %v6349_v30 }
 0x4c2   : > { %7694 = vmatmul.mubr.f32.gmra.mrb[78].mxu0 %v11590_v35 }
 0x4c3   : > { %7696 = vmatprep.mubr.msk.f32.mxu0 %vm8966_vm6, %v11457_v53 }
 0x4c6   : > { %7697 = vmatmul.mubr.f32.gmra.mrb[80].mxu0 %v4196_v55  ;;  %v6356_v55 = vld [vmem:[%s12513_s6 + $0x328] sm:$0xff] }
 0x4c7   : > { %7731 = vmatprep.mubr.msk.f32.mxu0 %vm8966_vm6, %v11457_v53  ;;  %v8595_v34 = vpack.c.bf16 %v6356_v55, %v6355_v22  ;;  %v6372_v22 = vld [vmem:[%s12513_s6 + $0x3a8] sm:$0xff] }
 0x4c9   : > { %v11695_v29 = vpop.f32.mrb[16].mxu0 }
 0x4ca   : > { %v7461_v39 = vpop.f32.mrb[17].mxu0  ;;  %7732 = vmatmul.mubr.f32.vlgmr.msra.gmra.mrb[82].mxu0 %v11457_v53 }
 0x4cb   : > { %8566 = vmatpush3.bf16.msra.mxu0 %v8565_v6  ;;  %7734 = vmatprep.mubr.msk.f32.mxu0 %vm8966_vm6, %v11457_v53  ;;  %v6358_v39 = vld [vmem:[%s12513_s6 + $0x338] sm:$0xff] }
 0x4cc   : > { %8567 = vmatprep.subr.bf16.mxu0 %v12524_v33 }
 0x4cd   : > { %v11707_v19 = vpop.f32.mrb[18].mxu0 }
 0x4ce   : > { %7735 = vmatmul.mubr.f32.gmra.mrb[84].mxu0 %v4354_v20  ;;  %v7464_v45 = vpop.f32.mrb[19].mxu0 }
 0x4cf   : > { %7737 = vmatprep.mubr.msk.f32.mxu0 %vm8966_vm6, %v11457_v53  ;;  %8569 = vmatpush3.bf16.msra.mxu0 %v8568_v11  ;;  %v8598_v45 = vpack.c.bf16 %v6358_v39, %v6357_v2 }
 0x4d0   : > { %8570 = vmatprep.subr.bf16.mxu0 %v12524_v33 }
 0x4d2   : > { %7738 = vmatmul.mubr.f32.gmra.mrb[12].mxu0 %v4355_v37  ;;  %v6361_v37 = vld [vmem:[%s12513_s6 + $0x350] sm:$0xff] }
 0x4d3   : > { %7740 = vmatprep.mubr.msk.f32.mxu0 %vm8966_vm6, %v11457_v53  ;;  %8572 = vmatpush3.bf16.msra.mxu0 %v8571_v48  ;;  %v6359_v48 = vld [vmem:[%s12513_s6 + $0x340] sm:$0xff] }
 0x4d4   : > { %8573 = vmatprep.subr.bf16.mxu0 %v12524_v33  ;;  %v8601_v50 = vpack.c.bf16 %v6360_v47, %v6359_v48  ;;  %v6377_v48 = vld [vmem:[%s12513_s6 + $0x3d0] sm:$0xff]  ;;  %v6378_v47 = vld [vmem:[%s12513_s6 + $0x3d8] sm:$0xff] }
 0x4d6   : > { %7741 = vmatmul.mubr.f32.gmra.mrb[14].mxu0 %v4356_v5  ;;  %v6363_v5 = vld [vmem:[%s12513_s6 + $0x360] sm:$0xff] }
 0x4d7   : > { %7743 = vmatprep.mubr.msk.f32.mxu0 %vm8966_vm6, %v11457_v53  ;;  %8575 = vmatpush3.bf16.msra.mxu0 %v8574_v61  ;;  %v6362_v61 = vld [vmem:[%s12513_s6 + $0x358] sm:$0xff] }
 0x4d8   : > { %8576 = vmatprep.subr.bf16.mxu0 %v12524_v33  ;;  %v8604_v15 = vpack.c.bf16 %v6362_v61, %v6361_v37  ;;  %v6380_v37 = vld [vmem:[%s12513_s6 + $0x3e8] sm:$0xff] }
 0x4da   : > { %7744 = vmatmul.mubr.f32.gmra.mrb[86].mxu0 %v4357_v0 }
 0x4db   : > { %7746 = vmatprep.mubr.msk.f32.mxu0 %vm8966_vm6, %v11457_v53  ;;  %8578 = vmatpush3.bf16.msra.mxu0 %v8577_v7  ;;  %v6364_v7 = vld [vmem:[%s12513_s6 + $0x368] sm:$0xff] }
 0x4dc   : > { %8579 = vmatprep.subr.bf16.mxu0 %v12524_v33  ;;  %v8607_v17 = vpack.c.bf16 %v6364_v7, %v6363_v5  ;;  %v6381_v7 = vld [vmem:[%s12513_s6 + $0x3f0] sm:$0xff] }
 0x4de   : > { %7747 = vmatmul.mubr.f32.gmra.mrb[88].mxu0 %v4358_v60  ;;  %v6366_v60 = vld [vmem:[%s12513_s6 + $0x378] sm:$0xff] }
 0x4df   : > { %7749 = vmatprep.mubr.msk.f32.mxu0 %vm8966_vm6, %v11457_v53  ;;  %8581 = vmatpush3.bf16.msra.mxu0 %v8580_v21 }
 0x4e0   : > { %8582 = vmatprep.subr.bf16.mxu0 %v12524_v33 }
 0x4e2   : > { %7750 = vmatmul.mubr.f32.gmra.mrb[20].mxu0 %v4359_v10  ;;  %v8610_v10 = vpack.c.bf16 %v6366_v60, %v6365_v27 }
 0x4e3   : > { %7752 = vmatprep.mubr.msk.f32.mxu0 %vm8966_vm6, %v11457_v53  ;;  %v11756_v35 = vpop.f32.mrb[26].mxu0  ;;  %8584 = vmatpush3.bf16.msra.mxu0 %v8583_v16  ;;  %v11863_v16 = vld [vmem:[#allocation3 + $0x3c] sm:$0xff] }
 0x4e4   : > { %v7476_v28 = vpop.f32.mrb[27].mxu0  ;;  %8585 = vmatprep.subr.bf16.mxu0 %v12524_v33 }
 0x4e5   : > { %v11883_v28 = vld [vmem:[#allocation3 + $0x54] sm:$0xff] }
 0x4e6   : > { %7753 = vmatmul.mubr.f32.gmra.mrb[22].mxu0 %v4360_v52 }
 0x4e7   : > { %7755 = vmatprep.mubr.msk.f32.mxu0 %vm8966_vm6, %v11457_v53  ;;  %8587 = vmatpush3.bf16.msra.mxu0 %v8586_v43  ;;  %v11872_v43 = vld [vmem:[#allocation3 + $0x44] sm:$0xff] }
 0x4e8   : > { %8588 = vmatprep.subr.bf16.mxu0 %v12524_v33 }
 0x4ea   : > { %7756 = vmatmul.mubr.f32.gmra.mrb[24].mxu0 %v4361_v36  ;;  %v11888_v36 = vld [vmem:[#allocation3 + $0x5c] sm:$0xff] }
 0x4eb   : > { %7758 = vmatprep.mubr.msk.f32.mxu0 %vm8966_vm6, %v11457_v53  ;;  %v11764_v14 = vpop.f32.mrb[28].mxu0 }
 0x4ec   : > { %v7479_v57 = vpop.f32.mrb[29].mxu0 }
 0x4ee   : > { %7759 = vmatmul.mubr.f32.gmra.mrb[90].mxu0 %v4362_v13 }
 0x4ef   : > { %7761 = vmatprep.mubr.msk.f32.mxu0 %vm8966_vm6, %v11457_v53 }
 0x4f2   : > { %7762 = vmatmul.mubr.f32.gmra.mrb[92].mxu0 %v4363_v41 }
 0x4f3   : > { %7764 = vmatprep.mubr.msk.f32.mxu0 %vm8966_vm6, %v11457_v53  ;;  %v11770_v18 = vpop.f32.mrb[30].mxu0 }
 0x4f4   : > { %v7482_v9 = vpop.f32.mrb[31].mxu0 }
 0x4f6   : > { %7765 = vmatmul.mubr.f32.gmra.mrb[94].mxu0 %v4364_v23 }
 0x4f7   : > { %7767 = vmatprep.mubr.msk.f32.mxu0 %vm8966_vm6, %v11457_v53 }
 0x4fa   : > { %7768 = vmatmul.mubr.f32.gmra.mrb[96].mxu0 %v4365_v31  ;;  %v11902_v31 = vld [vmem:[#allocation3 + $0x6c] sm:$0xff] }
 0x4fb   : > { %7802 = vmatprep.mubr.msk.f32.mxu0 %vm8966_vm6, %v11457_v53 }
 0x4fd   : > { %v3884_v32 = vpop.f32.mrb[32].mxu0 }
 0x4fe   : > { %v7485_v4 = vpop.f32.mrb[33].mxu0  ;;  %7803 = vmatmul.mubr.f32.vlgmr.msra.gmra.mrb[98].mxu0 %v4522_v46 }
 0x4ff   : > { %8590 = vmatpush3.bf16.msra.mxu0 %v8589_v25  ;;  %7805 = vmatprep.mubr.msk.f32.mxu0 %vm8966_vm6, %v11457_v53 }
 0x500   : > { %8591 = vmatprep.subr.bf16.mxu0 %v12524_v33 }
 0x501   : > { %v3953_v24 = vpop.f32.mrb[34].mxu0 }
 0x502   : > { %v7520_v6 = vpop.f32.mrb[35].mxu0  ;;  %7806 = vmatmul.mubr.f32.gmra.mrb[100].mxu0 %v11797_v54 }
 0x503   : > { %7808 = vmatprep.mubr.msk.f32.mxu0 %vm8966_vm6, %v11457_v53  ;;  %8593 = vmatpush3.bf16.msra.mxu0 %v8592_v40  ;;  %v6371_v40 = vld [vmem:[%s12513_s6 + $0x3a0] sm:$0xff]  ;;  %v6373_v6 = vld [vmem:[%s12513_s6 + $0x3b0] sm:$0xff] }
 0x504   : > { %8594 = vmatprep.subr.bf16.mxu0 %v12524_v33 }
 0x505   : > { %v3957_v11 = vpop.f32.mrb[36].mxu0 }
 0x506   : > { %v11812_v38 = vadd.f32 %v3957_v11, %v11514_v58  ;;  %v7523_v20 = vpop.f32.mrb[37].mxu0  ;;  %7809 = vmatmul.mubr.f32.gmra.mrb[12].mxu0 %v11809_v3  ;;  %v11824_v58 = vld [vmem:[#allocation3 + $0x24] sm:$0xff] }
 0x507   : > { %7811 = vmatprep.mubr.msk.f32.mxu0 %vm8966_vm6, %v11457_v53  ;;  %8596 = vmatpush3.bf16.msra.mxu0 %v8595_v34  ;;  %v6374_v34 = vld [vmem:[%s12513_s6 + $0x3b8] sm:$0xff]  ;;  %v6375_v20 = vld [vmem:[%s12513_s6 + $0x3c0] sm:$0xff] }
 0x508   : > { %8597 = vmatprep.subr.bf16.mxu0 %v12524_v33 }
 0x50a   : > { %7812 = vmatmul.mubr.f32.gmra.mrb[14].mxu0 %v11824_v58 }
 0x50b   : > { %7814 = vmatprep.mubr.msk.f32.mxu0 %vm8966_vm6, %v11457_v53  ;;  %8599 = vmatpush3.bf16.msra.mxu0 %v8598_v45  ;;  %v6376_v45 = vld [vmem:[%s12513_s6 + $0x3c8] sm:$0xff] }
 0x50c   : > { %8600 = vmatprep.subr.bf16.mxu0 %v12524_v33 }
 0x50e   : > { %7815 = vmatmul.mubr.f32.gmra.mrb[102].mxu0 %v11836_v62 }
 0x50f   : > { %7817 = vmatprep.mubr.msk.f32.mxu0 %vm8966_vm6, %v11457_v53  ;;  %8602 = vmatpush3.bf16.msra.mxu0 %v8601_v50  ;;  %v6379_v50 = vld [vmem:[%s12513_s6 + $0x3e0] sm:$0xff] }
 0x510   : > { %8603 = vmatprep.subr.bf16.mxu0 %v12524_v33  ;;  %v8631_v5 = vpack.c.bf16 %v6380_v37, %v6379_v50  ;;  %v6397_v37 = vld [vmem:[%s12513_s6 + $0x470] sm:$0xff] }
 0x511   : > { %v3972_v59 = vpop.f32.mrb[38].mxu0 }
 0x512   : > { %v11851_v0 = vadd.f32 %v3972_v59, %v11695_v29  ;;  %v7532_v21 = vpop.f32.mrb[39].mxu0  ;;  %7818 = vmatmul.mubr.f32.gmra.mrb[104].mxu0 %v11848_v49  ;;  %v6382_v59 = vld [vmem:[%s12513_s6 + $0x3f8] sm:$0xff] }
 0x513   : > { %7820 = vmatprep.mubr.msk.f32.mxu0 %vm8966_vm6, %v11457_v53  ;;  %8605 = vmatpush3.bf16.msra.mxu0 %v8604_v15 }
 0x514   : > { %8606 = vmatprep.subr.bf16.mxu0 %v12524_v33 }
 0x515   : > { %v3977_v29 = vpop.f32.mrb[40].mxu0 }
 0x516   : > { %v11866_v30 = vadd.f32 %v3977_v29, %v11707_v19  ;;  %v7535_v42 = vpop.f32.mrb[41].mxu0  ;;  %7821 = vmatmul.mubr.f32.gmra.mrb[20].mxu0 %v11863_v16  ;;  %v11878_v19 = vld [vmem:[#allocation3 + $0x4c] sm:$0xff] }
 0x517   : > { %7823 = vmatprep.mubr.msk.f32.mxu0 %vm8966_vm6, %v11457_v53  ;;  %8608 = vmatpush3.bf16.msra.mxu0 %v8607_v17  ;;  %v8634_v17 = vpack.c.bf16 %v6382_v59, %v6381_v7 }
 0x518   : > { %8609 = vmatprep.subr.bf16.mxu0 %v12524_v33 }
 0x51a   : > { %7824 = vmatmul.mubr.f32.gmra.mrb[22].mxu0 %v11872_v43 }
 0x51b   : > { %7826 = vmatprep.mubr.msk.f32.mxu0 %vm8966_vm6, %v11457_v53  ;;  %8611 = vmatpush3.bf16.msra.mxu0 %v8610_v10  ;;  %v4703_v10 = vld [vmem:[#allocation3 + $0x74] sm:$0xff] }
 0x51c   : > { %8612 = vmatprep.subr.bf16.mxu0 %v12524_v33 }
 0x51e   : > { %7827 = vmatmul.mubr.f32.gmra.mrb[24].mxu0 %v11878_v19 }
 0x51f   : > { %7829 = vmatprep.mubr.msk.f32.mxu0 %vm8966_vm6, %v11457_v53 }
 0x522   : > { %7830 = vmatmul.mubr.f32.gmra.mrb[106].mxu0 %v11883_v28 }
 0x523   : > { %7832 = vmatprep.mubr.msk.f32.mxu0 %vm8966_vm6, %v11457_v53 }
 0x525   : > { %v3997_v52 = vpop.f32.mrb[42].mxu0 }
 0x526   : > { %v11891_v57 = vadd.f32 %v3997_v52, %v11756_v35  ;;  %v7547_v13 = vpop.f32.mrb[43].mxu0  ;;  %7833 = vmatmul.mubr.f32.gmra.mrb[108].mxu0 %v11888_v36  ;;  %v6367_v35 = vld [vmem:[%s12513_s6 + $0x380] sm:$0xff] }
 0x527   : > { %7835 = vmatprep.mubr.msk.f32.mxu0 %vm8966_vm6, %v11457_v53  ;;  %v8613_v25 = vpack.c.bf16 %v6368_v44, %v6367_v35  ;;  %v6385_v13 = vld [vmem:[%s12513_s6 + $0x410] sm:$0xff]  ;;  %v6387_v44 = vld [vmem:[%s12513_s6 + $0x420] sm:$0xff] }
 0x529   : > { %v4002_v41 = vpop.f32.mrb[44].mxu0 }
 0x52a   : > { %v11897_v9 = vadd.f32 %v4002_v41, %v11764_v14  ;;  %v7550_v23 = vpop.f32.mrb[45].mxu0  ;;  %7836 = vmatmul.mubr.f32.gmra.mrb[110].mxu0 %v11457_v53  ;;  %v6386_v41 = vld [vmem:[%s12513_s6 + $0x418] sm:$0xff] }
 0x52b   : > { %7838 = vmatprep.mubr.msk.f32.mxu0 %vm8966_vm6, %v11457_v53  ;;  %v4860_v23 = vld [vmem:[#allocation3 + $0x15] sm:$0xff]  ;;  %v8640_v35 = vpack.c.bf16 %v6386_v41, %v6385_v13 }
 0x52c   : > { %v5029_v41 = vld [vmem:[#allocation3 + $0x16] sm:$0xff] }
 0x52d   : > { %v4007_v63 = vpop.f32.mrb[46].mxu0 }
 0x52e   : > { %v11911_v14 = vadd.f32 %v4007_v63, %v11770_v18  ;;  %v7553_v46 = vpop.f32.mrb[47].mxu0  ;;  %7839 = vmatmul.mubr.f32.gmra.mrb[112].mxu0 %v11902_v31  ;;  %v8616_v18 = vpack.c.bf16 %v6370_v8, %v6369_v51  ;;  %v6388_v63 = vld [vmem:[%s12513_s6 + $0x428] sm:$0xff]  ;;  %v6389_v8 = vld [vmem:[%s12513_s6 + $0x430] sm:$0xff] }
 0x52f   : > { %7873 = vmatprep.mubr.msk.f32.mxu0 %vm8966_vm6, %v11457_v53  ;;  %v4861_v46 = vld [vmem:[#allocation3 + $0x1d] sm:$0xff]  ;;  %v8643_v51 = vpack.c.bf16 %v6388_v63, %v6387_v44 }
 0x531   : > { %v4012_v32 = vpop.f32.mrb[48].mxu0 }
 0x532   : > { %v7556_v4 = vpop.f32.mrb[49].mxu0  ;;  %7874 = vmatmul.mubr.f32.vlgmr.msra.gmra.mrb[114].mxu0 %v11797_v54  ;;  %v8619_v54 = vpack.c.bf16 %v6372_v22, %v6371_v40  ;;  %v6390_v32 = vld [vmem:[%s12513_s6 + $0x438] sm:$0xff] }
 0x533   : > { %8614 = vmatpush3.bf16.msra.mxu0 %v8613_v25  ;;  %7876 = vmatprep.mubr.msk.f32.mxu0 %vm8966_vm6, %v11457_v53 }
 0x534   : > { %8615 = vmatprep.subr.bf16.mxu0 %v12524_v33 }
 0x535   : > { %v4111_v55 = vpop.f32.mrb[50].mxu0 }
 0x536   : > { %v7591_v24 = vpop.f32.mrb[51].mxu0  ;;  %7877 = vmatmul.mubr.f32.gmra.mrb[116].mxu0 %v11809_v3  ;;  %v8622_v3 = vpack.c.bf16 %v6374_v34, %v6373_v6  ;;  %v8646_v55 = vpack.c.bf16 %v6390_v32, %v6389_v8  ;;  %v4863_v6 = vld [vmem:[#allocation3 + $0x2d] sm:$0xff] }
 0x537   : > { %7879 = vmatprep.mubr.msk.f32.mxu0 %vm8966_vm6, %v11457_v53  ;;  %8617 = vmatpush3.bf16.msra.mxu0 %v8616_v18  ;;  %v4862_v18 = vld [vmem:[#allocation3 + $0x25] sm:$0xff] }
 0x538   : > { %8618 = vmatprep.subr.bf16.mxu0 %v12524_v33  ;;  %v6391_v24 = vld [vmem:[%s12513_s6 + $0x440] sm:$0xff] }
 0x539   : > { %v4115_v2 = vpop.f32.mrb[52].mxu0 }
 0x53a   : > { %v11943_v39 = vadd.f32 %v4115_v2, %v11812_v38  ;;  %v7594_v11 = vpop.f32.mrb[53].mxu0  ;;  %7880 = vmatmul.mubr.f32.gmra.mrb[12].mxu0 %v11824_v58  ;;  %v8625_v38 = vpack.c.bf16 %v6376_v45, %v6375_v20  ;;  %v8628_v58 = vpack.c.bf16 %v6378_v47, %v6377_v48  ;;  %v6393_v2 = vld [vmem:[%s12513_s6 + $0x450] sm:$0xff]  ;;  %v6395_v20 = vld [vmem:[%s12513_s6 + $0x460] sm:$0xff]  ;;  %v6396_v45 = vld [vmem:[%s12513_s6 + $0x468] sm:$0xff] }
 0x53b   : > { %7882 = vmatprep.mubr.msk.f32.mxu0 %vm8966_vm6, %v11457_v53  ;;  %8620 = vmatpush3.bf16.msra.mxu0 %v8619_v54  ;;  %v6392_v54 = vld [vmem:[%s12513_s6 + $0x448] sm:$0xff]  ;;  %v4864_v11 = vld [vmem:[#allocation3 + $0x35] sm:$0xff]  ;;  %v4865_v48 = vld [vmem:[#allocation3 + $0x3d] sm:$0xff]  ;;  %v8655_v50 = vpack.c.bf16 %v6396_v45, %v6395_v20 }
 0x53c   : > { %8621 = vmatprep.subr.bf16.mxu0 %v12524_v33  ;;  %v8649_v34 = vpack.c.bf16 %v6392_v54, %v6391_v24  ;;  %v5037_v24 = vld [vmem:[#allocation3 + $0x56] sm:$0xff]  ;;  %v5038_v54 = vld [vmem:[#allocation3 + $0x5e] sm:$0xff] }
 0x53e   : > { %7883 = vmatmul.mubr.f32.gmra.mrb[14].mxu0 %v11836_v62 }
 0x53f   : > { %7885 = vmatprep.mubr.msk.f32.mxu0 %vm8966_vm6, %v11457_v53  ;;  %8623 = vmatpush3.bf16.msra.mxu0 %v8622_v3 }
 0x540   : > { %8624 = vmatprep.subr.bf16.mxu0 %v12524_v33 }
 0x542   : > { %7886 = vmatmul.mubr.f32.gmra.mrb[118].mxu0 %v11848_v49 }
 0x543   : > { %7888 = vmatprep.mubr.msk.f32.mxu0 %vm8966_vm6, %v11457_v53  ;;  %8626 = vmatpush3.bf16.msra.mxu0 %v8625_v38 }
 0x544   : > { %8627 = vmatprep.subr.bf16.mxu0 %v12524_v33 }
 0x545   : > { %v4130_v61 = vpop.f32.mrb[54].mxu0 }
 0x546   : > { %v11976_v62 = vadd.f32 %v4130_v61, %v11851_v0  ;;  %v7603_v15 = vpop.f32.mrb[55].mxu0  ;;  %7889 = vmatmul.mubr.f32.gmra.mrb[120].mxu0 %v11863_v16  ;;  %v6398_v61 = vld [vmem:[%s12513_s6 + $0x478] sm:$0xff] }
 0x547   : > { %7891 = vmatprep.mubr.msk.f32.mxu0 %vm8966_vm6, %v11457_v53  ;;  %8629 = vmatpush3.bf16.msra.mxu0 %v8628_v58  ;;  %v8658_v59 = vpack.c.bf16 %v6398_v61, %v6397_v37 }
 0x548   : > { %8630 = vmatprep.subr.bf16.mxu0 %v12524_v33 }
 0x549   : > { %v4135_v49 = vpop.f32.mrb[56].mxu0 }
 0x54a   : > { %v11989_v0 = vadd.f32 %v4135_v49, %v11866_v30  ;;  %v7606_v21 = vpop.f32.mrb[57].mxu0  ;;  %7892 = vmatmul.mubr.f32.gmra.mrb[20].mxu0 %v11872_v43  ;;  %v6383_v43 = vld [vmem:[%s12513_s6 + $0x400] sm:$0xff]  ;;  %v4867_v49 = vld [vmem:[#allocation3 + $0x4d] sm:$0xff] }
 0x54b   : > { %7894 = vmatprep.mubr.msk.f32.mxu0 %vm8966_vm6, %v11457_v53  ;;  %8632 = vmatpush3.bf16.msra.mxu0 %v8631_v5  ;;  %v12100_v21 = vld [vmem:[#allocation3 + $0xb] sm:$0xff] }
 0x54c   : > { %8633 = vmatprep.subr.bf16.mxu0 %v12524_v33 }
 0x54e   : > { %7895 = vmatmul.mubr.f32.gmra.mrb[22].mxu0 %v11878_v19  ;;  %v6384_v19 = vld [vmem:[%s12513_s6 + $0x408] sm:$0xff] }
 0x54f   : > { %7897 = vmatprep.mubr.msk.f32.mxu0 %vm8966_vm6, %v11457_v53  ;;  %8635 = vmatpush3.bf16.msra.mxu0 %v8634_v17  ;;  %v4868_v17 = vld [vmem:[#allocation3 + $0x55] sm:$0xff] }
 0x550   : > { %8636 = vmatprep.subr.bf16.mxu0 %v12524_v33 }
 0x552   : > { %7898 = vmatmul.mubr.f32.gmra.mrb[24].mxu0 %v11883_v28 }
 0x553   : > { %7900 = vmatprep.mubr.msk.f32.mxu0 %vm8966_vm6, %v11457_v53 }
 0x556   : > { %7901 = vmatmul.mubr.f32.gmra.mrb[122].mxu0 %v11888_v36 }
 0x557   : > { %7903 = vmatprep.mubr.msk.f32.mxu0 %vm8966_vm6, %v11457_v53 }
 0x559   : > { %v4155_v27 = vpop.f32.mrb[58].mxu0 }
 0x55a   : > { %v12006_v60 = vadd.f32 %v4155_v27, %v11891_v57  ;;  %v7618_v29 = vpop.f32.mrb[59].mxu0  ;;  %7904 = vmatmul.mubr.f32.gmra.mrb[124].mxu0 %v11457_v53  ;;  %v8637_v57 = vpack.c.bf16 %v6384_v19, %v6383_v43 }
 0x55b   : > { %7906 = vmatprep.mubr.msk.f32.mxu0 %vm8966_vm6, %v11457_v53 }
 0x55d   : > { %v4160_v16 = vpop.f32.mrb[60].mxu0 }
 0x55e   : > { %v12012_v30 = vadd.f32 %v4160_v16, %v11897_v9  ;;  %v7621_v42 = vpop.f32.mrb[61].mxu0  ;;  %7907 = vmatmul.mubr.f32.gmra.mrb[126].mxu0 %v11902_v31 }
 0x55f   : > { %7909 = vmatprep.mubr.msk.f32.mxu0 %vm8966_vm6, %v11457_v53  ;;  %v4871_v42 = vld [vmem:[#allocation3 + $0x6d] sm:$0xff] }
 0x561   : > { %v4165_v28 = vpop.f32.mrb[62].mxu0 }
 0x562   : > { %v12024_v52 = vadd.f32 %v4165_v28, %v11911_v14  ;;  %v7624_v36 = vpop.f32.mrb[63].mxu0  ;;  %7910 = vmatmul.mubr.f32.gmra.mrb[128].mxu0 %v4703_v10  ;;  %v4872_v28 = vld [vmem:[#allocation3 + $0x75] sm:$0xff] }
 0x563   : > { %7944 = vmatprep.mubr.msk.f32.mxu0 %vm8966_vm6, %v11457_v53 }
 0x565   : > { %v4170_v9 = vpop.f32.mrb[64].mxu0 }
 0x566   : > { %v7627_v31 = vpop.f32.mrb[65].mxu0  ;;  %7945 = vmatmul.mubr.f32.vlgmr.msra.gmra.mrb[130].mxu0 %v4860_v23  ;;  %v5030_v23 = vld [vmem:[#allocation3 + $0x1e] sm:$0xff] }
 0x567   : > { %8638 = vmatpush3.bf16.msra.mxu0 %v8637_v57  ;;  %7947 = vmatprep.mubr.msk.f32.mxu0 %vm8966_vm6, %v11457_v53 }
 0x568   : > { %8639 = vmatprep.subr.bf16.mxu0 %v12524_v33 }
 0x569   : > { %v4280_v14 = vpop.f32.mrb[66].mxu0 }
 0x56a   : > { %v7662_v25 = vpop.f32.mrb[67].mxu0  ;;  %7948 = vmatmul.mubr.f32.gmra.mrb[132].mxu0 %v4861_v46  ;;  %v5032_v14 = vld [vmem:[#allocation3 + $0x2e] sm:$0xff]  ;;  %v5033_v46 = vld [vmem:[#allocation3 + $0x36] sm:$0xff] }
 0x56b   : > { %7950 = vmatprep.mubr.msk.f32.mxu0 %vm8966_vm6, %v11457_v53  ;;  %8641 = vmatpush3.bf16.msra.mxu0 %v8640_v35  ;;  %v5031_v35 = vld [vmem:[#allocation3 + $0x26] sm:$0xff] }
 0x56c   : > { %8642 = vmatprep.subr.bf16.mxu0 %v12524_v33 }
 0x56d   : > { %v4284_v4 = vpop.f32.mrb[68].mxu0 }
 0x56e   : > { %v12053_v40 = vadd.f32 %v4284_v4, %v11943_v39  ;;  %v7665_v22 = vpop.f32.mrb[69].mxu0  ;;  %7951 = vmatmul.mubr.f32.gmra.mrb[12].mxu0 %v4862_v18  ;;  %v6394_v39 = vld [vmem:[%s12513_s6 + $0x458] sm:$0xff]  ;;  %v5035_v18 = vld [vmem:[#allocation3 + $0x46] sm:$0xff] }
 0x56f   : > { %7953 = vmatprep.mubr.msk.f32.mxu0 %vm8966_vm6, %v11457_v53  ;;  %8644 = vmatpush3.bf16.msra.mxu0 %v8643_v51  ;;  %v8652_v3 = vpack.c.bf16 %v6394_v39, %v6393_v2  ;;  %v5034_v51 = vld [vmem:[#allocation3 + $0x3e] sm:$0xff] }
 0x570   : > { %8645 = vmatprep.subr.bf16.mxu0 %v12524_v33 }
 0x572   : > { %7954 = vmatmul.mubr.f32.gmra.mrb[14].mxu0 %v4863_v6  ;;  %v5039_v6 = vld [vmem:[#allocation3 + $0x66] sm:$0xff] }
 0x573   : > { %7956 = vmatprep.mubr.msk.f32.mxu0 %vm8966_vm6, %v11457_v53  ;;  %8647 = vmatpush3.bf16.msra.mxu0 %v8646_v55  ;;  %v5036_v55 = vld [vmem:[#allocation3 + $0x4e] sm:$0xff] }
 0x574   : > { %8648 = vmatprep.subr.bf16.mxu0 %v12524_v33 }
 0x576   : > { %7957 = vmatmul.mubr.f32.gmra.mrb[134].mxu0 %v4864_v11  ;;  %v5040_v11 = vld [vmem:[#allocation3 + $0x6e] sm:$0xff] }
 0x577   : > { %7959 = vmatprep.mubr.msk.f32.mxu0 %vm8966_vm6, %v11457_v53  ;;  %8650 = vmatpush3.bf16.msra.mxu0 %v8649_v34 }
 0x578   : > { %8651 = vmatprep.subr.bf16.mxu0 %v12524_v33 }
 0x579   : > { %v4299_v38 = vpop.f32.mrb[70].mxu0 }
 0x57a   : > { %v12083_v47 = vadd.f32 %v4299_v38, %v11976_v62  ;;  %v7674_v58 = vpop.f32.mrb[71].mxu0  ;;  %7960 = vmatmul.mubr.f32.gmra.mrb[136].mxu0 %v4865_v48  ;;  %v4866_v62 = vld [vmem:[#allocation3 + $0x45] sm:$0xff] }
 0x57b   : > { %7962 = vmatprep.mubr.msk.f32.mxu0 %vm8966_vm6, %v11457_v53  ;;  %8653 = vmatpush3.bf16.msra.mxu0 %v8652_v3 }
 0x57c   : > { %8654 = vmatprep.subr.bf16.mxu0 %v12524_v33 }
 0x57d   : > { %v4304_v15 = vpop.f32.mrb[72].mxu0 }
 0x57e   : > { %v12095_v5 = vadd.f32 %v4304_v15, %v11989_v0  ;;  %v7677_v7 = vpop.f32.mrb[73].mxu0  ;;  %7963 = vmatmul.mubr.f32.gmra.mrb[20].mxu0 %v4866_v62  ;;  %v4869_v0 = vld [vmem:[#allocation3 + $0x5d] sm:$0xff] }
 0x57f   : > { %7965 = vmatprep.mubr.msk.f32.mxu0 %vm8966_vm6, %v11457_v53  ;;  %8656 = vmatpush3.bf16.msra.mxu0 %v8655_v50  ;;  %v4870_v53 = vld [vmem:[#allocation3 + $0x65] sm:$0xff] }
 0x580   : > { %8657 = vmatprep.subr.bf16.mxu0 %v12524_v33 }
 0x582   : > { %7966 = vmatmul.mubr.f32.gmra.mrb[22].mxu0 %v4867_v49 }
 0x583   : > { %7968 = vmatprep.mubr.msk.f32.mxu0 %vm8966_vm6, %v12100_v21  ;;  %8659 = vmatpush3.bf16.msra.mxu0 %v8658_v59 }
 0x586   : > { %7969 = vmatmul.mubr.f32.gmra.mrb[24].mxu0 %v4868_v17 }
 0x587   : > { %7971 = vmatprep.mubr.msk.f32.mxu0 %vm8966_vm6, %v12100_v21 }
 0x58a   : > { %7972 = vmatmul.mubr.f32.gmra.mrb[138].mxu0 %v4869_v0 }
 0x58b   : > { %7974 = vmatprep.mubr.msk.f32.mxu0 %vm8966_vm6, %v12100_v21 }
 0x58d   : > { %v4324_v27 = vpop.f32.mrb[74].mxu0 }
 0x58e   : > { %v4350_v29 = vadd.f32 %v4324_v27, %v12006_v60  ;;  %v7689_v16 = vpop.f32.mrb[75].mxu0  ;;  %7975 = vmatmul.mubr.f32.gmra.mrb[140].mxu0 %v4870_v53 }
 0x58f   : > { %7977 = vmatprep.mubr.msk.f32.mxu0 %vm8966_vm6, %v12100_v21 }
 0x591   : > { %v4329_v10 = vpop.f32.mrb[76].mxu0 }
 0x592   : > { %v4351_v43 = vadd.f32 %v4329_v10, %v12012_v30  ;;  %v7692_v19 = vpop.f32.mrb[77].mxu0  ;;  %7978 = vmatmul.mubr.f32.gmra.mrb[142].mxu0 %v4871_v42 }
 0x593   : > { %7980 = vmatprep.mubr.msk.f32.mxu0 %vm8966_vm6, %v12100_v21 }
 0x595   : > { %v4334_v36 = vpop.f32.mrb[78].mxu0 }
 0x596   : > { %v4352_v57 = vadd.f32 %v4334_v36, %v12024_v52  ;;  %v7695_v13 = vpop.f32.mrb[79].mxu0  ;;  %7981 = vmatmul.mubr.f32.gmra.mrb[144].mxu0 %v4872_v28 }
 0x597   : > { %8015 = vmatprep.mubr.msk.f32.mxu0 %vm8966_vm6, %v12100_v21 }
 0x599   : > { %v4339_v60 = vpop.f32.mrb[80].mxu0 }
 0x59a   : > { %v7698_v9 = vpop.f32.mrb[81].mxu0  ;;  %8016 = vmatmul.mubr.f32.vlgmr.msra.gmra.mrb[146].mxu0 %v5029_v41 }
 0x59b   : > { %8018 = vmatprep.mubr.msk.f32.mxu0 %vm8966_vm6, %v12100_v21 }
 0x59d   : > { %v4449_v30 = vpop.f32.mrb[82].mxu0 }
 0x59e   : > { %v7733_v31 = vpop.f32.mrb[83].mxu0  ;;  %8019 = vmatmul.mubr.f32.gmra.mrb[148].mxu0 %v5030_v23 }
 0x59f   : > { %8021 = vmatprep.mubr.msk.f32.mxu0 %vm8966_vm6, %v12100_v21 }
 0x5a1   : > { %v4453_v52 = vpop.f32.mrb[84].mxu0 }
 0x5a2   : > { %v4511_v44 = vadd.f32 %v4453_v52, %v12053_v40  ;;  %v7736_v63 = vpop.f32.mrb[85].mxu0  ;;  %8022 = vmatmul.mubr.f32.gmra.mrb[12].mxu0 %v5031_v35 }
 0x5a3   : > { %8024 = vmatprep.mubr.msk.f32.mxu0 %vm8966_vm6, %v12100_v21 }
 0x5a6   : > { %8025 = vmatmul.mubr.f32.gmra.mrb[14].mxu0 %v5032_v14 }
 0x5a7   : > { %8027 = vmatprep.mubr.msk.f32.mxu0 %vm8966_vm6, %v12100_v21 }
 0x5aa   : > { %8028 = vmatmul.mubr.f32.gmra.mrb[150].mxu0 %v5033_v46 }
 0x5ab   : > { %8030 = vmatprep.mubr.msk.f32.mxu0 %vm8966_vm6, %v12100_v21 }
 0x5ad   : > { %v4468_v25 = vpop.f32.mrb[86].mxu0 }
 0x5ae   : > { %v4514_v8 = vadd.f32 %v4468_v25, %v12083_v47  ;;  %v7745_v32 = vpop.f32.mrb[87].mxu0  ;;  %8031 = vmatmul.mubr.f32.gmra.mrb[152].mxu0 %v5034_v51 }
 0x5af   : > { %8033 = vmatprep.mubr.msk.f32.mxu0 %vm8966_vm6, %v12100_v21 }
 0x5b1   : > { %v4473_v4 = vpop.f32.mrb[88].mxu0 }
 0x5b2   : > { %v4515_v40 = vadd.f32 %v4473_v4, %v12095_v5  ;;  %v7748_v22 = vpop.f32.mrb[89].mxu0  ;;  %8034 = vmatmul.mubr.f32.gmra.mrb[20].mxu0 %v5035_v18 }
 0x5b3   : > { %8036 = vmatprep.mubr.msk.f32.mxu0 %vm8966_vm6, %v12100_v21 }
 0x5b6   : > { %8037 = vmatmul.mubr.f32.gmra.mrb[22].mxu0 %v5036_v55 }
 0x5b7   : > { %8039 = vmatprep.mubr.msk.f32.mxu0 %vm8966_vm6, %v12100_v21 }
 0x5ba   : > { %8040 = vmatmul.mubr.f32.gmra.mrb[24].mxu0 %v5037_v24 }
 0x5bb   : > { %8042 = vmatprep.mubr.msk.f32.mxu0 %vm8966_vm6, %v12100_v21 }
 0x5be   : > { %8043 = vmatmul.mubr.f32.gmra.mrb[154].mxu0 %v5038_v54 }
 0x5bf   : > { %8045 = vmatprep.mubr.msk.f32.mxu0 %vm8966_vm6, %v12100_v21 }
 0x5c1   : > { %v4493_v34 = vpop.f32.mrb[90].mxu0 }
 0x5c2   : > { %v4519_v2 = vadd.f32 %v4493_v34, %v4350_v29  ;;  %v7760_v39 = vpop.f32.mrb[91].mxu0  ;;  %8046 = vmatmul.mubr.f32.gmra.mrb[156].mxu0 %v5039_v6 }
 0x5c3   : > { %8048 = vmatprep.mubr.msk.f32.mxu0 %vm8966_vm6, %v12100_v21 }
 0x5c5   : > { %v4498_v3 = vpop.f32.mrb[92].mxu0 }
 0x5c6   : > { %v4520_v20 = vadd.f32 %v4498_v3, %v4351_v43  ;;  %v7763_v45 = vpop.f32.mrb[93].mxu0  ;;  %8049 = vmatmul.mubr.f32.gmra.mrb[158].mxu0 %v5040_v11 }
 0x5c7   : > { %8051 = vmatprep.mubr.msk.f32.mxu0 %vm8966_vm6, %v12100_v21 }
 0x5c9   : > { %v4503_v38 = vpop.f32.mrb[94].mxu0 }
 0x5ca   : > { %v4521_v48 = vadd.f32 %v4503_v38, %v4352_v57  ;;  %v7766_v47 = vpop.f32.mrb[95].mxu0 }
 0x5cb   : > { %v5691_v47 = vld [vmem:[%s12517_s10] sm:$0xff] }
 0x5cd   : > { %v4508_v58 = vpop.f32.mrb[96].mxu0 }
 0x5ce   : > { %v7769_v50 = vpop.f32.mrb[97].mxu0  ;;  %v5692_v58 = vld [vmem:[%s12517_s10 + $0x8] sm:$0xff] }
 0x5cf   : > { %v5693_v50 = vld [vmem:[%s12517_s10 + $0x10] sm:$0xff] }
 0x5d1   : > { %v4618_v37 = vpop.f32.mrb[98].mxu0 }
 0x5d2   : > { %v7804_v61 = vpop.f32.mrb[99].mxu0  ;;  %v12159_v37 = vpack.c.bf16 %v5692_v58, %v5691_v47 }
 0x5d3   : > { %v5694_v61 = vld [vmem:[%s12517_s10 + $0x18] sm:$0xff] }
 0x5d4   : > { %8662 = vmatpush3.bf16.msra.mxu1 %v12159_v37 }
 0x5d5   : > { %v4622_v15 = vpop.f32.mrb[100].mxu0  ;;  %8663 = vmatprep.subr.bf16.mxu1 %v12524_v33 }
 0x5d6   : > { %v4680_v62 = vadd.f32 %v4622_v15, %v4511_v44  ;;  %v7807_v5 = vpop.f32.mrb[101].mxu0  ;;  %v12165_v15 = vpack.c.bf16 %v5694_v61, %v5693_v50 }
 0x5d7   : > { %v5695_v5 = vld [vmem:[%s12517_s10 + $0x20] sm:$0xff] }
 0x5d8   : > { %8665 = vmatpush3.bf16.msra.mxu1 %v12165_v15 }
 0x5d9   : > { %8666 = vmatprep.subr.bf16.mxu1 %v12524_v33 }
 0x5e1   : > { %v4637_v7 = vpop.f32.mrb[102].mxu0 }
 0x5e2   : > { %v4683_v59 = vadd.f32 %v4637_v7, %v4514_v8  ;;  %v7816_v49 = vpop.f32.mrb[103].mxu0  ;;  %v5696_v7 = vld [vmem:[%s12517_s10 + $0x28] sm:$0xff] }
 0x5e5   : > { %v4642_v17 = vpop.f32.mrb[104].mxu0 }
 0x5e6   : > { %v4684_v0 = vadd.f32 %v4642_v17, %v4515_v40  ;;  %v7819_v53 = vpop.f32.mrb[105].mxu0 }
 0x5e7   : > { %v2969_v53 = vld [vmem:[#allocation2 + $0xf0] sm:$0x3f] }
 0x5f5   : > { %v4662_v27 = vpop.f32.mrb[106].mxu0 }
 0x5f6   : > { %v4688_v29 = vadd.f32 %v4662_v27, %v4519_v2  ;;  %v7831_v16 = vpop.f32.mrb[107].mxu0  ;;  %v3059_v27 = vrot.slane %v2969_v53, 6 }
 0x5f9   : > { %v4667_v42 = vpop.f32.mrb[108].mxu0 }
 0x5fa   : > { %v4689_v10 = vadd.f32 %v4667_v42, %v4520_v20  ;;  %v7834_v43 = vpop.f32.mrb[109].mxu0 }
 0x5fb   : > { %v5698_v43 = vld [vmem:[%s12517_s10 + $0x38] sm:$0xff] }
 0x5fd   : > { %v4672_v19 = vpop.f32.mrb[110].mxu0 }
 0x5fe   : > { %v4690_v28 = vadd.f32 %v4672_v19, %v4521_v48  ;;  %v7837_v36 = vpop.f32.mrb[111].mxu0  ;;  %v3060_v19 = vsel %vm3008_vm4, %v3055_v12, %v3059_v27  ;;  %v5700_v12 = vld [vmem:[%s12517_s10 + $0x48] sm:$0xff] }
 0x601   : > { %v4677_v57 = vpop.f32.mrb[112].mxu0 }
 0x602   : > { %v7840_v13 = vpop.f32.mrb[113].mxu0 }
 0x605   : > { %v4787_v60 = vpop.f32.mrb[114].mxu0 }
 0x606   : > { %v7875_v41 = vpop.f32.mrb[115].mxu0 }
 0x607   : > { %v5701_v41 = vld [vmem:[%s12517_s10 + $0x50] sm:$0xff] }
 0x609   : > { %v4791_v9 = vpop.f32.mrb[116].mxu0 }
 0x60a   : > { %v4849_v30 = vadd.f32 %v4791_v9, %v4680_v62  ;;  %v7878_v23 = vpop.f32.mrb[117].mxu0  ;;  %v5702_v9 = vld [vmem:[%s12517_s10 + $0x58] sm:$0xff] }
 0x60b   : > { %v12219_v23 = vpack.c.bf16 %v5702_v9, %v5701_v41 }
 0x615   : > { %v4806_v31 = vpop.f32.mrb[118].mxu0 }
 0x616   : > { %v4852_v52 = vadd.f32 %v4806_v31, %v4683_v59  ;;  %v7887_v35 = vpop.f32.mrb[119].mxu0  ;;  %v2970_v59 = vld [vmem:[#allocation2 + $0xf8] sm:$0x3f] }
 0x617   : > { %v5704_v35 = vld [vmem:[%s12517_s10 + $0x68] sm:$0xff] }
 0x619   : > { %v4811_v44 = vpop.f32.mrb[120].mxu0 }
 0x61a   : > { %v4853_v63 = vadd.f32 %v4811_v44, %v4684_v0  ;;  %v7890_v14 = vpop.f32.mrb[121].mxu0  ;;  %v3061_v0 = vrot.slane %v2970_v59, 6 }
 0x61c   : > { %v3062_v16 = vsel %vm3008_vm4, %v3057_v26, %v3061_v0 }
 0x61d   : > { %3212 = vmatprep.mubr.f32.mxu1 %v3062_v16 }
 0x61e   : > { %3213 = vmatmul.mubr.f32.gmra.mrb[232].mxu1 %v3060_v19 }
 0x61f   : > { %8086 = vmatprep.mubr.msk.f32.mxu1 %vm8966_vm6, %v12100_v21  ;;  %v12209_v21 = vpack.c.bf16 %v5700_v12, %v5699_v56 }
 0x629   : > { %v4831_v46 = vpop.f32.mrb[122].mxu0 }
 0x62a   : > { %v4857_v25 = vadd.f32 %v4831_v46, %v4688_v29  ;;  %v7902_v51 = vpop.f32.mrb[123].mxu0  ;;  %v12177_v29 = vpack.c.bf16 %v5696_v7, %v5695_v5  ;;  %v12234_v46 = vld [vmem:[%s12514_s7] ss:$0 sm:$0xff] }
 0x62b   : > { %v5706_v51 = vld [vmem:[%s12517_s10 + $0x78] sm:$0xff] }
 0x62c   : > { %8668 = vmatpush3.bf16.msra.mxu1 %v12177_v29 }
 0x62d   : > { %v4836_v8 = vpop.f32.mrb[124].mxu0  ;;  %8669 = vmatprep.subr.bf16.mxu1 %v12524_v33 }
 0x62e   : > { %v4858_v32 = vadd.f32 %v4836_v8, %v4689_v10  ;;  %v7905_v4 = vpop.f32.mrb[125].mxu0  ;;  %v5697_v10 = vld [vmem:[%s12517_s10 + $0x30] sm:$0xff] }
 0x62f   : > { %v12197_v26 = vpack.c.bf16 %v5698_v43, %v5697_v10 }
 0x631   : > { %v4841_v18 = vpop.f32.mrb[126].mxu0  ;;  %8671 = vmatpush3.bf16.msra.mxu1 %v12197_v26 }
 0x632   : > { %v4859_v40 = vadd.f32 %v4841_v18, %v4690_v28  ;;  %v7908_v22 = vpop.f32.mrb[127].mxu0  ;;  %8672 = vmatprep.subr.bf16.mxu1 %v12524_v33 }
 0x635   : > { %v4846_v55 = vpop.f32.mrb[128].mxu0  ;;  %8674 = vmatpush3.bf16.msra.mxu1 %v12209_v21 }
 0x636   : > { %v7911_v24 = vpop.f32.mrb[129].mxu0  ;;  %8675 = vmatprep.subr.bf16.mxu1 %v12524_v33 }
 0x639   : > { %v4956_v54 = vpop.f32.mrb[130].mxu0  ;;  %8677 = vmatpush3.bf16.msra.mxu1 %v12219_v23 }
 0x63a   : > { %v7946_v6 = vpop.f32.mrb[131].mxu0  ;;  %8678 = vmatprep.subr.bf16.mxu1 %v12524_v33 }
 0x63d   : > { %v4960_v34 = vpop.f32.mrb[132].mxu0 }
 0x63e   : > { %v12144_v2 = vadd.f32 %v4960_v34, %v4849_v30  ;;  %v7949_v39 = vpop.f32.mrb[133].mxu0 }
 0x649   : > { %v4975_v11 = vpop.f32.mrb[134].mxu0 }
 0x64a   : > { %v12146_v3 = vadd.f32 %v4975_v11, %v4852_v52  ;;  %v7958_v20 = vpop.f32.mrb[135].mxu0  ;;  %v5703_v52 = vld [vmem:[%s12517_s10 + $0x60] sm:$0xff] }
 0x64d   : > { %v4980_v45 = vpop.f32.mrb[136].mxu0 }
 0x64e   : > { %v12148_v38 = vadd.f32 %v4980_v45, %v4853_v63  ;;  %v7961_v48 = vpop.f32.mrb[137].mxu0  ;;  %v12229_v63 = vpack.c.bf16 %v5704_v35, %v5703_v52 }
 0x650   : > { %8680 = vmatpush3.bf16.msra.mxu1 %v12229_v63 }
 0x651   : > { %8681 = vmatprep.subr.bf16.mxu1 %v12524_v33 }
 0x65d   : > { %v5000_v62 = vpop.f32.mrb[138].mxu0 }
 0x65e   : > { %v12174_v49 = vadd.f32 %v5000_v62, %v4857_v25  ;;  %v7973_v17 = vpop.f32.mrb[139].mxu0  ;;  %v5705_v25 = vld [vmem:[%s12517_s10 + $0x70] sm:$0xff] }
 0x65f   : > { %v12248_v18 = vpack.c.bf16 %v5706_v51, %v5705_v25 }
 0x661   : > { %v5005_v42 = vpop.f32.mrb[140].mxu0  ;;  %8683 = vmatpush3.bf16.msra.mxu1 %v12248_v18 }
 0x662   : > { %v12192_v28 = vadd.f32 %v5005_v42, %v4858_v32  ;;  %v7976_v1 = vpop.f32.mrb[141].mxu0  ;;  %8684 = vmatprep.subr.bf16.mxu1 %v12524_v33 }
 0x665   : > { %v5010_v36 = vpop.f32.mrb[142].mxu0 }
 0x666   : > { %v12206_v57 = vadd.f32 %v5010_v36, %v4859_v40  ;;  %v7979_v13 = vpop.f32.mrb[143].mxu0 }
 0x669   : > { %v5015_v60 = vpop.f32.mrb[144].mxu0 }
 0x66a   : > { %v7982_v30 = vpop.f32.mrb[145].mxu0 }
 0x66d   : > { %v5125_v31 = vpop.f32.mrb[146].mxu0 }
 0x66e   : > { %v8017_v44 = vpop.f32.mrb[147].mxu0 }
 0x671   : > { %v5129_v14 = vpop.f32.mrb[148].mxu0 }
 0x672   : > { %v5187_v8 = vadd.f32 %v5129_v14, %v12144_v2  ;;  %v8020_v32 = vpop.f32.mrb[149].mxu0 }
 0x674   : > { %v12245_v4 = vadd.f32 %v12234_v46, %v5187_v8 }
 0x675   : > { %v5134_v40 = vpop.f32.mrb[12].mxu0 }
 0x676   : > { %v5207_v22 = vand.u32 2147483647, %v12245_v4  ;;  %v12253_v55 = vadd.f32 %v12234_v46, %v5134_v40  ;;  %v8023_v24 = vpop.f32.mrb[13].mxu0  ;;  %v5237_v58 = vmul.f32 -0.5, %v12245_v4  ;;  %v5247_v9 = vmax.f32 %v12245_v4, 0.0 }
 0x678   : > { %v5209_v54 = vmul.f32 0.70710677, %v5207_v22  ;;  %v5208_v6 = vand.u32 2147483647, %v12253_v55  ;;  %v5239_v17 = vmul.f32 %v5237_v58, %v12245_v4  ;;  %v5238_v0 = vmul.f32 -0.5, %v12253_v55 }
 0x679   : > { %v5139_v34 = vpop.f32.mrb[14].mxu0  ;;  %v12282_v30 = vmul.f32 0.5, %v5207_v22  ;;  %v5248_v35 = vmax.f32 %v12253_v55, 0.0 }
 0x67a   : > { %v5211_v2 = vmul.f32 0.3275911, %v5209_v54  ;;  %v5210_v39 = vmul.f32 0.70710677, %v5208_v6  ;;  %v12259_v11 = vadd.f32 %v12234_v46, %v5139_v34  ;;  %v8026_v20 = vpop.f32.mrb[15].mxu0  ;;  %v5240_v36 = vmul.f32 %v5238_v0, %v12253_v55 }
 0x67b   : > { %v5241_v1 = vmul.f32 1.442695, %v5239_v17 }
 0x67c   : > { %v5213_v45 = vadd.f32 1.0, %v5211_v2  ;;  %v5212_v48 = vmul.f32 0.3275911, %v5210_v39  ;;  %v5267_v47 = vand.u32 2147483647, %v12259_v11  ;;  %v5297_v42 = vmul.f32 -0.5, %v12259_v11 }
 0x67d   : > { %v5144_v50 = vpop.f32.mrb[150].mxu0  ;;  %v5243_v8 = vmul.f32 1.442695, %v5240_v36 }
 0x67e   : > { %8875 = vrcp.f32 %v5213_v45  ;;  %v5214_v61 = vadd.f32 1.0, %v5212_v48  ;;  %v5269_v62 = vmul.f32 0.70710677, %v5267_v47  ;;  %v8029_v5 = vpop.f32.mrb[151].mxu0  ;;  %v5190_v7 = vadd.f32 %v5144_v50, %v12146_v3 }
 0x67f   : > { %v5299_v13 = vmul.f32 %v5297_v42, %v12259_v11  ;;  %v12300_v45 = vmul.f32 0.5, %v5208_v6 }
 0x680   : > { %8877 = vrcp.f32 %v5214_v61  ;;  %v5271_v59 = vmul.f32 0.3275911, %v5269_v62  ;;  %v12267_v53 = vadd.f32 %v12234_v46, %v5190_v7 }
 0x681   : > { %v5149_v27 = vpop.f32.mrb[152].mxu0  ;;  %v5302_v24 = vmul.f32 1.442695, %v5299_v13 }
 0x682   : > { %v5273_v16 = vadd.f32 1.0, %v5271_v59  ;;  %v5191_v10 = vadd.f32 %v5149_v27, %v12148_v38  ;;  %v8032_v43 = vpop.f32.mrb[153].mxu0  ;;  %v5326_v19 = vand.u32 2147483647, %v12267_v53  ;;  %v5356_v44 = vmul.f32 -0.5, %v12267_v53 }
 0x683   : > { %v5307_v59 = vmax.f32 %v12259_v11, 0.0  ;;  %v12308_v27 = vmul.f32 0.5, %v5267_v47 }
 0x684   : > { %8879 = vrcp.f32 %v5273_v16  ;;  %v12273_v3 = vadd.f32 %v12234_v46, %v5191_v10  ;;  %v5328_v56 = vmul.f32 0.70710677, %v5326_v19  ;;  %v5358_v58 = vmul.f32 %v5356_v44, %v12267_v53 }
 0x685   : > { %v5154_v12 = vpop.f32.mrb[20].mxu0  ;;  %8881 = vpow2.f32 %v5241_v1 }
 0x686   : > { %v5384_v60 = vand.u32 2147483647, %v12273_v3  ;;  %v12279_v41 = vadd.f32 %v12234_v46, %v5154_v12  ;;  %v8035_v38 = vpop.f32.mrb[21].mxu0  ;;  %v5330_v31 = vmul.f32 0.3275911, %v5328_v56  ;;  %v5414_v61 = vmul.f32 -0.5, %v12273_v3 }
 0x687   : > { %v5361_v36 = vmul.f32 1.442695, %v5358_v58  ;;  %v5424_v58 = vmax.f32 %v12273_v3, 0.0 }
 0x688   : > { %v12284_v52 = vpop.eup %8875  ;;  %v5386_v14 = vmul.f32 0.70710677, %v5384_v60  ;;  %v5385_v25 = vand.u32 2147483647, %v12279_v41  ;;  %v5332_v32 = vadd.f32 1.0, %v5330_v31  ;;  %v5416_v56 = vmul.f32 %v5414_v61, %v12273_v3 }
 0x689   : > { %v5219_v51 = vmul.f32 1.0614054, %v12284_v52  ;;  %v5159_v40 = vpop.f32.mrb[22].mxu0  ;;  %v5366_v31 = vmax.f32 %v12267_v53, 0.0 }
 0x68a   : > { %v12292_v22 = vpop.eup %8877  ;;  %v5388_v54 = vmul.f32 0.3275911, %v5386_v14  ;;  %v5387_v34 = vmul.f32 0.70710677, %v5385_v25  ;;  %v12297_v2 = vadd.f32 %v12234_v46, %v5159_v40  ;;  %8883 = vrcp.f32 %v5332_v32  ;;  %v8038_v48 = vpop.f32.mrb[23].mxu0 }
 0x68b   : > { %v5221_v39 = vadd.f32 -1.4531521, %v5219_v51  ;;  %v5220_v20 = vmul.f32 1.0614054, %v12292_v22  ;;  %8885 = vpow2.f32 %v5243_v8  ;;  %v12318_v14 = vmul.f32 0.5, %v5326_v19 }
 0x68c   : > { %v5390_v50 = vadd.f32 1.0, %v5388_v54  ;;  %v5389_v62 = vmul.f32 0.3275911, %v5387_v34  ;;  %v5444_v16 = vand.u32 2147483647, %v12297_v2 }
 0x68d   : > { %v5223_v5 = vmul.f32 %v12284_v52, %v5221_v39  ;;  %v5222_v7 = vadd.f32 -1.4531521, %v5220_v20  ;;  %v5164_v17 = vpop.f32.mrb[24].mxu0  ;;  %v5415_v20 = vmul.f32 -0.5, %v12279_v41  ;;  %v5418_v48 = vmul.f32 1.442695, %v5416_v56 }
 0x68e   : > { %v12306_v0 = vpop.eup %8879  ;;  %8887 = vrcp.f32 %v5390_v50  ;;  %v5391_v6 = vadd.f32 1.0, %v5389_v62  ;;  %v8041_v42 = vpop.f32.mrb[25].mxu0  ;;  %v5446_v12 = vmul.f32 0.70710677, %v5444_v16  ;;  %v12321_v8 = vadd.f32 %v12234_v46, %v5164_v17 }
 0x68f   : > { %v5225_v10 = vadd.f32 1.4214138, %v5223_v5  ;;  %v5224_v43 = vmul.f32 %v12292_v22, %v5222_v7  ;;  %v5279_v1 = vmul.f32 1.0614054, %v12306_v0  ;;  %8889 = vpow2.f32 %v5302_v24  ;;  %v8882_v24 = vpop.eup %8881 }
 0x690   : > { %8891 = vrcp.f32 %v5391_v6  ;;  %v5448_v51 = vmul.f32 0.3275911, %v5446_v12  ;;  %v5503_v50 = vand.u32 2147483647, %v12321_v8  ;;  %v12337_v6 = vmul.f32 0.5, %v5384_v60 }
 0x691   : > { %v5227_v47 = vmul.f32 %v12284_v52, %v5225_v10  ;;  %v5226_v13 = vadd.f32 1.4214138, %v5224_v43  ;;  %v5281_v38 = vadd.f32 -1.4531521, %v5279_v1  ;;  %v5169_v44 = vpop.f32.mrb[154].mxu0  ;;  %8893 = vpow2.f32 %v5361_v36 }
 0x692   : > { %v5195_v32 = vadd.f32 %v5169_v44, %v12174_v49  ;;  %v8044_v40 = vpop.f32.mrb[155].mxu0  ;;  %v5450_v19 = vadd.f32 1.0, %v5448_v51  ;;  %v5505_v42 = vmul.f32 0.70710677, %v5503_v50  ;;  %v5417_v36 = vmul.f32 %v5415_v20, %v12279_v41 }
 0x693   : > { %v5229_v54 = vadd.f32 -0.28449672, %v5227_v47  ;;  %v5228_v34 = vmul.f32 %v12292_v22, %v5226_v13  ;;  %v5283_v39 = vmul.f32 %v12306_v0, %v5281_v38  ;;  %v5474_v20 = vmul.f32 -0.5, %v12297_v2 }
 0x694   : > { %v12329_v61 = vpop.eup %8883  ;;  %8895 = vrcp.f32 %v5450_v19  ;;  %v5507_v38 = vmul.f32 0.3275911, %v5505_v42  ;;  %v12347_v60 = vadd.f32 %v12234_v46, %v5195_v32 }
 0x695   : > { %v5231_v62 = vmul.f32 %v12284_v52, %v5229_v54  ;;  %v5230_v49 = vadd.f32 -0.28449672, %v5228_v34  ;;  %v5285_v5 = vadd.f32 1.4214138, %v5283_v39  ;;  %v12332_v7 = vpop.f32.mrb[156].mxu0  ;;  %v8886_v43 = vpop.eup %8885  ;;  %8897 = vpow2.f32 %v5418_v48 }
 0x696   : > { %v5338_v17 = vmul.f32 1.0614054, %v12329_v61  ;;  %v8047_v10 = vpop.f32.mrb[157].mxu0  ;;  %v5562_v48 = vand.u32 2147483647, %v12347_v60 }
 0x697   : > { %v5233_v1 = vadd.f32 0.2548296, %v5231_v62  ;;  %v5232_v56 = vmul.f32 %v12292_v22, %v5230_v49  ;;  %v5287_v12 = vmul.f32 %v12306_v0, %v5285_v5  ;;  %v5509_v62 = vadd.f32 1.0, %v5507_v38 }
 0x698   : > { %v12344_v47 = vpop.eup %8887  ;;  %v5340_v13 = vadd.f32 -1.4531521, %v5338_v17 }
 0x699   : > { %v8890_v44 = vpop.eup %8889  ;;  %v5235_v51 = vmul.f32 %v12284_v52, %v5233_v1  ;;  %v5234_v40 = vadd.f32 0.2548296, %v5232_v56  ;;  %v5289_v54 = vadd.f32 -0.28449672, %v5287_v12  ;;  %v5396_v34 = vmul.f32 1.0614054, %v12344_v47 }
 0x69a   : > { %v12351_v39 = vpop.eup %8891  ;;  %v5342_v19 = vmul.f32 %v12329_v61, %v5340_v13  ;;  %v5179_v49 = vpop.f32.mrb[158].mxu0  ;;  %8899 = vrcp.f32 %v5509_v62  ;;  %v5564_v56 = vmul.f32 0.70710677, %v5562_v48 }
 0x69b   : > { %v5245_v32 = vmul.f32 %v8882_v24, %v5235_v51  ;;  %v5236_v5 = vmul.f32 %v12292_v22, %v5234_v40  ;;  %v5291_v52 = vmul.f32 %v12306_v0, %v5289_v54  ;;  %v5398_v17 = vadd.f32 -1.4531521, %v5396_v34  ;;  %v8050_v42 = vpop.f32.mrb[159].mxu0  ;;  %v8894_v54 = vpop.eup %8893 }
 0x69c   : > { %v5344_v10 = vadd.f32 1.4214138, %v5342_v19  ;;  %v5397_v1 = vmul.f32 1.0614054, %v12351_v39  ;;  %v5420_v51 = vmul.f32 1.442695, %v5417_v36 }
 0x69d   : > { %v5251_v12 = vmul.f32 %v12282_v30, %v5245_v32  ;;  %v5246_v13 = vmul.f32 %v8886_v43, %v5236_v5  ;;  %v5293_v38 = vadd.f32 0.2548296, %v5291_v52  ;;  %v5400_v33 = vmul.f32 %v12344_v47, %v5398_v17 }
 0x69e   : > { %v5346_v22 = vmul.f32 %v12329_v61, %v5344_v10  ;;  %v5399_v24 = vadd.f32 -1.4531521, %v5397_v1  ;;  %v5566_v40 = vmul.f32 0.3275911, %v5564_v56  ;;  %v12374_v62 = vpop.eup %8895  ;;  %v5476_v52 = vmul.f32 %v5474_v20, %v12297_v2 }
 0x69f   : > { %v5253_v34 = vsub.f32 %v5247_v9, %v5251_v12  ;;  %v5252_v30 = vmul.f32 %v12300_v45, %v5246_v13  ;;  %v5295_v43 = vmul.f32 %v12306_v0, %v5293_v38  ;;  %v5402_v19 = vadd.f32 1.4214138, %v5400_v33  ;;  %v8898_v33 = vpop.eup %8897 }
 0x6a0   : > { %v5348_v32 = vadd.f32 -0.28449672, %v5346_v22  ;;  %v5401_v5 = vmul.f32 %v12351_v39, %v5399_v24  ;;  %v5568_v36 = vadd.f32 1.0, %v5566_v40  ;;  %v5456_v0 = vmul.f32 1.0614054, %v12374_v62 }
 0x6a1   : > { %5255 = vst [vmem:[%s12367_s27 - $0x3] sm:$0xf8] %v5253_v34  ;;  %v5254_v4 = vsub.f32 %v5248_v35, %v5252_v30  ;;  %v5305_v9 = vmul.f32 %v8890_v44, %v5295_v43  ;;  %v5404_v45 = vmul.f32 %v12344_v47, %v5402_v19  ;;  %v5533_v10 = vmul.f32 -0.5, %v12321_v8 }
 0x6a2   : > { %v5350_v17 = vmul.f32 %v12329_v61, %v5348_v32  ;;  %v5403_v42 = vadd.f32 1.4214138, %v5401_v5  ;;  %8901 = vrcp.f32 %v5568_v36  ;;  %v5458_v55 = vadd.f32 -1.4531521, %v5456_v0 }
 0x6a3   : > { %5256 = vst [vmem:[%s12367_s27 + $0x5] sm:$0x7] %v5254_v4  ;;  %5314 = vst [vmem:[%s12367_s27 + $0x3] sm:$0xe0] %v5254_v4  ;;  %v5311_v20 = vmul.f32 %v12308_v27, %v5305_v9  ;;  %v5406_v1 = vadd.f32 -0.28449672, %v5404_v45  ;;  %8903 = vpow2.f32 %v5420_v51  ;;  %v5196_v27 = vadd.f32 %v12332_v7, %v12192_v28 }
 0x6a4   : > { %v5352_v35 = vadd.f32 0.2548296, %v5350_v17  ;;  %v5405_v44 = vmul.f32 %v12351_v39, %v5403_v42  ;;  %v5425_v56 = vmax.f32 %v12279_v41, 0.0  ;;  %v5479_v12 = vmul.f32 1.442695, %v5476_v52  ;;  %v12396_v24 = vpop.eup %8899 }
 0x6a5   : > { %v5313_v13 = vsub.f32 %v5307_v59, %v5311_v20  ;;  %v5408_v38 = vmul.f32 %v12344_v47, %v5406_v1  ;;  %v5460_v22 = vmul.f32 %v12374_v62, %v5458_v55  ;;  %v5535_v34 = vmul.f32 %v5533_v10, %v12321_v8 }
 0x6a6   : > { %v5354_v51 = vmul.f32 %v12329_v61, %v5352_v35  ;;  %v5407_v40 = vadd.f32 -0.28449672, %v5405_v44  ;;  %v5197_v30 = vadd.f32 %v5179_v49, %v12206_v57  ;;  %v5515_v43 = vmul.f32 1.0614054, %v12396_v24 }
 0x6a7   : > { %5315 = vst [vmem:[%s12367_s27 + $0xb] sm:$0x1f] %v5313_v13  ;;  %5373 = vst [vmem:[%s12367_s27 + $0x9] sm:$0x80] %v5313_v13  ;;  %v5410_v11 = vadd.f32 0.2548296, %v5408_v38  ;;  %v12405_v19 = vadd.f32 %v12234_v46, %v5196_v27  ;;  %8905 = vpow2.f32 %v5479_v12 }
 0x6a8   : > { %v5462_v59 = vadd.f32 1.4214138, %v5460_v22  ;;  %v5364_v32 = vmul.f32 %v8894_v54, %v5354_v51  ;;  %v5409_v28 = vmul.f32 %v12351_v39, %v5407_v40  ;;  %v5592_v61 = vmul.f32 -0.5, %v12347_v60 }
 0x6a9   : > { %v5412_v7 = vmul.f32 %v12344_v47, %v5410_v11  ;;  %v5517_v57 = vadd.f32 -1.4531521, %v5515_v43  ;;  %v5620_v49 = vand.u32 2147483647, %v12405_v19  ;;  %v5538_v4 = vmul.f32 1.442695, %v5535_v34 }
 0x6aa   : > { %v5464_v5 = vmul.f32 %v12374_v62, %v5462_v59  ;;  %v5370_v52 = vmul.f32 %v12318_v14, %v5364_v32  ;;  %v5411_v36 = vadd.f32 0.2548296, %v5409_v28  ;;  %v12414_v9 = vadd.f32 %v12234_v46, %v5197_v30 }
 0x6ab   : > { %v5422_v54 = vmul.f32 %v8898_v33, %v5412_v7  ;;  %v5519_v0 = vmul.f32 %v12396_v24, %v5517_v57  ;;  %v5622_v47 = vmul.f32 0.70710677, %v5620_v49  ;;  %v5427_v14 = vmul.f32 0.5, %v5385_v25 }
 0x6ac   : > { %v5466_v45 = vadd.f32 -0.28449672, %v5464_v5  ;;  %v8902_v17 = vpop.eup %8901  ;;  %v5372_v42 = vsub.f32 %v5366_v31, %v5370_v52  ;;  %v5413_v10 = vmul.f32 %v12351_v39, %v5411_v36  ;;  %v5594_v20 = vmul.f32 %v5592_v61, %v12347_v60 }
 0x6ad   : > { %v8904_v46 = vpop.eup %8903  ;;  %v5428_v33 = vmul.f32 %v12337_v6, %v5422_v54  ;;  %v5521_v55 = vadd.f32 1.4214138, %v5519_v0  ;;  %v5574_v35 = vmul.f32 1.0614054, %v8902_v17  ;;  %8907 = vpow2.f32 %v5538_v4 }
 0x6ae   : > { %v5468_v1 = vmul.f32 %v12374_v62, %v5466_v45  ;;  %5374 = vst [vmem:[%s12367_s27 + $0x11] sm:$0x7f] %v5372_v42  ;;  %v5423_v44 = vmul.f32 %v8904_v46, %v5413_v10  ;;  %v5624_v53 = vmul.f32 0.3275911, %v5622_v47  ;;  %v5621_v31 = vand.u32 2147483647, %v12414_v9 }
 0x6af   : > { %v5430_v41 = vsub.f32 %v5424_v58, %v5428_v33  ;;  %v5523_v39 = vmul.f32 %v12396_v24, %v5521_v55  ;;  %v5576_v12 = vadd.f32 -1.4531521, %v5574_v35  ;;  %v5597_v6 = vmul.f32 1.442695, %v5594_v20 }
 0x6b0   : > { %v5470_v25 = vadd.f32 0.2548296, %v5468_v1  ;;  %v5429_v13 = vmul.f32 %v5427_v14, %v5423_v44  ;;  %v5626_v38 = vadd.f32 1.0, %v5624_v53  ;;  %v5623_v22 = vmul.f32 0.70710677, %v5621_v31 }
 0x6b1   : > { %5432 = vst [vmem:[%s12367_s27 + $0x17] sm:$0xfe] %v5430_v41  ;;  %v5525_v51 = vadd.f32 -0.28449672, %v5523_v39  ;;  %v5578_v40 = vmul.f32 %v8902_v17, %v5576_v12  ;;  %v8906_v34 = vpop.eup %8905  ;;  %v5486_v11 = vmul.f32 0.5, %v5444_v16  ;;  %v5650_v52 = vmul.f32 -0.5, %v12405_v19 }
 0x6b2   : > { %v5472_v27 = vmul.f32 %v12374_v62, %v5470_v25  ;;  %v5431_v3 = vsub.f32 %v5425_v56, %v5429_v13  ;;  %8909 = vrcp.f32 %v5626_v38  ;;  %v5625_v58 = vmul.f32 0.3275911, %v5623_v22 }
 0x6b3   : > { %v5527_v59 = vmul.f32 %v12396_v24, %v5525_v51  ;;  %v5580_v43 = vadd.f32 1.4214138, %v5578_v40  ;;  %8911 = vpow2.f32 %v5597_v6  ;;  %v5484_v62 = vmax.f32 %v12297_v2, 0.0 }
 0x6b4   : > { %v5482_v30 = vmul.f32 %v8906_v34, %v5472_v27  ;;  %5433 = vst [vmem:[%s12367_s27 + $0x1f] sm:$0x1] %v5431_v3  ;;  %5491 = vst [vmem:[%s12367_s27 + $0x1d] sm:$0xf8] %v5431_v3  ;;  %v5627_v32 = vadd.f32 1.0, %v5625_v58  ;;  %v5545_v4 = vmul.f32 0.5, %v5503_v50 }
 0x6b5   : > { %v5529_v61 = vadd.f32 0.2548296, %v5527_v59  ;;  %v5582_v56 = vmul.f32 %v8902_v17, %v5580_v43  ;;  %v5543_v54 = vmax.f32 %v12321_v8, 0.0  ;;  %v5651_v42 = vmul.f32 -0.5, %v12414_v9 }
 0x6b6   : > { %v5488_v28 = vmul.f32 %v5486_v11, %v5482_v30  ;;  %8913 = vrcp.f32 %v5627_v32  ;;  %v5604_v50 = vmul.f32 0.5, %v5562_v48  ;;  %v5602_v44 = vmax.f32 %v12347_v60, 0.0 }
 0x6b7   : > { %v5531_v5 = vmul.f32 %v12396_v24, %v5529_v61  ;;  %v5584_v57 = vadd.f32 -0.28449672, %v5582_v56  ;;  %v8908_v16 = vpop.eup %8907  ;;  %v5652_v24 = vmul.f32 %v5650_v52, %v12405_v19  ;;  %v5653_v35 = vmul.f32 %v5651_v42, %v12414_v9  ;;  %v5671_v61 = vld [vmem:[%s12367_s27 + $0x8] sm:$0xff] }
 0x6b8   : > { %v5490_v7 = vsub.f32 %v5484_v62, %v5488_v28  ;;  %v5662_v11 = vmul.f32 0.5, %v5620_v49  ;;  %v5660_v43 = vmax.f32 %v12405_v19, 0.0  ;;  %v5661_v49 = vmax.f32 %v12414_v9, 0.0 }
 0x6b9   : > { %v5541_v36 = vmul.f32 %v8908_v16, %v5531_v5  ;;  %v5586_v2 = vmul.f32 %v8902_v17, %v5584_v57  ;;  %v5654_v55 = vmul.f32 1.442695, %v5652_v24  ;;  %v5656_v13 = vmul.f32 1.442695, %v5653_v35  ;;  %v5670_v57 = vld [vmem:[%s12367_s27] sm:$0xff]  ;;  %v5672_v16 = vld [vmem:[%s12367_s27 + $0x10] sm:$0xff] }
 0x6ba   : > { %5492 = vst [vmem:[%s12367_s27 + $0x25] sm:$0x7] %v5490_v7  ;;  %5550 = vst [vmem:[%s12367_s27 + $0x23] sm:$0xe0] %v5490_v7  ;;  %v5663_v5 = vmul.f32 0.5, %v5621_v31  ;;  %v5678_v52 = vadd.f32 %v5671_v61, %v5670_v57 }
 0x6bb   : > { %v5547_v45 = vmul.f32 %v5545_v4, %v5541_v36  ;;  %v5588_v0 = vadd.f32 0.2548296, %v5586_v2  ;;  %8915 = vpow2.f32 %v5654_v55  ;;  %v5673_v36 = vld [vmem:[%s12367_s27 + $0x18] sm:$0xff]  ;;  %v12538_v55 = vmov 0.0|0.0  }
 0x6bc   : > { %v8910_v47 = vpop.eup %8909  ;;  %8917 = vpow2.f32 %v5656_v13  ;;  %v5679_v2 = vadd.f32 %v5678_v52, %v5672_v16 }
 0x6bd   : > { %v5549_v10 = vsub.f32 %v5543_v54, %v5547_v45  ;;  %v5590_v14 = vmul.f32 %v8902_v17, %v5588_v0  ;;  %v5632_v20 = vmul.f32 1.0614054, %v8910_v47  ;;  %v8912_v46 = vpop.eup %8911 }
 0x6be   : > { %v5680_v45 = vadd.f32 %v5679_v2, %v5673_v36 }
 0x6bf   : > { %5551 = vst [vmem:[%s12367_s27 + $0x2b] sm:$0x1f] %v5549_v10  ;;  %5609 = vst [vmem:[%s12367_s27 + $0x29] sm:$0x80] %v5549_v10  ;;  %v5600_v33 = vmul.f32 %v8912_v46, %v5590_v14  ;;  %v5634_v1 = vadd.f32 -1.4531521, %v5632_v20 }
 0x6c0   : > { %v8914_v8 = vpop.eup %8913 }
 0x6c1   : > { %v5606_v53 = vmul.f32 %v5604_v50, %v5600_v33  ;;  %v5636_v41 = vmul.f32 %v8910_v47, %v5634_v1  ;;  %v5633_v25 = vmul.f32 1.0614054, %v8914_v8  ;;  %v5674_v54 = vld [vmem:[%s12367_s27 + $0x20] sm:$0xff] }
 0x6c3   : > { %v5608_v17 = vsub.f32 %v5602_v44, %v5606_v53  ;;  %v5638_v39 = vadd.f32 1.4214138, %v5636_v41  ;;  %v5635_v12 = vadd.f32 -1.4531521, %v5633_v25 }
 0x6c5   : > { %5610 = vst [vmem:[%s12367_s27 + $0x31] sm:$0x7f] %v5608_v17  ;;  %v5640_v6 = vmul.f32 %v8910_v47, %v5638_v39  ;;  %v5637_v38 = vmul.f32 %v8914_v8, %v5635_v12  ;;  %v8916_v58 = vpop.eup %8915 }
 0x6c6   : > { %v8918_v28 = vpop.eup %8917  ;;  %v5675_v0 = vld [vmem:[%s12367_s27 + $0x28] sm:$0xff] }
 0x6c7   : > { %v5642_v22 = vadd.f32 -0.28449672, %v5640_v6  ;;  %v5639_v48 = vadd.f32 1.4214138, %v5637_v38 }
 0x6c9   : > { %v5644_v27 = vmul.f32 %v8910_v47, %v5642_v22  ;;  %v5641_v51 = vmul.f32 %v8914_v8, %v5639_v48 }
 0x6cb   : > { %v5646_v40 = vadd.f32 0.2548296, %v5644_v27  ;;  %v5643_v60 = vadd.f32 -0.28449672, %v5641_v51 }
 0x6cc   : > { %v5676_v24 = vld [vmem:[%s12367_s27 + $0x30] sm:$0xff] }
 0x6cd   : > { %v5648_v34 = vmul.f32 %v8910_v47, %v5646_v40  ;;  %v5645_v3 = vmul.f32 %v8914_v8, %v5643_v60  ;;  %v5681_v47 = vadd.f32 %v5680_v45, %v5674_v54 }
 0x6cf   : > { %v5658_v30 = vmul.f32 %v8916_v58, %v5648_v34  ;;  %v5647_v59 = vadd.f32 0.2548296, %v5645_v3  ;;  %v5682_v42 = vadd.f32 %v5681_v47, %v5675_v0 }
 0x6d1   : > { %v5664_v32 = vmul.f32 %v5662_v11, %v5658_v30  ;;  %v5649_v62 = vmul.f32 %v8914_v8, %v5647_v59  ;;  %v5683_v10 = vadd.f32 %v5682_v42, %v5676_v24  ;;  %v8955_v8 = vld [vmem:[#allocation3 + $0xb] sm:$0xff] }
 0x6d3   : > { %v5666_v56 = vsub.f32 %v5660_v43, %v5664_v32  ;;  %v5659_v7 = vmul.f32 %v8918_v28, %v5649_v62 }
 0x6d5   : > { %5668 = vst [vmem:[%s12367_s27 + $0x37] sm:$0xfe] %v5666_v56  ;;  %v5665_v19 = vmul.f32 %v5663_v5, %v5659_v7 }
 0x6d7   : > { %v5667_v4 = vsub.f32 %v5661_v49, %v5665_v19 }
 0x6d9   : > { %5669 = vst [vmem:[%s12367_s27 + $0x3f] sm:$0x1] %v5667_v4  ;;  %v5884_v4 = vld [vmem:[%s12515_s8] sm:$0x1] }
 0x6e0   : > { %v5677_v31 = vld [vmem:[%s12367_s27 + $0x38] sm:$0xff] }
 0x6e1   : > { %v5684_v14 = vadd.f32 %v5683_v10, %v5677_v31 }
 0x6e3   : > { %v5685_v20 = vrot.slane %v5684_v14, 4 }
 0x6e5   : > { %v5686_v46 = vadd.f32 %v5685_v20, %v5684_v14 }
 0x6e7   : > { %v5687_v33 = vrot.slane %v5686_v46, 2 }
 0x6e9   : > { %v5688_v50 = vadd.f32 %v5687_v33, %v5686_v46 }
 0x6eb   : > { %v5689_v9 = vrot.slane %v5688_v50, 1 }
 0x6ed   : > { %v5690_v1 = vadd.f32 %v5689_v9, %v5688_v50 }
 0x6ef   : > { %8087 = vmatmul.mubr.f32.vlgmr.msra.gmra.mrb[234].mxu1 %v5690_v1 }
 0x6f0   : > { %8686 = vmatpush3.bf16.msra.mxu1 %v12159_v37  ;;  %8121 = vmatprep.mubr.msk.f32.mxu1 %vm8966_vm6, %v8955_v8 }
 0x6f1   : > { %8687 = vmatprep.subr.bf16.mxu1 %v12538_v55  ;;  %v7073_v37 = vpop.f32.mrb[232].mxu1 }
 0x6f4   : > { %8689 = vmatpush3.bf16.msra.mxu1 %v12165_v15  ;;  %v7074_v15 = vpop.f32.mrb[233].mxu1 }
 0x6f5   : > { %8690 = vmatprep.subr.bf16.mxu1 %v12538_v55 }
 0x6f8   : > { %8692 = vmatpush3.bf16.msra.mxu1 %v12177_v29  ;;  %v5041_v29 = vld [vmem:[#allocation3 + $0x76] sm:$0xff] }
 0x6f9   : > { %8693 = vmatprep.subr.bf16.mxu1 %v12538_v55  ;;  %8052 = vmatmul.mubr.f32.gmra.mrb[160].mxu0 %v5041_v29 }
 0x6fc   : > { %8695 = vmatpush3.bf16.msra.mxu1 %v12197_v26  ;;  %v5778_v26 = vlaneseq }
 0x6fd   : > { %8696 = vmatprep.subr.bf16.mxu1 %v12538_v55 }
 0x6fe   : > { %v5779_v35 = vshrl.u32 %v5778_v26, 7 }
 0x700   : > { %8698 = vmatpush3.bf16.msra.mxu1 %v12209_v21  ;;  %v5780_v44 = vsub.s32 0, %v5779_v35 }
 0x701   : > { %8699 = vmatprep.subr.bf16.mxu1 %v12538_v55 }
 0x704   : > { %8701 = vmatpush3.bf16.msra.mxu1 %v12219_v23 }
 0x705   : > { %8702 = vmatprep.subr.bf16.mxu1 %v12538_v55 }
 0x708   : > { %8704 = vmatpush3.bf16.msra.mxu1 %v12229_v63 }
 0x709   : > { %8705 = vmatprep.subr.bf16.mxu1 %v12538_v55 }
 0x70c   : > { %8707 = vmatpush3.bf16.msra.mxu1 %v12248_v18 }
 0x7c2   : > { %v5773_v21 = vpop.f32.mrb[234].mxu1 }
 0x7c3   : > { %v5777_v53 = vmul.f32 0.0009765625, %v5773_v21  ;;  %v8088_v41 = vpop.f32.mrb[235].mxu1 }
 0x7c5   : > { %v5781_v25 = vrot.slane %v5777_v53, %v5780_v44 }
 0x7c7   : > { %v5782_v23 = vsub.f32 %v5670_v57, %v5781_v25  ;;  %v5783_v17 = vsub.f32 %v5671_v61, %v5781_v25  ;;  %v5784_v39 = vsub.f32 %v5672_v16, %v5781_v25  ;;  %v5785_v12 = vsub.f32 %v5673_v36, %v5781_v25 }
 0x7c8   : > { %v5786_v6 = vsub.f32 %v5674_v54, %v5781_v25  ;;  %v5787_v22 = vsub.f32 %v5675_v0, %v5781_v25  ;;  %v5788_v51 = vsub.f32 %v5676_v24, %v5781_v25  ;;  %v5789_v34 = vsub.f32 %v5677_v31, %v5781_v25  ;;  %v6407_v0 = vld [vmem:[%s12516_s9] ss:$0 sm:$0xff] }
 0x7c9   : > { %v5790_v63 = vmul.f32 %v5782_v23, %v5782_v23  ;;  %v5791_v13 = vmul.f32 %v5783_v17, %v5783_v17  ;;  %v5792_v38 = vmul.f32 %v5784_v39, %v5784_v39  ;;  %v5793_v48 = vmul.f32 %v5785_v12, %v5785_v12 }
 0x7ca   : > { %v5794_v40 = vmul.f32 %v5786_v6, %v5786_v6  ;;  %v5795_v3 = vmul.f32 %v5787_v22, %v5787_v22  ;;  %v5796_v30 = vmul.f32 %v5788_v51, %v5788_v51  ;;  %v5797_v59 = vmul.f32 %v5789_v34, %v5789_v34 }
 0x7cb   : > { %v5798_v18 = vadd.f32 %v5791_v13, %v5790_v63 }
 0x7cc   : > { %v5184_v57 = vpop.f32.mrb[160].mxu0 }
 0x7cd   : > { %v5799_v27 = vadd.f32 %v5798_v18, %v5792_v38  ;;  %v8053_v16 = vpop.f32.mrb[161].mxu0 }
 0x7cf   : > { %v5800_v60 = vadd.f32 %v5799_v27, %v5793_v48 }
 0x7d1   : > { %v5801_v58 = vadd.f32 %v5800_v60, %v5794_v40 }
 0x7d3   : > { %v5802_v11 = vadd.f32 %v5801_v58, %v5795_v3 }
 0x7d5   : > { %v5803_v43 = vadd.f32 %v5802_v11, %v5796_v30 }
 0x7d7   : > { %v5804_v32 = vadd.f32 %v5803_v43, %v5797_v59 }
 0x7d9   : > { %v5805_v62 = vrot.slane %v5804_v32, 4 }
 0x7db   : > { %v5806_v28 = vadd.f32 %v5805_v62, %v5804_v32 }
 0x7dd   : > { %v5807_v61 = vrot.slane %v5806_v28, 2 }
 0x7df   : > { %v5808_v56 = vadd.f32 %v5807_v61, %v5806_v28 }
 0x7e1   : > { %v5809_v7 = vrot.slane %v5808_v56, 1 }
 0x7e3   : > { %v5810_v5 = vadd.f32 %v5809_v7, %v5808_v56 }
 0x7e5   : > { %8122 = vmatmul.mubr.f32.vlgmr.msra.gmra.mrb[236].mxu1 %v5810_v5 }
 0x8b8   : > { %v5877_v49 = vpop.f32.mrb[236].mxu1 }
 0x8b9   : > { %v5881_v19 = vmul.f32 0.0009765625, %v5877_v49  ;;  %v8123_v52 = vpop.f32.mrb[237].mxu1 }
 0x8bb   : > { %v5882_v36 = vadd.f32 0.001, %v5881_v19 }
 0x8bd   : > { %8919 = vrsqrt.f32 %v5882_v36 }
 0x8c7   : > { %v8920_v2 = vpop.eup %8919 }
 0x8c8   : > { %v5885_v54 = vmul.f32 %v8920_v2, %v5884_v4 }
 0x8ca   : > { %v5889_v45 = vrot.slane %v5885_v54, %v5780_v44 }
 0x8cc   : > { %v5890_v47 = vmul.f32 %v5889_v45, %v5782_v23  ;;  %v5891_v24 = vmul.f32 %v5889_v45, %v5783_v17  ;;  %v5892_v42 = vmul.f32 %v5889_v45, %v5784_v39  ;;  %v5893_v10 = vmul.f32 %v5889_v45, %v5785_v12 }
 0x8cd   : > { %v5894_v31 = vmul.f32 %v5889_v45, %v5786_v6  ;;  %v5895_v14 = vmul.f32 %v5889_v45, %v5787_v22  ;;  %v5896_v20 = vmul.f32 %v5889_v45, %v5788_v51  ;;  %v5897_v46 = vmul.f32 %v5889_v45, %v5789_v34 }
 0x8ce   : > { %v5905_v33 = vadd.f32 %v6407_v0, %v5890_v47  ;;  %v5906_v50 = vadd.f32 %v6407_v0, %v5891_v24  ;;  %v5907_v9 = vadd.f32 %v6407_v0, %v5892_v42  ;;  %v5908_v1 = vadd.f32 %v6407_v0, %v5893_v10 }
 0x8cf   : > { %v5909_v8 = vadd.f32 %v6407_v0, %v5894_v31  ;;  %v5910_v55 = vadd.f32 %v6407_v0, %v5895_v14  ;;  %v5911_v37 = vadd.f32 %v6407_v0, %v5896_v20  ;;  %v5912_v15 = vadd.f32 %v6407_v0, %v5897_v46 }
 0x8d0   : > { %5913 = vst [vmem:[%s12367_s27] sm:$0xff] %v5905_v33  ;;  %5914 = vst [vmem:[%s12367_s27 + $0x8] sm:$0xff] %v5906_v50 }
 0x8d1   : > { %5915 = vst [vmem:[%s12367_s27 + $0x10] sm:$0xff] %v5907_v9  ;;  %5916 = vst [vmem:[%s12367_s27 + $0x18] sm:$0xff] %v5908_v1 }
 0x8d2   : > { %5917 = vst [vmem:[%s12367_s27 + $0x20] sm:$0xff] %v5909_v8  ;;  %5918 = vst [vmem:[%s12367_s27 + $0x28] sm:$0xff] %v5910_v55 }
 0x8d3   : > { %5919 = vst [vmem:[%s12367_s27 + $0x30] sm:$0xff] %v5911_v37  ;;  %5920 = vst [vmem:[%s12367_s27 + $0x38] sm:$0xff] %v5912_v15 }
 0x8d4 PF: > { %s21_s17 = sadd.s32 1, %s8962_s17  }
 0x8d5   : > { %p18_p4 = scmp.ge.s32.totalorder %s21_s17, 4  }
 0x8d7   :  { %20 = sbr.rel (!%p18_p4) target bundleno = 1 (0x1), region = 120 }

</bundles_post_ra>
